<compile_context>
chip_gen: v6e
topology: v6e:2x2x1
jax: 0.10.0
libtpu: 0.0.40
codegen_flags: <defaults>
</compile_context>

<pallas_src>
import functools

import jax
import jax.numpy as jnp
from jax.experimental import pallas as pl
from jax.experimental.pallas import tpu as pltpu


LANE = 128
CHANNELS_TAIL = (48, 72, 96, 128, 192, 256, 256)


def _round_up(x, m):
    return ((x + m - 1) // m) * m


def _cpad(c):
    return _round_up(c, LANE)


# ----------------------------------------------------------------------------
# Pallas kernels
# ----------------------------------------------------------------------------
def _conv_bn_relu_kernel(x_ref, w_ref, b_ref, s_ref, t_ref, o_ref):
    # relu(x @ w + b) then BN affine (scale/shift).  bf16 operands, f32 acc.
    acc = jnp.dot(x_ref[...], w_ref[...], preferred_element_type=jnp.float32)
    acc = jnp.maximum(acc + b_ref[...], 0.0)
    acc = acc * s_ref[...] + t_ref[...]
    o_ref[...] = acc.astype(o_ref.dtype)


def _res_tail_kernel(x2_ref, w2_ref, b2_ref, s2_ref, t2_ref,
                     xp_ref, wp_ref, sp_ref, tp_ref, o_ref):
    # Fused: conv2 (bias -> ReLU -> BN affine)  +  1x1 projection (BN affine,
    # conv bias pre-folded into tp)  +  residual add  +  final ReLU.
    h = jnp.dot(x2_ref[...], w2_ref[...], preferred_element_type=jnp.float32)
    h = jnp.maximum(h + b2_ref[...], 0.0) * s2_ref[...] + t2_ref[...]
    p = jnp.dot(xp_ref[...], wp_ref[...], preferred_element_type=jnp.float32)
    p = p * sp_ref[...] + tp_ref[...]
    o_ref[...] = jnp.maximum(h + p, 0.0).astype(o_ref.dtype)


def _fc_head_kernel(h_ref, *refs):
    # Chain of linear layers (ReLU between all but the last), all weights
    # resident in VMEM; intermediate activations stay in registers.
    o_ref = refs[-1]
    wb = refs[:-1]
    n_layers = len(wb) // 2
    h = h_ref[...]
    for li in range(n_layers):
        w_ref, b_ref = wb[2 * li], wb[2 * li + 1]
        acc = jnp.dot(h, w_ref[...], preferred_element_type=jnp.float32)
        acc = acc + b_ref[...]
        if li < n_layers - 1:
            h = jnp.maximum(acc, 0.0).astype(jnp.bfloat16)
        else:
            o_ref[...] = acc


# ----------------------------------------------------------------------------
# pallas_call wrappers
# ----------------------------------------------------------------------------
def _row_tiling(M):
    # sublane padding to 16 (bf16-native tile), row tile up to 256
    TM = min(256, _round_up(M, 16))
    Mp = _round_up(M, TM)
    return TM, Mp


def conv_bn_relu(x, w, b, s, t):
    """Fused conv-as-matmul: BN_affine(relu(x @ w + b)); bf16 in, bf16 out."""
    M, K = x.shape
    Kw, N = w.shape
    assert K == Kw, (K, Kw)
    TM, Mp = _row_tiling(M)
    xp = jnp.pad(x, ((0, Mp - M), (0, 0)))
    cost = pl.CostEstimate(
        flops=2 * Mp * K * N, transcendentals=0,
        bytes_accessed=Mp * K * 2 + K * N * 2 + Mp * N * 2 + 3 * N * 4)
    out = pl.pallas_call(
        _conv_bn_relu_kernel,
        out_shape=jax.ShapeDtypeStruct((Mp, N), jnp.bfloat16),
        grid=(Mp // TM,),
        in_specs=[
            pl.BlockSpec((TM, K), lambda i: (i, 0)),
            pl.BlockSpec((K, N), lambda i: (0, 0)),
            pl.BlockSpec((1, N), lambda i: (0, 0)),
            pl.BlockSpec((1, N), lambda i: (0, 0)),
            pl.BlockSpec((1, N), lambda i: (0, 0)),
        ],
        out_specs=pl.BlockSpec((TM, N), lambda i: (i, 0)),
        compiler_params=pltpu.CompilerParams(dimension_semantics=("parallel",)),
        cost_estimate=cost,
    )(xp, w, b, s, t)
    return out[:M]


def res_block_tail(x2, w2, b2, s2, t2, xp1, wp, sp, tp):
    """Fused conv2 + 1x1 shortcut projection + residual add + ReLU."""
    M, K2 = x2.shape
    Mq, Kp = xp1.shape
    assert M == Mq, (M, Mq)
    N = w2.shape[1]
    TM, Mp = _row_tiling(M)
    x2p = jnp.pad(x2, ((0, Mp - M), (0, 0)))
    xpp = jnp.pad(xp1, ((0, Mp - M), (0, 0)))
    cost = pl.CostEstimate(
        flops=2 * Mp * (K2 + Kp) * N, transcendentals=0,
        bytes_accessed=(Mp * (K2 + Kp) * 2 + (K2 + Kp) * N * 2
                        + Mp * N * 2 + 5 * N * 4))
    out = pl.pallas_call(
        _res_tail_kernel,
        out_shape=jax.ShapeDtypeStruct((Mp, N), jnp.bfloat16),
        grid=(Mp // TM,),
        in_specs=[
            pl.BlockSpec((TM, K2), lambda i: (i, 0)),
            pl.BlockSpec((K2, N), lambda i: (0, 0)),
            pl.BlockSpec((1, N), lambda i: (0, 0)),
            pl.BlockSpec((1, N), lambda i: (0, 0)),
            pl.BlockSpec((1, N), lambda i: (0, 0)),
            pl.BlockSpec((TM, Kp), lambda i: (i, 0)),
            pl.BlockSpec((Kp, N), lambda i: (0, 0)),
            pl.BlockSpec((1, N), lambda i: (0, 0)),
            pl.BlockSpec((1, N), lambda i: (0, 0)),
        ],
        out_specs=pl.BlockSpec((TM, N), lambda i: (i, 0)),
        compiler_params=pltpu.CompilerParams(dimension_semantics=("parallel",)),
        cost_estimate=cost,
    )(x2p, w2, b2, s2, t2, xpp, wp, sp, tp)
    return out[:M]


def fc_head(h, fc):
    """All 5 FC layers fused into one pallas_call (weights resident in VMEM)."""
    M, K = h.shape
    Mp = _round_up(M, 16)
    hp = jnp.pad(h, ((0, Mp - M), (0, 0)))
    Nout = fc[-1][0].shape[1]
    args = [hp]
    in_specs = [pl.BlockSpec((Mp, K), lambda i: (0, 0))]
    flops = 0
    wbytes = 0
    for w, b in fc:
        args += [w, b]
        in_specs += [pl.BlockSpec(w.shape, lambda i: (0, 0)),
                     pl.BlockSpec(b.shape, lambda i: (0, 0))]
        flops += 2 * Mp * w.shape[0] * w.shape[1]
        wbytes += w.size * 2 + b.size * 4
    cost = pl.CostEstimate(flops=flops, transcendentals=0,
                           bytes_accessed=Mp * K * 2 + wbytes + Mp * Nout * 4)
    out = pl.pallas_call(
        _fc_head_kernel,
        out_shape=jax.ShapeDtypeStruct((Mp, Nout), jnp.float32),
        grid=(1,),
        in_specs=in_specs,
        out_specs=pl.BlockSpec((Mp, Nout), lambda i: (0, 0)),
        compiler_params=pltpu.CompilerParams(dimension_semantics=("arbitrary",)),
        cost_estimate=cost,
    )(*args)
    return out[:M]


# ----------------------------------------------------------------------------
# Glue: im2col patch extraction (NHWC, bf16)
# ----------------------------------------------------------------------------
def im2col(x, kh, kw, stride, pad):
    """x: (N, H, W, C) -> patches (N*OH*OW, kh*kw*C), plus (N, OH, OW)."""
    N, H, W, C = x.shape
    xp = jnp.pad(x, ((0, 0), (pad, pad), (pad, pad), (0, 0)))
    OH = (H + 2 * pad - kh) // stride + 1
    OW = (W + 2 * pad - kw) // stride + 1
    cols = []
    for i in range(kh):
        for j in range(kw):
            cols.append(xp[:, i:i + stride * OH:stride, j:j + stride * OW:stride, :])
    patches = jnp.stack(cols, axis=3)  # (N, OH, OW, kh*kw, C)
    return patches.reshape(N * OH * OW, kh * kw * C), (N, OH, OW)


# ----------------------------------------------------------------------------
# Deterministic parameter construction (synthetic weights) + padding/casting
# ----------------------------------------------------------------------------
def _conv_params(key, kh, kw, ic, oc):
    k1, k2 = jax.random.split(key)
    w = jax.random.normal(k1, (kh, kw, ic, oc), jnp.float32) / jnp.sqrt(kh * kw * ic)
    b = 0.01 * jax.random.normal(k2, (oc,), jnp.float32)
    return w, b


def _bn_params(key, c, eps=1e-5):
    k1, k2, k3, k4 = jax.random.split(key, 4)
    gamma = 1.0 + 0.1 * jax.random.normal(k1, (c,), jnp.float32)
    beta = 0.1 * jax.random.normal(k2, (c,), jnp.float32)
    mean = 0.1 * jax.random.normal(k3, (c,), jnp.float32)
    var = 1.0 + 0.1 * jax.random.uniform(k4, (c,), jnp.float32)
    scale = gamma / jnp.sqrt(var + eps)
    shift = beta - mean * scale
    return scale, shift


def compute_final_out_size(hw, n_layers=7, k=3, s=2, p=1):
    h, w = hw
    for _ in range(n_layers):
        h = (h + 2 * p - k) // s + 1
        w = (w + 2 * p - k) // s + 1
    return h, w


def build_params(key, in_channels, in_hw, out_classes):
    channels = (in_channels,) + CHANNELS_TAIL
    keys = iter(jax.random.split(key, 64))

    res = []
    for i in range(5):  # residual blocks
        ic, oc = channels[i], channels[i + 1]
        w1, b1 = _conv_params(next(keys), 3, 3, ic, ic)      # conv k3 s1 p1
        s1, t1 = _bn_params(next(keys), ic)
        w2, b2 = _conv_params(next(keys), 3, 3, ic, oc)      # conv k3 s2 p1
        s2, t2 = _bn_params(next(keys), oc)
        wp, bp = _conv_params(next(keys), 1, 1, ic, oc)      # 1x1 projection, s2
        sp, tp = _bn_params(next(keys), oc)
        res.append(dict(w1=w1, b1=b1, s1=s1, t1=t1,
                        w2=w2, b2=b2, s2=s2, t2=t2,
                        wp=wp, bp=bp, sp=sp, tp=tp))

    plain = []
    for i in range(5, 7):  # non-residual conv blocks
        ic, oc = channels[i], channels[i + 1]
        w, b = _conv_params(next(keys), 3, 3, ic, oc)
        s, t = _bn_params(next(keys), oc)
        plain.append(dict(w=w, b=b, s=s, t=t))

    oh, ow = compute_final_out_size(in_hw)
    fc_in = oh * ow * channels[-1]
    fc_sizes = [(fc_in, 256), (256, 256), (256, 128), (128, 96), (96, out_classes)]
    fc = []
    for ni, no in fc_sizes:
        k1, k2 = jax.random.split(next(keys))
        w = jax.random.normal(k1, (ni, no), jnp.float32) / jnp.sqrt(ni)
        b = 0.01 * jax.random.normal(k2, (no,), jnp.float32)
        fc.append((w, b))

    return dict(res=res, plain=plain, fc=fc)


def _pad_vec(v, n, fill):
    v = v.astype(jnp.float32)
    return jnp.pad(v, (0, n - v.shape[0]), constant_values=fill).reshape(1, n)


def _pad_conv_w(w, icp, ocp):
    kh, kw, ic, oc = w.shape
    wpad = jnp.pad(w, ((0, 0), (0, 0), (0, icp - ic), (0, ocp - oc)))
    return wpad.reshape(kh * kw * icp, ocp).astype(jnp.bfloat16)


def prepare_params(params):
    """Pad channel/feature dims to multiples of 128, fold the projection conv
    bias into its BN shift, and cast matmul operands to bf16 (epilogue f32)."""
    prep = {"res": [], "plain": [], "fc": []}
    for p in params["res"]:
        ic = p["w1"].shape[2]
        oc = p["w2"].shape[3]
        icp, ocp = _cpad(ic), _cpad(oc)
        prep["res"].append(dict(
            w1=_pad_conv_w(p["w1"], icp, icp),
            b1=_pad_vec(p["b1"], icp, 0.0),
            s1=_pad_vec(p["s1"], icp, 1.0),
            t1=_pad_vec(p["t1"], icp, 0.0),
            w2=_pad_conv_w(p["w2"], icp, ocp),
            b2=_pad_vec(p["b2"], ocp, 0.0),
            s2=_pad_vec(p["s2"], ocp, 1.0),
            t2=_pad_vec(p["t2"], ocp, 0.0),
            wp=jnp.pad(p["wp"].reshape(ic, oc),
                       ((0, icp - ic), (0, ocp - oc))).astype(jnp.bfloat16),
            sp=_pad_vec(p["sp"], ocp, 1.0),
            # projection conv bias folded into the BN shift (no ReLU between)
            tp=_pad_vec(p["bp"] * p["sp"] + p["tp"], ocp, 0.0),
        ))
    for p in params["plain"]:
        ic, oc = p["w"].shape[2], p["w"].shape[3]
        icp, ocp = _cpad(ic), _cpad(oc)
        prep["plain"].append(dict(
            w=_pad_conv_w(p["w"], icp, ocp),
            b=_pad_vec(p["b"], ocp, 0.0),
            s=_pad_vec(p["s"], ocp, 1.0),
            t=_pad_vec(p["t"], ocp, 0.0),
        ))
    for w, b in params["fc"]:
        ni, no = w.shape
        nip, nop = _cpad(ni), _cpad(no)
        wp = jnp.pad(w, ((0, nip - ni), (0, nop - no))).astype(jnp.bfloat16)
        prep["fc"].append((wp, _pad_vec(b, nop, 0.0)))
    return prep


# ----------------------------------------------------------------------------
# BenNet forward (eval semantics)
# ----------------------------------------------------------------------------
def bennet_forward(x_nchw, prep, *, c_last, out_classes):
    # NCHW -> NHWC, zero-pad channels to a 128 multiple, bf16 activations.
    x = jnp.transpose(x_nchw, (0, 2, 3, 1)).astype(jnp.float32)
    c_in = x.shape[-1]
    x = jnp.pad(x, ((0, 0), (0, 0), (0, 0), (0, _cpad(c_in) - c_in)))
    x = x.astype(jnp.bfloat16)

    # residual blocks
    for p in prep["res"]:
        n, h_, w_, _ = x.shape
        c_mid = p["w1"].shape[1]
        c_out = p["w2"].shape[1]

        # conv1 (k3,s1,p1) -> ReLU -> BN
        cols1, _ = im2col(x, 3, 3, 1, 1)
        h = conv_bn_relu(cols1, p["w1"], p["b1"], p["s1"], p["t1"])
        h = h.reshape(n, h_, w_, c_mid)

        # fused: conv2 (k3,s2,p1)->ReLU->BN  +  1x1 proj (s2)->BN  + add + ReLU
        cols2, (_, oh, ow) = im2col(h, 3, 3, 2, 1)
        colsp, _ = im2col(x, 1, 1, 2, 0)
        y = res_block_tail(cols2, p["w2"], p["b2"], p["s2"], p["t2"],
                           colsp, p["wp"], p["sp"], p["tp"])
        x = y.reshape(n, oh, ow, c_out)
        # Dropout2d (eval) = identity

    # non-residual conv blocks
    for p in prep["plain"]:
        n = x.shape[0]
        c_out = p["w"].shape[1]
        cols, (_, oh, ow) = im2col(x, 3, 3, 2, 1)
        y = conv_bn_relu(cols, p["w"], p["b"], p["s"], p["t"])
        x = y.reshape(n, oh, ow, c_out)
        # Dropout2d (eval) = identity

    # classifier: drop padded channels, flatten in NCHW order (PyTorch Flatten)
    n, h_, w_, _ = x.shape
    flat = jnp.transpose(x[..., :c_last], (0, 3, 1, 2)).reshape(n, c_last * h_ * w_)
    fc_in_p = prep["fc"][0][0].shape[0]
    flat = jnp.pad(flat, ((0, 0), (0, fc_in_p - flat.shape[1]))).astype(jnp.bfloat16)
    logits_p = fc_head(flat, prep["fc"])   # single fused kernel for all 5 FCs
    return logits_p[:, :out_classes]


if __name__ == "__main__":
    key = jax.random.PRNGKey(0)
    kx, kp = jax.random.split(key)

    batch, in_channels, H, W = 2, 4, 16, 16
    out_classes = 10

    x = jax.random.normal(kx, (batch, in_channels, H, W), jnp.float32)
    params = build_params(kp, in_channels, (H, W), out_classes)
    prep = prepare_params(params)

    fwd = jax.jit(functools.partial(bennet_forward,
                                    c_last=CHANNELS_TAIL[-1],
                                    out_classes=out_classes))
    out = fwd(x, prep)
    out = jax.block_until_ready(out)
    assert out.shape == (batch, out_classes), out.shape
    assert bool(jnp.all(jnp.isfinite(out)))
    print("KERNEL_OK")
</pallas_src>

<mosaic_0001>
module attributes {stable_mosaic.version = 11 : i64} {
  func.func @_conv_bn_relu_kernel(%arg0: i32, %arg1: memref<256x1152xbf16, #tpu.memory_space<vmem>>, %arg2: memref<1152x128xbf16, #tpu.memory_space<vmem>>, %arg3: memref<1x128xf32, #tpu.memory_space<vmem>>, %arg4: memref<1x128xf32, #tpu.memory_space<vmem>>, %arg5: memref<1x128xf32, #tpu.memory_space<vmem>>, %arg6: memref<256x128xbf16, #tpu.memory_space<vmem>>) attributes {dimension_semantics = [#tpu.dimension_semantics<parallel>], iteration_bounds = array<i64: 2>, scalar_prefetch = 0 : i64, scratch_operands = 0 : i64, tpu.core_type = #tpu.core_type<tc>, window_params = [{transform_indices = @transform_0, window_bounds = array<i64: 256, 1152>}, {pipeline_mode = #tpu.pipeline_mode<synchronous>, transform_indices = @transform_1, window_bounds = array<i64: 1152, 128>}, {pipeline_mode = #tpu.pipeline_mode<synchronous>, transform_indices = @transform_2, window_bounds = array<i64: 1, 128>}, {pipeline_mode = #tpu.pipeline_mode<synchronous>, transform_indices = @transform_3, window_bounds = array<i64: 1, 128>}, {pipeline_mode = #tpu.pipeline_mode<synchronous>, transform_indices = @transform_4, window_bounds = array<i64: 1, 128>}, {transform_indices = @transform_5, window_bounds = array<i64: 256, 128>}]} {
    %c0 = arith.constant 0 : index
    %c0_0 = arith.constant 0 : index
    %0 = vector.load %arg1[%c0, %c0_0] : memref<256x1152xbf16, #tpu.memory_space<vmem>>, vector<256x1152xbf16>
    %c0_1 = arith.constant 0 : index
    %c0_2 = arith.constant 0 : index
    %1 = vector.load %arg2[%c0_1, %c0_2] : memref<1152x128xbf16, #tpu.memory_space<vmem>>, vector<1152x128xbf16>
    %cst = arith.constant dense<0.000000e+00> : vector<256x128xf32>
    %2 = tpu.matmul %0, %1, %cst {dimension_numbers = #tpu.dot_dimension_numbers<[1], [0], [0], [1], [0, 0, 1, 1], [], []>} : vector<256x1152xbf16>, vector<1152x128xbf16>, vector<256x128xf32> -> vector<256x128xf32>
    %c0_3 = arith.constant 0 : index
    %c0_4 = arith.constant 0 : index
    %3 = vector.load %arg3[%c0_3, %c0_4] : memref<1x128xf32, #tpu.memory_space<vmem>>, vector<1x128xf32>
    %4 = vector.broadcast %3 : vector<1x128xf32> to vector<256x128xf32>
    %5 = arith.addf %2, %4 : vector<256x128xf32>
    %cst_5 = arith.constant 0.000000e+00 : f32
    %6 = vector.broadcast %cst_5 : f32 to vector<256x128xf32>
    %7 = arith.maximumf %5, %6 : vector<256x128xf32>
    %c0_6 = arith.constant 0 : index
    %c0_7 = arith.constant 0 : index
    %8 = vector.load %arg4[%c0_6, %c0_7] : memref<1x128xf32, #tpu.memory_space<vmem>>, vector<1x128xf32>
    %9 = vector.broadcast %8 : vector<1x128xf32> to vector<256x128xf32>
    %10 = arith.mulf %7, %9 : vector<256x128xf32>
    %c0_8 = arith.constant 0 : index
    %c0_9 = arith.constant 0 : index
    %11 = vector.load %arg5[%c0_8, %c0_9] : memref<1x128xf32, #tpu.memory_space<vmem>>, vector<1x128xf32>
    %12 = vector.broadcast %11 : vector<1x128xf32> to vector<256x128xf32>
    %13 = arith.addf %10, %12 : vector<256x128xf32>
    %14 = arith.truncf %13 : vector<256x128xf32> to vector<256x128xbf16>
    %c0_10 = arith.constant 0 : index
    %c0_11 = arith.constant 0 : index
    %15 = vector.load %arg6[%c0_10, %c0_11] : memref<256x128xbf16, #tpu.memory_space<vmem>>, vector<256x128xbf16>
    tpu.vector_store %arg6[%c0_10, %c0_11], %14 {strides = array<i32>} : memref<256x128xbf16, #tpu.memory_space<vmem>>, vector<256x128xbf16>,
    return
  }
  func.func @transform_0(%arg0: i32) -> (i32, i32) {
    %c0_i32 = arith.constant 0 : i32
    %c0_i32_0 = arith.constant 0 : i32
    return %arg0, %c0_i32 : i32, i32
  }
  func.func @transform_1(%arg0: i32) -> (i32, i32) {
    %c0_i32 = arith.constant 0 : i32
    %c0_i32_0 = arith.constant 0 : i32
    %c0_i32_1 = arith.constant 0 : i32
    return %c0_i32, %c0_i32_0 : i32, i32
  }
  func.func @transform_2(%arg0: i32) -> (i32, i32) {
    %c0_i32 = arith.constant 0 : i32
    %c0_i32_0 = arith.constant 0 : i32
    %c0_i32_1 = arith.constant 0 : i32
    return %c0_i32, %c0_i32_0 : i32, i32
  }
  func.func @transform_3(%arg0: i32) -> (i32, i32) {
    %c0_i32 = arith.constant 0 : i32
    %c0_i32_0 = arith.constant 0 : i32
    %c0_i32_1 = arith.constant 0 : i32
    return %c0_i32, %c0_i32_0 : i32, i32
  }
  func.func @transform_4(%arg0: i32) -> (i32, i32) {
    %c0_i32 = arith.constant 0 : i32
    %c0_i32_0 = arith.constant 0 : i32
    %c0_i32_1 = arith.constant 0 : i32
    return %c0_i32, %c0_i32_0 : i32, i32
  }
  func.func @transform_5(%arg0: i32) -> (i32, i32) {
    %c0_i32 = arith.constant 0 : i32
    %c0_i32_0 = arith.constant 0 : i32
    return %arg0, %c0_i32 : i32, i32
  }
}

module attributes {stable_mosaic.version = 11 : i64} {
  func.func @_res_tail_kernel(%arg0: i32, %arg1: memref<128x1152xbf16, #tpu.memory_space<vmem>>, %arg2: memref<1152x128xbf16, #tpu.memory_space<vmem>>, %arg3: memref<1x128xf32, #tpu.memory_space<vmem>>, %arg4: memref<1x128xf32, #tpu.memory_space<vmem>>, %arg5: memref<1x128xf32, #tpu.memory_space<vmem>>, %arg6: memref<128x128xbf16, #tpu.memory_space<vmem>>, %arg7: memref<128x128xbf16, #tpu.memory_space<vmem>>, %arg8: memref<1x128xf32, #tpu.memory_space<vmem>>, %arg9: memref<1x128xf32, #tpu.memory_space<vmem>>, %arg10: memref<128x128xbf16, #tpu.memory_space<vmem>>) attributes {dimension_semantics = [#tpu.dimension_semantics<parallel>], iteration_bounds = array<i64: 1>, scalar_prefetch = 0 : i64, scratch_operands = 0 : i64, tpu.core_type = #tpu.core_type<tc>, window_params = [{transform_indices = @transform_0, window_bounds = array<i64: 128, 1152>}, {pipeline_mode = #tpu.pipeline_mode<synchronous>, transform_indices = @transform_1, window_bounds = array<i64: 1152, 128>}, {pipeline_mode = #tpu.pipeline_mode<synchronous>, transform_indices = @transform_2, window_bounds = array<i64: 1, 128>}, {pipeline_mode = #tpu.pipeline_mode<synchronous>, transform_indices = @transform_3, window_bounds = array<i64: 1, 128>}, {pipeline_mode = #tpu.pipeline_mode<synchronous>, transform_indices = @transform_4, window_bounds = array<i64: 1, 128>}, {transform_indices = @transform_5, window_bounds = array<i64: 128, 128>}, {pipeline_mode = #tpu.pipeline_mode<synchronous>, transform_indices = @transform_6, window_bounds = array<i64: 128, 128>}, {pipeline_mode = #tpu.pipeline_mode<synchronous>, transform_indices = @transform_7, window_bounds = array<i64: 1, 128>}, {pipeline_mode = #tpu.pipeline_mode<synchronous>, transform_indices = @transform_8, window_bounds = array<i64: 1, 128>}, {transform_indices = @transform_9, window_bounds = array<i64: 128, 128>}]} {
    %c0 = arith.constant 0 : index
    %c0_0 = arith.constant 0 : index
    %0 = vector.load %arg1[%c0, %c0_0] : memref<128x1152xbf16, #tpu.memory_space<vmem>>, vector<128x1152xbf16>
    %c0_1 = arith.constant 0 : index
    %c0_2 = arith.constant 0 : index
    %1 = vector.load %arg2[%c0_1, %c0_2] : memref<1152x128xbf16, #tpu.memory_space<vmem>>, vector<1152x128xbf16>
    %cst = arith.constant dense<0.000000e+00> : vector<128x128xf32>
    %2 = tpu.matmul %0, %1, %cst {dimension_numbers = #tpu.dot_dimension_numbers<[1], [0], [0], [1], [0, 0, 1, 1], [], []>} : vector<128x1152xbf16>, vector<1152x128xbf16>, vector<128x128xf32> -> vector<128x128xf32>
    %c0_3 = arith.constant 0 : index
    %c0_4 = arith.constant 0 : index
    %3 = vector.load %arg3[%c0_3, %c0_4] : memref<1x128xf32, #tpu.memory_space<vmem>>, vector<1x128xf32>
    %4 = vector.broadcast %3 : vector<1x128xf32> to vector<128x128xf32>
    %5 = arith.addf %2, %4 : vector<128x128xf32>
    %cst_5 = arith.constant 0.000000e+00 : f32
    %6 = vector.broadcast %cst_5 : f32 to vector<128x128xf32>
    %7 = arith.maximumf %5, %6 : vector<128x128xf32>
    %c0_6 = arith.constant 0 : index
    %c0_7 = arith.constant 0 : index
    %8 = vector.load %arg4[%c0_6, %c0_7] : memref<1x128xf32, #tpu.memory_space<vmem>>, vector<1x128xf32>
    %9 = vector.broadcast %8 : vector<1x128xf32> to vector<128x128xf32>
    %10 = arith.mulf %7, %9 : vector<128x128xf32>
    %c0_8 = arith.constant 0 : index
    %c0_9 = arith.constant 0 : index
    %11 = vector.load %arg5[%c0_8, %c0_9] : memref<1x128xf32, #tpu.memory_space<vmem>>, vector<1x128xf32>
    %12 = vector.broadcast %11 : vector<1x128xf32> to vector<128x128xf32>
    %13 = arith.addf %10, %12 : vector<128x128xf32>
    %c0_10 = arith.constant 0 : index
    %c0_11 = arith.constant 0 : index
    %14 = vector.load %arg6[%c0_10, %c0_11] : memref<128x128xbf16, #tpu.memory_space<vmem>>, vector<128x128xbf16>
    %c0_12 = arith.constant 0 : index
    %c0_13 = arith.constant 0 : index
    %15 = vector.load %arg7[%c0_12, %c0_13] : memref<128x128xbf16, #tpu.memory_space<vmem>>, vector<128x128xbf16>
    %cst_14 = arith.constant dense<0.000000e+00> : vector<128x128xf32>
    %16 = tpu.matmul %14, %15, %cst_14 {dimension_numbers = #tpu.dot_dimension_numbers<[1], [0], [0], [1], [0, 0, 1, 1], [], []>} : vector<128x128xbf16>, vector<128x128xbf16>, vector<128x128xf32> -> vector<128x128xf32>
    %c0_15 = arith.constant 0 : index
    %c0_16 = arith.constant 0 : index
    %17 = vector.load %arg8[%c0_15, %c0_16] : memref<1x128xf32, #tpu.memory_space<vmem>>, vector<1x128xf32>
    %18 = vector.broadcast %17 : vector<1x128xf32> to vector<128x128xf32>
    %19 = arith.mulf %16, %18 : vector<128x128xf32>
    %c0_17 = arith.constant 0 : index
    %c0_18 = arith.constant 0 : index
    %20 = vector.load %arg9[%c0_17, %c0_18] : memref<1x128xf32, #tpu.memory_space<vmem>>, vector<1x128xf32>
    %21 = vector.broadcast %20 : vector<1x128xf32> to vector<128x128xf32>
    %22 = arith.addf %19, %21 : vector<128x128xf32>
    %23 = arith.addf %13, %22 : vector<128x128xf32>
    %cst_19 = arith.constant 0.000000e+00 : f32
    %24 = vector.broadcast %cst_19 : f32 to vector<128x128xf32>
    %25 = arith.maximumf %23, %24 : vector<128x128xf32>
    %26 = arith.truncf %25 : vector<128x128xf32> to vector<128x128xbf16>
    %c0_20 = arith.constant 0 : index
    %c0_21 = arith.constant 0 : index
    %27 = vector.load %arg10[%c0_20, %c0_21] : memref<128x128xbf16, #tpu.memory_space<vmem>>, vector<128x128xbf16>
    tpu.vector_store %arg10[%c0_20, %c0_21], %26 {strides = array<i32>} : memref<128x128xbf16, #tpu.memory_space<vmem>>, vector<128x128xbf16>,
    return
  }
  func.func @transform_0(%arg0: i32) -> (i32, i32) {
    %c0_i32 = arith.constant 0 : i32
    %c0_i32_0 = arith.constant 0 : i32
    return %arg0, %c0_i32 : i32, i32
  }
  func.func @transform_1(%arg0: i32) -> (i32, i32) {
    %c0_i32 = arith.constant 0 : i32
    %c0_i32_0 = arith.constant 0 : i32
    %c0_i32_1 = arith.constant 0 : i32
    return %c0_i32, %c0_i32_0 : i32, i32
  }
  func.func @transform_2(%arg0: i32) -> (i32, i32) {
    %c0_i32 = arith.constant 0 : i32
    %c0_i32_0 = arith.constant 0 : i32
    %c0_i32_1 = arith.constant 0 : i32
    return %c0_i32, %c0_i32_0 : i32, i32
  }
  func.func @transform_3(%arg0: i32) -> (i32, i32) {
    %c0_i32 = arith.constant 0 : i32
    %c0_i32_0 = arith.constant 0 : i32
    %c0_i32_1 = arith.constant 0 : i32
    return %c0_i32, %c0_i32_0 : i32, i32
  }
  func.func @transform_4(%arg0: i32) -> (i32, i32) {
    %c0_i32 = arith.constant 0 : i32
    %c0_i32_0 = arith.constant 0 : i32
    %c0_i32_1 = arith.constant 0 : i32
    return %c0_i32, %c0_i32_0 : i32, i32
  }
  func.func @transform_5(%arg0: i32) -> (i32, i32) {
    %c0_i32 = arith.constant 0 : i32
    %c0_i32_0 = arith.constant 0 : i32
    return %arg0, %c0_i32 : i32, i32
  }
  func.func @transform_6(%arg0: i32) -> (i32, i32) {
    %c0_i32 = arith.constant 0 : i32
    %c0_i32_0 = arith.constant 0 : i32
    %c0_i32_1 = arith.constant 0 : i32
    return %c0_i32, %c0_i32_0 : i32, i32
  }
  func.func @transform_7(%arg0: i32) -> (i32, i32) {
    %c0_i32 = arith.constant 0 : i32
    %c0_i32_0 = arith.constant 0 : i32
    %c0_i32_1 = arith.constant 0 : i32
    return %c0_i32, %c0_i32_0 : i32, i32
  }
  func.func @transform_8(%arg0: i32) -> (i32, i32) {
    %c0_i32 = arith.constant 0 : i32
    %c0_i32_0 = arith.constant 0 : i32
    %c0_i32_1 = arith.constant 0 : i32
    return %c0_i32, %c0_i32_0 : i32, i32
  }
  func.func @transform_9(%arg0: i32) -> (i32, i32) {
    %c0_i32 = arith.constant 0 : i32
    %c0_i32_0 = arith.constant 0 : i32
    return %arg0, %c0_i32 : i32, i32
  }
}

module attributes {stable_mosaic.version = 11 : i64} {
  func.func @_conv_bn_relu_kernel(%arg0: i32, %arg1: memref<128x1152xbf16, #tpu.memory_space<vmem>>, %arg2: memref<1152x128xbf16, #tpu.memory_space<vmem>>, %arg3: memref<1x128xf32, #tpu.memory_space<vmem>>, %arg4: memref<1x128xf32, #tpu.memory_space<vmem>>, %arg5: memref<1x128xf32, #tpu.memory_space<vmem>>, %arg6: memref<128x128xbf16, #tpu.memory_space<vmem>>) attributes {dimension_semantics = [#tpu.dimension_semantics<parallel>], iteration_bounds = array<i64: 1>, scalar_prefetch = 0 : i64, scratch_operands = 0 : i64, tpu.core_type = #tpu.core_type<tc>, window_params = [{transform_indices = @transform_0, window_bounds = array<i64: 128, 1152>}, {pipeline_mode = #tpu.pipeline_mode<synchronous>, transform_indices = @transform_1, window_bounds = array<i64: 1152, 128>}, {pipeline_mode = #tpu.pipeline_mode<synchronous>, transform_indices = @transform_2, window_bounds = array<i64: 1, 128>}, {pipeline_mode = #tpu.pipeline_mode<synchronous>, transform_indices = @transform_3, window_bounds = array<i64: 1, 128>}, {pipeline_mode = #tpu.pipeline_mode<synchronous>, transform_indices = @transform_4, window_bounds = array<i64: 1, 128>}, {transform_indices = @transform_5, window_bounds = array<i64: 128, 128>}]} {
    %c0 = arith.constant 0 : index
    %c0_0 = arith.constant 0 : index
    %0 = vector.load %arg1[%c0, %c0_0] : memref<128x1152xbf16, #tpu.memory_space<vmem>>, vector<128x1152xbf16>
    %c0_1 = arith.constant 0 : index
    %c0_2 = arith.constant 0 : index
    %1 = vector.load %arg2[%c0_1, %c0_2] : memref<1152x128xbf16, #tpu.memory_space<vmem>>, vector<1152x128xbf16>
    %cst = arith.constant dense<0.000000e+00> : vector<128x128xf32>
    %2 = tpu.matmul %0, %1, %cst {dimension_numbers = #tpu.dot_dimension_numbers<[1], [0], [0], [1], [0, 0, 1, 1], [], []>} : vector<128x1152xbf16>, vector<1152x128xbf16>, vector<128x128xf32> -> vector<128x128xf32>
    %c0_3 = arith.constant 0 : index
    %c0_4 = arith.constant 0 : index
    %3 = vector.load %arg3[%c0_3, %c0_4] : memref<1x128xf32, #tpu.memory_space<vmem>>, vector<1x128xf32>
    %4 = vector.broadcast %3 : vector<1x128xf32> to vector<128x128xf32>
    %5 = arith.addf %2, %4 : vector<128x128xf32>
    %cst_5 = arith.constant 0.000000e+00 : f32
    %6 = vector.broadcast %cst_5 : f32 to vector<128x128xf32>
    %7 = arith.maximumf %5, %6 : vector<128x128xf32>
    %c0_6 = arith.constant 0 : index
    %c0_7 = arith.constant 0 : index
    %8 = vector.load %arg4[%c0_6, %c0_7] : memref<1x128xf32, #tpu.memory_space<vmem>>, vector<1x128xf32>
    %9 = vector.broadcast %8 : vector<1x128xf32> to vector<128x128xf32>
    %10 = arith.mulf %7, %9 : vector<128x128xf32>
    %c0_8 = arith.constant 0 : index
    %c0_9 = arith.constant 0 : index
    %11 = vector.load %arg5[%c0_8, %c0_9] : memref<1x128xf32, #tpu.memory_space<vmem>>, vector<1x128xf32>
    %12 = vector.broadcast %11 : vector<1x128xf32> to vector<128x128xf32>
    %13 = arith.addf %10, %12 : vector<128x128xf32>
    %14 = arith.truncf %13 : vector<128x128xf32> to vector<128x128xbf16>
    %c0_10 = arith.constant 0 : index
    %c0_11 = arith.constant 0 : index
    %15 = vector.load %arg6[%c0_10, %c0_11] : memref<128x128xbf16, #tpu.memory_space<vmem>>, vector<128x128xbf16>
    tpu.vector_store %arg6[%c0_10, %c0_11], %14 {strides = array<i32>} : memref<128x128xbf16, #tpu.memory_space<vmem>>, vector<128x128xbf16>,
    return
  }
  func.func @transform_0(%arg0: i32) -> (i32, i32) {
    %c0_i32 = arith.constant 0 : i32
    %c0_i32_0 = arith.constant 0 : i32
    return %arg0, %c0_i32 : i32, i32
  }
  func.func @transform_1(%arg0: i32) -> (i32, i32) {
    %c0_i32 = arith.constant 0 : i32
    %c0_i32_0 = arith.constant 0 : i32
    %c0_i32_1 = arith.constant 0 : i32
    return %c0_i32, %c0_i32_0 : i32, i32
  }
  func.func @transform_2(%arg0: i32) -> (i32, i32) {
    %c0_i32 = arith.constant 0 : i32
    %c0_i32_0 = arith.constant 0 : i32
    %c0_i32_1 = arith.constant 0 : i32
    return %c0_i32, %c0_i32_0 : i32, i32
  }
  func.func @transform_3(%arg0: i32) -> (i32, i32) {
    %c0_i32 = arith.constant 0 : i32
    %c0_i32_0 = arith.constant 0 : i32
    %c0_i32_1 = arith.constant 0 : i32
    return %c0_i32, %c0_i32_0 : i32, i32
  }
  func.func @transform_4(%arg0: i32) -> (i32, i32) {
    %c0_i32 = arith.constant 0 : i32
    %c0_i32_0 = arith.constant 0 : i32
    %c0_i32_1 = arith.constant 0 : i32
    return %c0_i32, %c0_i32_0 : i32, i32
  }
  func.func @transform_5(%arg0: i32) -> (i32, i32) {
    %c0_i32 = arith.constant 0 : i32
    %c0_i32_0 = arith.constant 0 : i32
    return %arg0, %c0_i32 : i32, i32
  }
}

module attributes {stable_mosaic.version = 11 : i64} {
  func.func @_res_tail_kernel(%arg0: i32, %arg1: memref<32x1152xbf16, #tpu.memory_space<vmem>>, %arg2: memref<1152x128xbf16, #tpu.memory_space<vmem>>, %arg3: memref<1x128xf32, #tpu.memory_space<vmem>>, %arg4: memref<1x128xf32, #tpu.memory_space<vmem>>, %arg5: memref<1x128xf32, #tpu.memory_space<vmem>>, %arg6: memref<32x128xbf16, #tpu.memory_space<vmem>>, %arg7: memref<128x128xbf16, #tpu.memory_space<vmem>>, %arg8: memref<1x128xf32, #tpu.memory_space<vmem>>, %arg9: memref<1x128xf32, #tpu.memory_space<vmem>>, %arg10: memref<32x128xbf16, #tpu.memory_space<vmem>>) attributes {dimension_semantics = [#tpu.dimension_semantics<parallel>], iteration_bounds = array<i64: 1>, scalar_prefetch = 0 : i64, scratch_operands = 0 : i64, tpu.core_type = #tpu.core_type<tc>, window_params = [{transform_indices = @transform_0, window_bounds = array<i64: 32, 1152>}, {pipeline_mode = #tpu.pipeline_mode<synchronous>, transform_indices = @transform_1, window_bounds = array<i64: 1152, 128>}, {pipeline_mode = #tpu.pipeline_mode<synchronous>, transform_indices = @transform_2, window_bounds = array<i64: 1, 128>}, {pipeline_mode = #tpu.pipeline_mode<synchronous>, transform_indices = @transform_3, window_bounds = array<i64: 1, 128>}, {pipeline_mode = #tpu.pipeline_mode<synchronous>, transform_indices = @transform_4, window_bounds = array<i64: 1, 128>}, {transform_indices = @transform_5, window_bounds = array<i64: 32, 128>}, {pipeline_mode = #tpu.pipeline_mode<synchronous>, transform_indices = @transform_6, window_bounds = array<i64: 128, 128>}, {pipeline_mode = #tpu.pipeline_mode<synchronous>, transform_indices = @transform_7, window_bounds = array<i64: 1, 128>}, {pipeline_mode = #tpu.pipeline_mode<synchronous>, transform_indices = @transform_8, window_bounds = array<i64: 1, 128>}, {transform_indices = @transform_9, window_bounds = array<i64: 32, 128>}]} {
    %c0 = arith.constant 0 : index
    %c0_0 = arith.constant 0 : index
    %0 = vector.load %arg1[%c0, %c0_0] : memref<32x1152xbf16, #tpu.memory_space<vmem>>, vector<32x1152xbf16>
    %c0_1 = arith.constant 0 : index
    %c0_2 = arith.constant 0 : index
    %1 = vector.load %arg2[%c0_1, %c0_2] : memref<1152x128xbf16, #tpu.memory_space<vmem>>, vector<1152x128xbf16>
    %cst = arith.constant dense<0.000000e+00> : vector<32x128xf32>
    %2 = tpu.matmul %0, %1, %cst {dimension_numbers = #tpu.dot_dimension_numbers<[1], [0], [0], [1], [0, 0, 1, 1], [], []>} : vector<32x1152xbf16>, vector<1152x128xbf16>, vector<32x128xf32> -> vector<32x128xf32>
    %c0_3 = arith.constant 0 : index
    %c0_4 = arith.constant 0 : index
    %3 = vector.load %arg3[%c0_3, %c0_4] : memref<1x128xf32, #tpu.memory_space<vmem>>, vector<1x128xf32>
    %4 = vector.broadcast %3 : vector<1x128xf32> to vector<32x128xf32>
    %5 = arith.addf %2, %4 : vector<32x128xf32>
    %cst_5 = arith.constant 0.000000e+00 : f32
    %6 = vector.broadcast %cst_5 : f32 to vector<32x128xf32>
    %7 = arith.maximumf %5, %6 : vector<32x128xf32>
    %c0_6 = arith.constant 0 : index
    %c0_7 = arith.constant 0 : index
    %8 = vector.load %arg4[%c0_6, %c0_7] : memref<1x128xf32, #tpu.memory_space<vmem>>, vector<1x128xf32>
    %9 = vector.broadcast %8 : vector<1x128xf32> to vector<32x128xf32>
    %10 = arith.mulf %7, %9 : vector<32x128xf32>
    %c0_8 = arith.constant 0 : index
    %c0_9 = arith.constant 0 : index
    %11 = vector.load %arg5[%c0_8, %c0_9] : memref<1x128xf32, #tpu.memory_space<vmem>>, vector<1x128xf32>
    %12 = vector.broadcast %11 : vector<1x128xf32> to vector<32x128xf32>
    %13 = arith.addf %10, %12 : vector<32x128xf32>
    %c0_10 = arith.constant 0 : index
    %c0_11 = arith.constant 0 : index
    %14 = vector.load %arg6[%c0_10, %c0_11] : memref<32x128xbf16, #tpu.memory_space<vmem>>, vector<32x128xbf16>
    %c0_12 = arith.constant 0 : index
    %c0_13 = arith.constant 0 : index
    %15 = vector.load %arg7[%c0_12, %c0_13] : memref<128x128xbf16, #tpu.memory_space<vmem>>, vector<128x128xbf16>
    %cst_14 = arith.constant dense<0.000000e+00> : vector<32x128xf32>
    %16 = tpu.matmul %14, %15, %cst_14 {dimension_numbers = #tpu.dot_dimension_numbers<[1], [0], [0], [1], [0, 0, 1, 1], [], []>} : vector<32x128xbf16>, vector<128x128xbf16>, vector<32x128xf32> -> vector<32x128xf32>
    %c0_15 = arith.constant 0 : index
    %c0_16 = arith.constant 0 : index
    %17 = vector.load %arg8[%c0_15, %c0_16] : memref<1x128xf32, #tpu.memory_space<vmem>>, vector<1x128xf32>
    %18 = vector.broadcast %17 : vector<1x128xf32> to vector<32x128xf32>
    %19 = arith.mulf %16, %18 : vector<32x128xf32>
    %c0_17 = arith.constant 0 : index
    %c0_18 = arith.constant 0 : index
    %20 = vector.load %arg9[%c0_17, %c0_18] : memref<1x128xf32, #tpu.memory_space<vmem>>, vector<1x128xf32>
    %21 = vector.broadcast %20 : vector<1x128xf32> to vector<32x128xf32>
    %22 = arith.addf %19, %21 : vector<32x128xf32>
    %23 = arith.addf %13, %22 : vector<32x128xf32>
    %cst_19 = arith.constant 0.000000e+00 : f32
    %24 = vector.broadcast %cst_19 : f32 to vector<32x128xf32>
    %25 = arith.maximumf %23, %24 : vector<32x128xf32>
    %26 = arith.truncf %25 : vector<32x128xf32> to vector<32x128xbf16>
    %c0_20 = arith.constant 0 : index
    %c0_21 = arith.constant 0 : index
    %27 = vector.load %arg10[%c0_20, %c0_21] : memref<32x128xbf16, #tpu.memory_space<vmem>>, vector<32x128xbf16>
    tpu.vector_store %arg10[%c0_20, %c0_21], %26 {strides = array<i32>} : memref<32x128xbf16, #tpu.memory_space<vmem>>, vector<32x128xbf16>,
    return
  }
  func.func @transform_0(%arg0: i32) -> (i32, i32) {
    %c0_i32 = arith.constant 0 : i32
    %c0_i32_0 = arith.constant 0 : i32
    return %arg0, %c0_i32 : i32, i32
  }
  func.func @transform_1(%arg0: i32) -> (i32, i32) {
    %c0_i32 = arith.constant 0 : i32
    %c0_i32_0 = arith.constant 0 : i32
    %c0_i32_1 = arith.constant 0 : i32
    return %c0_i32, %c0_i32_0 : i32, i32
  }
  func.func @transform_2(%arg0: i32) -> (i32, i32) {
    %c0_i32 = arith.constant 0 : i32
    %c0_i32_0 = arith.constant 0 : i32
    %c0_i32_1 = arith.constant 0 : i32
    return %c0_i32, %c0_i32_0 : i32, i32
  }
  func.func @transform_3(%arg0: i32) -> (i32, i32) {
    %c0_i32 = arith.constant 0 : i32
    %c0_i32_0 = arith.constant 0 : i32
    %c0_i32_1 = arith.constant 0 : i32
    return %c0_i32, %c0_i32_0 : i32, i32
  }
  func.func @transform_4(%arg0: i32) -> (i32, i32) {
    %c0_i32 = arith.constant 0 : i32
    %c0_i32_0 = arith.constant 0 : i32
    %c0_i32_1 = arith.constant 0 : i32
    return %c0_i32, %c0_i32_0 : i32, i32
  }
  func.func @transform_5(%arg0: i32) -> (i32, i32) {
    %c0_i32 = arith.constant 0 : i32
    %c0_i32_0 = arith.constant 0 : i32
    return %arg0, %c0_i32 : i32, i32
  }
  func.func @transform_6(%arg0: i32) -> (i32, i32) {
    %c0_i32 = arith.constant 0 : i32
    %c0_i32_0 = arith.constant 0 : i32
    %c0_i32_1 = arith.constant 0 : i32
    return %c0_i32, %c0_i32_0 : i32, i32
  }
  func.func @transform_7(%arg0: i32) -> (i32, i32) {
    %c0_i32 = arith.constant 0 : i32
    %c0_i32_0 = arith.constant 0 : i32
    %c0_i32_1 = arith.constant 0 : i32
    return %c0_i32, %c0_i32_0 : i32, i32
  }
  func.func @transform_8(%arg0: i32) -> (i32, i32) {
    %c0_i32 = arith.constant 0 : i32
    %c0_i32_0 = arith.constant 0 : i32
    %c0_i32_1 = arith.constant 0 : i32
    return %c0_i32, %c0_i32_0 : i32, i32
  }
  func.func @transform_9(%arg0: i32) -> (i32, i32) {
    %c0_i32 = arith.constant 0 : i32
    %c0_i32_0 = arith.constant 0 : i32
    return %arg0, %c0_i32 : i32, i32
  }
}

module attributes {stable_mosaic.version = 11 : i64} {
  func.func @_conv_bn_relu_kernel(%arg0: i32, %arg1: memref<32x1152xbf16, #tpu.memory_space<vmem>>, %arg2: memref<1152x128xbf16, #tpu.memory_space<vmem>>, %arg3: memref<1x128xf32, #tpu.memory_space<vmem>>, %arg4: memref<1x128xf32, #tpu.memory_space<vmem>>, %arg5: memref<1x128xf32, #tpu.memory_space<vmem>>, %arg6: memref<32x128xbf16, #tpu.memory_space<vmem>>) attributes {dimension_semantics = [#tpu.dimension_semantics<parallel>], iteration_bounds = array<i64: 1>, scalar_prefetch = 0 : i64, scratch_operands = 0 : i64, tpu.core_type = #tpu.core_type<tc>, window_params = [{transform_indices = @transform_0, window_bounds = array<i64: 32, 1152>}, {pipeline_mode = #tpu.pipeline_mode<synchronous>, transform_indices = @transform_1, window_bounds = array<i64: 1152, 128>}, {pipeline_mode = #tpu.pipeline_mode<synchronous>, transform_indices = @transform_2, window_bounds = array<i64: 1, 128>}, {pipeline_mode = #tpu.pipeline_mode<synchronous>, transform_indices = @transform_3, window_bounds = array<i64: 1, 128>}, {pipeline_mode = #tpu.pipeline_mode<synchronous>, transform_indices = @transform_4, window_bounds = array<i64: 1, 128>}, {transform_indices = @transform_5, window_bounds = array<i64: 32, 128>}]} {
    %c0 = arith.constant 0 : index
    %c0_0 = arith.constant 0 : index
    %0 = vector.load %arg1[%c0, %c0_0] : memref<32x1152xbf16, #tpu.memory_space<vmem>>, vector<32x1152xbf16>
    %c0_1 = arith.constant 0 : index
    %c0_2 = arith.constant 0 : index
    %1 = vector.load %arg2[%c0_1, %c0_2] : memref<1152x128xbf16, #tpu.memory_space<vmem>>, vector<1152x128xbf16>
    %cst = arith.constant dense<0.000000e+00> : vector<32x128xf32>
    %2 = tpu.matmul %0, %1, %cst {dimension_numbers = #tpu.dot_dimension_numbers<[1], [0], [0], [1], [0, 0, 1, 1], [], []>} : vector<32x1152xbf16>, vector<1152x128xbf16>, vector<32x128xf32> -> vector<32x128xf32>
    %c0_3 = arith.constant 0 : index
    %c0_4 = arith.constant 0 : index
    %3 = vector.load %arg3[%c0_3, %c0_4] : memref<1x128xf32, #tpu.memory_space<vmem>>, vector<1x128xf32>
    %4 = vector.broadcast %3 : vector<1x128xf32> to vector<32x128xf32>
    %5 = arith.addf %2, %4 : vector<32x128xf32>
    %cst_5 = arith.constant 0.000000e+00 : f32
    %6 = vector.broadcast %cst_5 : f32 to vector<32x128xf32>
    %7 = arith.maximumf %5, %6 : vector<32x128xf32>
    %c0_6 = arith.constant 0 : index
    %c0_7 = arith.constant 0 : index
    %8 = vector.load %arg4[%c0_6, %c0_7] : memref<1x128xf32, #tpu.memory_space<vmem>>, vector<1x128xf32>
    %9 = vector.broadcast %8 : vector<1x128xf32> to vector<32x128xf32>
    %10 = arith.mulf %7, %9 : vector<32x128xf32>
    %c0_8 = arith.constant 0 : index
    %c0_9 = arith.constant 0 : index
    %11 = vector.load %arg5[%c0_8, %c0_9] : memref<1x128xf32, #tpu.memory_space<vmem>>, vector<1x128xf32>
    %12 = vector.broadcast %11 : vector<1x128xf32> to vector<32x128xf32>
    %13 = arith.addf %10, %12 : vector<32x128xf32>
    %14 = arith.truncf %13 : vector<32x128xf32> to vector<32x128xbf16>
    %c0_10 = arith.constant 0 : index
    %c0_11 = arith.constant 0 : index
    %15 = vector.load %arg6[%c0_10, %c0_11] : memref<32x128xbf16, #tpu.memory_space<vmem>>, vector<32x128xbf16>
    tpu.vector_store %arg6[%c0_10, %c0_11], %14 {strides = array<i32>} : memref<32x128xbf16, #tpu.memory_space<vmem>>, vector<32x128xbf16>,
    return
  }
  func.func @transform_0(%arg0: i32) -> (i32, i32) {
    %c0_i32 = arith.constant 0 : i32
    %c0_i32_0 = arith.constant 0 : i32
    return %arg0, %c0_i32 : i32, i32
  }
  func.func @transform_1(%arg0: i32) -> (i32, i32) {
    %c0_i32 = arith.constant 0 : i32
    %c0_i32_0 = arith.constant 0 : i32
    %c0_i32_1 = arith.constant 0 : i32
    return %c0_i32, %c0_i32_0 : i32, i32
  }
  func.func @transform_2(%arg0: i32) -> (i32, i32) {
    %c0_i32 = arith.constant 0 : i32
    %c0_i32_0 = arith.constant 0 : i32
    %c0_i32_1 = arith.constant 0 : i32
    return %c0_i32, %c0_i32_0 : i32, i32
  }
  func.func @transform_3(%arg0: i32) -> (i32, i32) {
    %c0_i32 = arith.constant 0 : i32
    %c0_i32_0 = arith.constant 0 : i32
    %c0_i32_1 = arith.constant 0 : i32
    return %c0_i32, %c0_i32_0 : i32, i32
  }
  func.func @transform_4(%arg0: i32) -> (i32, i32) {
    %c0_i32 = arith.constant 0 : i32
    %c0_i32_0 = arith.constant 0 : i32
    %c0_i32_1 = arith.constant 0 : i32
    return %c0_i32, %c0_i32_0 : i32, i32
  }
  func.func @transform_5(%arg0: i32) -> (i32, i32) {
    %c0_i32 = arith.constant 0 : i32
    %c0_i32_0 = arith.constant 0 : i32
    return %arg0, %c0_i32 : i32, i32
  }
}

module attributes {stable_mosaic.version = 11 : i64} {
  func.func @_res_tail_kernel(%arg0: i32, %arg1: memref<16x1152xbf16, #tpu.memory_space<vmem>>, %arg2: memref<1152x128xbf16, #tpu.memory_space<vmem>>, %arg3: memref<1x128xf32, #tpu.memory_space<vmem>>, %arg4: memref<1x128xf32, #tpu.memory_space<vmem>>, %arg5: memref<1x128xf32, #tpu.memory_space<vmem>>, %arg6: memref<16x128xbf16, #tpu.memory_space<vmem>>, %arg7: memref<128x128xbf16, #tpu.memory_space<vmem>>, %arg8: memref<1x128xf32, #tpu.memory_space<vmem>>, %arg9: memref<1x128xf32, #tpu.memory_space<vmem>>, %arg10: memref<16x128xbf16, #tpu.memory_space<vmem>>) attributes {dimension_semantics = [#tpu.dimension_semantics<parallel>], iteration_bounds = array<i64: 1>, scalar_prefetch = 0 : i64, scratch_operands = 0 : i64, tpu.core_type = #tpu.core_type<tc>, window_params = [{transform_indices = @transform_0, window_bounds = array<i64: 16, 1152>}, {pipeline_mode = #tpu.pipeline_mode<synchronous>, transform_indices = @transform_1, window_bounds = array<i64: 1152, 128>}, {pipeline_mode = #tpu.pipeline_mode<synchronous>, transform_indices = @transform_2, window_bounds = array<i64: 1, 128>}, {pipeline_mode = #tpu.pipeline_mode<synchronous>, transform_indices = @transform_3, window_bounds = array<i64: 1, 128>}, {pipeline_mode = #tpu.pipeline_mode<synchronous>, transform_indices = @transform_4, window_bounds = array<i64: 1, 128>}, {transform_indices = @transform_5, window_bounds = array<i64: 16, 128>}, {pipeline_mode = #tpu.pipeline_mode<synchronous>, transform_indices = @transform_6, window_bounds = array<i64: 128, 128>}, {pipeline_mode = #tpu.pipeline_mode<synchronous>, transform_indices = @transform_7, window_bounds = array<i64: 1, 128>}, {pipeline_mode = #tpu.pipeline_mode<synchronous>, transform_indices = @transform_8, window_bounds = array<i64: 1, 128>}, {transform_indices = @transform_9, window_bounds = array<i64: 16, 128>}]} {
    %c0 = arith.constant 0 : index
    %c0_0 = arith.constant 0 : index
    %0 = vector.load %arg1[%c0, %c0_0] : memref<16x1152xbf16, #tpu.memory_space<vmem>>, vector<16x1152xbf16>
    %c0_1 = arith.constant 0 : index
    %c0_2 = arith.constant 0 : index
    %1 = vector.load %arg2[%c0_1, %c0_2] : memref<1152x128xbf16, #tpu.memory_space<vmem>>, vector<1152x128xbf16>
    %cst = arith.constant dense<0.000000e+00> : vector<16x128xf32>
    %2 = tpu.matmul %0, %1, %cst {dimension_numbers = #tpu.dot_dimension_numbers<[1], [0], [0], [1], [0, 0, 1, 1], [], []>} : vector<16x1152xbf16>, vector<1152x128xbf16>, vector<16x128xf32> -> vector<16x128xf32>
    %c0_3 = arith.constant 0 : index
    %c0_4 = arith.constant 0 : index
    %3 = vector.load %arg3[%c0_3, %c0_4] : memref<1x128xf32, #tpu.memory_space<vmem>>, vector<1x128xf32>
    %4 = vector.broadcast %3 : vector<1x128xf32> to vector<16x128xf32>
    %5 = arith.addf %2, %4 : vector<16x128xf32>
    %cst_5 = arith.constant 0.000000e+00 : f32
    %6 = vector.broadcast %cst_5 : f32 to vector<16x128xf32>
    %7 = arith.maximumf %5, %6 : vector<16x128xf32>
    %c0_6 = arith.constant 0 : index
    %c0_7 = arith.constant 0 : index
    %8 = vector.load %arg4[%c0_6, %c0_7] : memref<1x128xf32, #tpu.memory_space<vmem>>, vector<1x128xf32>
    %9 = vector.broadcast %8 : vector<1x128xf32> to vector<16x128xf32>
    %10 = arith.mulf %7, %9 : vector<16x128xf32>
    %c0_8 = arith.constant 0 : index
    %c0_9 = arith.constant 0 : index
    %11 = vector.load %arg5[%c0_8, %c0_9] : memref<1x128xf32, #tpu.memory_space<vmem>>, vector<1x128xf32>
    %12 = vector.broadcast %11 : vector<1x128xf32> to vector<16x128xf32>
    %13 = arith.addf %10, %12 : vector<16x128xf32>
    %c0_10 = arith.constant 0 : index
    %c0_11 = arith.constant 0 : index
    %14 = vector.load %arg6[%c0_10, %c0_11] : memref<16x128xbf16, #tpu.memory_space<vmem>>, vector<16x128xbf16>
    %c0_12 = arith.constant 0 : index
    %c0_13 = arith.constant 0 : index
    %15 = vector.load %arg7[%c0_12, %c0_13] : memref<128x128xbf16, #tpu.memory_space<vmem>>, vector<128x128xbf16>
    %cst_14 = arith.constant dense<0.000000e+00> : vector<16x128xf32>
    %16 = tpu.matmul %14, %15, %cst_14 {dimension_numbers = #tpu.dot_dimension_numbers<[1], [0], [0], [1], [0, 0, 1, 1], [], []>} : vector<16x128xbf16>, vector<128x128xbf16>, vector<16x128xf32> -> vector<16x128xf32>
    %c0_15 = arith.constant 0 : index
    %c0_16 = arith.constant 0 : index
    %17 = vector.load %arg8[%c0_15, %c0_16] : memref<1x128xf32, #tpu.memory_space<vmem>>, vector<1x128xf32>
    %18 = vector.broadcast %17 : vector<1x128xf32> to vector<16x128xf32>
    %19 = arith.mulf %16, %18 : vector<16x128xf32>
    %c0_17 = arith.constant 0 : index
    %c0_18 = arith.constant 0 : index
    %20 = vector.load %arg9[%c0_17, %c0_18] : memref<1x128xf32, #tpu.memory_space<vmem>>, vector<1x128xf32>
    %21 = vector.broadcast %20 : vector<1x128xf32> to vector<16x128xf32>
    %22 = arith.addf %19, %21 : vector<16x128xf32>
    %23 = arith.addf %13, %22 : vector<16x128xf32>
    %cst_19 = arith.constant 0.000000e+00 : f32
    %24 = vector.broadcast %cst_19 : f32 to vector<16x128xf32>
    %25 = arith.maximumf %23, %24 : vector<16x128xf32>
    %26 = arith.truncf %25 : vector<16x128xf32> to vector<16x128xbf16>
    %c0_20 = arith.constant 0 : index
    %c0_21 = arith.constant 0 : index
    %27 = vector.load %arg10[%c0_20, %c0_21] : memref<16x128xbf16, #tpu.memory_space<vmem>>, vector<16x128xbf16>
    tpu.vector_store %arg10[%c0_20, %c0_21], %26 {strides = array<i32>} : memref<16x128xbf16, #tpu.memory_space<vmem>>, vector<16x128xbf16>,
    return
  }
  func.func @transform_0(%arg0: i32) -> (i32, i32) {
    %c0_i32 = arith.constant 0 : i32
    %c0_i32_0 = arith.constant 0 : i32
    return %arg0, %c0_i32 : i32, i32
  }
  func.func @transform_1(%arg0: i32) -> (i32, i32) {
    %c0_i32 = arith.constant 0 : i32
    %c0_i32_0 = arith.constant 0 : i32
    %c0_i32_1 = arith.constant 0 : i32
    return %c0_i32, %c0_i32_0 : i32, i32
  }
  func.func @transform_2(%arg0: i32) -> (i32, i32) {
    %c0_i32 = arith.constant 0 : i32
    %c0_i32_0 = arith.constant 0 : i32
    %c0_i32_1 = arith.constant 0 : i32
    return %c0_i32, %c0_i32_0 : i32, i32
  }
  func.func @transform_3(%arg0: i32) -> (i32, i32) {
    %c0_i32 = arith.constant 0 : i32
    %c0_i32_0 = arith.constant 0 : i32
    %c0_i32_1 = arith.constant 0 : i32
    return %c0_i32, %c0_i32_0 : i32, i32
  }
  func.func @transform_4(%arg0: i32) -> (i32, i32) {
    %c0_i32 = arith.constant 0 : i32
    %c0_i32_0 = arith.constant 0 : i32
    %c0_i32_1 = arith.constant 0 : i32
    return %c0_i32, %c0_i32_0 : i32, i32
  }
  func.func @transform_5(%arg0: i32) -> (i32, i32) {
    %c0_i32 = arith.constant 0 : i32
    %c0_i32_0 = arith.constant 0 : i32
    return %arg0, %c0_i32 : i32, i32
  }
  func.func @transform_6(%arg0: i32) -> (i32, i32) {
    %c0_i32 = arith.constant 0 : i32
    %c0_i32_0 = arith.constant 0 : i32
    %c0_i32_1 = arith.constant 0 : i32
    return %c0_i32, %c0_i32_0 : i32, i32
  }
  func.func @transform_7(%arg0: i32) -> (i32, i32) {
    %c0_i32 = arith.constant 0 : i32
    %c0_i32_0 = arith.constant 0 : i32
    %c0_i32_1 = arith.constant 0 : i32
    return %c0_i32, %c0_i32_0 : i32, i32
  }
  func.func @transform_8(%arg0: i32) -> (i32, i32) {
    %c0_i32 = arith.constant 0 : i32
    %c0_i32_0 = arith.constant 0 : i32
    %c0_i32_1 = arith.constant 0 : i32
    return %c0_i32, %c0_i32_0 : i32, i32
  }
  func.func @transform_9(%arg0: i32) -> (i32, i32) {
    %c0_i32 = arith.constant 0 : i32
    %c0_i32_0 = arith.constant 0 : i32
    return %arg0, %c0_i32 : i32, i32
  }
}

module attributes {stable_mosaic.version = 11 : i64} {
  func.func @_conv_bn_relu_kernel(%arg0: i32, %arg1: memref<16x1152xbf16, #tpu.memory_space<vmem>>, %arg2: memref<1152x128xbf16, #tpu.memory_space<vmem>>, %arg3: memref<1x128xf32, #tpu.memory_space<vmem>>, %arg4: memref<1x128xf32, #tpu.memory_space<vmem>>, %arg5: memref<1x128xf32, #tpu.memory_space<vmem>>, %arg6: memref<16x128xbf16, #tpu.memory_space<vmem>>) attributes {dimension_semantics = [#tpu.dimension_semantics<parallel>], iteration_bounds = array<i64: 1>, scalar_prefetch = 0 : i64, scratch_operands = 0 : i64, tpu.core_type = #tpu.core_type<tc>, window_params = [{transform_indices = @transform_0, window_bounds = array<i64: 16, 1152>}, {pipeline_mode = #tpu.pipeline_mode<synchronous>, transform_indices = @transform_1, window_bounds = array<i64: 1152, 128>}, {pipeline_mode = #tpu.pipeline_mode<synchronous>, transform_indices = @transform_2, window_bounds = array<i64: 1, 128>}, {pipeline_mode = #tpu.pipeline_mode<synchronous>, transform_indices = @transform_3, window_bounds = array<i64: 1, 128>}, {pipeline_mode = #tpu.pipeline_mode<synchronous>, transform_indices = @transform_4, window_bounds = array<i64: 1, 128>}, {transform_indices = @transform_5, window_bounds = array<i64: 16, 128>}]} {
    %c0 = arith.constant 0 : index
    %c0_0 = arith.constant 0 : index
    %0 = vector.load %arg1[%c0, %c0_0] : memref<16x1152xbf16, #tpu.memory_space<vmem>>, vector<16x1152xbf16>
    %c0_1 = arith.constant 0 : index
    %c0_2 = arith.constant 0 : index
    %1 = vector.load %arg2[%c0_1, %c0_2] : memref<1152x128xbf16, #tpu.memory_space<vmem>>, vector<1152x128xbf16>
    %cst = arith.constant dense<0.000000e+00> : vector<16x128xf32>
    %2 = tpu.matmul %0, %1, %cst {dimension_numbers = #tpu.dot_dimension_numbers<[1], [0], [0], [1], [0, 0, 1, 1], [], []>} : vector<16x1152xbf16>, vector<1152x128xbf16>, vector<16x128xf32> -> vector<16x128xf32>
    %c0_3 = arith.constant 0 : index
    %c0_4 = arith.constant 0 : index
    %3 = vector.load %arg3[%c0_3, %c0_4] : memref<1x128xf32, #tpu.memory_space<vmem>>, vector<1x128xf32>
    %4 = vector.broadcast %3 : vector<1x128xf32> to vector<16x128xf32>
    %5 = arith.addf %2, %4 : vector<16x128xf32>
    %cst_5 = arith.constant 0.000000e+00 : f32
    %6 = vector.broadcast %cst_5 : f32 to vector<16x128xf32>
    %7 = arith.maximumf %5, %6 : vector<16x128xf32>
    %c0_6 = arith.constant 0 : index
    %c0_7 = arith.constant 0 : index
    %8 = vector.load %arg4[%c0_6, %c0_7] : memref<1x128xf32, #tpu.memory_space<vmem>>, vector<1x128xf32>
    %9 = vector.broadcast %8 : vector<1x128xf32> to vector<16x128xf32>
    %10 = arith.mulf %7, %9 : vector<16x128xf32>
    %c0_8 = arith.constant 0 : index
    %c0_9 = arith.constant 0 : index
    %11 = vector.load %arg5[%c0_8, %c0_9] : memref<1x128xf32, #tpu.memory_space<vmem>>, vector<1x128xf32>
    %12 = vector.broadcast %11 : vector<1x128xf32> to vector<16x128xf32>
    %13 = arith.addf %10, %12 : vector<16x128xf32>
    %14 = arith.truncf %13 : vector<16x128xf32> to vector<16x128xbf16>
    %c0_10 = arith.constant 0 : index
    %c0_11 = arith.constant 0 : index
    %15 = vector.load %arg6[%c0_10, %c0_11] : memref<16x128xbf16, #tpu.memory_space<vmem>>, vector<16x128xbf16>
    tpu.vector_store %arg6[%c0_10, %c0_11], %14 {strides = array<i32>} : memref<16x128xbf16, #tpu.memory_space<vmem>>, vector<16x128xbf16>,
    return
  }
  func.func @transform_0(%arg0: i32) -> (i32, i32) {
    %c0_i32 = arith.constant 0 : i32
    %c0_i32_0 = arith.constant 0 : i32
    return %arg0, %c0_i32 : i32, i32
  }
  func.func @transform_1(%arg0: i32) -> (i32, i32) {
    %c0_i32 = arith.constant 0 : i32
    %c0_i32_0 = arith.constant 0 : i32
    %c0_i32_1 = arith.constant 0 : i32
    return %c0_i32, %c0_i32_0 : i32, i32
  }
  func.func @transform_2(%arg0: i32) -> (i32, i32) {
    %c0_i32 = arith.constant 0 : i32
    %c0_i32_0 = arith.constant 0 : i32
    %c0_i32_1 = arith.constant 0 : i32
    return %c0_i32, %c0_i32_0 : i32, i32
  }
  func.func @transform_3(%arg0: i32) -> (i32, i32) {
    %c0_i32 = arith.constant 0 : i32
    %c0_i32_0 = arith.constant 0 : i32
    %c0_i32_1 = arith.constant 0 : i32
    return %c0_i32, %c0_i32_0 : i32, i32
  }
  func.func @transform_4(%arg0: i32) -> (i32, i32) {
    %c0_i32 = arith.constant 0 : i32
    %c0_i32_0 = arith.constant 0 : i32
    %c0_i32_1 = arith.constant 0 : i32
    return %c0_i32, %c0_i32_0 : i32, i32
  }
  func.func @transform_5(%arg0: i32) -> (i32, i32) {
    %c0_i32 = arith.constant 0 : i32
    %c0_i32_0 = arith.constant 0 : i32
    return %arg0, %c0_i32 : i32, i32
  }
}

module attributes {stable_mosaic.version = 11 : i64} {
  func.func @_res_tail_kernel(%arg0: i32, %arg1: memref<16x1152xbf16, #tpu.memory_space<vmem>>, %arg2: memref<1152x256xbf16, #tpu.memory_space<vmem>>, %arg3: memref<1x256xf32, #tpu.memory_space<vmem>>, %arg4: memref<1x256xf32, #tpu.memory_space<vmem>>, %arg5: memref<1x256xf32, #tpu.memory_space<vmem>>, %arg6: memref<16x128xbf16, #tpu.memory_space<vmem>>, %arg7: memref<128x256xbf16, #tpu.memory_space<vmem>>, %arg8: memref<1x256xf32, #tpu.memory_space<vmem>>, %arg9: memref<1x256xf32, #tpu.memory_space<vmem>>, %arg10: memref<16x256xbf16, #tpu.memory_space<vmem>>) attributes {dimension_semantics = [#tpu.dimension_semantics<parallel>], iteration_bounds = array<i64: 1>, scalar_prefetch = 0 : i64, scratch_operands = 0 : i64, tpu.core_type = #tpu.core_type<tc>, window_params = [{transform_indices = @transform_0, window_bounds = array<i64: 16, 1152>}, {pipeline_mode = #tpu.pipeline_mode<synchronous>, transform_indices = @transform_1, window_bounds = array<i64: 1152, 256>}, {pipeline_mode = #tpu.pipeline_mode<synchronous>, transform_indices = @transform_2, window_bounds = array<i64: 1, 256>}, {pipeline_mode = #tpu.pipeline_mode<synchronous>, transform_indices = @transform_3, window_bounds = array<i64: 1, 256>}, {pipeline_mode = #tpu.pipeline_mode<synchronous>, transform_indices = @transform_4, window_bounds = array<i64: 1, 256>}, {transform_indices = @transform_5, window_bounds = array<i64: 16, 128>}, {pipeline_mode = #tpu.pipeline_mode<synchronous>, transform_indices = @transform_6, window_bounds = array<i64: 128, 256>}, {pipeline_mode = #tpu.pipeline_mode<synchronous>, transform_indices = @transform_7, window_bounds = array<i64: 1, 256>}, {pipeline_mode = #tpu.pipeline_mode<synchronous>, transform_indices = @transform_8, window_bounds = array<i64: 1, 256>}, {transform_indices = @transform_9, window_bounds = array<i64: 16, 256>}]} {
    %c0 = arith.constant 0 : index
    %c0_0 = arith.constant 0 : index
    %0 = vector.load %arg1[%c0, %c0_0] : memref<16x1152xbf16, #tpu.memory_space<vmem>>, vector<16x1152xbf16>
    %c0_1 = arith.constant 0 : index
    %c0_2 = arith.constant 0 : index
    %1 = vector.load %arg2[%c0_1, %c0_2] : memref<1152x256xbf16, #tpu.memory_space<vmem>>, vector<1152x256xbf16>
    %cst = arith.constant dense<0.000000e+00> : vector<16x256xf32>
    %2 = tpu.matmul %0, %1, %cst {dimension_numbers = #tpu.dot_dimension_numbers<[1], [0], [0], [1], [0, 0, 1, 1], [], []>} : vector<16x1152xbf16>, vector<1152x256xbf16>, vector<16x256xf32> -> vector<16x256xf32>
    %c0_3 = arith.constant 0 : index
    %c0_4 = arith.constant 0 : index
    %3 = vector.load %arg3[%c0_3, %c0_4] : memref<1x256xf32, #tpu.memory_space<vmem>>, vector<1x256xf32>
    %4 = vector.broadcast %3 : vector<1x256xf32> to vector<16x256xf32>
    %5 = arith.addf %2, %4 : vector<16x256xf32>
    %cst_5 = arith.constant 0.000000e+00 : f32
    %6 = vector.broadcast %cst_5 : f32 to vector<16x256xf32>
    %7 = arith.maximumf %5, %6 : vector<16x256xf32>
    %c0_6 = arith.constant 0 : index
    %c0_7 = arith.constant 0 : index
    %8 = vector.load %arg4[%c0_6, %c0_7] : memref<1x256xf32, #tpu.memory_space<vmem>>, vector<1x256xf32>
    %9 = vector.broadcast %8 : vector<1x256xf32> to vector<16x256xf32>
    %10 = arith.mulf %7, %9 : vector<16x256xf32>
    %c0_8 = arith.constant 0 : index
    %c0_9 = arith.constant 0 : index
    %11 = vector.load %arg5[%c0_8, %c0_9] : memref<1x256xf32, #tpu.memory_space<vmem>>, vector<1x256xf32>
    %12 = vector.broadcast %11 : vector<1x256xf32> to vector<16x256xf32>
    %13 = arith.addf %10, %12 : vector<16x256xf32>
    %c0_10 = arith.constant 0 : index
    %c0_11 = arith.constant 0 : index
    %14 = vector.load %arg6[%c0_10, %c0_11] : memref<16x128xbf16, #tpu.memory_space<vmem>>, vector<16x128xbf16>
    %c0_12 = arith.constant 0 : index
    %c0_13 = arith.constant 0 : index
    %15 = vector.load %arg7[%c0_12, %c0_13] : memref<128x256xbf16, #tpu.memory_space<vmem>>, vector<128x256xbf16>
    %cst_14 = arith.constant dense<0.000000e+00> : vector<16x256xf32>
    %16 = tpu.matmul %14, %15, %cst_14 {dimension_numbers = #tpu.dot_dimension_numbers<[1], [0], [0], [1], [0, 0, 1, 1], [], []>} : vector<16x128xbf16>, vector<128x256xbf16>, vector<16x256xf32> -> vector<16x256xf32>
    %c0_15 = arith.constant 0 : index
    %c0_16 = arith.constant 0 : index
    %17 = vector.load %arg8[%c0_15, %c0_16] : memref<1x256xf32, #tpu.memory_space<vmem>>, vector<1x256xf32>
    %18 = vector.broadcast %17 : vector<1x256xf32> to vector<16x256xf32>
    %19 = arith.mulf %16, %18 : vector<16x256xf32>
    %c0_17 = arith.constant 0 : index
    %c0_18 = arith.constant 0 : index
    %20 = vector.load %arg9[%c0_17, %c0_18] : memref<1x256xf32, #tpu.memory_space<vmem>>, vector<1x256xf32>
    %21 = vector.broadcast %20 : vector<1x256xf32> to vector<16x256xf32>
    %22 = arith.addf %19, %21 : vector<16x256xf32>
    %23 = arith.addf %13, %22 : vector<16x256xf32>
    %cst_19 = arith.constant 0.000000e+00 : f32
    %24 = vector.broadcast %cst_19 : f32 to vector<16x256xf32>
    %25 = arith.maximumf %23, %24 : vector<16x256xf32>
    %26 = arith.truncf %25 : vector<16x256xf32> to vector<16x256xbf16>
    %c0_20 = arith.constant 0 : index
    %c0_21 = arith.constant 0 : index
    %27 = vector.load %arg10[%c0_20, %c0_21] : memref<16x256xbf16, #tpu.memory_space<vmem>>, vector<16x256xbf16>
    tpu.vector_store %arg10[%c0_20, %c0_21], %26 {strides = array<i32>} : memref<16x256xbf16, #tpu.memory_space<vmem>>, vector<16x256xbf16>,
    return
  }
  func.func @transform_0(%arg0: i32) -> (i32, i32) {
    %c0_i32 = arith.constant 0 : i32
    %c0_i32_0 = arith.constant 0 : i32
    return %arg0, %c0_i32 : i32, i32
  }
  func.func @transform_1(%arg0: i32) -> (i32, i32) {
    %c0_i32 = arith.constant 0 : i32
    %c0_i32_0 = arith.constant 0 : i32
    %c0_i32_1 = arith.constant 0 : i32
    return %c0_i32, %c0_i32_0 : i32, i32
  }
  func.func @transform_2(%arg0: i32) -> (i32, i32) {
    %c0_i32 = arith.constant 0 : i32
    %c0_i32_0 = arith.constant 0 : i32
    %c0_i32_1 = arith.constant 0 : i32
    return %c0_i32, %c0_i32_0 : i32, i32
  }
  func.func @transform_3(%arg0: i32) -> (i32, i32) {
    %c0_i32 = arith.constant 0 : i32
    %c0_i32_0 = arith.constant 0 : i32
    %c0_i32_1 = arith.constant 0 : i32
    return %c0_i32, %c0_i32_0 : i32, i32
  }
  func.func @transform_4(%arg0: i32) -> (i32, i32) {
    %c0_i32 = arith.constant 0 : i32
    %c0_i32_0 = arith.constant 0 : i32
    %c0_i32_1 = arith.constant 0 : i32
    return %c0_i32, %c0_i32_0 : i32, i32
  }
  func.func @transform_5(%arg0: i32) -> (i32, i32) {
    %c0_i32 = arith.constant 0 : i32
    %c0_i32_0 = arith.constant 0 : i32
    return %arg0, %c0_i32 : i32, i32
  }
  func.func @transform_6(%arg0: i32) -> (i32, i32) {
    %c0_i32 = arith.constant 0 : i32
    %c0_i32_0 = arith.constant 0 : i32
    %c0_i32_1 = arith.constant 0 : i32
    return %c0_i32, %c0_i32_0 : i32, i32
  }
  func.func @transform_7(%arg0: i32) -> (i32, i32) {
    %c0_i32 = arith.constant 0 : i32
    %c0_i32_0 = arith.constant 0 : i32
    %c0_i32_1 = arith.constant 0 : i32
    return %c0_i32, %c0_i32_0 : i32, i32
  }
  func.func @transform_8(%arg0: i32) -> (i32, i32) {
    %c0_i32 = arith.constant 0 : i32
    %c0_i32_0 = arith.constant 0 : i32
    %c0_i32_1 = arith.constant 0 : i32
    return %c0_i32, %c0_i32_0 : i32, i32
  }
  func.func @transform_9(%arg0: i32) -> (i32, i32) {
    %c0_i32 = arith.constant 0 : i32
    %c0_i32_0 = arith.constant 0 : i32
    return %arg0, %c0_i32 : i32, i32
  }
}

module attributes {stable_mosaic.version = 11 : i64} {
  func.func @_fc_head_kernel(%arg0: i32, %arg1: memref<16x256xbf16, #tpu.memory_space<vmem>>, %arg2: memref<256x256xbf16, #tpu.memory_space<vmem>>, %arg3: memref<1x256xf32, #tpu.memory_space<vmem>>, %arg4: memref<256x256xbf16, #tpu.memory_space<vmem>>, %arg5: memref<1x256xf32, #tpu.memory_space<vmem>>, %arg6: memref<256x128xbf16, #tpu.memory_space<vmem>>, %arg7: memref<1x128xf32, #tpu.memory_space<vmem>>, %arg8: memref<128x128xbf16, #tpu.memory_space<vmem>>, %arg9: memref<1x128xf32, #tpu.memory_space<vmem>>, %arg10: memref<128x128xbf16, #tpu.memory_space<vmem>>, %arg11: memref<1x128xf32, #tpu.memory_space<vmem>>, %arg12: memref<16x128xf32, #tpu.memory_space<vmem>>) attributes {dimension_semantics = [#tpu.dimension_semantics<arbitrary>], iteration_bounds = array<i64: 1>, scalar_prefetch = 0 : i64, scratch_operands = 0 : i64, tpu.core_type = #tpu.core_type<tc>, window_params = [{pipeline_mode = #tpu.pipeline_mode<synchronous>, transform_indices = @transform_0, window_bounds = array<i64: 16, 256>}, {pipeline_mode = #tpu.pipeline_mode<synchronous>, transform_indices = @transform_1, window_bounds = array<i64: 256, 256>}, {pipeline_mode = #tpu.pipeline_mode<synchronous>, transform_indices = @transform_2, window_bounds = array<i64: 1, 256>}, {pipeline_mode = #tpu.pipeline_mode<synchronous>, transform_indices = @transform_3, window_bounds = array<i64: 256, 256>}, {pipeline_mode = #tpu.pipeline_mode<synchronous>, transform_indices = @transform_4, window_bounds = array<i64: 1, 256>}, {pipeline_mode = #tpu.pipeline_mode<synchronous>, transform_indices = @transform_5, window_bounds = array<i64: 256, 128>}, {pipeline_mode = #tpu.pipeline_mode<synchronous>, transform_indices = @transform_6, window_bounds = array<i64: 1, 128>}, {pipeline_mode = #tpu.pipeline_mode<synchronous>, transform_indices = @transform_7, window_bounds = array<i64: 128, 128>}, {pipeline_mode = #tpu.pipeline_mode<synchronous>, transform_indices = @transform_8, window_bounds = array<i64: 1, 128>}, {pipeline_mode = #tpu.pipeline_mode<synchronous>, transform_indices = @transform_9, window_bounds = array<i64: 128, 128>}, {pipeline_mode = #tpu.pipeline_mode<synchronous>, transform_indices = @transform_10, window_bounds = array<i64: 1, 128>}, {pipeline_mode = #tpu.pipeline_mode<synchronous>, transform_indices = @transform_11, window_bounds = array<i64: 16, 128>}]} {
    %c0 = arith.constant 0 : index
    %c0_0 = arith.constant 0 : index
    %0 = vector.load %arg1[%c0, %c0_0] : memref<16x256xbf16, #tpu.memory_space<vmem>>, vector<16x256xbf16>
    %c0_1 = arith.constant 0 : index
    %c0_2 = arith.constant 0 : index
    %1 = vector.load %arg2[%c0_1, %c0_2] : memref<256x256xbf16, #tpu.memory_space<vmem>>, vector<256x256xbf16>
    %cst = arith.constant dense<0.000000e+00> : vector<16x256xf32>
    %2 = tpu.matmul %0, %1, %cst {dimension_numbers = #tpu.dot_dimension_numbers<[1], [0], [0], [1], [0, 0, 1, 1], [], []>} : vector<16x256xbf16>, vector<256x256xbf16>, vector<16x256xf32> -> vector<16x256xf32>
    %c0_3 = arith.constant 0 : index
    %c0_4 = arith.constant 0 : index
    %3 = vector.load %arg3[%c0_3, %c0_4] : memref<1x256xf32, #tpu.memory_space<vmem>>, vector<1x256xf32>
    %4 = vector.broadcast %3 : vector<1x256xf32> to vector<16x256xf32>
    %5 = arith.addf %2, %4 : vector<16x256xf32>
    %cst_5 = arith.constant 0.000000e+00 : f32
    %6 = vector.broadcast %cst_5 : f32 to vector<16x256xf32>
    %7 = arith.maximumf %5, %6 : vector<16x256xf32>
    %8 = arith.truncf %7 : vector<16x256xf32> to vector<16x256xbf16>
    %c0_6 = arith.constant 0 : index
    %c0_7 = arith.constant 0 : index
    %9 = vector.load %arg4[%c0_6, %c0_7] : memref<256x256xbf16, #tpu.memory_space<vmem>>, vector<256x256xbf16>
    %cst_8 = arith.constant dense<0.000000e+00> : vector<16x256xf32>
    %10 = tpu.matmul %8, %9, %cst_8 {dimension_numbers = #tpu.dot_dimension_numbers<[1], [0], [0], [1], [0, 0, 1, 1], [], []>} : vector<16x256xbf16>, vector<256x256xbf16>, vector<16x256xf32> -> vector<16x256xf32>
    %c0_9 = arith.constant 0 : index
    %c0_10 = arith.constant 0 : index
    %11 = vector.load %arg5[%c0_9, %c0_10] : memref<1x256xf32, #tpu.memory_space<vmem>>, vector<1x256xf32>
    %12 = vector.broadcast %11 : vector<1x256xf32> to vector<16x256xf32>
    %13 = arith.addf %10, %12 : vector<16x256xf32>
    %cst_11 = arith.constant 0.000000e+00 : f32
    %14 = vector.broadcast %cst_11 : f32 to vector<16x256xf32>
    %15 = arith.maximumf %13, %14 : vector<16x256xf32>
    %16 = arith.truncf %15 : vector<16x256xf32> to vector<16x256xbf16>
    %c0_12 = arith.constant 0 : index
    %c0_13 = arith.constant 0 : index
    %17 = vector.load %arg6[%c0_12, %c0_13] : memref<256x128xbf16, #tpu.memory_space<vmem>>, vector<256x128xbf16>
    %cst_14 = arith.constant dense<0.000000e+00> : vector<16x128xf32>
    %18 = tpu.matmul %16, %17, %cst_14 {dimension_numbers = #tpu.dot_dimension_numbers<[1], [0], [0], [1], [0, 0, 1, 1], [], []>} : vector<16x256xbf16>, vector<256x128xbf16>, vector<16x128xf32> -> vector<16x128xf32>
    %c0_15 = arith.constant 0 : index
    %c0_16 = arith.constant 0 : index
    %19 = vector.load %arg7[%c0_15, %c0_16] : memref<1x128xf32, #tpu.memory_space<vmem>>, vector<1x128xf32>
    %20 = vector.broadcast %19 : vector<1x128xf32> to vector<16x128xf32>
    %21 = arith.addf %18, %20 : vector<16x128xf32>
    %cst_17 = arith.constant 0.000000e+00 : f32
    %22 = vector.broadcast %cst_17 : f32 to vector<16x128xf32>
    %23 = arith.maximumf %21, %22 : vector<16x128xf32>
    %24 = arith.truncf %23 : vector<16x128xf32> to vector<16x128xbf16>
    %c0_18 = arith.constant 0 : index
    %c0_19 = arith.constant 0 : index
    %25 = vector.load %arg8[%c0_18, %c0_19] : memref<128x128xbf16, #tpu.memory_space<vmem>>, vector<128x128xbf16>
    %cst_20 = arith.constant dense<0.000000e+00> : vector<16x128xf32>
    %26 = tpu.matmul %24, %25, %cst_20 {dimension_numbers = #tpu.dot_dimension_numbers<[1], [0], [0], [1], [0, 0, 1, 1], [], []>} : vector<16x128xbf16>, vector<128x128xbf16>, vector<16x128xf32> -> vector<16x128xf32>
    %c0_21 = arith.constant 0 : index
    %c0_22 = arith.constant 0 : index
    %27 = vector.load %arg9[%c0_21, %c0_22] : memref<1x128xf32, #tpu.memory_space<vmem>>, vector<1x128xf32>
    %28 = vector.broadcast %27 : vector<1x128xf32> to vector<16x128xf32>
    %29 = arith.addf %26, %28 : vector<16x128xf32>
    %cst_23 = arith.constant 0.000000e+00 : f32
    %30 = vector.broadcast %cst_23 : f32 to vector<16x128xf32>
    %31 = arith.maximumf %29, %30 : vector<16x128xf32>
    %32 = arith.truncf %31 : vector<16x128xf32> to vector<16x128xbf16>
    %c0_24 = arith.constant 0 : index
    %c0_25 = arith.constant 0 : index
    %33 = vector.load %arg10[%c0_24, %c0_25] : memref<128x128xbf16, #tpu.memory_space<vmem>>, vector<128x128xbf16>
    %cst_26 = arith.constant dense<0.000000e+00> : vector<16x128xf32>
    %34 = tpu.matmul %32, %33, %cst_26 {dimension_numbers = #tpu.dot_dimension_numbers<[1], [0], [0], [1], [0, 0, 1, 1], [], []>} : vector<16x128xbf16>, vector<128x128xbf16>, vector<16x128xf32> -> vector<16x128xf32>
    %c0_27 = arith.constant 0 : index
    %c0_28 = arith.constant 0 : index
    %35 = vector.load %arg11[%c0_27, %c0_28] : memref<1x128xf32, #tpu.memory_space<vmem>>, vector<1x128xf32>
    %36 = vector.broadcast %35 : vector<1x128xf32> to vector<16x128xf32>
    %37 = arith.addf %34, %36 : vector<16x128xf32>
    %c0_29 = arith.constant 0 : index
    %c0_30 = arith.constant 0 : index
    %38 = vector.load %arg12[%c0_29, %c0_30] : memref<16x128xf32, #tpu.memory_space<vmem>>, vector<16x128xf32>
    tpu.vector_store %arg12[%c0_29, %c0_30], %37 {strides = array<i32>} : memref<16x128xf32, #tpu.memory_space<vmem>>, vector<16x128xf32>,
    return
  }
  func.func @transform_0(%arg0: i32) -> (i32, i32) {
    %c0_i32 = arith.constant 0 : i32
    %c0_i32_0 = arith.constant 0 : i32
    %c0_i32_1 = arith.constant 0 : i32
    return %c0_i32, %c0_i32_0 : i32, i32
  }
  func.func @transform_1(%arg0: i32) -> (i32, i32) {
    %c0_i32 = arith.constant 0 : i32
    %c0_i32_0 = arith.constant 0 : i32
    %c0_i32_1 = arith.constant 0 : i32
    return %c0_i32, %c0_i32_0 : i32, i32
  }
  func.func @transform_2(%arg0: i32) -> (i32, i32) {
    %c0_i32 = arith.constant 0 : i32
    %c0_i32_0 = arith.constant 0 : i32
    %c0_i32_1 = arith.constant 0 : i32
    return %c0_i32, %c0_i32_0 : i32, i32
  }
  func.func @transform_3(%arg0: i32) -> (i32, i32) {
    %c0_i32 = arith.constant 0 : i32
    %c0_i32_0 = arith.constant 0 : i32
    %c0_i32_1 = arith.constant 0 : i32
    return %c0_i32, %c0_i32_0 : i32, i32
  }
  func.func @transform_4(%arg0: i32) -> (i32, i32) {
    %c0_i32 = arith.constant 0 : i32
    %c0_i32_0 = arith.constant 0 : i32
    %c0_i32_1 = arith.constant 0 : i32
    return %c0_i32, %c0_i32_0 : i32, i32
  }
  func.func @transform_5(%arg0: i32) -> (i32, i32) {
    %c0_i32 = arith.constant 0 : i32
    %c0_i32_0 = arith.constant 0 : i32
    %c0_i32_1 = arith.constant 0 : i32
    return %c0_i32, %c0_i32_0 : i32, i32
  }
  func.func @transform_6(%arg0: i32) -> (i32, i32) {
    %c0_i32 = arith.constant 0 : i32
    %c0_i32_0 = arith.constant 0 : i32
    %c0_i32_1 = arith.constant 0 : i32
    return %c0_i32, %c0_i32_0 : i32, i32
  }
  func.func @transform_7(%arg0: i32) -> (i32, i32) {
    %c0_i32 = arith.constant 0 : i32
    %c0_i32_0 = arith.constant 0 : i32
    %c0_i32_1 = arith.constant 0 : i32
    return %c0_i32, %c0_i32_0 : i32, i32
  }
  func.func @transform_8(%arg0: i32) -> (i32, i32) {
    %c0_i32 = arith.constant 0 : i32
    %c0_i32_0 = arith.constant 0 : i32
    %c0_i32_1 = arith.constant 0 : i32
    return %c0_i32, %c0_i32_0 : i32, i32
  }
  func.func @transform_9(%arg0: i32) -> (i32, i32) {
    %c0_i32 = arith.constant 0 : i32
    %c0_i32_0 = arith.constant 0 : i32
    %c0_i32_1 = arith.constant 0 : i32
    return %c0_i32, %c0_i32_0 : i32, i32
  }
  func.func @transform_10(%arg0: i32) -> (i32, i32) {
    %c0_i32 = arith.constant 0 : i32
    %c0_i32_0 = arith.constant 0 : i32
    %c0_i32_1 = arith.constant 0 : i32
    return %c0_i32, %c0_i32_0 : i32, i32
  }
  func.func @transform_11(%arg0: i32) -> (i32, i32) {
    %c0_i32 = arith.constant 0 : i32
    %c0_i32_0 = arith.constant 0 : i32
    %c0_i32_1 = arith.constant 0 : i32
    return %c0_i32, %c0_i32_0 : i32, i32
  }
}

module attributes {stable_mosaic.version = 11 : i64} {
  func.func @_conv_bn_relu_kernel(%arg0: i32, %arg1: memref<16x2304xbf16, #tpu.memory_space<vmem>>, %arg2: memref<2304x256xbf16, #tpu.memory_space<vmem>>, %arg3: memref<1x256xf32, #tpu.memory_space<vmem>>, %arg4: memref<1x256xf32, #tpu.memory_space<vmem>>, %arg5: memref<1x256xf32, #tpu.memory_space<vmem>>, %arg6: memref<16x256xbf16, #tpu.memory_space<vmem>>) attributes {dimension_semantics = [#tpu.dimension_semantics<parallel>], iteration_bounds = array<i64: 1>, scalar_prefetch = 0 : i64, scratch_operands = 0 : i64, tpu.core_type = #tpu.core_type<tc>, window_params = [{transform_indices = @transform_0, window_bounds = array<i64: 16, 2304>}, {pipeline_mode = #tpu.pipeline_mode<synchronous>, transform_indices = @transform_1, window_bounds = array<i64: 2304, 256>}, {pipeline_mode = #tpu.pipeline_mode<synchronous>, transform_indices = @transform_2, window_bounds = array<i64: 1, 256>}, {pipeline_mode = #tpu.pipeline_mode<synchronous>, transform_indices = @transform_3, window_bounds = array<i64: 1, 256>}, {pipeline_mode = #tpu.pipeline_mode<synchronous>, transform_indices = @transform_4, window_bounds = array<i64: 1, 256>}, {transform_indices = @transform_5, window_bounds = array<i64: 16, 256>}]} {
    %c0 = arith.constant 0 : index
    %c0_0 = arith.constant 0 : index
    %0 = vector.load %arg1[%c0, %c0_0] : memref<16x2304xbf16, #tpu.memory_space<vmem>>, vector<16x2304xbf16>
    %c0_1 = arith.constant 0 : index
    %c0_2 = arith.constant 0 : index
    %1 = vector.load %arg2[%c0_1, %c0_2] : memref<2304x256xbf16, #tpu.memory_space<vmem>>, vector<2304x256xbf16>
    %cst = arith.constant dense<0.000000e+00> : vector<16x256xf32>
    %2 = tpu.matmul %0, %1, %cst {dimension_numbers = #tpu.dot_dimension_numbers<[1], [0], [0], [1], [0, 0, 1, 1], [], []>} : vector<16x2304xbf16>, vector<2304x256xbf16>, vector<16x256xf32> -> vector<16x256xf32>
    %c0_3 = arith.constant 0 : index
    %c0_4 = arith.constant 0 : index
    %3 = vector.load %arg3[%c0_3, %c0_4] : memref<1x256xf32, #tpu.memory_space<vmem>>, vector<1x256xf32>
    %4 = vector.broadcast %3 : vector<1x256xf32> to vector<16x256xf32>
    %5 = arith.addf %2, %4 : vector<16x256xf32>
    %cst_5 = arith.constant 0.000000e+00 : f32
    %6 = vector.broadcast %cst_5 : f32 to vector<16x256xf32>
    %7 = arith.maximumf %5, %6 : vector<16x256xf32>
    %c0_6 = arith.constant 0 : index
    %c0_7 = arith.constant 0 : index
    %8 = vector.load %arg4[%c0_6, %c0_7] : memref<1x256xf32, #tpu.memory_space<vmem>>, vector<1x256xf32>
    %9 = vector.broadcast %8 : vector<1x256xf32> to vector<16x256xf32>
    %10 = arith.mulf %7, %9 : vector<16x256xf32>
    %c0_8 = arith.constant 0 : index
    %c0_9 = arith.constant 0 : index
    %11 = vector.load %arg5[%c0_8, %c0_9] : memref<1x256xf32, #tpu.memory_space<vmem>>, vector<1x256xf32>
    %12 = vector.broadcast %11 : vector<1x256xf32> to vector<16x256xf32>
    %13 = arith.addf %10, %12 : vector<16x256xf32>
    %14 = arith.truncf %13 : vector<16x256xf32> to vector<16x256xbf16>
    %c0_10 = arith.constant 0 : index
    %c0_11 = arith.constant 0 : index
    %15 = vector.load %arg6[%c0_10, %c0_11] : memref<16x256xbf16, #tpu.memory_space<vmem>>, vector<16x256xbf16>
    tpu.vector_store %arg6[%c0_10, %c0_11], %14 {strides = array<i32>} : memref<16x256xbf16, #tpu.memory_space<vmem>>, vector<16x256xbf16>,
    return
  }
  func.func @transform_0(%arg0: i32) -> (i32, i32) {
    %c0_i32 = arith.constant 0 : i32
    %c0_i32_0 = arith.constant 0 : i32
    return %arg0, %c0_i32 : i32, i32
  }
  func.func @transform_1(%arg0: i32) -> (i32, i32) {
    %c0_i32 = arith.constant 0 : i32
    %c0_i32_0 = arith.constant 0 : i32
    %c0_i32_1 = arith.constant 0 : i32
    return %c0_i32, %c0_i32_0 : i32, i32
  }
  func.func @transform_2(%arg0: i32) -> (i32, i32) {
    %c0_i32 = arith.constant 0 : i32
    %c0_i32_0 = arith.constant 0 : i32
    %c0_i32_1 = arith.constant 0 : i32
    return %c0_i32, %c0_i32_0 : i32, i32
  }
  func.func @transform_3(%arg0: i32) -> (i32, i32) {
    %c0_i32 = arith.constant 0 : i32
    %c0_i32_0 = arith.constant 0 : i32
    %c0_i32_1 = arith.constant 0 : i32
    return %c0_i32, %c0_i32_0 : i32, i32
  }
  func.func @transform_4(%arg0: i32) -> (i32, i32) {
    %c0_i32 = arith.constant 0 : i32
    %c0_i32_0 = arith.constant 0 : i32
    %c0_i32_1 = arith.constant 0 : i32
    return %c0_i32, %c0_i32_0 : i32, i32
  }
  func.func @transform_5(%arg0: i32) -> (i32, i32) {
    %c0_i32 = arith.constant 0 : i32
    %c0_i32_0 = arith.constant 0 : i32
    return %arg0, %c0_i32 : i32, i32
  }
}

</mosaic_0001>

<bundles_post_ra>
// kernel: bennet_forward.13
= control target key start
LH: loop header
LB: loop body
LE: loop exit
PB: predicated region body
PF: predicated region fallthrough
CT: control target
= control target key end

     0   :  { %s4094_s18 = smov 0   ;;  %s5023_s0 = inlined_call_operand.vmem [shape: bf16[512,1152], index: 0, kind: input, shape index: {}]   ;;  %s5024_s1 = inlined_call_operand.vmem [shape: bf16[1152,128], index: 1, kind: input, shape index: {}]   ;;  %s5025_s2 = inlined_call_operand.vmem [shape: f32[1,128], index: 2, kind: input, shape index: {}]   ;;  %s5026_s3 = inlined_call_operand.vmem [shape: f32[1,128], index: 3, kind: input, shape index: {}]   ;;  %s5027_s4 = inlined_call_operand.vmem [shape: f32[1,128], index: 4, kind: input, shape index: {}]   ;;  %s5028_s5 = inlined_call_operand.vmem [shape: bf16[512,128], index: 5, kind: output, shape index: {}]  }
   0x1 LB: > { %s2842_s19 = sadd.s32 4294967295, %s4062_s18   ;;  %p2846_p0 = scmp.ge.s32.totalorder %s4062_s18, 1  ;;  %s4062_s18 = sphi %s4094_s18, %s15_s18  }
   0x2   : > { %p189_p1 = scmp.lt.s32.totalorder %s4062_s18, 3 }
   0x4   : > { %p190_p2 = pnand %p2846_p0, %p189_p1 }
   0x6   : > { %193 = sbr.rel (%p190_p2) target bundleno = 538 (0x21a), region = 40 }
   0xb   : > { %v3776_v0 = vld [vmem:[%s5024_s1 + $0x78] sm:$0xff]   ;;  %s2847_s22 = sshll.u32 %s2842_s19, 5  ;;  %v3778_v2 = vld [vmem:[%s5024_s1 + $0x70] sm:$0xff]   ;;  %v3780_v4 = vld [vmem:[%s5024_s1 + $0x68] sm:$0xff]  }
   0xc   : > { %v3777_v1 = vld [vmem:[%s5024_s1 + $0x38] sm:$0xff]   ;;  %3231 = vmatprep.subr.bf16.mxu0 %v3776_v0  ;;  %3751 = vmatprep.subr.bf16.mxu1 %v3776_v0  ;;  %p219_p3 = scmp.lt.s32.totalorder %s2847_s22, 63  ;;  %v3779_v3 = vld [vmem:[%s5024_s1 + $0x30] sm:$0xff]   ;;  %v3781_v5 = vld [vmem:[%s5024_s1 + $0x28] sm:$0xff]  }
   0xd   : > { %3232 = vmatpush3.bf16.msra.mxu0 %v3777_v1  ;;  %3759 = vmatpush3.bf16.msra.mxu1 %v3777_v1  ;;  %v3782_v6 = vld [vmem:[%s5024_s1 + $0x60] sm:$0xff]   ;;  %v3784_v8 = vld [vmem:[%s5024_s1 + $0x58] sm:$0xff]   ;;  %v3786_v10 = vld [vmem:[%s5024_s1 + $0x50] sm:$0xff]  }
   0xe   : > { %3233 = vmatprep.subr.bf16.mxu0 %v3778_v2  ;;  %3752 = vmatprep.subr.bf16.mxu1 %v3778_v2  ;;  %s5050_s22 = smov (!%p219_p3, %s2847_s22), 63  ;;  %v3783_v7 = vld [vmem:[%s5024_s1 + $0x20] sm:$0xff]   ;;  %v3785_v9 = vld [vmem:[%s5024_s1 + $0x18] sm:$0xff]   ;;  %v3787_v13 = vld [vmem:[%s5024_s1 + $0x10] sm:$0xff]  }
   0xf   : > { %s3767_s10 = smul.u32 36, %s5050_s22  ;;  %v3788_v14 = vld [vmem:[%s5024_s1 + $0x48] sm:$0xff]   ;;  %v3790_v16 = vld [vmem:[%s5024_s1 + $0x40] sm:$0xff]   ;;  %v3798_v18 = vld [vmem:[%s5024_s1 + $0xf8] sm:$0xff]   ;;  %s2850_s16 = sshll.u32 %s5050_s22, 2 }
  0x10   : > { %v3789_v15 = vld [vmem:[%s5024_s1 + $0x8] sm:$0xff]   ;;  %v3791_v17 = vld [vmem:[%s5024_s1] sm:$0xff]   ;;  %v3801_v21 = vld [vmem:[%s5024_s1 + $0x178] sm:$0xff]   ;;  %s4880_s20 = scalar_lea.vmem %s5028_s5, %s2850_s16 }
  0x11   : > { %3234 = vmatpush3.bf16.msra.mxu0 %v3779_v3  ;;  %3760 = vmatpush3.bf16.msra.mxu1 %v3779_v3  ;;  %s4135_s17 = scalar_lea.vmem %s5023_s0, %s3767_s10  ;;  %v3799_v22 = vld [vmem:[%s5024_s1 + $0xb8] sm:$0xff]   ;;  %v3800_v23 = vld [vmem:[%s5024_s1 + $0xf0] sm:$0xff]   ;;  %v3810_v31 = vld [vmem:[%s5024_s1 + $0xe8] sm:$0xff]  }
  0x12   : > { %3235 = vmatprep.subr.bf16.mxu0 %v3780_v4  ;;  %3753 = vmatprep.subr.bf16.mxu1 %v3780_v4  ;;  %v3794_v11 = vld [vmem:[%s4135_s17 + $0x4] ss:$36 sps:$4 sm:$0xff]   ;;  %v3803_v24 = vld [vmem:[%s5024_s1 + $0x138] sm:$0xff]   ;;  %v3804_v25 = vld [vmem:[%s4135_s17 + $0x4c] ss:$36 sps:$4 sm:$0xff]  }
  0x13   : > { %v3797_v12 = vld [vmem:[%s4135_s17 + $0x364] ss:$36 sps:$4 sm:$0xff]   ;;  %1743 = vmatprep.mubr.bf16.mxu0 %v3794_v11  ;;  %v3806_v26 = vld [vmem:[%s4135_s17 + $0x3ac] ss:$36 sps:$4 sm:$0xff]   ;;  %v3814_v35 = vld [vmem:[%s4135_s17 + $0x94] ss:$36 sps:$4 sm:$0xff]  }
  0x14   : > { %1839 = vmatprep.mubr.bf16.mxu1 %v3797_v12  ;;  %v3792_v19 = vld [vmem:[%s4135_s17] ss:$36 sps:$4 sm:$0xff]   ;;  %v3802_v27 = vld [vmem:[%s5024_s1 + $0xb0] sm:$0xff]   ;;  %v3808_v29 = vld [vmem:[%s4135_s17 + $0x48] ss:$36 sps:$4 sm:$0xff]  }
  0x15   : > { %3236 = vmatpush3.bf16.msra.mxu0 %v3781_v5  ;;  %3761 = vmatpush3.bf16.msra.mxu1 %v3781_v5  ;;  %v3795_v20 = vld [vmem:[%s4135_s17 + $0x360] ss:$36 sps:$4 sm:$0xff]   ;;  %v3821_v28 = vld [vmem:[%s5024_s1 + $0x170] sm:$0xff]   ;;  %v3809_v30 = vld [vmem:[%s4135_s17 + $0x3a8] ss:$36 sps:$4 sm:$0xff]  }
  0x16   : > { %3237 = vmatprep.subr.bf16.mxu0 %v3782_v6  ;;  %3754 = vmatprep.subr.bf16.mxu1 %v3782_v6  ;;  %v3811_v32 = vld [vmem:[%s5024_s1 + $0xa8] sm:$0xff]   ;;  %v3823_v33 = vld [vmem:[%s5024_s1 + $0x130] sm:$0xff]   ;;  %v3812_v34 = vld [vmem:[%s5024_s1 + $0xe0] sm:$0xff]  }
  0x17   : > { %v3816_v36 = vld [vmem:[%s4135_s17 + $0x3f4] ss:$36 sps:$4 sm:$0xff]   ;;  %v3813_v37 = vld [vmem:[%s5024_s1 + $0xa0] sm:$0xff]   ;;  %v3835_v43 = vld [vmem:[%s5024_s1 + $0x168] sm:$0xff]  }
  0x18   : > { %v3818_v38 = vld [vmem:[%s4135_s17 + $0x90] ss:$36 sps:$4 sm:$0xff]   ;;  %v3820_v40 = vld [vmem:[%s5024_s1 + $0xd8] sm:$0xff]   ;;  %v3837_v46 = vld [vmem:[%s5024_s1 + $0x128] sm:$0xff]  }
  0x19   : > { %3238 = vmatpush3.bf16.msra.mxu0 %v3783_v7  ;;  %3762 = vmatpush3.bf16.msra.mxu1 %v3783_v7  ;;  %v3819_v39 = vld [vmem:[%s4135_s17 + $0x3f0] ss:$36 sps:$4 sm:$0xff]   ;;  %v3822_v41 = vld [vmem:[%s5024_s1 + $0x98] sm:$0xff]   ;;  %v3832_v48 = vld [vmem:[%s5024_s1 + $0xc8] sm:$0xff]  }
  0x1a   : > { %3239 = vmatprep.subr.bf16.mxu0 %v3784_v8  ;;  %3755 = vmatprep.subr.bf16.mxu1 %v3784_v8  ;;  %v3824_v42 = vld [vmem:[%s5024_s1 + $0xd0] sm:$0xff]   ;;  %v3826_v44 = vld [vmem:[%s4135_s17 + $0xdc] ss:$36 sps:$4 sm:$0xff]   ;;  %v3833_v51 = vld [vmem:[%s5024_s1 + $0x88] sm:$0xff]  }
  0x1b   : > { %v3828_v45 = vld [vmem:[%s4135_s17 + $0x43c] ss:$36 sps:$4 sm:$0xff]   ;;  %v3825_v47 = vld [vmem:[%s5024_s1 + $0x90] sm:$0xff]   ;;  %v3838_v53 = vld [vmem:[%s4135_s17 + $0x124] ss:$36 sps:$4 sm:$0xff]  }
  0x1c   : > { %v3830_v49 = vld [vmem:[%s4135_s17 + $0xd8] ss:$36 sps:$4 sm:$0xff]   ;;  %v3834_v52 = vld [vmem:[%s5024_s1 + $0xc0] sm:$0xff]   ;;  %v3842_v54 = vld [vmem:[%s4135_s17 + $0xc] ss:$36 sps:$4 sm:$0xff]  }
  0x1d   : > { %3240 = vmatpush3.bf16.msra.mxu0 %v3785_v9  ;;  %3763 = vmatpush3.bf16.msra.mxu1 %v3785_v9  ;;  %v3831_v50 = vld [vmem:[%s4135_s17 + $0x438] ss:$36 sps:$4 sm:$0xff]   ;;  %v3852_v55 = vld [vmem:[%s5024_s1 + $0x160] sm:$0xff]   ;;  %v3840_v58 = vld [vmem:[%s4135_s17 + $0x8] ss:$36 sps:$4 sm:$0xff]  }
  0x1e   : > { %3241 = vmatprep.subr.bf16.mxu0 %v3786_v10  ;;  %3756 = vmatprep.subr.bf16.mxu1 %v3786_v10  ;;  %v3853_v56 = vld [vmem:[%s5024_s1 + $0x120] sm:$0xff]   ;;  %v3844_v60 = vld [vmem:[%s5024_s1 + $0x1f8] sm:$0xff]   ;;  %v3846_v62 = vld [vmem:[%s4135_s17 + $0x16c] ss:$36 sps:$4 sm:$0xff]  }
  0x1f   : > { %v3836_v57 = vld [vmem:[%s5024_s1 + $0x80] sm:$0xff]   ;;  %v3845_v61 = vld [vmem:[%s5024_s1 + $0x1b8] sm:$0xff]   ;;  %v3860_v1 = vld [vmem:[%s5024_s1 + $0x1f0] sm:$0xff]  }
  0x20   : > { %v3843_v59 = vld [vmem:[%s4135_s17 + $0x120] ss:$36 sps:$4 sm:$0xff]   ;;  %v3848_v63 = vld [vmem:[%s4135_s17 + $0x54] ss:$36 sps:$4 sm:$0xff]   ;;  %v3850_v4 = vld [vmem:[%s4135_s17 + $0x168] ss:$36 sps:$4 sm:$0xff]  }
  0x21   : > { %3242 = vmatpush3.bf16.msra.mxu0 %v3787_v13  ;;  %3764 = vmatpush3.bf16.msra.mxu1 %v3787_v13  ;;  %v3862_v0 = vld [vmem:[%s5024_s1 + $0x158] sm:$0xff]   ;;  %v3861_v3 = vld [vmem:[%s5024_s1 + $0x1b0] sm:$0xff]   ;;  %v3877_v9 = vld [vmem:[%s5024_s1 + $0x1e8] sm:$0xff]  }
  0x22   : > { %3243 = vmatprep.subr.bf16.mxu0 %v3788_v14  ;;  %3757 = vmatprep.subr.bf16.mxu1 %v3788_v14  ;;  %v3863_v2 = vld [vmem:[%s5024_s1 + $0x118] sm:$0xff]   ;;  %v3851_v5 = vld [vmem:[%s4135_s17 + $0x50] ss:$36 sps:$4 sm:$0xff]   ;;  %v3879_v11 = vld [vmem:[%s5024_s1 + $0x1a8] sm:$0xff]  }
  0x23   : > { %v3854_v6 = vld [vmem:[%s4135_s17 + $0x1b4] ss:$36 sps:$4 sm:$0xff]   ;;  %v3856_v7 = vld [vmem:[%s4135_s17 + $0x9c] ss:$36 sps:$4 sm:$0xff]  }
  0x24   : > { %v3876_v8 = vld [vmem:[%s5024_s1 + $0x150] sm:$0xff]   ;;  %v3859_v13 = vld [vmem:[%s4135_s17 + $0x98] ss:$36 sps:$4 sm:$0xff]  }
  0x25   : > { %3244 = vmatpush3.bf16.msra.mxu0 %v3789_v15  ;;  %3765 = vmatpush3.bf16.msra.mxu1 %v3789_v15  ;;  %v3878_v10 = vld [vmem:[%s5024_s1 + $0x110] sm:$0xff]   ;;  %v3864_v14 = vld [vmem:[%s4135_s17 + $0x1fc] ss:$36 sps:$4 sm:$0xff]   ;;  %v3886_v15 = vld [vmem:[%s5024_s1 + $0x148] sm:$0xff]  }
  0x26   : > { %3245 = vmatprep.subr.bf16.mxu0 %v3790_v16  ;;  %3758 = vmatprep.subr.bf16.mxu1 %v3790_v16  ;;  %v3858_v12 = vld [vmem:[%s4135_s17 + $0x1b0] ss:$36 sps:$4 sm:$0xff]   ;;  %v3887_v16 = vld [vmem:[%s5024_s1 + $0x108] sm:$0xff]  }
  0x29   : > { %3246 = vmatpush3.bf16.msra.mxu0 %v3791_v17  ;;  %3766 = vmatpush3.bf16.msra.mxu1 %v3791_v17  ;;  %v3866_v17 = vld [vmem:[%s4135_s17 + $0xe4] ss:$36 sps:$4 sm:$0xff]  }
  0x2a   : > { %3343 = vmatprep.subr.bf16.mxu1 %v3798_v18  ;;  %3455 = vmatprep.subr.bf16.mxu0 %v3801_v21  ;;  %v3894_v18 = vld [vmem:[%s5024_s1 + $0x1e0] sm:$0xff]  }
  0x2b   : > { %v3869_v21 = vld [vmem:[%s4135_s17 + $0xe0] ss:$36 sps:$4 sm:$0xff]  }
  0x2c   : > { %1744 = vmatmul.mubr.bf16.vlgmr.msra.gmra.mxu0 %v3792_v19  ;;  %1840 = vmatmul.mubr.bf16.vlgmr.msra.gmra.mxu1 %v3795_v20  ;;  %v3895_v19 = vld [vmem:[%s5024_s1 + $0x1a0] sm:$0xff]   ;;  %v3868_v20 = vld [vmem:[%s4135_s17 + $0x1f8] ss:$36 sps:$4 sm:$0xff]  }
  0x2d   : > { %3344 = vmatpush3.bf16.msra.mxu1 %v3799_v22  ;;  %3456 = vmatpush3.bf16.msra.mxu0 %v3803_v24  ;;  %v3870_v22 = vld [vmem:[%s4135_s17 + $0x244] ss:$36 sps:$4 sm:$0xff]  }
  0x2e   : > { %3345 = vmatprep.subr.bf16.mxu1 %v3800_v23  ;;  %1751 = vmatprep.mubr.bf16.mxu0 %v3804_v25  ;;  %v3872_v23 = vld [vmem:[%s4135_s17 + $0x12c] ss:$36 sps:$4 sm:$0xff]   ;;  %v3902_v24 = vld [vmem:[%s5024_s1 + $0x140] sm:$0xff]  }
  0x2f   : > { %1847 = vmatprep.mubr.bf16.mxu1 %v3806_v26  ;;  %3457 = vmatprep.subr.bf16.mxu0 %v3821_v28  ;;  %v3903_v25 = vld [vmem:[%s5024_s1 + $0x100] sm:$0xff]   ;;  %v3910_v26 = vld [vmem:[%s5024_s1 + $0x1d8] sm:$0xff]  }
  0x30   : > { %v3911_v28 = vld [vmem:[%s5024_s1 + $0x198] sm:$0xff]  }
  0x31   : > { %3346 = vmatpush3.bf16.msra.mxu1 %v3802_v27  ;;  %3458 = vmatpush3.bf16.msra.mxu0 %v3823_v33  ;;  %v3874_v27 = vld [vmem:[%s4135_s17 + $0x240] ss:$36 sps:$4 sm:$0xff]   ;;  %v3925_v33 = vld [vmem:[%s5024_s1 + $0x1d0] sm:$0xff]  }
  0x32   : > { %3347 = vmatprep.subr.bf16.mxu1 %v3810_v31  ;;  %3459 = vmatprep.subr.bf16.mxu0 %v3835_v43  ;;  %v3880_v31 = vld [vmem:[%s4135_s17 + $0x28c] ss:$36 sps:$4 sm:$0xff]   ;;  %v3896_v43 = vld [vmem:[%s4135_s17 + $0x31c] ss:$36 sps:$4 sm:$0xff]  }
  0x34   : > { %1752 = vmatmul.mubr.bf16.gmra.mxu0 %v3808_v29  ;;  %1848 = vmatmul.mubr.bf16.gmra.mxu1 %v3809_v30  ;;  %v3912_v29 = vld [vmem:[%s5024_s1 + $0x238] sm:$0xff]   ;;  %v3875_v30 = vld [vmem:[%s4135_s17 + $0x128] ss:$36 sps:$4 sm:$0xff]  }
  0x35   : > { %3348 = vmatpush3.bf16.msra.mxu1 %v3811_v32  ;;  %1759 = vmatprep.mubr.bf16.mxu0 %v3814_v35  ;;  %v3882_v32 = vld [vmem:[%s4135_s17 + $0x174] ss:$36 sps:$4 sm:$0xff]  }
  0x36   : > { %3349 = vmatprep.subr.bf16.mxu1 %v3812_v34  ;;  %1855 = vmatprep.mubr.bf16.mxu1 %v3816_v36  ;;  %v3884_v34 = vld [vmem:[%s4135_s17 + $0x288] ss:$36 sps:$4 sm:$0xff]   ;;  %v3926_v35 = vld [vmem:[%s5024_s1 + $0x190] sm:$0xff]  }
  0x37   : > { %3460 = vmatpush3.bf16.msra.mxu0 %v3837_v46  ;;  %v3885_v36 = vld [vmem:[%s4135_s17 + $0x170] ss:$36 sps:$4 sm:$0xff]   ;;  %v3901_v46 = vld [vmem:[%s4135_s17 + $0x200] ss:$36 sps:$4 sm:$0xff]  }
  0x38   : > { %3461 = vmatprep.subr.bf16.mxu0 %v3852_v55  ;;  %v3927_v55 = vld [vmem:[%s5024_s1 + $0x230] sm:$0xff]  }
  0x39   : > { %3350 = vmatpush3.bf16.msra.mxu1 %v3813_v37  ;;  %v3888_v37 = vld [vmem:[%s4135_s17 + $0x2d4] ss:$36 sps:$4 sm:$0xff]  }
  0x3a   : > { %3351 = vmatprep.subr.bf16.mxu1 %v3820_v40  ;;  %v3893_v40 = vld [vmem:[%s4135_s17 + $0x1b8] ss:$36 sps:$4 sm:$0xff]  }
  0x3b   : > { %3462 = vmatpush3.bf16.msra.mxu0 %v3853_v56  ;;  %v3942_v56 = vld [vmem:[%s5024_s1 + $0x228] sm:$0xff]  }
  0x3c   : > { %1760 = vmatmul.mubr.bf16.gmra.mxu0 %v3818_v38  ;;  %1856 = vmatmul.mubr.bf16.gmra.mxu1 %v3819_v39  ;;  %v3890_v38 = vld [vmem:[%s4135_s17 + $0x1bc] ss:$36 sps:$4 sm:$0xff]   ;;  %v3892_v39 = vld [vmem:[%s4135_s17 + $0x2d0] ss:$36 sps:$4 sm:$0xff]  }
  0x3d   : > { %3352 = vmatpush3.bf16.msra.mxu1 %v3822_v41  ;;  %1767 = vmatprep.mubr.bf16.mxu0 %v3826_v44  ;;  %v3940_v41 = vld [vmem:[%s5024_s1 + $0x1c8] sm:$0xff]  }
  0x3e   : > { %3353 = vmatprep.subr.bf16.mxu1 %v3824_v42  ;;  %1863 = vmatprep.mubr.bf16.mxu1 %v3828_v45  ;;  %v3941_v42 = vld [vmem:[%s5024_s1 + $0x188] sm:$0xff]   ;;  %v3900_v45 = vld [vmem:[%s4135_s17 + $0x318] ss:$36 sps:$4 sm:$0xff]  }
  0x3f   : > { %3463 = vmatprep.subr.bf16.mxu0 %v3862_v0  ;;  %v3898_v44 = vld [vmem:[%s4135_s17 + $0x204] ss:$36 sps:$4 sm:$0xff]  }
  0x40   : > { %3464 = vmatpush3.bf16.msra.mxu0 %v3863_v2  ;;  %v3924_v0 = vld [vmem:[%s4135_s17 + $0xa0] ss:$36 sps:$4 sm:$0xff]   ;;  %v3930_v2 = vld [vmem:[%s4135_s17 + $0xec] ss:$36 sps:$4 sm:$0xff]  }
  0x41   : > { %3354 = vmatpush3.bf16.msra.mxu1 %v3825_v47  ;;  %3465 = vmatprep.subr.bf16.mxu0 %v3876_v8  ;;  %v3955_v47 = vld [vmem:[%s5024_s1 + $0x1c0] sm:$0xff]   ;;  %v3936_v8 = vld [vmem:[%s4135_s17 + $0x134] ss:$36 sps:$4 sm:$0xff]  }
  0x42   : > { %3355 = vmatprep.subr.bf16.mxu1 %v3832_v48  ;;  %v3956_v48 = vld [vmem:[%s5024_s1 + $0x180] sm:$0xff]  }
  0x44   : > { %1768 = vmatmul.mubr.bf16.gmra.mxu0 %v3830_v49  ;;  %1864 = vmatmul.mubr.bf16.gmra.mxu1 %v3831_v50  ;;  %v3904_v49 = vld [vmem:[%s4135_s17 + $0x24c] ss:$36 sps:$4 sm:$0xff]   ;;  %v3908_v50 = vld [vmem:[%s4135_s17 + $0x14] ss:$36 sps:$4 sm:$0xff]  }
  0x45   : > { %3356 = vmatpush3.bf16.msra.mxu1 %v3833_v51  ;;  %1775 = vmatprep.mubr.bf16.mxu0 %v3838_v53  ;;  %v3906_v51 = vld [vmem:[%s4135_s17 + $0x10] ss:$36 sps:$4 sm:$0xff]  }
  0x46   : > { %3357 = vmatprep.subr.bf16.mxu1 %v3834_v52  ;;  %1904 = vmatprep.mubr.bf16.mxu1 %v3842_v54  ;;  %v3909_v52 = vld [vmem:[%s4135_s17 + $0x248] ss:$36 sps:$4 sm:$0xff]   ;;  %v3913_v53 = vld [vmem:[%s4135_s17 + $0x294] ss:$36 sps:$4 sm:$0xff]   ;;  %v3915_v54 = vld [vmem:[%s4135_s17 + $0x5c] ss:$36 sps:$4 sm:$0xff]  }
  0x47   : > { %3466 = vmatpush3.bf16.msra.mxu0 %v3878_v10  ;;  %v3938_v10 = vld [vmem:[%s4135_s17 + $0x368] ss:$36 sps:$4 sm:$0xff]  }
  0x48   : > { %3467 = vmatprep.subr.bf16.mxu0 %v3886_v15  ;;  %v3948_v15 = vld [vmem:[%s4135_s17 + $0x178] ss:$36 sps:$4 sm:$0xff]  }
  0x49   : > { %3358 = vmatpush3.bf16.msra.mxu1 %v3836_v57  ;;  %v3917_v57 = vld [vmem:[%s4135_s17 + $0x290] ss:$36 sps:$4 sm:$0xff]  }
  0x4a   : > { %3567 = vmatprep.subr.bf16.mxu1 %v3844_v60  ;;  %v3921_v60 = vld [vmem:[%s4135_s17 + $0xa4] ss:$36 sps:$4 sm:$0xff]  }
  0x4b   : > { %3468 = vmatpush3.bf16.msra.mxu0 %v3887_v16  ;;  %v3949_v16 = vld [vmem:[%s4135_s17 + $0x3fc] ss:$36 sps:$4 sm:$0xff]  }
  0x4c   : > { %1776 = vmatmul.mubr.bf16.gmra.mxu0 %v3843_v59  ;;  %1905 = vmatmul.mubr.bf16.vlgmr.msra.gmra.mxu1 %v3840_v58  ;;  %v3918_v58 = vld [vmem:[%s4135_s17 + $0x58] ss:$36 sps:$4 sm:$0xff]  }
  0x4d   : > { %3568 = vmatpush3.bf16.msra.mxu1 %v3845_v61  ;;  %1783 = vmatprep.mubr.bf16.mxu0 %v3846_v62  ;;  %v3919_v59 = vld [vmem:[%s4135_s17 + $0x2dc] ss:$36 sps:$4 sm:$0xff]  }
  0x4e   : > { %1912 = vmatprep.mubr.bf16.mxu1 %v3848_v63  ;;  %3569 = vmatprep.subr.bf16.mxu1 %v3860_v1  ;;  %v3957_v61 = vld [vmem:[%s5024_s1 + $0x220] sm:$0xff]   ;;  %v3923_v62 = vld [vmem:[%s4135_s17 + $0x2d8] ss:$36 sps:$4 sm:$0xff]  }
  0x4f   : > { %3469 = vmatprep.subr.bf16.mxu0 %v3902_v24  ;;  %v3970_v63 = vld [vmem:[%s5024_s1 + $0x218] sm:$0xff]   ;;  %v3928_v1 = vld [vmem:[%s4135_s17 + $0x324] ss:$36 sps:$4 sm:$0xff]  }
  0x50   : > { %3470 = vmatpush3.bf16.msra.mxu0 %v3903_v25  ;;  %v3964_v24 = vld [vmem:[%s4135_s17 + $0x254] ss:$36 sps:$4 sm:$0xff]   ;;  %v3968_v25 = vld [vmem:[%s4135_s17 + $0x1c] ss:$36 sps:$4 sm:$0xff]  }
  0x51   : > { %3570 = vmatpush3.bf16.msra.mxu1 %v3861_v3  ;;  %3703 = vmatprep.subr.bf16.mxu0 %v3912_v29  ;;  %v3983_v3 = vld [vmem:[%s5024_s1 + $0x210] sm:$0xff]  }
  0x52   : > { %3571 = vmatprep.subr.bf16.mxu1 %v3877_v9  ;;  %v4009_v9 = vld [vmem:[%s5024_s1 + $0x200] sm:$0xff]  }
  0x54   : > { %1784 = vmatmul.mubr.bf16.gmra.mxu0 %v3850_v4  ;;  %1913 = vmatmul.mubr.bf16.gmra.mxu1 %v3851_v5  ;;  %v3932_v4 = vld [vmem:[%s4135_s17 + $0x320] ss:$36 sps:$4 sm:$0xff]   ;;  %v3996_v5 = vld [vmem:[%s5024_s1 + $0x208] sm:$0xff]  }
  0x55   : > { %1791 = vmatprep.mubr.bf16.mxu0 %v3854_v6  ;;  %1920 = vmatprep.mubr.bf16.mxu1 %v3856_v7  ;;  %v3933_v6 = vld [vmem:[%s4135_s17 + $0xe8] ss:$36 sps:$4 sm:$0xff]  }
  0x56   : > { %3572 = vmatpush3.bf16.msra.mxu1 %v3879_v11  ;;  %v3934_v7 = vld [vmem:[%s4135_s17 + $0x36c] ss:$36 sps:$4 sm:$0xff]  }
  0x57   : > { %3573 = vmatprep.subr.bf16.mxu1 %v3894_v18  ;;  %v3939_v11 = vld [vmem:[%s4135_s17 + $0x130] ss:$36 sps:$4 sm:$0xff]   ;;  %v3953_v18 = vld [vmem:[%s4135_s17 + $0x3f8] ss:$36 sps:$4 sm:$0xff]  }
  0x5a   : > { %3574 = vmatpush3.bf16.msra.mxu1 %v3895_v19  ;;  %v3954_v19 = vld [vmem:[%s4135_s17 + $0x1c0] ss:$36 sps:$4 sm:$0xff]  }
  0x5b   : > { %3575 = vmatprep.subr.bf16.mxu1 %v3910_v26  ;;  %v3966_v26 = vld [vmem:[%s4135_s17 + $0x18] ss:$36 sps:$4 sm:$0xff]  }
  0x5c   : > { %1792 = vmatmul.mubr.bf16.gmra.mxu0 %v3858_v12  ;;  %1921 = vmatmul.mubr.bf16.gmra.mxu1 %v3859_v13  ;;  %v3943_v12 = vld [vmem:[%s4135_s17 + $0x3b4] ss:$36 sps:$4 sm:$0xff]   ;;  %v3945_v13 = vld [vmem:[%s4135_s17 + $0x17c] ss:$36 sps:$4 sm:$0xff]  }
  0x5d   : > { %1799 = vmatprep.mubr.bf16.mxu0 %v3864_v14  ;;  %1928 = vmatprep.mubr.bf16.mxu1 %v3866_v17  ;;  %v3947_v14 = vld [vmem:[%s4135_s17 + $0x3b0] ss:$36 sps:$4 sm:$0xff]   ;;  %v3951_v17 = vld [vmem:[%s4135_s17 + $0x1c4] ss:$36 sps:$4 sm:$0xff]  }
  0x5e   : > { %3576 = vmatpush3.bf16.msra.mxu1 %v3911_v28  ;;  %v3971_v28 = vld [vmem:[%s4135_s17 + $0x29c] ss:$36 sps:$4 sm:$0xff]  }
  0x5f   : > { %3577 = vmatprep.subr.bf16.mxu1 %v3925_v33  ;;  %v3979_v33 = vld [vmem:[%s4135_s17 + $0xac] ss:$36 sps:$4 sm:$0xff]  }
  0x62   : > { %3578 = vmatpush3.bf16.msra.mxu1 %v3926_v35  ;;  %v3982_v35 = vld [vmem:[%s4135_s17 + $0xa8] ss:$36 sps:$4 sm:$0xff]  }
  0x63   : > { %3579 = vmatprep.subr.bf16.mxu1 %v3940_v41  ;;  %v3992_v41 = vld [vmem:[%s4135_s17 + $0x13c] ss:$36 sps:$4 sm:$0xff]  }
  0x64   : > { %1800 = vmatmul.mubr.bf16.gmra.mxu0 %v3868_v20  ;;  %1929 = vmatmul.mubr.bf16.gmra.mxu1 %v3869_v21  ;;  %v3958_v20 = vld [vmem:[%s4135_s17 + $0x444] ss:$36 sps:$4 sm:$0xff]   ;;  %v3960_v21 = vld [vmem:[%s4135_s17 + $0x20c] ss:$36 sps:$4 sm:$0xff]  }
  0x65   : > { %1807 = vmatprep.mubr.bf16.mxu0 %v3870_v22  ;;  %1936 = vmatprep.mubr.bf16.mxu1 %v3872_v23  ;;  %v3962_v22 = vld [vmem:[%s4135_s17 + $0x440] ss:$36 sps:$4 sm:$0xff]   ;;  %v3963_v23 = vld [vmem:[%s4135_s17 + $0x208] ss:$36 sps:$4 sm:$0xff]  }
  0x66   : > { %3580 = vmatpush3.bf16.msra.mxu1 %v3941_v42  ;;  %v3994_v42 = vld [vmem:[%s4135_s17 + $0x370] ss:$36 sps:$4 sm:$0xff]  }
  0x67   : > { %3581 = vmatprep.subr.bf16.mxu1 %v3955_v47 }
  0x6a   : > { %3582 = vmatpush3.bf16.msra.mxu1 %v3956_v48 }
  0x6c   : > { %1808 = vmatmul.mubr.bf16.gmra.mxu0 %v3874_v27  ;;  %1937 = vmatmul.mubr.bf16.gmra.mxu1 %v3875_v30  ;;  %v3969_v27 = vld [vmem:[%s4135_s17 + $0x250] ss:$36 sps:$4 sm:$0xff]   ;;  %v3975_v30 = vld [vmem:[%s4135_s17 + $0x298] ss:$36 sps:$4 sm:$0xff]  }
  0x6d   : > { %1815 = vmatprep.mubr.bf16.mxu0 %v3880_v31  ;;  %1944 = vmatprep.mubr.bf16.mxu1 %v3882_v32  ;;  %v3976_v31 = vld [vmem:[%s4135_s17 + $0x60] ss:$36 sps:$4 sm:$0xff]  }
  0x6e   : > { %v3977_v32 = vld [vmem:[%s4135_s17 + $0x2e4] ss:$36 sps:$4 sm:$0xff]  }
  0x74   : > { %1816 = vmatmul.mubr.bf16.gmra.mxu0 %v3884_v34  ;;  %1945 = vmatmul.mubr.bf16.gmra.mxu1 %v3885_v36  ;;  %v3981_v34 = vld [vmem:[%s4135_s17 + $0x2e0] ss:$36 sps:$4 sm:$0xff]   ;;  %v3984_v36 = vld [vmem:[%s4135_s17 + $0x32c] ss:$36 sps:$4 sm:$0xff]  }
  0x75   : > { %1823 = vmatprep.mubr.bf16.mxu0 %v3888_v37  ;;  %1952 = vmatprep.mubr.bf16.mxu1 %v3890_v38  ;;  %v3986_v37 = vld [vmem:[%s4135_s17 + $0xf4] ss:$36 sps:$4 sm:$0xff]   ;;  %v3988_v38 = vld [vmem:[%s4135_s17 + $0x328] ss:$36 sps:$4 sm:$0xff]  }
  0x7c   : > { %1824 = vmatmul.mubr.bf16.gmra.mxu0 %v3892_v39  ;;  %1953 = vmatmul.mubr.bf16.gmra.mxu1 %v3893_v40  ;;  %v3989_v39 = vld [vmem:[%s4135_s17 + $0xf0] ss:$36 sps:$4 sm:$0xff]  }
  0x7d   : > { %1831 = vmatprep.mubr.bf16.mxu0 %v3896_v43  ;;  %1960 = vmatprep.mubr.bf16.mxu1 %v3898_v44  ;;  %v3990_v40 = vld [vmem:[%s4135_s17 + $0x374] ss:$36 sps:$4 sm:$0xff]   ;;  %v3997_v44 = vld [vmem:[%s4135_s17 + $0x3bc] ss:$36 sps:$4 sm:$0xff]  }
  0x7e   : > { %v3995_v43 = vld [vmem:[%s4135_s17 + $0x138] ss:$36 sps:$4 sm:$0xff]  }
  0x84   : > { %1832 = vmatmul.mubr.bf16.gmra.mxu0 %v3900_v45  ;;  %1961 = vmatmul.mubr.bf16.gmra.mxu1 %v3901_v46  ;;  %v3999_v45 = vld [vmem:[%s4135_s17 + $0x184] ss:$36 sps:$4 sm:$0xff]  }
  0x85   : > { %1968 = vmatprep.mubr.bf16.mxu1 %v3904_v49  ;;  %2065 = vmatprep.mubr.bf16.mxu0 %v3908_v50 }
  0x8c   : > { %1969 = vmatmul.mubr.bf16.gmra.mxu1 %v3909_v52  ;;  %2066 = vmatmul.mubr.bf16.vlgmr.msra.gmra.mxu0 %v3906_v51 }
  0x8d   : > { %3704 = vmatpush3.bf16.msra.mxu0 %v3912_v29  ;;  %1976 = vmatprep.mubr.bf16.mxu1 %v3913_v53  ;;  %v3973_v29 = vld [vmem:[%s4135_s17 + $0x64] ss:$36 sps:$4 sm:$0xff]  }
  0x8e   : > { %2073 = vmatprep.mubr.bf16.mxu0 %v3915_v54  ;;  %3705 = vmatprep.subr.bf16.mxu0 %v3927_v55  ;;  %v4001_v54 = vld [vmem:[%s4135_s17 + $0x3b8] ss:$36 sps:$4 sm:$0xff]  }
  0x91   : > { %3706 = vmatpush3.bf16.msra.mxu0 %v3927_v55  ;;  %v4002_v55 = vld [vmem:[%s4135_s17 + $0x180] ss:$36 sps:$4 sm:$0xff]  }
  0x92   : > { %3707 = vmatprep.subr.bf16.mxu0 %v3942_v56 }
  0x94   : > { %1977 = vmatmul.mubr.bf16.gmra.mxu1 %v3917_v57  ;;  %2074 = vmatmul.mubr.bf16.gmra.mxu0 %v3918_v58  ;;  %v4005_v57 = vld [vmem:[%s4135_s17 + $0x1cc] ss:$36 sps:$4 sm:$0xff]  }
  0x95   : > { %1984 = vmatprep.mubr.bf16.mxu1 %v3919_v59  ;;  %2081 = vmatprep.mubr.bf16.mxu0 %v3921_v60 }
  0x96   : > { %3708 = vmatpush3.bf16.msra.mxu0 %v3942_v56  ;;  %v4003_v56 = vld [vmem:[%s4135_s17 + $0x404] ss:$36 sps:$4 sm:$0xff]  }
  0x97   : > { %3709 = vmatprep.subr.bf16.mxu0 %v3957_v61 }
  0x9a   : > { %3710 = vmatpush3.bf16.msra.mxu0 %v3957_v61 }
  0x9b   : > { %3711 = vmatprep.subr.bf16.mxu0 %v3970_v63 }
  0x9c   : > { %1985 = vmatmul.mubr.bf16.gmra.mxu1 %v3923_v62  ;;  %2082 = vmatmul.mubr.bf16.gmra.mxu0 %v3924_v0 }
  0x9d   : > { %1992 = vmatprep.mubr.bf16.mxu1 %v3928_v1  ;;  %2089 = vmatprep.mubr.bf16.mxu0 %v3930_v2 }
  0x9e   : > { %3712 = vmatpush3.bf16.msra.mxu0 %v3970_v63 }
  0x9f   : > { %3713 = vmatprep.subr.bf16.mxu0 %v3983_v3 }
  0xa2   : > { %3714 = vmatpush3.bf16.msra.mxu0 %v3983_v3 }
  0xa3   : > { %3715 = vmatprep.subr.bf16.mxu0 %v3996_v5 }
  0xa4   : > { %1993 = vmatmul.mubr.bf16.gmra.mxu1 %v3932_v4  ;;  %2090 = vmatmul.mubr.bf16.gmra.mxu0 %v3933_v6  ;;  %v4007_v6 = vld [vmem:[%s4135_s17 + $0x400] ss:$36 sps:$4 sm:$0xff]  }
  0xa5   : > { %2000 = vmatprep.mubr.bf16.mxu1 %v3934_v7  ;;  %2097 = vmatprep.mubr.bf16.mxu0 %v3936_v8  ;;  %v4008_v7 = vld [vmem:[%s4135_s17 + $0x1c8] ss:$36 sps:$4 sm:$0xff]  }
  0xa6   : > { %3716 = vmatpush3.bf16.msra.mxu0 %v3996_v5  ;;  %v4010_v8 = vld [vmem:[%s4135_s17 + $0x44c] ss:$36 sps:$4 sm:$0xff]  }
  0xa7   : > { %3717 = vmatprep.subr.bf16.mxu0 %v4009_v9 }
  0xaa   : > { %3718 = vmatpush3.bf16.msra.mxu0 %v4009_v9  ;;  %v4012_v9 = vld [vmem:[%s4135_s17 + $0x214] ss:$36 sps:$4 sm:$0xff]  }
  0xac   : > { %2001 = vmatmul.mubr.bf16.gmra.mxu1 %v3938_v10  ;;  %2098 = vmatmul.mubr.bf16.gmra.mxu0 %v3939_v11 }
  0xad   : > { %2008 = vmatprep.mubr.bf16.mxu1 %v3943_v12  ;;  %2105 = vmatprep.mubr.bf16.mxu0 %v3945_v13 }
  0xb4   : > { %2009 = vmatmul.mubr.bf16.gmra.mxu1 %v3947_v14  ;;  %2106 = vmatmul.mubr.bf16.gmra.mxu0 %v3948_v15 }
  0xb5   : > { %2016 = vmatprep.mubr.bf16.mxu1 %v3949_v16  ;;  %2113 = vmatprep.mubr.bf16.mxu0 %v3951_v17 }
  0xbc   : > { %2017 = vmatmul.mubr.bf16.gmra.mxu1 %v3953_v18  ;;  %2114 = vmatmul.mubr.bf16.gmra.mxu0 %v3954_v19 }
  0xbd   : > { %2024 = vmatprep.mubr.bf16.mxu1 %v3958_v20  ;;  %2121 = vmatprep.mubr.bf16.mxu0 %v3960_v21 }
  0xc4   : > { %2025 = vmatmul.mubr.bf16.gmra.mxu1 %v3962_v22  ;;  %2122 = vmatmul.mubr.bf16.gmra.mxu0 %v3963_v23  ;;  %v4014_v22 = vld [vmem:[%s4135_s17 + $0x448] ss:$36 sps:$4 sm:$0xff]   ;;  %v4015_v23 = vld [vmem:[%s4135_s17 + $0x210] ss:$36 sps:$4 sm:$0xff]  }
  0xc5   : > { %2129 = vmatprep.mubr.bf16.mxu0 %v3964_v24  ;;  %2226 = vmatprep.mubr.bf16.mxu1 %v3968_v25  ;;  %v4018_v24 = vld [vmem:[%s4135_s17 + $0x25c] ss:$36 sps:$4 sm:$0xff]  }
  0xc6   : > { %v4019_v25 = vld [vmem:[%s4135_s17 + $0x20] ss:$36 sps:$4 sm:$0xff]  }
  0xcc   : > { %2130 = vmatmul.mubr.bf16.gmra.mxu0 %v3969_v27  ;;  %2227 = vmatmul.mubr.bf16.vlgmr.msra.gmra.mxu1 %v3966_v26 }
  0xcd   : > { %2137 = vmatprep.mubr.bf16.mxu0 %v3971_v28  ;;  %2234 = vmatprep.mubr.bf16.mxu1 %v3973_v29 }
  0xd4   : > { %2138 = vmatmul.mubr.bf16.gmra.mxu0 %v3975_v30  ;;  %2235 = vmatmul.mubr.bf16.gmra.mxu1 %v3976_v31 }
  0xd5   : > { %2145 = vmatprep.mubr.bf16.mxu0 %v3977_v32  ;;  %2242 = vmatprep.mubr.bf16.mxu1 %v3979_v33 }
  0xdc   : > { %2146 = vmatmul.mubr.bf16.gmra.mxu0 %v3981_v34  ;;  %2243 = vmatmul.mubr.bf16.gmra.mxu1 %v3982_v35 }
  0xdd   : > { %2153 = vmatprep.mubr.bf16.mxu0 %v3984_v36  ;;  %2250 = vmatprep.mubr.bf16.mxu1 %v3986_v37 }
  0xe4   : > { %2154 = vmatmul.mubr.bf16.gmra.mxu0 %v3988_v38  ;;  %2251 = vmatmul.mubr.bf16.gmra.mxu1 %v3989_v39  ;;  %v4016_v38 = vld [vmem:[%s4135_s17 + $0x258] ss:$36 sps:$4 sm:$0xff]   ;;  %v4020_v39 = vld [vmem:[%s4135_s17 + $0x68] ss:$36 sps:$4 sm:$0xff]  }
  0xe5   : > { %2161 = vmatprep.mubr.bf16.mxu0 %v3990_v40  ;;  %2258 = vmatprep.mubr.bf16.mxu1 %v3992_v41  ;;  %v4023_v40 = vld [vmem:[%s4135_s17 + $0x2a4] ss:$36 sps:$4 sm:$0xff]   ;;  %v4024_v41 = vld [vmem:[%s4135_s17 + $0xb0] ss:$36 sps:$4 sm:$0xff]  }
  0xec   : > { %v3247_v46 = vpop.f32.mrf.mxu0  ;;  %v3319_v47 = vpop.f32.mrf.mxu1  ;;  %2162 = vmatmul.mubr.bf16.gmra.mxu0 %v3994_v42  ;;  %2259 = vmatmul.mubr.bf16.gmra.mxu1 %v3995_v43 }
  0xed   : > { %2169 = vmatprep.mubr.bf16.mxu0 %v3997_v44  ;;  %2266 = vmatprep.mubr.bf16.mxu1 %v3999_v45 }
  0xee   : > { %v3248_v48 = vpop.f32.mrf.mxu0  ;;  %v3320_v49 = vpop.f32.mrf.mxu1 }
  0xef   : > { %v4428_v50 = vadd.f32 %v3248_v48, %v3247_v46  ;;  %v4430_v51 = vadd.f32 %v3320_v49, %v3319_v47  ;;  %v4479_v48 = vld [vmem:[%s5025_s2] ss:$0 sm:$0xff] }
  0xf0   : > { %v3250_v52 = vpop.f32.mrf.mxu0  ;;  %v3322_v53 = vpop.f32.mrf.mxu1 }
  0xf2   : > { %v3251_v58 = vpop.f32.mrf.mxu0  ;;  %v3323_v59 = vpop.f32.mrf.mxu1 }
  0xf3   : > { %v4436_v60 = vadd.f32 %v3251_v58, %v3250_v52  ;;  %v4438_v61 = vadd.f32 %v3323_v59, %v3322_v53  ;;  %v1746_v53 = vadd.f32 %v4428_v50, %v4479_v48  ;;  %v4021_v58 = vld [vmem:[%s4135_s17 + $0x2a0] ss:$36 sps:$4 sm:$0xff]   ;;  %v4025_v59 = vld [vmem:[%s4135_s17 + $0xf8] ss:$36 sps:$4 sm:$0xff]  }
  0xf4   : > { %v3253_v62 = vpop.f32.mrf.mxu0  ;;  %v3325_v63 = vpop.f32.mrf.mxu1  ;;  %2170 = vmatmul.mubr.bf16.gmra.mxu0 %v4001_v54  ;;  %2267 = vmatmul.mubr.bf16.gmra.mxu1 %v4002_v55 }
  0xf5   : > { %2177 = vmatprep.mubr.bf16.mxu0 %v4003_v56  ;;  %2274 = vmatprep.mubr.bf16.mxu1 %v4005_v57 }
  0xf6   : > { %v3254_v0 = vpop.f32.mrf.mxu0  ;;  %v3326_v1 = vpop.f32.mrf.mxu1 }
  0xf7   : > { %v4440_v2 = vadd.f32 %v3254_v0, %v3253_v62  ;;  %v4442_v3 = vadd.f32 %v3326_v1, %v3325_v63  ;;  %v4028_v63 = vld [vmem:[%s4135_s17 + $0x2ec] ss:$36 sps:$4 sm:$0xff]   ;;  %v4029_v0 = vld [vmem:[%s4135_s17 + $0x140] ss:$36 sps:$4 sm:$0xff]  }
  0xf8   : > { %v3256_v4 = vpop.f32.mrf.mxu0  ;;  %v3328_v5 = vpop.f32.mrf.mxu1 }
  0xfa   : > { %v3257_v10 = vpop.f32.mrf.mxu0  ;;  %v3329_v11 = vpop.f32.mrf.mxu1 }
  0xfb   : > { %v4448_v12 = vadd.f32 %v3257_v10, %v3256_v4  ;;  %v4450_v13 = vadd.f32 %v3329_v11, %v3328_v5  ;;  %v1749_v5 = vadd.f32 %v4436_v60, %v4479_v48  ;;  %v1754_v60 = vadd.f32 %v4440_v2, %v4479_v48 }
  0xfc   : > { %v3259_v14 = vpop.f32.mrf.mxu0  ;;  %v3331_v15 = vpop.f32.mrf.mxu1  ;;  %2178 = vmatmul.mubr.bf16.gmra.mxu0 %v4007_v6  ;;  %2275 = vmatmul.mubr.bf16.gmra.mxu1 %v4008_v7 }
  0xfd   : > { %2185 = vmatprep.mubr.bf16.mxu0 %v4010_v8  ;;  %2282 = vmatprep.mubr.bf16.mxu1 %v4012_v9 }
  0xfe   : > { %v3260_v16 = vpop.f32.mrf.mxu0  ;;  %v3332_v17 = vpop.f32.mrf.mxu1 }
  0xff   : > { %v4452_v18 = vadd.f32 %v3260_v16, %v3259_v14  ;;  %v4454_v19 = vadd.f32 %v3332_v17, %v3331_v15 }
 0x100   : > { %v3262_v20 = vpop.f32.mrf.mxu0  ;;  %v3334_v21 = vpop.f32.mrf.mxu1 }
 0x102   : > { %v3263_v26 = vpop.f32.mrf.mxu0  ;;  %v3335_v27 = vpop.f32.mrf.mxu1 }
 0x103   : > { %v4460_v28 = vadd.f32 %v3263_v26, %v3262_v20  ;;  %v4462_v29 = vadd.f32 %v3335_v27, %v3334_v21  ;;  %v4026_v20 = vld [vmem:[%s4135_s17 + $0x2e8] ss:$36 sps:$4 sm:$0xff]   ;;  %v1757_v27 = vadd.f32 %v4448_v12, %v4479_v48  ;;  %v1762_v12 = vadd.f32 %v4452_v18, %v4479_v48 }
 0x104   : > { %v3265_v30 = vpop.f32.mrf.mxu0  ;;  %v3337_v31 = vpop.f32.mrf.mxu1  ;;  %2186 = vmatmul.mubr.bf16.gmra.mxu0 %v4014_v22  ;;  %2283 = vmatmul.mubr.bf16.gmra.mxu1 %v4015_v23  ;;  %v4030_v21 = vld [vmem:[%s4135_s17 + $0x188] ss:$36 sps:$4 sm:$0xff]   ;;  %v4033_v23 = vld [vmem:[%s4135_s17 + $0x334] ss:$36 sps:$4 sm:$0xff]  }
 0x105   : > { %2290 = vmatprep.mubr.bf16.mxu1 %v4018_v24  ;;  %3719 = vmatprep.mubr.bf16.mxu0 %v4019_v25  ;;  %v4034_v24 = vld [vmem:[%s4135_s17 + $0x1d0] ss:$36 sps:$4 sm:$0xff]  }
 0x106   : > { %v3266_v32 = vpop.f32.mrf.mxu0  ;;  %v3338_v33 = vpop.f32.mrf.mxu1 }
 0x107   : > { %v4464_v34 = vadd.f32 %v3266_v32, %v3265_v30  ;;  %v4466_v35 = vadd.f32 %v3338_v33, %v3337_v31 }
 0x108   : > { %v3268_v36 = vpop.f32.mrf.mxu0  ;;  %v3340_v37 = vpop.f32.mrf.mxu1 }
 0x10a   : > { %v3269_v42 = vpop.f32.mrf.mxu0  ;;  %v3341_v43 = vpop.f32.mrf.mxu1 }
 0x10b   : > { %v4472_v44 = vadd.f32 %v3269_v42, %v3268_v36  ;;  %v4474_v45 = vadd.f32 %v3341_v43, %v3340_v37  ;;  %v4031_v42 = vld [vmem:[%s4135_s17 + $0x330] ss:$36 sps:$4 sm:$0xff]   ;;  %v4035_v43 = vld [vmem:[%s4135_s17 + $0x218] ss:$36 sps:$4 sm:$0xff]  }
 0x10c   : > { %v3271_v46 = vpop.f32.mrf.mxu0  ;;  %v3359_v47 = vpop.f32.mrf.mxu1  ;;  %2291 = vmatmul.mubr.bf16.gmra.mxu1 %v4016_v38  ;;  %3720 = vmatmul.mubr.bf16.vlgmr.msra.gmra.mxu0 %v4020_v39 }
 0x10d   : > { %2298 = vmatprep.mubr.bf16.mxu1 %v4023_v40  ;;  %3723 = vmatprep.mubr.bf16.mxu0 %v4024_v41 }
 0x10e   : > { %v3272_v49 = vpop.f32.mrf.mxu0  ;;  %v3360_v52 = vpop.f32.mrf.mxu1 }
 0x10f   : > { %v4483_v54 = vadd.f32 %v3272_v49, %v3271_v46  ;;  %v3361_v55 = vadd.f32 %v3360_v52, %v3359_v47  ;;  %v4038_v47 = vld [vmem:[%s4135_s17 + $0x37c] ss:$36 sps:$4 sm:$0xff]  }
 0x110   : > { %v3274_v56 = vpop.f32.mrf.mxu0  ;;  %v3362_v57 = vpop.f32.mrf.mxu1  ;;  %v4039_v49 = vld [vmem:[%s4135_s17 + $0x260] ss:$36 sps:$4 sm:$0xff]  }
 0x111   : > { %v4487_v62 = vadd.f32 %v3361_v55, %v1746_v53  ;;  %v1765_v55 = vadd.f32 %v4460_v28, %v4479_v48  ;;  %v1770_v28 = vadd.f32 %v4464_v34, %v4479_v48 }
 0x112   : > { %v3275_v1 = vpop.f32.mrf.mxu0  ;;  %v3363_v4 = vpop.f32.mrf.mxu1 }
 0x113   : > { %v4493_v6 = vadd.f32 %v3275_v1, %v3274_v56  ;;  %v3364_v50 = vadd.f32 %v3363_v4, %v3362_v57 }
 0x114   : > { %v3277_v7 = vpop.f32.mrf.mxu0  ;;  %v3365_v8 = vpop.f32.mrf.mxu1  ;;  %2299 = vmatmul.mubr.bf16.gmra.mxu1 %v4021_v58  ;;  %3724 = vmatmul.mubr.bf16.gmra.mxu0 %v4025_v59 }
 0x115   : > { %v4495_v9 = vadd.f32 %v3364_v50, %v1749_v5  ;;  %2306 = vmatprep.mubr.bf16.mxu1 %v4028_v63  ;;  %3727 = vmatprep.mubr.bf16.mxu0 %v4029_v0 }
 0x116   : > { %v3278_v10 = vpop.f32.mrf.mxu0  ;;  %v3366_v11 = vpop.f32.mrf.mxu1 }
 0x117   : > { %v4499_v14 = vadd.f32 %v3278_v10, %v3277_v7  ;;  %v3367_v15 = vadd.f32 %v3366_v11, %v3365_v8  ;;  %v4036_v7 = vld [vmem:[%s4135_s17 + $0x378] ss:$36 sps:$4 sm:$0xff]   ;;  %v4040_v8 = vld [vmem:[%s4135_s17 + $0x2a8] ss:$36 sps:$4 sm:$0xff]  }
 0x118   : > { %v3280_v16 = vpop.f32.mrf.mxu0  ;;  %v3368_v17 = vpop.f32.mrf.mxu1  ;;  %v4043_v11 = vld [vmem:[%s4135_s17 + $0x3c4] ss:$36 sps:$4 sm:$0xff]  }
 0x119   : > { %v4503_v22 = vadd.f32 %v3367_v15, %v1754_v60  ;;  %v4044_v60 = vld [vmem:[%s4135_s17 + $0x2f0] ss:$36 sps:$4 sm:$0xff]  }
 0x11a   : > { %v3281_v25 = vpop.f32.mrf.mxu0  ;;  %v3369_v26 = vpop.f32.mrf.mxu1 }
 0x11b   : > { %v4509_v30 = vadd.f32 %v3281_v25, %v3280_v16  ;;  %v3370_v2 = vadd.f32 %v3369_v26, %v3368_v17  ;;  %v1773_v17 = vadd.f32 %v4472_v44, %v4479_v48  ;;  %v1778_v44 = vadd.f32 %v4483_v54, %v4479_v48 }
 0x11c   : > { %v3283_v31 = vpop.f32.mrf.mxu0  ;;  %v3371_v32 = vpop.f32.mrf.mxu1  ;;  %2307 = vmatmul.mubr.bf16.gmra.mxu1 %v4026_v20  ;;  %3728 = vmatmul.mubr.bf16.gmra.mxu0 %v4030_v21 }
 0x11d   : > { %v4511_v33 = vadd.f32 %v3370_v2, %v1757_v27  ;;  %2314 = vmatprep.mubr.bf16.mxu1 %v4033_v23  ;;  %3731 = vmatprep.mubr.bf16.mxu0 %v4034_v24 }
 0x11e   : > { %v3284_v36 = vpop.f32.mrf.mxu0  ;;  %v3372_v37 = vpop.f32.mrf.mxu1 }
 0x11f   : > { %v4515_v38 = vadd.f32 %v3284_v36, %v3283_v31  ;;  %v3373_v39 = vadd.f32 %v3372_v37, %v3371_v32  ;;  %v4041_v36 = vld [vmem:[%s4135_s17 + $0x3c0] ss:$36 sps:$4 sm:$0xff]   ;;  %v4045_v37 = vld [vmem:[%s4135_s17 + $0x338] ss:$36 sps:$4 sm:$0xff]  }
 0x120   : > { %v3286_v40 = vpop.f32.mrf.mxu0  ;;  %v3374_v41 = vpop.f32.mrf.mxu1 }
 0x121   : > { %v4519_v46 = vadd.f32 %v3373_v39, %v1762_v12  ;;  %v4048_v39 = vld [vmem:[%s4135_s17 + $0x40c] ss:$36 sps:$4 sm:$0xff]  }
 0x122   : > { %v3287_v52 = vpop.f32.mrf.mxu0  ;;  %v3375_v53 = vpop.f32.mrf.mxu1 }
 0x123   : > { %v4525_v56 = vadd.f32 %v3287_v52, %v3286_v40  ;;  %v3376_v18 = vadd.f32 %v3375_v53, %v3374_v41  ;;  %v4049_v40 = vld [vmem:[%s4135_s17 + $0x380] ss:$36 sps:$4 sm:$0xff]  }
 0x124   : > { %v3289_v57 = vpop.f32.mrf.mxu0  ;;  %v3377_v58 = vpop.f32.mrf.mxu1  ;;  %2315 = vmatmul.mubr.bf16.gmra.mxu1 %v4031_v42  ;;  %3732 = vmatmul.mubr.bf16.gmra.mxu0 %v4035_v43  ;;  %v1781_v43 = vadd.f32 %v4493_v6, %v4479_v48  ;;  %v1786_v6 = vadd.f32 %v4499_v14, %v4479_v48 }
 0x125   : > { %v4527_v59 = vadd.f32 %v3376_v18, %v1765_v55  ;;  %2322 = vmatprep.mubr.bf16.mxu1 %v4038_v47  ;;  %3735 = vmatprep.mubr.bf16.mxu0 %v4039_v49 }
 0x126   : > { %v3290_v63 = vpop.f32.mrf.mxu0  ;;  %v3378_v0 = vpop.f32.mrf.mxu1 }
 0x127   : > { %v4531_v1 = vadd.f32 %v3290_v63, %v3289_v57  ;;  %v3379_v4 = vadd.f32 %v3378_v0, %v3377_v58 }
 0x128   : > { %v3292_v5 = vpop.f32.mrf.mxu0  ;;  %v3380_v50 = vpop.f32.mrf.mxu1 }
 0x129   : > { %v4535_v10 = vadd.f32 %v3379_v4, %v1770_v28  ;;  %v4046_v28 = vld [vmem:[%s4135_s17 + $0x408] ss:$36 sps:$4 sm:$0xff]  }
 0x12a   : > { %v3293_v15 = vpop.f32.mrf.mxu0  ;;  %v3381_v16 = vpop.f32.mrf.mxu1  ;;  %v4050_v4 = vld [vmem:[%s4135_s17 + $0x3c8] ss:$36 sps:$4 sm:$0xff]  }
 0x12b   : > { %v4541_v20 = vadd.f32 %v3293_v15, %v3292_v5  ;;  %v3382_v34 = vadd.f32 %v3381_v16, %v3380_v50  ;;  %v4053_v50 = vld [vmem:[%s4135_s17 + $0x454] ss:$36 sps:$4 sm:$0xff]  }
 0x12c   : > { %v3295_v21 = vpop.f32.mrf.mxu0  ;;  %v3383_v23 = vpop.f32.mrf.mxu1  ;;  %2323 = vmatmul.mubr.bf16.gmra.mxu1 %v4036_v7  ;;  %3736 = vmatmul.mubr.bf16.gmra.mxu0 %v4040_v8  ;;  %v4054_v7 = vld [vmem:[%s4135_s17 + $0x410] ss:$36 sps:$4 sm:$0xff]  }
 0x12d   : > { %v4543_v24 = vadd.f32 %v3382_v34, %v1773_v17  ;;  %2330 = vmatprep.mubr.bf16.mxu1 %v4043_v11  ;;  %3739 = vmatprep.mubr.bf16.mxu0 %v4044_v60  ;;  %v1789_v60 = vadd.f32 %v4509_v30, %v4479_v48 }
 0x12e   : > { %v3296_v25 = vpop.f32.mrf.mxu0  ;;  %v3384_v26 = vpop.f32.mrf.mxu1 }
 0x12f   : > { %v4547_v27 = vadd.f32 %v3296_v25, %v3295_v21  ;;  %v3385_v2 = vadd.f32 %v3384_v26, %v3383_v23  ;;  %v1794_v25 = vadd.f32 %v4515_v38, %v4479_v48 }
 0x130   : > { %v3298_v31 = vpop.f32.mrf.mxu0  ;;  %v3386_v32 = vpop.f32.mrf.mxu1 }
 0x131   : > { %v4551_v12 = vadd.f32 %v3385_v2, %v1778_v44 }
 0x132   : > { %v3299_v41 = vpop.f32.mrf.mxu0  ;;  %v3387_v42 = vpop.f32.mrf.mxu1 }
 0x133   : > { %v4557_v47 = vadd.f32 %v3299_v41, %v3298_v31  ;;  %v3388_v54 = vadd.f32 %v3387_v42, %v3386_v32  ;;  %v4051_v31 = vld [vmem:[%s4135_s17 + $0x450] ss:$36 sps:$4 sm:$0xff]   ;;  %v4055_v32 = vld [vmem:[%s4135_s17 + $0x458] ss:$36 sps:$4 sm:$0xff]  }
 0x134   : > { %v3301_v49 = vpop.f32.mrf.mxu0  ;;  %v3389_v52 = vpop.f32.mrf.mxu1  ;;  %2331 = vmatmul.mubr.bf16.gmra.mxu1 %v4041_v36  ;;  %3740 = vmatmul.mubr.bf16.gmra.mxu0 %v4045_v37 }
 0x135   : > { %v4559_v53 = vadd.f32 %v3388_v54, %v1781_v43  ;;  %2338 = vmatprep.mubr.bf16.mxu1 %v4048_v39  ;;  %3743 = vmatprep.mubr.bf16.mxu0 %v4049_v40  ;;  %v1797_v40 = vadd.f32 %v4525_v56, %v4479_v48 }
 0x136   : > { %v3302_v55 = vpop.f32.mrf.mxu0  ;;  %v3390_v18 = vpop.f32.mrf.mxu1 }
 0x137   : > { %v4563_v57 = vadd.f32 %v3302_v55, %v3301_v49  ;;  %v3391_v58 = vadd.f32 %v3390_v18, %v3389_v52  ;;  %v1802_v55 = vadd.f32 %v4531_v1, %v4479_v48 }
 0x138   : > { %v3304_v63 = vpop.f32.mrf.mxu0  ;;  %v3392_v0 = vpop.f32.mrf.mxu1 }
 0x139   : > { %v4567_v5 = vadd.f32 %v3391_v58, %v1786_v6 }
 0x13a   : > { %v3305_v8 = vpop.f32.mrf.mxu0  ;;  %v3393_v11 = vpop.f32.mrf.mxu1 }
 0x13b   : > { %v4573_v15 = vadd.f32 %v3305_v8, %v3304_v63  ;;  %v3394_v14 = vadd.f32 %v3393_v11, %v3392_v0 }
 0x13c   : > { %v3307_v16 = vpop.f32.mrf.mxu0  ;;  %v3395_v17 = vpop.f32.mrf.mxu1  ;;  %2339 = vmatmul.mubr.bf16.gmra.mxu1 %v4046_v28  ;;  %3744 = vmatmul.mubr.bf16.gmra.mxu0 %v4050_v4  ;;  %v1805_v4 = vadd.f32 %v4541_v20, %v4479_v48 }
 0x13d   : > { %v4575_v34 = vadd.f32 %v3394_v14, %v1789_v60  ;;  %2346 = vmatprep.mubr.bf16.mxu1 %v4053_v50  ;;  %3747 = vmatprep.mubr.bf16.mxu0 %v4054_v7 }
 0x13e   : > { %v3308_v21 = vpop.f32.mrf.mxu0  ;;  %v3396_v23 = vpop.f32.mrf.mxu1 }
 0x13f   : > { %v4579_v26 = vadd.f32 %v3308_v21, %v3307_v16  ;;  %v3397_v30 = vadd.f32 %v3396_v23, %v3395_v17  ;;  %v1810_v16 = vadd.f32 %v4547_v27, %v4479_v48 }
 0x140   : > { %v3310_v44 = vpop.f32.mrf.mxu0  ;;  %v3398_v2 = vpop.f32.mrf.mxu1 }
 0x141   : > { %v4583_v36 = vadd.f32 %v3397_v30, %v1794_v25 }
 0x142   : > { %v3311_v37 = vpop.f32.mrf.mxu0  ;;  %v3399_v39 = vpop.f32.mrf.mxu1 }
 0x143   : > { %v4587_v41 = vadd.f32 %v3311_v37, %v3310_v44  ;;  %v3400_v42 = vadd.f32 %v3399_v39, %v3398_v2 }
 0x144   : > { %v3313_v43 = vpop.f32.mrf.mxu0  ;;  %v3401_v54 = vpop.f32.mrf.mxu1  ;;  %2347 = vmatmul.mubr.bf16.gmra.mxu1 %v4051_v31  ;;  %3748 = vmatmul.mubr.bf16.gmra.mxu0 %v4055_v32  ;;  %v1813_v31 = vadd.f32 %v4557_v47, %v4479_v48 }
 0x145   : > { %v4589_v38 = vadd.f32 %v3400_v42, %v1797_v40 }
 0x146   : > { %v3314_v49 = vpop.f32.mrf.mxu0  ;;  %v3402_v52 = vpop.f32.mrf.mxu1 }
 0x147   : > { %v4593_v18 = vadd.f32 %v3314_v49, %v3313_v43  ;;  %v3403_v6 = vadd.f32 %v3402_v52, %v3401_v54 }
 0x148   : > { %v3316_v58 = vpop.f32.mrf.mxu0  ;;  %v3404_v63 = vpop.f32.mrf.mxu1 }
 0x149   : > { %v4595_v56 = vadd.f32 %v3403_v6, %v1802_v55 }
 0x14a   : > { %v3317_v0 = vpop.f32.mrf.mxu0  ;;  %v3405_v28 = vpop.f32.mrf.mxu1 }
 0x14b   : > { %v4599_v50 = vadd.f32 %v3317_v0, %v3316_v58  ;;  %v3406_v7 = vadd.f32 %v3405_v28, %v3404_v63 }
 0x14c   : > { %v3407_v8 = vpop.f32.mrf.mxu1  ;;  %v3471_v11 = vpop.f32.mrf.mxu0 }
 0x14d   : > { %v4601_v60 = vadd.f32 %v3406_v7, %v1805_v4 }
 0x14e   : > { %v3408_v1 = vpop.f32.mrf.mxu1  ;;  %v3472_v14 = vpop.f32.mrf.mxu0 }
 0x14f   : > { %v3409_v17 = vadd.f32 %v3408_v1, %v3407_v8  ;;  %v3473_v21 = vadd.f32 %v3472_v14, %v3471_v11 }
 0x150   : > { %v3410_v23 = vpop.f32.mrf.mxu1  ;;  %v3474_v25 = vpop.f32.mrf.mxu0 }
 0x151   : > { %v4605_v30 = vadd.f32 %v3409_v17, %v1810_v16  ;;  %v4608_v20 = vadd.f32 %v3473_v21, %v4487_v62  ;;  %v1818_v62 = vadd.f32 %v4563_v57, %v4479_v48 }
 0x152   : > { %v3411_v44 = vpop.f32.mrf.mxu1  ;;  %v3475_v2 = vpop.f32.mrf.mxu0 }
 0x153   : > { %v3412_v32 = vadd.f32 %v3411_v44, %v3410_v23  ;;  %v3476_v37 = vadd.f32 %v3475_v2, %v3474_v25 }
 0x154   : > { %v3413_v39 = vpop.f32.mrf.mxu1  ;;  %v3477_v40 = vpop.f32.mrf.mxu0 }
 0x155   : > { %v4612_v42 = vadd.f32 %v3412_v32, %v1813_v31  ;;  %v4615_v27 = vadd.f32 %v3476_v37, %v4495_v9  ;;  %v1821_v9 = vadd.f32 %v4573_v15, %v4479_v48 }
 0x156   : > { %v3414_v43 = vpop.f32.mrf.mxu1  ;;  %v3478_v54 = vpop.f32.mrf.mxu0 }
 0x157   : > { %v3415_v49 = vadd.f32 %v3414_v43, %v3413_v39  ;;  %v3479_v52 = vadd.f32 %v3478_v54, %v3477_v40 }
 0x158   : > { %v3416_v55 = vpop.f32.mrf.mxu1  ;;  %v3480_v6 = vpop.f32.mrf.mxu0 }
 0x159   : > { %v4619_v58 = vadd.f32 %v3415_v49, %v1818_v62  ;;  %v4622_v47 = vadd.f32 %v3479_v52, %v4503_v22  ;;  %v1826_v22 = vadd.f32 %v4579_v26, %v4479_v48 }
 0x15a   : > { %v3417_v63 = vpop.f32.mrf.mxu1  ;;  %v3481_v0 = vpop.f32.mrf.mxu0 }
 0x15b   : > { %v3418_v28 = vadd.f32 %v3417_v63, %v3416_v55  ;;  %v3482_v4 = vadd.f32 %v3481_v0, %v3480_v6 }
 0x15c   : > { %v3419_v7 = vpop.f32.mrf.mxu1  ;;  %v3483_v8 = vpop.f32.mrf.mxu0 }
 0x15d   : > { %v4626_v11 = vadd.f32 %v3418_v28, %v1821_v9  ;;  %v4629_v57 = vadd.f32 %v3482_v4, %v4511_v33  ;;  %v1829_v33 = vadd.f32 %v4587_v41, %v4479_v48 }
 0x15e   : > { %v3420_v1 = vpop.f32.mrf.mxu1  ;;  %v3484_v14 = vpop.f32.mrf.mxu0 }
 0x15f   : > { %v3421_v16 = vadd.f32 %v3420_v1, %v3419_v7  ;;  %v3485_v17 = vadd.f32 %v3484_v14, %v3483_v8 }
 0x160   : > { %v3422_v21 = vpop.f32.mrf.mxu1  ;;  %v3486_v23 = vpop.f32.mrf.mxu0 }
 0x161   : > { %v4633_v25 = vadd.f32 %v3421_v16, %v1826_v22  ;;  %v4636_v15 = vadd.f32 %v3485_v17, %v4519_v46  ;;  %v1834_v46 = vadd.f32 %v4593_v18, %v4479_v48 }
 0x162   : > { %v3423_v44 = vpop.f32.mrf.mxu1  ;;  %v3487_v2 = vpop.f32.mrf.mxu0 }
 0x163   : > { %v3424_v31 = vadd.f32 %v3423_v44, %v3422_v21  ;;  %v3488_v32 = vadd.f32 %v3487_v2, %v3486_v23 }
 0x164   : > { %v3425_v37 = vpop.f32.mrf.mxu1  ;;  %v3489_v39 = vpop.f32.mrf.mxu0 }
 0x165   : > { %v4640_v40 = vadd.f32 %v3424_v31, %v1829_v33  ;;  %v4643_v26 = vadd.f32 %v3488_v32, %v4527_v59  ;;  %v1837_v59 = vadd.f32 %v4599_v50, %v4479_v48 }
 0x166   : > { %v3426_v43 = vpop.f32.mrf.mxu1  ;;  %v3490_v54 = vpop.f32.mrf.mxu0 }
 0x167   : > { %v3427_v62 = vadd.f32 %v3426_v43, %v3425_v37  ;;  %v3491_v49 = vadd.f32 %v3490_v54, %v3489_v39 }
 0x168   : > { %v3428_v52 = vpop.f32.mrf.mxu1  ;;  %v3492_v55 = vpop.f32.mrf.mxu0 }
 0x169   : > { %v4647_v6 = vadd.f32 %v3427_v62, %v1834_v46  ;;  %v4650_v41 = vadd.f32 %v3491_v49, %v4535_v10  ;;  %v1842_v10 = vadd.f32 %v4430_v51, %v4479_v48 }
 0x16a   : > { %v3429_v63 = vpop.f32.mrf.mxu1  ;;  %v3493_v0 = vpop.f32.mrf.mxu0 }
 0x16b   : > { %v3430_v9 = vadd.f32 %v3429_v63, %v3428_v52  ;;  %v3494_v28 = vadd.f32 %v3493_v0, %v3492_v55 }
 0x16c   : > { %v3431_v4 = vpop.f32.mrf.mxu1  ;;  %v3495_v7 = vpop.f32.mrf.mxu0 }
 0x16d   : > { %v4654_v8 = vadd.f32 %v3430_v9, %v1837_v59  ;;  %v4657_v18 = vadd.f32 %v3494_v28, %v4543_v24  ;;  %v1845_v24 = vadd.f32 %v4438_v61, %v4479_v48 }
 0x16e   : > { %v3432_v1 = vpop.f32.mrf.mxu1  ;;  %v3496_v14 = vpop.f32.mrf.mxu0 }
 0x16f   : > { %v3433_v22 = vadd.f32 %v3432_v1, %v3431_v4  ;;  %v3497_v16 = vadd.f32 %v3496_v14, %v3495_v7 }
 0x170   : > { %v3434_v17 = vpop.f32.mrf.mxu1  ;;  %v3498_v21 = vpop.f32.mrf.mxu0 }
 0x171   : > { %v4661_v23 = vadd.f32 %v3433_v22, %v1842_v10  ;;  %v4664_v50 = vadd.f32 %v3497_v16, %v4551_v12  ;;  %v1850_v12 = vadd.f32 %v4442_v3, %v4479_v48 }
 0x172   : > { %v3435_v44 = vpop.f32.mrf.mxu1  ;;  %v3499_v2 = vpop.f32.mrf.mxu0 }
 0x173   : > { %v3436_v33 = vadd.f32 %v3435_v44, %v3434_v17  ;;  %v3500_v31 = vadd.f32 %v3499_v2, %v3498_v21 }
 0x174   : > { %v3437_v32 = vpop.f32.mrf.mxu1  ;;  %v3501_v37 = vpop.f32.mrf.mxu0 }
 0x175   : > { %v4668_v39 = vadd.f32 %v3436_v33, %v1845_v24  ;;  %v4671_v51 = vadd.f32 %v3500_v31, %v4559_v53  ;;  %v1853_v53 = vadd.f32 %v4450_v13, %v4479_v48 }
 0x176   : > { %v3438_v43 = vpop.f32.mrf.mxu1  ;;  %v3502_v54 = vpop.f32.mrf.mxu0 }
 0x177   : > { %v3439_v46 = vadd.f32 %v3438_v43, %v3437_v32  ;;  %v3503_v62 = vadd.f32 %v3502_v54, %v3501_v37 }
 0x178   : > { %v3440_v49 = vpop.f32.mrf.mxu1  ;;  %v3504_v52 = vpop.f32.mrf.mxu0 }
 0x179   : > { %v4675_v55 = vadd.f32 %v3439_v46, %v1850_v12  ;;  %v4678_v61 = vadd.f32 %v3503_v62, %v4567_v5  ;;  %v1858_v5 = vadd.f32 %v4454_v19, %v4479_v48 }
 0x17a   : > { %v3441_v63 = vpop.f32.mrf.mxu1  ;;  %v3505_v0 = vpop.f32.mrf.mxu0 }
 0x17b   : > { %v3442_v59 = vadd.f32 %v3441_v63, %v3440_v49  ;;  %v3506_v9 = vadd.f32 %v3505_v0, %v3504_v52 }
 0x17c   : > { %v3443_v28 = vpop.f32.mrf.mxu1  ;;  %v3507_v4 = vpop.f32.mrf.mxu0 }
 0x17d   : > { %v4682_v7 = vadd.f32 %v3442_v59, %v1853_v53  ;;  %v4685_v3 = vadd.f32 %v3506_v9, %v4575_v34  ;;  %v1861_v34 = vadd.f32 %v4462_v29, %v4479_v48 }
 0x17e   : > { %v3444_v1 = vpop.f32.mrf.mxu1  ;;  %v3508_v14 = vpop.f32.mrf.mxu0 }
 0x17f   : > { %v3445_v10 = vadd.f32 %v3444_v1, %v3443_v28  ;;  %v3509_v22 = vadd.f32 %v3508_v14, %v3507_v4 }
 0x180   : > { %v3446_v16 = vpop.f32.mrf.mxu1  ;;  %v3510_v17 = vpop.f32.mrf.mxu0 }
 0x181   : > { %v4689_v21 = vadd.f32 %v3445_v10, %v1858_v5  ;;  %v4692_v13 = vadd.f32 %v3509_v22, %v4583_v36  ;;  %v1866_v36 = vadd.f32 %v4466_v35, %v4479_v48 }
 0x182   : > { %v3447_v44 = vpop.f32.mrf.mxu1  ;;  %v3511_v2 = vpop.f32.mrf.mxu0 }
 0x183   : > { %v3448_v24 = vadd.f32 %v3447_v44, %v3446_v16  ;;  %v3512_v33 = vadd.f32 %v3511_v2, %v3510_v17 }
 0x184   : > { %v3449_v31 = vpop.f32.mrf.mxu1  ;;  %v3513_v32 = vpop.f32.mrf.mxu0 }
 0x185   : > { %v4696_v37 = vadd.f32 %v3448_v24, %v1861_v34  ;;  %v4699_v19 = vadd.f32 %v3512_v33, %v4589_v38  ;;  %v1869_v38 = vadd.f32 %v4474_v45, %v4479_v48 }
 0x186   : > { %v3450_v43 = vpop.f32.mrf.mxu1  ;;  %v3514_v54 = vpop.f32.mrf.mxu0 }
 0x187   : > { %v3451_v12 = vadd.f32 %v3450_v43, %v3449_v31  ;;  %v3515_v46 = vadd.f32 %v3514_v54, %v3513_v32 }
 0x188   : > { %v3452_v62 = vpop.f32.mrf.mxu1  ;;  %v3516_v49 = vpop.f32.mrf.mxu0 }
 0x189   : > { %v4703_v52 = vadd.f32 %v3451_v12, %v1866_v36  ;;  %v4706_v29 = vadd.f32 %v3515_v46, %v4595_v56 }
 0x18a   : > { %v3453_v63 = vpop.f32.mrf.mxu1  ;;  %v3517_v0 = vpop.f32.mrf.mxu0 }
 0x18b   : > { %v3454_v53 = vadd.f32 %v3453_v63, %v3452_v62  ;;  %v3518_v59 = vadd.f32 %v3517_v0, %v3516_v49 }
 0x18c   : > { %v3519_v9 = vpop.f32.mrf.mxu0  ;;  %v3583_v28 = vpop.f32.mrf.mxu1 }
 0x18d   : > { %v4710_v4 = vadd.f32 %v3454_v53, %v1869_v38  ;;  %v4713_v35 = vadd.f32 %v3518_v59, %v4601_v60 }
 0x18e   : > { %v3520_v1 = vpop.f32.mrf.mxu0  ;;  %v3584_v14 = vpop.f32.mrf.mxu1 }
 0x18f   : > { %v3521_v5 = vadd.f32 %v3520_v1, %v3519_v9  ;;  %v3585_v10 = vadd.f32 %v3584_v14, %v3583_v28 }
 0x190   : > { %v3522_v56 = vpop.f32.mrf.mxu0  ;;  %v4715_v22 = vpop.f32.mrf.mxu1 }
 0x191   : > { %v4718_v16 = vadd.f32 %v3521_v5, %v4605_v30  ;;  %v4721_v45 = vadd.f32 %v3585_v10, %v4608_v20 }
 0x192   : > { %v3523_v48 = vpop.f32.mrf.mxu0  ;;  %v4723_v17 = vpop.f32.mrf.mxu1 }
 0x193   : > { %v3524_v44 = vadd.f32 %v3523_v48, %v3522_v56 }
 0x194   : > { %v3525_v2 = vpop.f32.mrf.mxu0  ;;  %v4725_v60 = vpop.f32.mrf.mxu1 }
 0x195   : > { %v4728_v34 = vadd.f32 %v3524_v44, %v4612_v42 }
 0x196   : > { %v3526_v24 = vpop.f32.mrf.mxu0  ;;  %v4730_v33 = vpop.f32.mrf.mxu1 }
 0x197   : > { %v3527_v31 = vadd.f32 %v3526_v24, %v3525_v2 }
 0x198   : > { %v3528_v32 = vpop.f32.mrf.mxu0  ;;  %v4732_v30 = vpop.f32.mrf.mxu1 }
 0x199   : > { %v4735_v20 = vadd.f32 %v3527_v31, %v4619_v58 }
 0x19a   : > { %v3529_v43 = vpop.f32.mrf.mxu0  ;;  %v4737_v54 = vpop.f32.mrf.mxu1 }
 0x19b   : > { %v3530_v36 = vadd.f32 %v3529_v43, %v3528_v32 }
 0x19c   : > { %v3531_v12 = vpop.f32.mrf.mxu0  ;;  %v4739_v46 = vpop.f32.mrf.mxu1 }
 0x19d   : > { %v4742_v42 = vadd.f32 %v3530_v36, %v4626_v11 }
 0x19e   : > { %v3532_v62 = vpop.f32.mrf.mxu0  ;;  %v4744_v49 = vpop.f32.mrf.mxu1 }
 0x19f   : > { %v3533_v63 = vadd.f32 %v3532_v62, %v3531_v12 }
 0x1a0   : > { %v3534_v0 = vpop.f32.mrf.mxu0  ;;  %v4746_v38 = vpop.f32.mrf.mxu1 }
 0x1a1   : > { %v4749_v58 = vadd.f32 %v3533_v63, %v4633_v25 }
 0x1a2   : > { %v3535_v53 = vpop.f32.mrf.mxu0  ;;  %v4751_v59 = vpop.f32.mrf.mxu1 }
 0x1a3   : > { %5029 = vst [vmem:[#allocation2_spill] sm:$0xff] %v4749_v58  ;;  %v3536_v9 = vadd.f32 %v3535_v53, %v3534_v0 }
 0x1a4   : > { %v3537_v28 = vpop.f32.mrf.mxu0  ;;  %v4753_v1 = vpop.f32.mrf.mxu1 }
 0x1a5   : > { %v4756_v11 = vadd.f32 %v3536_v9, %v4640_v40 }
 0x1a6   : > { %v3538_v14 = vpop.f32.mrf.mxu0  ;;  %v4758_v5 = vpop.f32.mrf.mxu1 }
 0x1a7   : > { %5030 = vst [vmem:[#allocation3_spill] sm:$0xff] %v4756_v11  ;;  %v3539_v10 = vadd.f32 %v3538_v14, %v3537_v28 }
 0x1a8   : > { %v3540_v56 = vpop.f32.mrf.mxu0  ;;  %v4760_v48 = vpop.f32.mrf.mxu1 }
 0x1a9   : > { %v4763_v25 = vadd.f32 %v3539_v10, %v4647_v6 }
 0x1aa   : > { %v3541_v44 = vpop.f32.mrf.mxu0  ;;  %v4765_v2 = vpop.f32.mrf.mxu1 }
 0x1ab   : > { %5031 = vst [vmem:[#allocation4_spill] sm:$0xff] %v4763_v25  ;;  %v3542_v24 = vadd.f32 %v3541_v44, %v3540_v56 }
 0x1ac   : > { %v3543_v31 = vpop.f32.mrf.mxu0  ;;  %v4767_v32 = vpop.f32.mrf.mxu1 }
 0x1ad   : > { %v4770_v40 = vadd.f32 %v3542_v24, %v4654_v8 }
 0x1ae   : > { %v3544_v43 = vpop.f32.mrf.mxu0  ;;  %v4772_v36 = vpop.f32.mrf.mxu1 }
 0x1af   : > { %5032 = vst [vmem:[#allocation5_spill] sm:$0xff] %v4770_v40  ;;  %v3545_v12 = vadd.f32 %v3544_v43, %v3543_v31 }
 0x1b0   : > { %v3546_v62 = vpop.f32.mrf.mxu0  ;;  %v4774_v63 = vpop.f32.mrf.mxu1 }
 0x1b1   : > { %v4777_v6 = vadd.f32 %v3545_v12, %v4661_v23 }
 0x1b2   : > { %v3547_v0 = vpop.f32.mrf.mxu0  ;;  %v4779_v53 = vpop.f32.mrf.mxu1 }
 0x1b3   : > { %5033 = vst [vmem:[#allocation6_spill] sm:$0xff] %v4777_v6  ;;  %v3548_v9 = vadd.f32 %v3547_v0, %v3546_v62 }
 0x1b4   : > { %v3549_v28 = vpop.f32.mrf.mxu0  ;;  %v4781_v14 = vpop.f32.mrf.mxu1 }
 0x1b5   : > { %v4784_v8 = vadd.f32 %v3548_v9, %v4668_v39 }
 0x1b6   : > { %v3550_v10 = vpop.f32.mrf.mxu0  ;;  %v4786_v56 = vpop.f32.mrf.mxu1 }
 0x1b7   : > { %5034 = vst [vmem:[#allocation7_spill] sm:$0xff] %v4784_v8  ;;  %v3551_v44 = vadd.f32 %v3550_v10, %v3549_v28 }
 0x1b8   : > { %v3552_v24 = vpop.f32.mrf.mxu0  ;;  %v4788_v31 = vpop.f32.mrf.mxu1 }
 0x1b9   : > { %v4791_v23 = vadd.f32 %v3551_v44, %v4675_v55 }
 0x1ba   : > { %v3553_v43 = vpop.f32.mrf.mxu0  ;;  %v4793_v12 = vpop.f32.mrf.mxu1 }
 0x1bb   : > { %5035 = vst [vmem:[#allocation8_spill] sm:$0xff] %v4791_v23  ;;  %v3554_v62 = vadd.f32 %v3553_v43, %v3552_v24 }
 0x1bc   : > { %v3555_v0 = vpop.f32.mrf.mxu0  ;;  %v4795_v6 = vpop.f32.mrf.mxu1 }
 0x1bd   : > { %v4798_v39 = vadd.f32 %v3554_v62, %v4682_v7 }
 0x1be   : > { %v3556_v9 = vpop.f32.mrf.mxu0  ;;  %v4800_v8 = vpop.f32.mrf.mxu1 }
 0x1bf   : > { %5036 = vst [vmem:[#allocation9_spill] sm:$0xff] %v4798_v39  ;;  %v3557_v28 = vadd.f32 %v3556_v9, %v3555_v0  ;;  %v3591_v0 = vadd.f32 %v4730_v33, %v4725_v60 }
 0x1c0   : > { %v3558_v10 = vpop.f32.mrf.mxu0  ;;  %v4802_v11 = vpop.f32.mrf.mxu1 }
 0x1c1   : > { %v4805_v55 = vadd.f32 %v3557_v28, %v4689_v21 }
 0x1c2   : > { %v3559_v44 = vpop.f32.mrf.mxu0  ;;  %v4807_v23 = vpop.f32.mrf.mxu1 }
 0x1c3   : > { %5037 = vst [vmem:[#allocation10_spill] sm:$0xff] %v4805_v55  ;;  %v3560_v24 = vadd.f32 %v3559_v44, %v3558_v10 }
 0x1c4   : > { %v3561_v43 = vpop.f32.mrf.mxu0  ;;  %v4809_v40 = vpop.f32.mrf.mxu1 }
 0x1c5   : > { %v4812_v7 = vadd.f32 %v3560_v24, %v4696_v37  ;;  %v3594_v37 = vadd.f32 %v4737_v54, %v4732_v30 }
 0x1c6   : > { %v3562_v62 = vpop.f32.mrf.mxu0  ;;  %v4814_v39 = vpop.f32.mrf.mxu1 }
 0x1c7   : > { %5038 = vst [vmem:[#allocation11_spill] sm:$0xff] %v4812_v7  ;;  %v3563_v9 = vadd.f32 %v3562_v62, %v3561_v43  ;;  %v2237_v7 = vadd.f32 %v3591_v0, %v4622_v47  ;;  %v2240_v47 = vadd.f32 %v3594_v37, %v4629_v57 }
 0x1c8   : > { %v3564_v58 = vpop.f32.mrf.mxu0  ;;  %v4818_v21 = vpop.f32.mrf.mxu1 }
 0x1c9   : > { %v4821_v28 = vadd.f32 %v3563_v9, %v4703_v52  ;;  %v3588_v52 = vadd.f32 %v4723_v17, %v4715_v22  ;;  %v3603_v9 = vadd.f32 %v4758_v5, %v4753_v1  ;;  %v3597_v22 = vadd.f32 %v4744_v49, %v4739_v46 }
 0x1ca   : > { %v3565_v10 = vpop.f32.mrf.mxu0  ;;  %v4823_v44 = vpop.f32.mrf.mxu1  ;;  %v3606_v1 = vadd.f32 %v4765_v2, %v4760_v48  ;;  %v3600_v2 = vadd.f32 %v4751_v59, %v4746_v38 }
 0x1cb   : > { %v3566_v24 = vadd.f32 %v3565_v10, %v3564_v58  ;;  %v2232_v57 = vadd.f32 %v3588_v52, %v4615_v27  ;;  %v2253_v37 = vadd.f32 %v3603_v9, %v4650_v41  ;;  %v2245_v52 = vadd.f32 %v3597_v22, %v4636_v15 }
 0x1cc   : > { %v4828_v55 = vpop.f32.mrf.mxu1  ;;  %v3721_v25 = vpop.f32.mrf.mxu0  ;;  %v3615_v41 = vadd.f32 %v4786_v56, %v4781_v14 }
 0x1cd   : > { %v4831_v60 = vadd.f32 %v3566_v24, %v4710_v4  ;;  %v2398_v33 = vadd.f32 %v3721_v25, %v2237_v7  ;;  %v4844_v4 = vld [vmem:[%s5026_s3] ss:$0 sm:$0xff] }
 0x1ce   : > { %v4835_v43 = vpop.f32.mrf.mxu1  ;;  %v2389_v62 = vpop.f32.mrf.mxu0  ;;  %v4860_v24 = vld [vmem:[%s5027_s4] ss:$0 sm:$0xff] }
 0x1cf   : > { %v2518_v30 = vmax.f32 %v2398_v33, 0.0  ;;  %v2390_v54 = vadd.f32 %v2389_v62, %v4721_v45 }
 0x1d0   : > { %v4846_v58 = vpop.f32.mrf.mxu1  ;;  %v3722_v25 = vpop.f32.mrf.mxu0 }
 0x1d1   : > { %v2401_v17 = vadd.f32 %v3722_v25, %v2240_v47  ;;  %v2516_v5 = vmax.f32 %v2390_v54, 0.0  ;;  %v2557_v0 = vmul.f32 %v4844_v4, %v2518_v30  ;;  %v2256_v47 = vadd.f32 %v3606_v1, %v4657_v18 }
 0x1d2   : > { %v4852_v45 = vpop.f32.mrf.mxu1  ;;  %v2392_v7 = vpop.f32.mrf.mxu0  ;;  %v3609_v18 = vadd.f32 %v4772_v36, %v4767_v32  ;;  %v2269_v36 = vadd.f32 %v3615_v41, %v4678_v61 }
 0x1d3   : > { %v2519_v10 = vmax.f32 %v2401_v17, 0.0  ;;  %v2393_v46 = vadd.f32 %v2392_v7, %v2232_v57  ;;  %v2555_v62 = vmul.f32 %v4844_v4, %v2516_v5  ;;  %v2596_v25 = vadd.f32 %v4860_v24, %v2557_v0 }
 0x1d4   : > { %v4862_v49 = vpop.f32.mrf.mxu1  ;;  %v3725_v48 = vpop.f32.mrf.mxu0  ;;  %v2248_v5 = vadd.f32 %v3600_v2, %v4643_v26  ;;  %v3618_v57 = vadd.f32 %v4793_v12, %v4788_v31  ;;  %v3612_v12 = vadd.f32 %v4779_v53, %v4774_v63 }
 0x1d5   : > { %v2558_v27 = vmul.f32 %v4844_v4, %v2519_v10  ;;  %v2414_v33 = vadd.f32 %v3725_v48, %v2253_v37  ;;  %v2517_v9 = vmax.f32 %v2393_v46, 0.0  ;;  %v2594_v7 = vadd.f32 %v4860_v24, %v2555_v62 }
 0x1d6   : > { %v4872_v30 = vpop.f32.mrf.mxu1  ;;  %v2405_v54 = vpop.f32.mrf.mxu0  ;;  %v2261_v62 = vadd.f32 %v3609_v18, %v4664_v50  ;;  %v2264_v18 = vadd.f32 %v3612_v12, %v4671_v51 }
 0x1d7   : > { %v2597_v38 = vadd.f32 %v4860_v24, %v2558_v27  ;;  %v2522_v59 = vmax.f32 %v2414_v33, 0.0  ;;  %v2406_v17 = vadd.f32 %v2405_v54, %v2245_v52  ;;  %v2556_v15 = vmul.f32 %v4844_v4, %v2517_v9 }
 0x1d8   : > { %v4883_v14 = vpop.f32.mrf.mxu1  ;;  %v3726_v56 = vpop.f32.mrf.mxu0  ;;  %v3627_v9 = vadd.f32 %v4814_v39, %v4809_v40  ;;  %v3621_v39 = vadd.f32 %v4800_v8, %v4795_v6 }
 0x1d9   : > { %v3144_v22 = vpack.c.bf16 %v2597_v38, %v2596_v25  ;;  %v2417_v1 = vadd.f32 %v3726_v56, %v2256_v47  ;;  %v2595_v0 = vadd.f32 %v4860_v24, %v2556_v15  ;;  %v2520_v10 = vmax.f32 %v2406_v17, 0.0 }
 0x1da   : > { %v4892_v37 = vpop.f32.mrf.mxu1  ;;  %v2408_v46 = vpop.f32.mrf.mxu0  ;;  %v2561_v48 = vmul.f32 %v4844_v4, %v2522_v59  ;;  %v2272_v25 = vadd.f32 %v3618_v57, %v4685_v3  ;;  %v3630_v3 = vadd.f32 %v4823_v44, %v4818_v21  ;;  %v2285_v8 = vadd.f32 %v3627_v9, %v4706_v29 }
 0x1db   : > { %3216 = vst [vmem:[%s4880_s20 + $0x8] sm:$0xff] %v3144_v22   ;;  %v2523_v32 = vmax.f32 %v2417_v1, 0.0  ;;  %v3139_v27 = vpack.c.bf16 %v2595_v0, %v2594_v7  ;;  %v2409_v26 = vadd.f32 %v2408_v46, %v2248_v5  ;;  %v2559_v54 = vmul.f32 %v4844_v4, %v2520_v10 }
 0x1dc   : > { %v4897_v2 = vpop.f32.mrf.mxu1  ;;  %v3729_v31 = vpop.f32.mrf.mxu0  ;;  %v2600_v38 = vadd.f32 %v4860_v24, %v2561_v48  ;;  %v3624_v21 = vadd.f32 %v4807_v23, %v4802_v11 }
 0x1dd   : > { %v2562_v33 = vmul.f32 %v4844_v4, %v2523_v32  ;;  %v2430_v52 = vadd.f32 %v3729_v31, %v2269_v36  ;;  %3140 = vst [vmem:[%s4880_s20] sm:$0xff] %v3139_v27   ;;  %v2521_v61 = vmax.f32 %v2409_v26, 0.0  ;;  %v2598_v22 = vadd.f32 %v4860_v24, %v2559_v54 }
 0x1de   : > { %v4907_v41 = vpop.f32.mrf.mxu1  ;;  %v2421_v47 = vpop.f32.mrf.mxu0  ;;  %v2277_v36 = vadd.f32 %v3621_v39, %v4692_v13  ;;  %v3639_v27 = vadd.f32 %v4872_v30, %v4862_v49  ;;  %v3633_v49 = vadd.f32 %v4835_v43, %v4828_v55 }
 0x1df   : > { %v2601_v63 = vadd.f32 %v4860_v24, %v2562_v33  ;;  %v2526_v53 = vmax.f32 %v2430_v52, 0.0  ;;  %v2422_v59 = vadd.f32 %v2421_v47, %v2261_v62  ;;  %v2560_v50 = vmul.f32 %v4844_v4, %v2521_v61 }
 0x1e0   : > { %v4913_v17 = vpop.f32.mrf.mxu1  ;;  %v3730_v40 = vpop.f32.mrf.mxu0  ;;  %v2288_v33 = vadd.f32 %v3630_v3, %v4713_v35  ;;  %v2280_v47 = vadd.f32 %v3624_v21, %v4699_v19  ;;  %v3642_v35 = vadd.f32 %v4892_v37, %v4883_v14  ;;  %v2301_v55 = vadd.f32 %v3639_v27, %v4735_v20 }
 0x1e1   : > { %v3154_v15 = vpack.c.bf16 %v2601_v63, %v2600_v38  ;;  %v2433_v56 = vadd.f32 %v3730_v40, %v2272_v25  ;;  %v2599_v1 = vadd.f32 %v4860_v24, %v2560_v50  ;;  %v2524_v5 = vmax.f32 %v2422_v59, 0.0 }
 0x1e2   : > { %v4922_v57 = vpop.f32.mrf.mxu1  ;;  %v2424_v7 = vpop.f32.mrf.mxu0  ;;  %v2565_v0 = vmul.f32 %v4844_v4, %v2526_v53  ;;  %v3636_v19 = vadd.f32 %v4852_v45, %v4846_v58  ;;  %v2304_v20 = vadd.f32 %v3642_v35, %v4742_v42  ;;  %v5041_v35 = vld [vmem:[#allocation5_spill] sm:$0xff] }
 0x1e3   : > { %3218 = vst [vmem:[%s4880_s20 + $0x18] sm:$0xff] %v3154_v15   ;;  %v2527_v6 = vmax.f32 %v2433_v56, 0.0  ;;  %v3149_v10 = vpack.c.bf16 %v2599_v1, %v2598_v22  ;;  %v2425_v51 = vadd.f32 %v2424_v7, %v2264_v18  ;;  %v2563_v26 = vmul.f32 %v4844_v4, %v2524_v5 }
 0x1e4   : > { %v3649_v46 = vpop.f32.mrf.mxu1  ;;  %v3733_v48 = vpop.f32.mrf.mxu0  ;;  %v2604_v52 = vadd.f32 %v4860_v24, %v2565_v0  ;;  %v2293_v18 = vadd.f32 %v3633_v49, %v4718_v16 }
 0x1e5   : > { %v2566_v44 = vmul.f32 %v4844_v4, %v2527_v6  ;;  %v2446_v32 = vadd.f32 %v3733_v48, %v2285_v8  ;;  %3217 = vst [vmem:[%s4880_s20 + $0x10] sm:$0xff] %v3149_v10   ;;  %v2525_v31 = vmax.f32 %v2425_v51, 0.0  ;;  %v2602_v25 = vadd.f32 %v4860_v24, %v2563_v26 }
 0x1e6   : > { %v3650_v29 = vpop.f32.mrf.mxu1  ;;  %v2437_v12 = vpop.f32.mrf.mxu0  ;;  %v2296_v51 = vadd.f32 %v3636_v19, %v4728_v34 }
 0x1e7   : > { %v2605_v11 = vadd.f32 %v4860_v24, %v2566_v44  ;;  %v2530_v23 = vmax.f32 %v2446_v32, 0.0  ;;  %v2438_v62 = vadd.f32 %v2437_v12, %v2277_v36  ;;  %v2564_v13 = vmul.f32 %v4844_v4, %v2525_v31  ;;  %v5039_v12 = vld [vmem:[#allocation4_spill] sm:$0xff] }
 0x1e8   : > { %v3652_v9 = vpop.f32.mrf.mxu1  ;;  %v3734_v54 = vpop.f32.mrf.mxu0  ;;  %v3651_v3 = vadd.f32 %v3650_v29, %v3649_v46  ;;  %v3645_v46 = vadd.f32 %v4907_v41, %v4897_v2 }
 0x1e9   : > { %v3164_v30 = vpack.c.bf16 %v2605_v11, %v2604_v52  ;;  %v2449_v61 = vadd.f32 %v3734_v54, %v2288_v33  ;;  %v2603_v38 = vadd.f32 %v4860_v24, %v2564_v13  ;;  %v2528_v63 = vmax.f32 %v2438_v62, 0.0  ;;  %v5040_v13 = vld [vmem:[#allocation2_spill] sm:$0xff] }
 0x1ea   : > { %v3653_v53 = vpop.f32.mrf.mxu1  ;;  %v2440_v59 = vpop.f32.mrf.mxu0  ;;  %v2569_v50 = vmul.f32 %v4844_v4, %v2530_v23  ;;  %v2317_v34 = vadd.f32 %v3651_v3, %v5039_v12  ;;  %v3648_v11 = vadd.f32 %v4922_v57, %v4913_v17 }
 0x1eb   : > { %3220 = vst [vmem:[%s4880_s20 + $0x28] sm:$0xff] %v3164_v30   ;;  %v2531_v40 = vmax.f32 %v2449_v61, 0.0  ;;  %v3159_v43 = vpack.c.bf16 %v2603_v38, %v2602_v25  ;;  %v2441_v39 = vadd.f32 %v2440_v59, %v2280_v47  ;;  %v2567_v22 = vmul.f32 %v4844_v4, %v2528_v63 }
 0x1ec   : > { %v3655_v14 = vpop.f32.mrf.mxu1  ;;  %v3737_v37 = vpop.f32.mrf.mxu0  ;;  %v2608_v58 = vadd.f32 %v4860_v24, %v2569_v50  ;;  %v3654_v21 = vadd.f32 %v3653_v53, %v3652_v9  ;;  %v2309_v9 = vadd.f32 %v3645_v46, %v5040_v13  ;;  %v5046_v13 = vld [vmem:[#allocation7_spill] sm:$0xff] }
 0x1ed   : > { %v2570_v15 = vmul.f32 %v4844_v4, %v2531_v40  ;;  %v2462_v56 = vadd.f32 %v3737_v37, %v2301_v55  ;;  %3219 = vst [vmem:[%s4880_s20 + $0x20] sm:$0xff] %v3159_v43   ;;  %v2529_v1 = vmax.f32 %v2441_v39, 0.0  ;;  %v2606_v42 = vadd.f32 %v4860_v24, %v2567_v22  ;;  %v5042_v43 = vld [vmem:[#allocation3_spill] sm:$0xff] }
 0x1ee   : > { %v3656_v5 = vpop.f32.mrf.mxu1  ;;  %v2453_v7 = vpop.f32.mrf.mxu0  ;;  %v2320_v25 = vadd.f32 %v3654_v21, %v5041_v35  ;;  %v2312_v39 = vadd.f32 %v3648_v11, %v5042_v43 }
 0x1ef   : > { %v2609_v45 = vadd.f32 %v4860_v24, %v2570_v15  ;;  %v2534_v0 = vmax.f32 %v2462_v56, 0.0  ;;  %v2454_v6 = vadd.f32 %v2453_v7, %v2293_v18  ;;  %v2568_v8 = vmul.f32 %v4844_v4, %v2529_v1 }
 0x1f0   : > { %v3658_v10 = vpop.f32.mrf.mxu1  ;;  %v3738_v16 = vpop.f32.mrf.mxu0  ;;  %v3657_v40 = vadd.f32 %v3656_v5, %v3655_v14 }
 0x1f1   : > { %v3174_v48 = vpack.c.bf16 %v2609_v45, %v2608_v58  ;;  %v2465_v44 = vadd.f32 %v3738_v16, %v2304_v20  ;;  %v2607_v32 = vadd.f32 %v4860_v24, %v2568_v8  ;;  %v2573_v36 = vmul.f32 %v4844_v4, %v2534_v0  ;;  %v5043_v20 = vld [vmem:[#allocation8_spill] sm:$0xff]  ;;  %v5044_v16 = vld [vmem:[#allocation6_spill] sm:$0xff] }
 0x1f2   : > { %v2532_v27 = vmax.f32 %v2454_v6, 0.0  ;;  %v3659_v26 = vpop.f32.mrf.mxu1  ;;  %v2456_v31 = vpop.f32.mrf.mxu0 }
 0x1f3   : > { %3222 = vst [vmem:[%s4880_s20 + $0x38] sm:$0xff] %v3174_v48   ;;  %v2535_v29 = vmax.f32 %v2465_v44, 0.0  ;;  %v3169_v33 = vpack.c.bf16 %v2607_v32, %v2606_v42  ;;  %v2457_v52 = vadd.f32 %v2456_v31, %v2296_v51  ;;  %v2612_v54 = vadd.f32 %v4860_v24, %v2573_v36 }
 0x1f4   : > { %v3661_v2 = vpop.f32.mrf.mxu1  ;;  %v3741_v41 = vpop.f32.mrf.mxu0  ;;  %v2571_v49 = vmul.f32 %v4844_v4, %v2532_v27  ;;  %v2325_v51 = vadd.f32 %v3657_v40, %v5044_v16  ;;  %v3660_v46 = vadd.f32 %v3659_v26, %v3658_v10 }
 0x1f5   : > { %v2574_v23 = vmul.f32 %v4844_v4, %v2535_v29  ;;  %v2478_v62 = vadd.f32 %v3741_v41, %v2317_v34  ;;  %3221 = vst [vmem:[%s4880_s20 + $0x30] sm:$0xff] %v3169_v33   ;;  %v2533_v30 = vmax.f32 %v2457_v52, 0.0  ;;  %v5045_v29 = vld [vmem:[#allocation9_spill] sm:$0xff] }
 0x1f6   : > { %v3662_v61 = vpop.f32.mrf.mxu1  ;;  %v2469_v47 = vpop.f32.mrf.mxu0  ;;  %v2610_v37 = vadd.f32 %v4860_v24, %v2571_v49 }
 0x1f7   : > { %v2613_v38 = vadd.f32 %v4860_v24, %v2574_v23  ;;  %v2538_v63 = vmax.f32 %v2478_v62, 0.0  ;;  %v3663_v17 = vadd.f32 %v3662_v61, %v3661_v2  ;;  %v2470_v57 = vadd.f32 %v2469_v47, %v2309_v9 }
 0x1f8   : > { %v2572_v53 = vmul.f32 %v4844_v4, %v2533_v30  ;;  %v3664_v59 = vpop.f32.mrf.mxu1  ;;  %v3742_v50 = vpop.f32.mrf.mxu0  ;;  %v2328_v9 = vadd.f32 %v3660_v46, %v5046_v13 }
 0x1f9   : > { %v3184_v55 = vpack.c.bf16 %v2613_v38, %v2612_v54  ;;  %v2481_v19 = vadd.f32 %v3742_v50, %v2320_v25  ;;  %v2577_v56 = vmul.f32 %v4844_v4, %v2538_v63  ;;  %v2536_v18 = vmax.f32 %v2470_v57, 0.0 }
 0x1fa   : > { %v2611_v15 = vadd.f32 %v4860_v24, %v2572_v53  ;;  %v3665_v3 = vpop.f32.mrf.mxu1  ;;  %v2472_v22 = vpop.f32.mrf.mxu0  ;;  %v2333_v58 = vadd.f32 %v3663_v17, %v5043_v20  ;;  %v5047_v17 = vld [vmem:[#allocation10_spill] sm:$0xff] }
 0x1fb   : > { %3224 = vst [vmem:[%s4880_s20 + $0x48] sm:$0xff] %v3184_v55   ;;  %v2539_v1 = vmax.f32 %v2481_v19, 0.0  ;;  %v3666_v7 = vadd.f32 %v3665_v3, %v3664_v59  ;;  %v2473_v5 = vadd.f32 %v2472_v22, %v2312_v39  ;;  %v2616_v48 = vadd.f32 %v4860_v24, %v2577_v56 }
 0x1fc   : > { %v3179_v14 = vpack.c.bf16 %v2611_v15, %v2610_v37  ;;  %v3667_v45 = vpop.f32.mrf.mxu1  ;;  %v3745_v0 = vpop.f32.mrf.mxu0  ;;  %v2575_v21 = vmul.f32 %v4844_v4, %v2536_v18 }
 0x1fd   : > { %v2578_v6 = vmul.f32 %v4844_v4, %v2539_v1  ;;  %v2494_v8 = vadd.f32 %v3745_v0, %v2333_v58  ;;  %v2537_v44 = vmax.f32 %v2473_v5, 0.0  ;;  %v2336_v12 = vadd.f32 %v3666_v7, %v5045_v29  ;;  %v5048_v1 = vld [vmem:[#allocation11_spill] sm:$0xff] }
 0x1fe   : > { %3223 = vst [vmem:[%s4880_s20 + $0x40] sm:$0xff] %v3179_v14   ;;  %v3668_v42 = vpop.f32.mrf.mxu1  ;;  %v2485_v32 = vpop.f32.mrf.mxu0  ;;  %v2614_v41 = vadd.f32 %v4860_v24, %v2575_v21 }
 0x1ff   : > { %v2617_v36 = vadd.f32 %v4860_v24, %v2578_v6  ;;  %v2542_v27 = vmax.f32 %v2494_v8, 0.0  ;;  %v2486_v31 = vadd.f32 %v2485_v32, %v2325_v51  ;;  %v2576_v34 = vmul.f32 %v4844_v4, %v2537_v44 }
 0x200   : > { %v3670_v33 = vpop.f32.mrf.mxu1  ;;  %v3746_v52 = vpop.f32.mrf.mxu0  ;;  %v3669_v26 = vadd.f32 %v3668_v42, %v3667_v45 }
 0x201   : > { %v3194_v10 = vpack.c.bf16 %v2617_v36, %v2616_v48  ;;  %v2497_v2 = vadd.f32 %v3746_v52, %v2336_v12  ;;  %v2615_v11 = vadd.f32 %v4860_v24, %v2576_v34  ;;  %v2540_v23 = vmax.f32 %v2486_v31, 0.0 }
 0x202   : > { %v3671_v62 = vpop.f32.mrf.mxu1  ;;  %v2488_v54 = vpop.f32.mrf.mxu0  ;;  %v2581_v49 = vmul.f32 %v4844_v4, %v2542_v27  ;;  %v2341_v57 = vadd.f32 %v3669_v26, %v5047_v17 }
 0x203   : > { %3226 = vst [vmem:[%s4880_s20 + $0x58] sm:$0xff] %v3194_v10   ;;  %v2543_v30 = vmax.f32 %v2497_v2, 0.0  ;;  %v3189_v61 = vpack.c.bf16 %v2615_v11, %v2614_v41  ;;  %v2489_v47 = vadd.f32 %v2488_v54, %v2328_v9  ;;  %v3672_v63 = vadd.f32 %v3671_v62, %v3670_v33 }
 0x204   : > { %v3673_v35 = vpop.f32.mrf.mxu1  ;;  %v3749_v25 = vpop.f32.mrf.mxu0  ;;  %v2579_v53 = vmul.f32 %v4844_v4, %v2540_v23  ;;  %v2620_v55 = vadd.f32 %v4860_v24, %v2581_v49 }
 0x205   : > { %v2582_v38 = vmul.f32 %v4844_v4, %v2543_v30  ;;  %3225 = vst [vmem:[%s4880_s20 + $0x50] sm:$0xff] %v3189_v61   ;;  %v2541_v59 = vmax.f32 %v2489_v47, 0.0  ;;  %v2344_v7 = vadd.f32 %v3672_v63, %v5048_v1 }
 0x206   : > { %v3674_v50 = vpop.f32.mrf.mxu1  ;;  %v2501_v40 = vpop.f32.mrf.mxu0  ;;  %v2618_v20 = vadd.f32 %v4860_v24, %v2579_v53 }
 0x207   : > { %v2621_v19 = vadd.f32 %v4860_v24, %v2582_v38  ;;  %v3675_v43 = vadd.f32 %v3674_v50, %v3673_v35  ;;  %v2502_v39 = vadd.f32 %v2501_v40, %v2341_v57  ;;  %v2580_v37 = vmul.f32 %v4844_v4, %v2541_v59 }
 0x208   : > { %v3676_v15 = vpop.f32.mrf.mxu1  ;;  %v3750_v56 = vpop.f32.mrf.mxu0 }
 0x209   : > { %v3204_v18 = vpack.c.bf16 %v2621_v19, %v2620_v55  ;;  %v2349_v3 = vadd.f32 %v3675_v43, %v4821_v28  ;;  %v2544_v22 = vmax.f32 %v2502_v39, 0.0  ;;  %v2619_v58 = vadd.f32 %v4860_v24, %v2580_v37 }
 0x20a   : > { %v3677_v14 = vpop.f32.mrf.mxu1  ;;  %v2504_v5 = vpop.f32.mrf.mxu0 }
 0x20b   : > { %3228 = vst [vmem:[%s4880_s20 + $0x68] sm:$0xff] %v3204_v18   ;;  %v2510_v45 = vadd.f32 %v3749_v25, %v2349_v3  ;;  %v3678_v0 = vadd.f32 %v3677_v14, %v3676_v15  ;;  %v2505_v6 = vadd.f32 %v2504_v5, %v2344_v7  ;;  %v3199_v8 = vpack.c.bf16 %v2619_v58, %v2618_v20 }
 0x20c   : > { %v2583_v51 = vmul.f32 %v4844_v4, %v2544_v22 }
 0x20d   : > { %v2546_v16 = vmax.f32 %v2510_v45, 0.0  ;;  %v2352_v28 = vadd.f32 %v3678_v0, %v4831_v60  ;;  %v2545_v46 = vmax.f32 %v2505_v6, 0.0  ;;  %3227 = vst [vmem:[%s4880_s20 + $0x60] sm:$0xff] %v3199_v8  }
 0x20e   : > { %v2622_v42 = vadd.f32 %v4860_v24, %v2583_v51 }
 0x20f   : > { %v2513_v48 = vadd.f32 %v3750_v56, %v2352_v28  ;;  %v2584_v21 = vmul.f32 %v4844_v4, %v2545_v46  ;;  %v2585_v44 = vmul.f32 %v4844_v4, %v2546_v16 }
 0x211   : > { %v2547_v32 = vmax.f32 %v2513_v48, 0.0  ;;  %v2623_v36 = vadd.f32 %v4860_v24, %v2584_v21  ;;  %v2624_v29 = vadd.f32 %v4860_v24, %v2585_v44 }
 0x213   : > { %v2586_v27 = vmul.f32 %v4844_v4, %v2547_v32  ;;  %v3209_v31 = vpack.c.bf16 %v2623_v36, %v2622_v42 }
 0x215   : > { %v2625_v12 = vadd.f32 %v4860_v24, %v2586_v27  ;;  %3229 = vst [vmem:[%s4880_s20 + $0x70] sm:$0xff] %v3209_v31  }
 0x217   : > { %v3214_v60 = vpack.c.bf16 %v2625_v12, %v2624_v29 }
 0x219   : > { %3230 = vst [vmem:[%s4880_s20 + $0x78] sm:$0xff] %v3214_v60  }
 0x21a PF: > { %s15_s18 = sadd.s32 1, %s4062_s18  }
 0x21b   : > { %p12_p4 = scmp.ge.s32.totalorder %s15_s18, 4  }
 0x21d   :  { %14 = sbr.rel (!%p12_p4) target bundleno = 1 (0x1), region = 70 }

// kernel: bennet_forward.14
= control target key start
LH: loop header
LB: loop body
LE: loop exit
PB: predicated region body
PF: predicated region fallthrough
CT: control target
= control target key end

     0   :  { %14 = vsyncpa [#allocation3], 0  ;;  %s3700_s0 = inlined_call_operand.vmem [shape: bf16[128,1152], index: 0, kind: input, shape index: {}]   ;;  %s3701_s1 = inlined_call_operand.vmem [shape: bf16[1152,128], index: 1, kind: input, shape index: {}]   ;;  %s3702_s2 = inlined_call_operand.vmem [shape: f32[1,128], index: 2, kind: input, shape index: {}]   ;;  %s3703_s3 = inlined_call_operand.hbm [shape: f32[1,128], index: 3, kind: input, shape index: {}]   ;;  %s3704_s4 = inlined_call_operand.hbm [shape: f32[1,128], index: 4, kind: input, shape index: {}]   ;;  %s3705_s5 = inlined_call_operand.vmem [shape: bf16[128,128], index: 5, kind: input, shape index: {}]   ;;  %s3706_s6 = inlined_call_operand.vmem [shape: bf16[128,128], index: 6, kind: input, shape index: {}]   ;;  %s3707_s7 = inlined_call_operand.hbm [shape: f32[1,128], index: 7, kind: input, shape index: {}]   ;;  %s3708_s8 = inlined_call_operand.hbm [shape: f32[1,128], index: 8, kind: input, shape index: {}]   ;;  %s3709_s9 = inlined_call_operand.vmem [shape: bf16[128,128], index: 9, kind: output, shape index: {}]  }
   0x1   :  { %15 = vsyncpa [#allocation5], 0 }
   0x2   :  { %16 = vsyncpa [#allocation8], 0  ;;  %s2926_s30 = smov [#allocation4]   ;;  %s2927_s11 = smov [#allocation2]  }
   0x3   :  { %s39_s10 = sshll.u32 %s2926_s30, 4  ;;  %s29_s12 = sshll.u32 %s2927_s11, 4  ;;  %s40_s10 = int_to_ptr.vmem [resolvable:$true] %s39_s10  ;;  %s30_s12 = int_to_ptr.vmem [resolvable:$true] %s29_s12 }
   0x4   :  { %s2848_s13 = scalar_lea.vmem %s40_s10, 16  ;;  %s2852_s14 = scalar_lea.vmem %s40_s10, 32 }
   0x5   :  { %p2849_p0 = scmp.ne.s32.totalorder %s40_s10, %s2848_s13  ;;  %p2853_p1 = scmp.lt.s32.totalorder %s40_s10, %s40_s10 }
   0x6   :  { %p2854_p2 = scmp.lt.s32.totalorder %s2852_s14, %s2848_s13 }
   0x8   :  { %p2855_p3 = por %p2854_p2, %p2853_p1 }
   0xa   :  { %p2856_p4 = pnand %p2855_p3, %p2849_p0 }
   0xc   :  { %2859 = shalt.err (!%p2856_p4)
}
   0xd   :  { %42 = dma.hbm_to_vmem [thread:$0]  %s3704_s4, 16, %s40_s10, [#allocation5]  }
   0xe   :  { %s2868_s17 = scalar_lea.vmem %s30_s12, 16  ;;  %s2872_s18 = scalar_lea.vmem %s30_s12, 32 }
   0xf   :  { %p2869_p5 = scmp.ne.s32.totalorder %s30_s12, %s2868_s17  ;;  %p2873_p6 = scmp.lt.s32.totalorder %s30_s12, %s30_s12 }
  0x10   :  { %p2874_p7 = scmp.lt.s32.totalorder %s2872_s18, %s2868_s17 }
  0x12   :  { %p2875_p8 = por %p2874_p7, %p2873_p6 }
  0x14   :  { %p2876_p9 = pnand %p2875_p8, %p2869_p5 }
  0x16   :  { %2879 = shalt.err (!%p2876_p9)
}
  0x17   :  { %32 = dma.hbm_to_vmem [thread:$0]  %s3703_s3, 16, %s30_s12, [#allocation3]  }
  0x18   :  { %s2928_s21 = smov [#allocation6]   ;;  %s2929_s23 = smov [#allocation7]  }
  0x19   :  { %s53_s22 = sshll.u32 %s2928_s21, 4  ;;  %s63_s24 = sshll.u32 %s2929_s23, 4  ;;  %s54_s22 = int_to_ptr.vmem [resolvable:$true] %s53_s22  ;;  %s64_s24 = int_to_ptr.vmem [resolvable:$true] %s63_s24 }
  0x1a   :  { %s2888_s25 = scalar_lea.vmem %s54_s22, 16  ;;  %s2892_s4 = scalar_lea.vmem %s54_s22, 32 }
  0x1b   :  { %p2889_p10 = scmp.ne.s32.totalorder %s54_s22, %s2888_s25  ;;  %p2893_p11 = scmp.lt.s32.totalorder %s54_s22, %s54_s22 }
  0x1c   :  { %p2894_p12 = scmp.lt.s32.totalorder %s2892_s4, %s2888_s25 }
  0x1e   :  { %p2895_p13 = por %p2894_p12, %p2893_p11 }
  0x20   :  { %p2896_p0 = pnand %p2895_p13, %p2889_p10 }
  0x22   :  { %2899 = shalt.err (!%p2896_p0)
}
  0x23   :  { %56 = dma.hbm_to_vmem [thread:$0]  %s3707_s7, 16, %s54_s22, [#allocation5]  }
  0x24   :  { %s2908_s28 = scalar_lea.vmem %s64_s24, 16  ;;  %s2912_s3 = scalar_lea.vmem %s64_s24, 32 }
  0x25   :  { %p2909_p1 = scmp.ne.s32.totalorder %s64_s24, %s2908_s28  ;;  %p2913_p2 = scmp.lt.s32.totalorder %s64_s24, %s64_s24 }
  0x26   :  { %p2914_p3 = scmp.lt.s32.totalorder %s2912_s3, %s2908_s28 }
  0x28   :  { %p2915_p4 = por %p2914_p3, %p2913_p2 }
  0x2a   :  { %p2916_p5 = pnand %p2915_p4, %p2909_p1 }
  0x2c   :  { %2919 = shalt.err (!%p2916_p5)
}
  0x2d   :  { %66 = dma.hbm_to_vmem [thread:$0]  %s3708_s8, 16, %s64_s24, [#allocation8]  }
  0x2e   :  { %2920 = dma.done.wait [#allocation3], 16  }
  0x2f   :  { %2921 = vsyncadd [#allocation3], 4294967280 }
  0x30   :  { %2922 = dma.done.wait [#allocation5], 32  }
  0x31   :  { %2923 = vsyncadd [#allocation5], 4294967264 }
  0x32   :  { %2924 = dma.done.wait [#allocation8], 16  }
  0x33   :  { %2925 = vsyncadd [#allocation8], 4294967280  ;;  %v2648_v0 = vld [vmem:[%s3701_s1 + $0x78] sm:$0xff]   ;;  %v2652_v4 = vld [vmem:[%s3701_s1 + $0x70] sm:$0xff]  }
  0x34   :  { %v2649_v1 = vld [vmem:[%s3701_s1 + $0xf8] sm:$0xff]   ;;  %2292 = vmatprep.subr.bf16.mxu0 %v2648_v0  ;;  %v2653_v5 = vld [vmem:[%s3701_s1 + $0xf0] sm:$0xff]   ;;  %v2656_v8 = vld [vmem:[%s3701_s1 + $0x68] sm:$0xff]  }
  0x35   :  { %v2650_v2 = vld [vmem:[%s3701_s1 + $0x38] sm:$0xff]   ;;  %2356 = vmatprep.subr.bf16.mxu1 %v2649_v1  ;;  %v2654_v6 = vld [vmem:[%s3701_s1 + $0x30] sm:$0xff]   ;;  %v2657_v9 = vld [vmem:[%s3701_s1 + $0xe8] sm:$0xff]  }
  0x36   :  { %v2651_v3 = vld [vmem:[%s3701_s1 + $0xb8] sm:$0xff]   ;;  %2293 = vmatpush3.bf16.msra.mxu0 %v2650_v2  ;;  %v2655_v7 = vld [vmem:[%s3701_s1 + $0xb0] sm:$0xff]   ;;  %v2658_v10 = vld [vmem:[%s3701_s1 + $0x28] sm:$0xff]  }
  0x37   :  { %2357 = vmatpush3.bf16.msra.mxu1 %v2651_v3  ;;  %2294 = vmatprep.subr.bf16.mxu0 %v2652_v4  ;;  %v2659_v11 = vld [vmem:[%s3701_s1 + $0xa8] sm:$0xff]   ;;  %v2660_v12 = vld [vmem:[%s3701_s1 + $0x60] sm:$0xff]   ;;  %v2664_v16 = vld [vmem:[%s3701_s1 + $0x58] sm:$0xff]  }
  0x38   :  { %2358 = vmatprep.subr.bf16.mxu1 %v2653_v5  ;;  %v2661_v13 = vld [vmem:[%s3701_s1 + $0xe0] sm:$0xff]   ;;  %v2665_v17 = vld [vmem:[%s3701_s1 + $0xd8] sm:$0xff]   ;;  %v2668_v20 = vld [vmem:[%s3701_s1 + $0x50] sm:$0xff]  }
  0x39   :  { %v2662_v14 = vld [vmem:[%s3701_s1 + $0x20] sm:$0xff]   ;;  %v2666_v18 = vld [vmem:[%s3701_s1 + $0x18] sm:$0xff]   ;;  %v2669_v21 = vld [vmem:[%s3701_s1 + $0xd0] sm:$0xff]  }
  0x3a   :  { %2295 = vmatpush3.bf16.msra.mxu0 %v2654_v6  ;;  %v2663_v15 = vld [vmem:[%s3701_s1 + $0xa0] sm:$0xff]   ;;  %v2667_v19 = vld [vmem:[%s3701_s1 + $0x98] sm:$0xff]   ;;  %v2670_v22 = vld [vmem:[%s3701_s1 + $0x10] sm:$0xff]  }
  0x3b   :  { %2359 = vmatpush3.bf16.msra.mxu1 %v2655_v7  ;;  %2296 = vmatprep.subr.bf16.mxu0 %v2656_v8  ;;  %v2671_v23 = vld [vmem:[%s3701_s1 + $0x90] sm:$0xff]   ;;  %v2672_v24 = vld [vmem:[%s3701_s1 + $0x48] sm:$0xff]   ;;  %v2676_v28 = vld [vmem:[%s3701_s1 + $0x40] sm:$0xff]  }
  0x3c   :  { %2360 = vmatprep.subr.bf16.mxu1 %v2657_v9  ;;  %v2673_v25 = vld [vmem:[%s3701_s1 + $0xc8] sm:$0xff]   ;;  %v2677_v29 = vld [vmem:[%s3701_s1 + $0xc0] sm:$0xff]   ;;  %v2686_v36 = vld [vmem:[%s3701_s1 + $0x178] sm:$0xff]  }
  0x3d   :  { %v2674_v26 = vld [vmem:[%s3701_s1 + $0x8] sm:$0xff]   ;;  %v2678_v30 = vld [vmem:[%s3701_s1] sm:$0xff]   ;;  %v2687_v37 = vld [vmem:[%s3701_s1 + $0x138] sm:$0xff]  }
  0x3e   :  { %2297 = vmatpush3.bf16.msra.mxu0 %v2658_v10  ;;  %v2675_v27 = vld [vmem:[%s3701_s1 + $0x88] sm:$0xff]   ;;  %v2679_v31 = vld [vmem:[%s3701_s1 + $0x80] sm:$0xff]   ;;  %v2688_v38 = vld [vmem:[%s3701_s1 + $0x1f8] sm:$0xff]  }
  0x3f   :  { %2361 = vmatpush3.bf16.msra.mxu1 %v2659_v11  ;;  %2298 = vmatprep.subr.bf16.mxu0 %v2660_v12  ;;  %v2680_v32 = vld [vmem:[%s3700_s0] ss:$36 sps:$4 sm:$0xff]   ;;  %v2683_v34 = vld [vmem:[%s3700_s0 + $0x8] ss:$36 sps:$4 sm:$0xff]   ;;  %v2689_v39 = vld [vmem:[%s3701_s1 + $0x1b8] sm:$0xff]  }
  0x40   :  { %2362 = vmatprep.subr.bf16.mxu1 %v2661_v13  ;;  %v2682_v33 = vld [vmem:[%s3700_s0 + $0x4] ss:$36 sps:$4 sm:$0xff]   ;;  %v2685_v35 = vld [vmem:[%s3700_s0 + $0xc] ss:$36 sps:$4 sm:$0xff]   ;;  %v2692_v41 = vld [vmem:[%s3700_s0 + $0x54] ss:$36 sps:$4 sm:$0xff]  }
  0x41   :  { %1143 = vmatprep.mubr.bf16.mxu0 %v2682_v33  ;;  %1240 = vmatprep.mubr.bf16.mxu1 %v2685_v35  ;;  %v2690_v40 = vld [vmem:[%s3700_s0 + $0x4c] ss:$36 sps:$4 sm:$0xff]   ;;  %v2700_v48 = vld [vmem:[%s3700_s0 + $0x94] ss:$36 sps:$4 sm:$0xff]   ;;  %v2702_v49 = vld [vmem:[%s3700_s0 + $0x9c] ss:$36 sps:$4 sm:$0xff]  }
  0x42   :  { %2299 = vmatpush3.bf16.msra.mxu0 %v2662_v14  ;;  %v2694_v42 = vld [vmem:[%s3700_s0 + $0x48] ss:$36 sps:$4 sm:$0xff]   ;;  %v2695_v43 = vld [vmem:[%s3700_s0 + $0x50] ss:$36 sps:$4 sm:$0xff]   ;;  %v2705_v51 = vld [vmem:[%s3700_s0 + $0x98] ss:$36 sps:$4 sm:$0xff]  }
  0x43   :  { %2363 = vmatpush3.bf16.msra.mxu1 %v2663_v15  ;;  %2300 = vmatprep.subr.bf16.mxu0 %v2664_v16  ;;  %v2696_v44 = vld [vmem:[%s3701_s1 + $0x170] sm:$0xff]   ;;  %v2706_v52 = vld [vmem:[%s3701_s1 + $0x168] sm:$0xff]   ;;  %v2710_v56 = vld [vmem:[%s3700_s0 + $0xdc] ss:$36 sps:$4 sm:$0xff]  }
  0x44   :  { %2364 = vmatprep.subr.bf16.mxu1 %v2665_v17  ;;  %v2697_v45 = vld [vmem:[%s3701_s1 + $0x130] sm:$0xff]   ;;  %v2707_v53 = vld [vmem:[%s3701_s1 + $0x128] sm:$0xff]   ;;  %v2714_v58 = vld [vmem:[%s3700_s0 + $0xd8] ss:$36 sps:$4 sm:$0xff]  }
  0x45   :  { %v2698_v46 = vld [vmem:[%s3701_s1 + $0x1f0] sm:$0xff]   ;;  %v2708_v54 = vld [vmem:[%s3701_s1 + $0x1e8] sm:$0xff]   ;;  %v2715_v59 = vld [vmem:[%s3700_s0 + $0xe0] ss:$36 sps:$4 sm:$0xff]  }
  0x46   :  { %2301 = vmatpush3.bf16.msra.mxu0 %v2666_v18  ;;  %v2699_v47 = vld [vmem:[%s3701_s1 + $0x1b0] sm:$0xff]   ;;  %v2709_v55 = vld [vmem:[%s3701_s1 + $0x1a8] sm:$0xff]   ;;  %v2716_v60 = vld [vmem:[%s3701_s1 + $0x160] sm:$0xff]  }
  0x47   :  { %2365 = vmatpush3.bf16.msra.mxu1 %v2667_v19  ;;  %2302 = vmatprep.subr.bf16.mxu0 %v2668_v20  ;;  %v2704_v50 = vld [vmem:[%s3700_s0 + $0x90] ss:$36 sps:$4 sm:$0xff]   ;;  %v2712_v57 = vld [vmem:[%s3700_s0 + $0xe4] ss:$36 sps:$4 sm:$0xff]   ;;  %v2726_v3 = vld [vmem:[%s3701_s1 + $0x158] sm:$0xff]  }
  0x48   :  { %2366 = vmatprep.subr.bf16.mxu1 %v2669_v21  ;;  %v2717_v61 = vld [vmem:[%s3701_s1 + $0x120] sm:$0xff]   ;;  %v2722_v1 = vld [vmem:[%s3700_s0 + $0x12c] ss:$36 sps:$4 sm:$0xff]   ;;  %v2727_v5 = vld [vmem:[%s3701_s1 + $0x118] sm:$0xff]  }
  0x49   :  { %v2718_v62 = vld [vmem:[%s3701_s1 + $0x1e0] sm:$0xff]   ;;  %v2725_v4 = vld [vmem:[%s3700_s0 + $0x128] ss:$36 sps:$4 sm:$0xff]   ;;  %v2728_v6 = vld [vmem:[%s3701_s1 + $0x1d8] sm:$0xff]  }
  0x4a   :  { %2303 = vmatpush3.bf16.msra.mxu0 %v2670_v22  ;;  %v2719_v63 = vld [vmem:[%s3701_s1 + $0x1a0] sm:$0xff]   ;;  %v2729_v7 = vld [vmem:[%s3701_s1 + $0x198] sm:$0xff]   ;;  %v2730_v8 = vld [vmem:[%s3700_s0 + $0x16c] ss:$36 sps:$4 sm:$0xff]  }
  0x4b   :  { %2367 = vmatpush3.bf16.msra.mxu1 %v2671_v23  ;;  %2304 = vmatprep.subr.bf16.mxu0 %v2672_v24  ;;  %v2720_v0 = vld [vmem:[%s3700_s0 + $0x124] ss:$36 sps:$4 sm:$0xff]   ;;  %v2732_v9 = vld [vmem:[%s3700_s0 + $0x174] ss:$36 sps:$4 sm:$0xff]   ;;  %v2742_v17 = vld [vmem:[%s3700_s0 + $0x1bc] ss:$36 sps:$4 sm:$0xff]  }
  0x4c   :  { %2368 = vmatprep.subr.bf16.mxu1 %v2673_v25  ;;  %v2724_v2 = vld [vmem:[%s3700_s0 + $0x120] ss:$36 sps:$4 sm:$0xff]   ;;  %v2736_v10 = vld [vmem:[%s3701_s1 + $0x150] sm:$0xff]   ;;  %v2734_v12 = vld [vmem:[%s3700_s0 + $0x168] ss:$36 sps:$4 sm:$0xff]  }
  0x4d   :  { %v2737_v11 = vld [vmem:[%s3701_s1 + $0x110] sm:$0xff]   ;;  %v2746_v18 = vld [vmem:[%s3701_s1 + $0x148] sm:$0xff]   ;;  %v2745_v23 = vld [vmem:[%s3700_s0 + $0x1b8] ss:$36 sps:$4 sm:$0xff]  }
  0x4e   :  { %2305 = vmatpush3.bf16.msra.mxu0 %v2674_v26  ;;  %v2738_v13 = vld [vmem:[%s3701_s1 + $0x1d0] sm:$0xff]   ;;  %v2747_v19 = vld [vmem:[%s3701_s1 + $0x108] sm:$0xff]   ;;  %v2750_v24 = vld [vmem:[%s3700_s0 + $0x1fc] ss:$36 sps:$4 sm:$0xff]  }
  0x4f   :  { %2369 = vmatpush3.bf16.msra.mxu1 %v2675_v27  ;;  %2306 = vmatprep.subr.bf16.mxu0 %v2676_v28  ;;  %v2739_v14 = vld [vmem:[%s3701_s1 + $0x190] sm:$0xff]   ;;  %v2748_v20 = vld [vmem:[%s3701_s1 + $0x1c8] sm:$0xff]   ;;  %v2756_v26 = vld [vmem:[%s3701_s1 + $0x140] sm:$0xff]  }
  0x50   :  { %2370 = vmatprep.subr.bf16.mxu1 %v2677_v29  ;;  %v2735_v15 = vld [vmem:[%s3700_s0 + $0x170] ss:$36 sps:$4 sm:$0xff]   ;;  %v2749_v21 = vld [vmem:[%s3701_s1 + $0x188] sm:$0xff]   ;;  %v2757_v27 = vld [vmem:[%s3701_s1 + $0x100] sm:$0xff]  }
  0x51   :  { %v2740_v16 = vld [vmem:[%s3700_s0 + $0x1b4] ss:$36 sps:$4 sm:$0xff]   ;;  %v2752_v25 = vld [vmem:[%s3700_s0 + $0x204] ss:$36 sps:$4 sm:$0xff]   ;;  %v2765_v35 = vld [vmem:[%s3700_s0 + $0x1c] ss:$36 sps:$4 sm:$0xff]  }
  0x52   :  { %2307 = vmatpush3.bf16.msra.mxu0 %v2678_v30  ;;  %v2744_v22 = vld [vmem:[%s3700_s0 + $0x1b0] ss:$36 sps:$4 sm:$0xff]   ;;  %v2758_v28 = vld [vmem:[%s3701_s1 + $0x1c0] sm:$0xff]   ;;  %v2754_v30 = vld [vmem:[%s3700_s0 + $0x1f8] ss:$36 sps:$4 sm:$0xff]  }
  0x53   :  { %2371 = vmatpush3.bf16.msra.mxu1 %v2679_v31  ;;  %2420 = vmatprep.subr.bf16.mxu0 %v2686_v36  ;;  %v2759_v29 = vld [vmem:[%s3701_s1 + $0x180] sm:$0xff]   ;;  %v2766_v33 = vld [vmem:[%s3701_s1 + $0x238] sm:$0xff]   ;;  %v2760_v36 = vld [vmem:[%s3700_s0 + $0x10] ss:$36 sps:$4 sm:$0xff]  }
  0x54   :  { %2484 = vmatprep.subr.bf16.mxu1 %v2688_v38  ;;  %v2755_v31 = vld [vmem:[%s3700_s0 + $0x200] ss:$36 sps:$4 sm:$0xff]  }
  0x55   :  { %1144 = vmatmul.mubr.bf16.vlgmr.msra.gmra.mxu0 %v2680_v32  ;;  %v2762_v32 = vld [vmem:[%s3700_s0 + $0x14] ss:$36 sps:$4 sm:$0xff]   ;;  %v2768_v38 = vld [vmem:[%s3700_s0 + $0x5c] ss:$36 sps:$4 sm:$0xff]  }
  0x56   :  { %1241 = vmatmul.mubr.bf16.vlgmr.msra.gmra.mxu1 %v2683_v34  ;;  %2421 = vmatpush3.bf16.msra.mxu0 %v2687_v37  ;;  %v2767_v34 = vld [vmem:[%s3706_s6 + $0x38] sm:$0xff]  }
  0x57   :  { %2485 = vmatpush3.bf16.msra.mxu1 %v2689_v39  ;;  %1151 = vmatprep.mubr.bf16.mxu0 %v2690_v40  ;;  %v2763_v37 = vld [vmem:[%s3700_s0 + $0x18] ss:$36 sps:$4 sm:$0xff]   ;;  %v2770_v39 = vld [vmem:[%s3700_s0 + $0x64] ss:$36 sps:$4 sm:$0xff]   ;;  %v2774_v40 = vld [vmem:[%s3701_s1 + $0x230] sm:$0xff]  }
  0x58   :  { %1248 = vmatprep.mubr.bf16.mxu1 %v2692_v41  ;;  %2422 = vmatprep.subr.bf16.mxu0 %v2696_v44  ;;  %v2775_v41 = vld [vmem:[%s3706_s6 + $0x30] sm:$0xff]   ;;  %v2783_v44 = vld [vmem:[%s3706_s6 + $0x28] sm:$0xff]  }
  0x59   :  { %2486 = vmatprep.subr.bf16.mxu1 %v2698_v46  ;;  %v2776_v46 = vld [vmem:[%s3700_s0 + $0xa4] ss:$36 sps:$4 sm:$0xff]  }
  0x5a   :  { %2423 = vmatpush3.bf16.msra.mxu0 %v2697_v45  ;;  %v2773_v45 = vld [vmem:[%s3700_s0 + $0x60] ss:$36 sps:$4 sm:$0xff]  }
  0x5b   :  { %2487 = vmatpush3.bf16.msra.mxu1 %v2699_v47  ;;  %2424 = vmatprep.subr.bf16.mxu0 %v2706_v52  ;;  %v2778_v47 = vld [vmem:[%s3700_s0 + $0xac] ss:$36 sps:$4 sm:$0xff]   ;;  %v2798_v52 = vld [vmem:[%s3701_s1 + $0x218] sm:$0xff]  }
  0x5c   :  { %2488 = vmatprep.subr.bf16.mxu1 %v2708_v54  ;;  %v2784_v54 = vld [vmem:[%s3700_s0 + $0xec] ss:$36 sps:$4 sm:$0xff]  }
  0x5d   :  { %1152 = vmatmul.mubr.bf16.gmra.mxu0 %v2694_v42  ;;  %v2772_v42 = vld [vmem:[%s3700_s0 + $0x58] ss:$36 sps:$4 sm:$0xff]  }
  0x5e   :  { %1249 = vmatmul.mubr.bf16.gmra.mxu1 %v2695_v43  ;;  %1159 = vmatprep.mubr.bf16.mxu0 %v2700_v48  ;;  %v2782_v43 = vld [vmem:[%s3701_s1 + $0x228] sm:$0xff]   ;;  %v2790_v48 = vld [vmem:[%s3701_s1 + $0x220] sm:$0xff]  }
  0x5f   :  { %1256 = vmatprep.mubr.bf16.mxu1 %v2702_v49  ;;  %2425 = vmatpush3.bf16.msra.mxu0 %v2707_v53  ;;  %v2791_v49 = vld [vmem:[%s3706_s6 + $0x20] sm:$0xff]   ;;  %v2799_v53 = vld [vmem:[%s3706_s6 + $0x18] sm:$0xff]  }
  0x60   :  { %2489 = vmatpush3.bf16.msra.mxu1 %v2709_v55  ;;  %2426 = vmatprep.subr.bf16.mxu0 %v2716_v60  ;;  %v2786_v55 = vld [vmem:[%s3700_s0 + $0xf4] ss:$36 sps:$4 sm:$0xff]  }
  0x61   :  { %2490 = vmatprep.subr.bf16.mxu1 %v2718_v62  ;;  %v2789_v60 = vld [vmem:[%s3700_s0 + $0xf0] ss:$36 sps:$4 sm:$0xff]  }
  0x62   :  { %v2792_v62 = vld [vmem:[%s3700_s0 + $0x134] ss:$36 sps:$4 sm:$0xff]  }
  0x63   :  { %2427 = vmatpush3.bf16.msra.mxu0 %v2717_v61  ;;  %v2815_v61 = vld [vmem:[%s3706_s6 + $0x8] sm:$0xff]  }
  0x64   :  { %2491 = vmatpush3.bf16.msra.mxu1 %v2719_v63  ;;  %2428 = vmatprep.subr.bf16.mxu0 %v2726_v3  ;;  %v2794_v63 = vld [vmem:[%s3700_s0 + $0x13c] ss:$36 sps:$4 sm:$0xff]  }
  0x65   :  { %1160 = vmatmul.mubr.bf16.gmra.mxu0 %v2704_v50  ;;  %2492 = vmatprep.subr.bf16.mxu1 %v2728_v6  ;;  %v2780_v50 = vld [vmem:[%s3700_s0 + $0xa0] ss:$36 sps:$4 sm:$0xff]   ;;  %v2797_v3 = vld [vmem:[%s3700_s0 + $0x138] ss:$36 sps:$4 sm:$0xff]  }
  0x66   :  { %1257 = vmatmul.mubr.bf16.gmra.mxu1 %v2705_v51  ;;  %1167 = vmatprep.mubr.bf16.mxu0 %v2710_v56  ;;  %v2781_v51 = vld [vmem:[%s3700_s0 + $0xa8] ss:$36 sps:$4 sm:$0xff]   ;;  %v2806_v56 = vld [vmem:[%s3701_s1 + $0x210] sm:$0xff]   ;;  %v2804_v6 = vld [vmem:[%s3700_s0 + $0x178] ss:$36 sps:$4 sm:$0xff]  }
  0x67   :  { %1264 = vmatprep.mubr.bf16.mxu1 %v2712_v57  ;;  %2429 = vmatpush3.bf16.msra.mxu0 %v2727_v5  ;;  %v2807_v57 = vld [vmem:[%s3706_s6 + $0x10] sm:$0xff]   ;;  %v2802_v5 = vld [vmem:[%s3700_s0 + $0x184] ss:$36 sps:$4 sm:$0xff]  }
  0x68   :  { %2493 = vmatpush3.bf16.msra.mxu1 %v2729_v7  ;;  %2430 = vmatprep.subr.bf16.mxu0 %v2736_v10  ;;  %v2805_v7 = vld [vmem:[%s3700_s0 + $0x180] ss:$36 sps:$4 sm:$0xff]  }
  0x69   :  { %2494 = vmatprep.subr.bf16.mxu1 %v2738_v13  ;;  %v2812_v10 = vld [vmem:[%s3700_s0 + $0x1c0] ss:$36 sps:$4 sm:$0xff]   ;;  %v2818_v13 = vld [vmem:[%s3700_s0 + $0x214] ss:$36 sps:$4 sm:$0xff]  }
  0x6b   :  { %2431 = vmatpush3.bf16.msra.mxu0 %v2737_v11  ;;  %v2813_v11 = vld [vmem:[%s3700_s0 + $0x1c8] ss:$36 sps:$4 sm:$0xff]  }
  0x6c   :  { %2495 = vmatpush3.bf16.msra.mxu1 %v2739_v14  ;;  %2432 = vmatprep.subr.bf16.mxu0 %v2746_v18  ;;  %v2820_v14 = vld [vmem:[%s3700_s0 + $0x208] ss:$36 sps:$4 sm:$0xff]  }
  0x6d   :  { %1168 = vmatmul.mubr.bf16.gmra.mxu0 %v2714_v58  ;;  %2496 = vmatprep.subr.bf16.mxu1 %v2748_v20  ;;  %v2788_v58 = vld [vmem:[%s3700_s0 + $0xe8] ss:$36 sps:$4 sm:$0xff]   ;;  %v2828_v20 = vld [vmem:[%s3700_s0 + $0xb0] ss:$36 sps:$4 sm:$0xff]  }
  0x6e   :  { %1265 = vmatmul.mubr.bf16.gmra.mxu1 %v2715_v59  ;;  %1175 = vmatprep.mubr.bf16.mxu0 %v2720_v0  ;;  %v2814_v59 = vld [vmem:[%s3701_s1 + $0x208] sm:$0xff]   ;;  %v2822_v0 = vld [vmem:[%s3701_s1 + $0x200] sm:$0xff]  }
  0x6f   :  { %1272 = vmatprep.mubr.bf16.mxu1 %v2722_v1  ;;  %2433 = vmatpush3.bf16.msra.mxu0 %v2747_v19  ;;  %v2823_v1 = vld [vmem:[%s3706_s6] sm:$0xff]   ;;  %v2826_v18 = vld [vmem:[%s3700_s0 + $0x68] ss:$36 sps:$4 sm:$0xff]  }
  0x70   :  { %2497 = vmatpush3.bf16.msra.mxu1 %v2749_v21  ;;  %2434 = vmatprep.subr.bf16.mxu0 %v2756_v26  ;;  %v2827_v19 = vld [vmem:[%s3705_s5 + $0x8] sm:$0xff]   ;;  %v2829_v21 = vld [vmem:[%s3705_s5 + $0x10] sm:$0xff]  }
  0x71   :  { %2498 = vmatprep.subr.bf16.mxu1 %v2758_v28  ;;  %v2834_v26 = vld [vmem:[%s3700_s0 + $0x188] ss:$36 sps:$4 sm:$0xff]   ;;  %v2836_v28 = vld [vmem:[%s3700_s0 + $0x1d0] ss:$36 sps:$4 sm:$0xff]  }
  0x73   :  { %2435 = vmatpush3.bf16.msra.mxu0 %v2757_v27  ;;  %v2835_v27 = vld [vmem:[%s3705_s5 + $0x28] sm:$0xff]  }
  0x74   :  { %2499 = vmatpush3.bf16.msra.mxu1 %v2759_v29  ;;  %2580 = vmatprep.subr.bf16.mxu0 %v2766_v33  ;;  %v2837_v29 = vld [vmem:[%s3705_s5 + $0x30] sm:$0xff]  }
  0x75   :  { %1176 = vmatmul.mubr.bf16.gmra.mxu0 %v2724_v2  ;;  %2612 = vmatprep.subr.bf16.mxu1 %v2767_v34  ;;  %v2796_v2 = vld [vmem:[%s3700_s0 + $0x130] ss:$36 sps:$4 sm:$0xff]  }
  0x76   :  { %1273 = vmatmul.mubr.bf16.gmra.mxu1 %v2725_v4  ;;  %1183 = vmatprep.mubr.bf16.mxu0 %v2730_v8  ;;  %v2800_v4 = vld [vmem:[%s3700_s0 + $0x17c] ss:$36 sps:$4 sm:$0xff]   ;;  %v2808_v8 = vld [vmem:[%s3700_s0 + $0x1c4] ss:$36 sps:$4 sm:$0xff]  }
  0x77   :  { %1280 = vmatprep.mubr.bf16.mxu1 %v2732_v9  ;;  %v2810_v9 = vld [vmem:[%s3700_s0 + $0x1cc] ss:$36 sps:$4 sm:$0xff]  }
  0x7d   :  { %1184 = vmatmul.mubr.bf16.gmra.mxu0 %v2734_v12  ;;  %v2816_v12 = vld [vmem:[%s3700_s0 + $0x20c] ss:$36 sps:$4 sm:$0xff]  }
  0x7e   :  { %1281 = vmatmul.mubr.bf16.gmra.mxu1 %v2735_v15  ;;  %1191 = vmatprep.mubr.bf16.mxu0 %v2740_v16  ;;  %v2821_v15 = vld [vmem:[%s3700_s0 + $0x210] ss:$36 sps:$4 sm:$0xff]   ;;  %v2824_v16 = vld [vmem:[%s3700_s0 + $0x20] ss:$36 sps:$4 sm:$0xff]  }
  0x7f   :  { %1288 = vmatprep.mubr.bf16.mxu1 %v2742_v17  ;;  %v2825_v17 = vld [vmem:[%s3705_s5] sm:$0xff]  }
  0x85   :  { %1192 = vmatmul.mubr.bf16.gmra.mxu0 %v2744_v22  ;;  %v2830_v22 = vld [vmem:[%s3700_s0 + $0xf8] ss:$36 sps:$4 sm:$0xff]  }
  0x86   :  { %1289 = vmatmul.mubr.bf16.gmra.mxu1 %v2745_v23  ;;  %1199 = vmatprep.mubr.bf16.mxu0 %v2750_v24  ;;  %v2831_v23 = vld [vmem:[%s3705_s5 + $0x18] sm:$0xff]   ;;  %v2832_v24 = vld [vmem:[%s3700_s0 + $0x140] ss:$36 sps:$4 sm:$0xff]  }
  0x87   :  { %1296 = vmatprep.mubr.bf16.mxu1 %v2752_v25  ;;  %v2833_v25 = vld [vmem:[%s3705_s5 + $0x20] sm:$0xff]  }
  0x8d   :  { %1200 = vmatmul.mubr.bf16.gmra.mxu0 %v2754_v30  ;;  %v2838_v30 = vld [vmem:[%s3700_s0 + $0x218] ss:$36 sps:$4 sm:$0xff]  }
  0x8e   :  { %1297 = vmatmul.mubr.bf16.gmra.mxu1 %v2755_v31  ;;  %1337 = vmatprep.mubr.bf16.mxu0 %v2762_v32  ;;  %v2839_v31 = vld [vmem:[%s3705_s5 + $0x38] sm:$0xff]  }
  0x8f   :  { %1434 = vmatprep.mubr.bf16.mxu1 %v2765_v35 }
  0x95   :  { %1338 = vmatmul.mubr.bf16.vlgmr.msra.gmra.mxu0 %v2760_v36 }
  0x96   :  { %1435 = vmatmul.mubr.bf16.vlgmr.msra.gmra.mxu1 %v2763_v37  ;;  %2581 = vmatpush3.bf16.msra.mxu0 %v2766_v33 }
  0x97   :  { %2613 = vmatpush3.bf16.msra.mxu1 %v2767_v34  ;;  %1345 = vmatprep.mubr.bf16.mxu0 %v2768_v38  ;;  %v3475_v34 = vld [vmem:[%s3702_s2] ss:$0 sm:$0xff] }
  0x98   :  { %1442 = vmatprep.mubr.bf16.mxu1 %v2770_v39  ;;  %2582 = vmatprep.subr.bf16.mxu0 %v2774_v40 }
  0x99   :  { %2614 = vmatprep.subr.bf16.mxu1 %v2775_v41 }
  0x9a   :  { %2583 = vmatpush3.bf16.msra.mxu0 %v2774_v40 }
  0x9b   :  { %2615 = vmatpush3.bf16.msra.mxu1 %v2775_v41  ;;  %2584 = vmatprep.subr.bf16.mxu0 %v2782_v43 }
  0x9c   :  { %2616 = vmatprep.subr.bf16.mxu1 %v2783_v44 }
  0x9d   :  { %1346 = vmatmul.mubr.bf16.gmra.mxu0 %v2772_v42 }
  0x9e   :  { %1443 = vmatmul.mubr.bf16.gmra.mxu1 %v2773_v45  ;;  %1353 = vmatprep.mubr.bf16.mxu0 %v2776_v46 }
  0x9f   :  { %1450 = vmatprep.mubr.bf16.mxu1 %v2778_v47  ;;  %2585 = vmatpush3.bf16.msra.mxu0 %v2782_v43 }
  0xa0   :  { %2617 = vmatpush3.bf16.msra.mxu1 %v2783_v44  ;;  %2586 = vmatprep.subr.bf16.mxu0 %v2790_v48 }
  0xa1   :  { %2618 = vmatprep.subr.bf16.mxu1 %v2791_v49 }
  0xa3   :  { %2587 = vmatpush3.bf16.msra.mxu0 %v2790_v48 }
  0xa4   :  { %2619 = vmatpush3.bf16.msra.mxu1 %v2791_v49  ;;  %2588 = vmatprep.subr.bf16.mxu0 %v2798_v52 }
  0xa5   :  { %1354 = vmatmul.mubr.bf16.gmra.mxu0 %v2780_v50  ;;  %2620 = vmatprep.subr.bf16.mxu1 %v2799_v53 }
  0xa6   :  { %1451 = vmatmul.mubr.bf16.gmra.mxu1 %v2781_v51  ;;  %1361 = vmatprep.mubr.bf16.mxu0 %v2784_v54 }
  0xa7   :  { %1458 = vmatprep.mubr.bf16.mxu1 %v2786_v55  ;;  %2589 = vmatpush3.bf16.msra.mxu0 %v2798_v52 }
  0xa8   :  { %2621 = vmatpush3.bf16.msra.mxu1 %v2799_v53  ;;  %2590 = vmatprep.subr.bf16.mxu0 %v2806_v56 }
  0xa9   :  { %2622 = vmatprep.subr.bf16.mxu1 %v2807_v57 }
  0xab   :  { %2591 = vmatpush3.bf16.msra.mxu0 %v2806_v56 }
  0xac   :  { %2623 = vmatpush3.bf16.msra.mxu1 %v2807_v57  ;;  %2592 = vmatprep.subr.bf16.mxu0 %v2814_v59 }
  0xad   :  { %1362 = vmatmul.mubr.bf16.gmra.mxu0 %v2788_v58  ;;  %2624 = vmatprep.subr.bf16.mxu1 %v2815_v61 }
  0xae   :  { %1459 = vmatmul.mubr.bf16.gmra.mxu1 %v2789_v60  ;;  %1369 = vmatprep.mubr.bf16.mxu0 %v2792_v62 }
  0xaf   :  { %1466 = vmatprep.mubr.bf16.mxu1 %v2794_v63  ;;  %2593 = vmatpush3.bf16.msra.mxu0 %v2814_v59 }
  0xb0   :  { %2625 = vmatpush3.bf16.msra.mxu1 %v2815_v61  ;;  %2594 = vmatprep.subr.bf16.mxu0 %v2822_v0 }
  0xb1   :  { %2626 = vmatprep.subr.bf16.mxu1 %v2823_v1 }
  0xb3   :  { %2595 = vmatpush3.bf16.msra.mxu0 %v2822_v0 }
  0xb4   :  { %2627 = vmatpush3.bf16.msra.mxu1 %v2823_v1 }
  0xb5   :  { %1370 = vmatmul.mubr.bf16.gmra.mxu0 %v2796_v2 }
  0xb6   :  { %1467 = vmatmul.mubr.bf16.gmra.mxu1 %v2797_v3  ;;  %1377 = vmatprep.mubr.bf16.mxu0 %v2800_v4 }
  0xb7   :  { %1474 = vmatprep.mubr.bf16.mxu1 %v2802_v5 }
  0xbd   :  { %1378 = vmatmul.mubr.bf16.gmra.mxu0 %v2804_v6 }
  0xbe   :  { %1475 = vmatmul.mubr.bf16.gmra.mxu1 %v2805_v7  ;;  %1385 = vmatprep.mubr.bf16.mxu0 %v2808_v8 }
  0xbf   :  { %1482 = vmatprep.mubr.bf16.mxu1 %v2810_v9 }
  0xc5   :  { %1386 = vmatmul.mubr.bf16.gmra.mxu0 %v2812_v10 }
  0xc6   :  { %1483 = vmatmul.mubr.bf16.gmra.mxu1 %v2813_v11  ;;  %1393 = vmatprep.mubr.bf16.mxu0 %v2816_v12 }
  0xc7   :  { %1490 = vmatprep.mubr.bf16.mxu1 %v2818_v13 }
  0xcd   :  { %1394 = vmatmul.mubr.bf16.gmra.mxu0 %v2820_v14 }
  0xce   :  { %1491 = vmatmul.mubr.bf16.gmra.mxu1 %v2821_v15  ;;  %2596 = vmatprep.mubr.bf16.mxu0 %v2824_v16 }
  0xcf   :  { %2628 = vmatprep.mubr.bf16.mxu1 %v2825_v17 }
  0xd5   :  { %2597 = vmatmul.mubr.bf16.vlgmr.msra.gmra.mxu0 %v2826_v18 }
  0xd6   :  { %2629 = vmatmul.mubr.bf16.vlgmr.msra.gmra.mxu1 %v2827_v19  ;;  %2600 = vmatprep.mubr.bf16.mxu0 %v2828_v20 }
  0xd7   :  { %2632 = vmatprep.mubr.bf16.mxu1 %v2829_v21 }
  0xdd   :  { %2601 = vmatmul.mubr.bf16.gmra.mxu0 %v2830_v22 }
  0xde   :  { %2633 = vmatmul.mubr.bf16.gmra.mxu1 %v2831_v23  ;;  %2604 = vmatprep.mubr.bf16.mxu0 %v2832_v24 }
  0xdf   :  { %2636 = vmatprep.mubr.bf16.mxu1 %v2833_v25 }
  0xe5   :  { %2605 = vmatmul.mubr.bf16.gmra.mxu0 %v2834_v26 }
  0xe6   :  { %2637 = vmatmul.mubr.bf16.gmra.mxu1 %v2835_v27  ;;  %2608 = vmatprep.mubr.bf16.mxu0 %v2836_v28 }
  0xe7   :  { %2640 = vmatprep.mubr.bf16.mxu1 %v2837_v29 }
  0xed   :  { %2609 = vmatmul.mubr.bf16.gmra.mxu0 %v2838_v30 }
  0xee   :  { %2641 = vmatmul.mubr.bf16.gmra.mxu1 %v2839_v31 }
 0x115   :  { %v2308_v32 = vpop.f32.mrf.mxu0 }
 0x116   :  { %v2372_v33 = vpop.f32.mrf.mxu1 }
 0x117   :  { %v2309_v35 = vpop.f32.mrf.mxu0 }
 0x118   :  { %v2310_v36 = vadd.f32 %v2309_v35, %v2308_v32  ;;  %v2373_v37 = vpop.f32.mrf.mxu1 }
 0x119   :  { %v2374_v38 = vadd.f32 %v2373_v37, %v2372_v33  ;;  %v2311_v39 = vpop.f32.mrf.mxu0 }
 0x11a   :  { %v1146_v40 = vadd.f32 %v2310_v36, %v3475_v34  ;;  %v2375_v41 = vpop.f32.mrf.mxu1 }
 0x11b   :  { %v2312_v42 = vpop.f32.mrf.mxu0 }
 0x11c   :  { %v3478_v43 = vadd.f32 %v2374_v38, %v1146_v40  ;;  %v2313_v44 = vadd.f32 %v2312_v42, %v2311_v39  ;;  %v2376_v45 = vpop.f32.mrf.mxu1 }
 0x11d   :  { %v2377_v46 = vadd.f32 %v2376_v45, %v2375_v41  ;;  %v2314_v47 = vpop.f32.mrf.mxu0 }
 0x11e   :  { %v1149_v48 = vadd.f32 %v2313_v44, %v3475_v34  ;;  %v2378_v49 = vpop.f32.mrf.mxu1 }
 0x11f   :  { %v2315_v50 = vpop.f32.mrf.mxu0 }
 0x120   :  { %v3481_v51 = vadd.f32 %v2377_v46, %v1149_v48  ;;  %v2316_v52 = vadd.f32 %v2315_v50, %v2314_v47  ;;  %v2379_v53 = vpop.f32.mrf.mxu1 }
 0x121   :  { %v2380_v54 = vadd.f32 %v2379_v53, %v2378_v49  ;;  %v2317_v55 = vpop.f32.mrf.mxu0 }
 0x122   :  { %v1154_v56 = vadd.f32 %v2316_v52, %v3475_v34  ;;  %v2381_v57 = vpop.f32.mrf.mxu1 }
 0x123   :  { %v2318_v58 = vpop.f32.mrf.mxu0 }
 0x124   :  { %v3484_v59 = vadd.f32 %v2380_v54, %v1154_v56  ;;  %v2319_v60 = vadd.f32 %v2318_v58, %v2317_v55  ;;  %v2382_v61 = vpop.f32.mrf.mxu1 }
 0x125   :  { %v2383_v62 = vadd.f32 %v2382_v61, %v2381_v57  ;;  %v2320_v63 = vpop.f32.mrf.mxu0 }
 0x126   :  { %v1157_v0 = vadd.f32 %v2319_v60, %v3475_v34  ;;  %v2384_v1 = vpop.f32.mrf.mxu1 }
 0x127   :  { %v2321_v2 = vpop.f32.mrf.mxu0 }
 0x128   :  { %v3487_v3 = vadd.f32 %v2383_v62, %v1157_v0  ;;  %v2322_v4 = vadd.f32 %v2321_v2, %v2320_v63  ;;  %v2385_v5 = vpop.f32.mrf.mxu1 }
 0x129   :  { %v2386_v6 = vadd.f32 %v2385_v5, %v2384_v1  ;;  %v2323_v7 = vpop.f32.mrf.mxu0 }
 0x12a   :  { %v1162_v8 = vadd.f32 %v2322_v4, %v3475_v34  ;;  %v2387_v9 = vpop.f32.mrf.mxu1 }
 0x12b   :  { %v2324_v10 = vpop.f32.mrf.mxu0 }
 0x12c   :  { %v3490_v11 = vadd.f32 %v2386_v6, %v1162_v8  ;;  %v2325_v12 = vadd.f32 %v2324_v10, %v2323_v7  ;;  %v2388_v13 = vpop.f32.mrf.mxu1 }
 0x12d   :  { %v2389_v14 = vadd.f32 %v2388_v13, %v2387_v9  ;;  %v2326_v15 = vpop.f32.mrf.mxu0 }
 0x12e   :  { %v1165_v16 = vadd.f32 %v2325_v12, %v3475_v34  ;;  %v2390_v17 = vpop.f32.mrf.mxu1 }
 0x12f   :  { %v2327_v18 = vpop.f32.mrf.mxu0 }
 0x130   :  { %v3493_v19 = vadd.f32 %v2389_v14, %v1165_v16  ;;  %v2328_v20 = vadd.f32 %v2327_v18, %v2326_v15  ;;  %v2391_v21 = vpop.f32.mrf.mxu1 }
 0x131   :  { %v2392_v22 = vadd.f32 %v2391_v21, %v2390_v17  ;;  %v2329_v23 = vpop.f32.mrf.mxu0 }
 0x132   :  { %v1170_v24 = vadd.f32 %v2328_v20, %v3475_v34  ;;  %v2393_v25 = vpop.f32.mrf.mxu1 }
 0x133   :  { %v2330_v26 = vpop.f32.mrf.mxu0 }
 0x134   :  { %v3496_v27 = vadd.f32 %v2392_v22, %v1170_v24  ;;  %v2331_v28 = vadd.f32 %v2330_v26, %v2329_v23  ;;  %v2394_v29 = vpop.f32.mrf.mxu1 }
 0x135   :  { %v2395_v30 = vadd.f32 %v2394_v29, %v2393_v25  ;;  %v2332_v31 = vpop.f32.mrf.mxu0 }
 0x136   :  { %v1173_v32 = vadd.f32 %v2331_v28, %v3475_v34  ;;  %v2396_v33 = vpop.f32.mrf.mxu1 }
 0x137   :  { %v2333_v35 = vpop.f32.mrf.mxu0 }
 0x138   :  { %v3499_v36 = vadd.f32 %v2395_v30, %v1173_v32  ;;  %v2334_v37 = vadd.f32 %v2333_v35, %v2332_v31  ;;  %v2397_v38 = vpop.f32.mrf.mxu1 }
 0x139   :  { %v2398_v39 = vadd.f32 %v2397_v38, %v2396_v33  ;;  %v2335_v40 = vpop.f32.mrf.mxu0 }
 0x13a   :  { %3710 = vst [vmem:[#allocation12_spill] sm:$0xff] %v3499_v36  ;;  %v1178_v41 = vadd.f32 %v2334_v37, %v3475_v34  ;;  %v2399_v42 = vpop.f32.mrf.mxu1 }
 0x13b   :  { %v2336_v44 = vpop.f32.mrf.mxu0 }
 0x13c   :  { %v3502_v45 = vadd.f32 %v2398_v39, %v1178_v41  ;;  %v2337_v46 = vadd.f32 %v2336_v44, %v2335_v40  ;;  %v2400_v47 = vpop.f32.mrf.mxu1 }
 0x13d   :  { %v2401_v48 = vadd.f32 %v2400_v47, %v2399_v42  ;;  %v2338_v49 = vpop.f32.mrf.mxu0 }
 0x13e   :  { %3711 = vst [vmem:[#allocation13_spill] sm:$0xff] %v3502_v45  ;;  %v1181_v50 = vadd.f32 %v2337_v46, %v3475_v34  ;;  %v2402_v52 = vpop.f32.mrf.mxu1 }
 0x13f   :  { %v2339_v53 = vpop.f32.mrf.mxu0 }
 0x140   :  { %v3505_v54 = vadd.f32 %v2401_v48, %v1181_v50  ;;  %v2340_v55 = vadd.f32 %v2339_v53, %v2338_v49  ;;  %v2403_v56 = vpop.f32.mrf.mxu1 }
 0x141   :  { %v2404_v57 = vadd.f32 %v2403_v56, %v2402_v52  ;;  %v2341_v58 = vpop.f32.mrf.mxu0 }
 0x142   :  { %3712 = vst [vmem:[#allocation14_spill] sm:$0xff] %v3505_v54  ;;  %v1186_v60 = vadd.f32 %v2340_v55, %v3475_v34  ;;  %v2405_v61 = vpop.f32.mrf.mxu1 }
 0x143   :  { %v2342_v62 = vpop.f32.mrf.mxu0 }
 0x144   :  { %v3508_v63 = vadd.f32 %v2404_v57, %v1186_v60  ;;  %v2343_v0 = vadd.f32 %v2342_v62, %v2341_v58  ;;  %v2406_v1 = vpop.f32.mrf.mxu1 }
 0x145   :  { %v2407_v2 = vadd.f32 %v2406_v1, %v2405_v61  ;;  %v2344_v4 = vpop.f32.mrf.mxu0 }
 0x146   :  { %3713 = vst [vmem:[#allocation15_spill] sm:$0xff] %v3508_v63  ;;  %v1189_v5 = vadd.f32 %v2343_v0, %v3475_v34  ;;  %v2408_v6 = vpop.f32.mrf.mxu1 }
 0x147   :  { %v2345_v7 = vpop.f32.mrf.mxu0 }
 0x148   :  { %v3511_v8 = vadd.f32 %v2407_v2, %v1189_v5  ;;  %v2346_v9 = vadd.f32 %v2345_v7, %v2344_v4  ;;  %v2409_v10 = vpop.f32.mrf.mxu1 }
 0x149   :  { %v2410_v12 = vadd.f32 %v2409_v10, %v2408_v6  ;;  %v2347_v13 = vpop.f32.mrf.mxu0 }
 0x14a   :  { %3714 = vst [vmem:[#allocation16_spill] sm:$0xff] %v3511_v8  ;;  %v1194_v14 = vadd.f32 %v2346_v9, %v3475_v34  ;;  %v2411_v15 = vpop.f32.mrf.mxu1 }
 0x14b   :  { %v2348_v16 = vpop.f32.mrf.mxu0 }
 0x14c   :  { %v3514_v17 = vadd.f32 %v2410_v12, %v1194_v14  ;;  %v2349_v18 = vadd.f32 %v2348_v16, %v2347_v13  ;;  %v2412_v20 = vpop.f32.mrf.mxu1 }
 0x14d   :  { %v2413_v21 = vadd.f32 %v2412_v20, %v2411_v15  ;;  %v2350_v22 = vpop.f32.mrf.mxu0 }
 0x14e   :  { %3715 = vst [vmem:[#allocation17_spill] sm:$0xff] %v3514_v17  ;;  %v1197_v23 = vadd.f32 %v2349_v18, %v3475_v34  ;;  %v2414_v24 = vpop.f32.mrf.mxu1 }
 0x14f   :  { %v2351_v25 = vpop.f32.mrf.mxu0 }
 0x150   :  { %v3517_v26 = vadd.f32 %v2413_v21, %v1197_v23  ;;  %v2352_v28 = vadd.f32 %v2351_v25, %v2350_v22  ;;  %v2415_v29 = vpop.f32.mrf.mxu1 }
 0x151   :  { %v2416_v30 = vadd.f32 %v2415_v29, %v2414_v24  ;;  %v2353_v31 = vpop.f32.mrf.mxu0 }
 0x152   :  { %3716 = vst [vmem:[#allocation18_spill] sm:$0xff] %v3517_v26  ;;  %v1202_v32 = vadd.f32 %v2352_v28, %v3475_v34  ;;  %v2417_v33 = vpop.f32.mrf.mxu1 }
 0x153   :  { %v2354_v35 = vpop.f32.mrf.mxu0 }
 0x154   :  { %v3520_v37 = vadd.f32 %v2416_v30, %v1202_v32  ;;  %v2355_v38 = vadd.f32 %v2354_v35, %v2353_v31  ;;  %v2418_v39 = vpop.f32.mrf.mxu1 }
 0x155   :  { %v2419_v40 = vadd.f32 %v2418_v39, %v2417_v33  ;;  %v2436_v41 = vpop.f32.mrf.mxu0 }
 0x156   :  { %3717 = vst [vmem:[#allocation19_spill] sm:$0xff] %v3520_v37  ;;  %v1205_v42 = vadd.f32 %v2355_v38, %v3475_v34  ;;  %v2500_v44 = vpop.f32.mrf.mxu1 }
 0x157   :  { %v2437_v46 = vpop.f32.mrf.mxu0 }
 0x158   :  { %v3523_v47 = vadd.f32 %v2419_v40, %v1205_v42  ;;  %v2438_v48 = vadd.f32 %v2437_v46, %v2436_v41  ;;  %v2501_v49 = vpop.f32.mrf.mxu1 }
 0x159   :  { %v2439_v50 = vpop.f32.mrf.mxu0 }
 0x15a   :  { %3718 = vst [vmem:[#allocation20_spill] sm:$0xff] %v3523_v47  ;;  %v3526_v52 = vadd.f32 %v2438_v48, %v3478_v43  ;;  %v2503_v53 = vpop.f32.mrf.mxu1 }
 0x15b   :  { %v2440_v55 = vpop.f32.mrf.mxu0 }
 0x15c   :  { %v2504_v56 = vpop.f32.mrf.mxu1  ;;  %v2441_v47 = vadd.f32 %v2440_v55, %v2439_v50 }
 0x15d   :  { %v2442_v57 = vpop.f32.mrf.mxu0 }
 0x15e   :  { %v2506_v58 = vpop.f32.mrf.mxu1 }
 0x15f   :  { %v2443_v60 = vpop.f32.mrf.mxu0 }
 0x160   :  { %v2507_v61 = vpop.f32.mrf.mxu1  ;;  %v2444_v26 = vadd.f32 %v2443_v60, %v2442_v57 }
 0x161   :  { %v2445_v62 = vpop.f32.mrf.mxu0 }
 0x162   :  { %v2509_v0 = vpop.f32.mrf.mxu1  ;;  %v1348_v45 = vadd.f32 %v2444_v26, %v3484_v59 }
 0x163   :  { %v2446_v34 = vpop.f32.mrf.mxu0 }
 0x164   :  { %v2510_v1 = vpop.f32.mrf.mxu1  ;;  %v2447_v17 = vadd.f32 %v2446_v34, %v2445_v62 }
 0x165   :  { %v2448_v2 = vpop.f32.mrf.mxu0  ;;  %v2511_v50 = vadd.f32 %v2510_v1, %v2509_v0 }
 0x166   :  { %v2512_v4 = vpop.f32.mrf.mxu1  ;;  %v1351_v36 = vadd.f32 %v2447_v17, %v3487_v3 }
 0x167   :  { %v2449_v5 = vpop.f32.mrf.mxu0 }
 0x168   :  { %v2513_v6 = vpop.f32.mrf.mxu1 }
 0x169   :  { %v2451_v7 = vpop.f32.mrf.mxu0 }
 0x16a   :  { %v3528_v9 = vpop.f32.mrf.mxu1 }
 0x16b   :  { %3719 = vst [vmem:[#allocation21_spill] sm:$0xff] %v3528_v9  ;;  %v2452_v43 = vpop.f32.mrf.mxu0  ;;  %v1343_v9 = vadd.f32 %v2441_v47, %v3481_v51 }
 0x16c   :  { %v3530_v10 = vpop.f32.mrf.mxu1  ;;  %v2453_v55 = vadd.f32 %v2452_v43, %v2451_v7 }
 0x16d   :  { %3720 = vst [vmem:[#allocation22_spill] sm:$0xff] %v3530_v10  ;;  %v2454_v12 = vpop.f32.mrf.mxu0  ;;  %v2502_v10 = vadd.f32 %v2501_v49, %v2500_v44 }
 0x16e   :  { %v2518_v13 = vpop.f32.mrf.mxu1 }
 0x16f   :  { %v2455_v14 = vpop.f32.mrf.mxu0  ;;  %v1437_v47 = vadd.f32 %v2502_v10, %v3526_v52 }
 0x170   :  { %v2519_v15 = vpop.f32.mrf.mxu1  ;;  %v2456_v57 = vadd.f32 %v2455_v14, %v2454_v12  ;;  %v3728_v12 = vld [vmem:[#allocation14_spill] sm:$0xff] }
 0x171   :  { %v2457_v16 = vpop.f32.mrf.mxu0  ;;  %v2520_v0 = vadd.f32 %v2519_v15, %v2518_v13 }
 0x172   :  { %v3532_v18 = vpop.f32.mrf.mxu1  ;;  %v3729_v14 = vld [vmem:[#allocation21_spill] sm:$0xff] }
 0x173   :  { %3721 = vst [vmem:[#allocation23_spill] sm:$0xff] %v3532_v18  ;;  %v2458_v20 = vpop.f32.mrf.mxu0 }
 0x174   :  { %v3534_v21 = vpop.f32.mrf.mxu1  ;;  %v2459_v60 = vadd.f32 %v2458_v20, %v2457_v16  ;;  %v3730_v16 = vld [vmem:[#allocation22_spill] sm:$0xff] }
 0x175   :  { %3722 = vst [vmem:[#allocation24_spill] sm:$0xff] %v3534_v21  ;;  %v2460_v22 = vpop.f32.mrf.mxu0  ;;  %v2450_v21 = vadd.f32 %v2449_v5, %v2448_v2  ;;  %v2514_v2 = vadd.f32 %v2513_v6, %v2512_v4  ;;  %v3727_v6 = vld [vmem:[#allocation13_spill] sm:$0xff] }
 0x176   :  { %v2524_v23 = vpop.f32.mrf.mxu1 }
 0x177   :  { %v2461_v24 = vpop.f32.mrf.mxu0  ;;  %v1356_v34 = vadd.f32 %v2450_v21, %v3490_v11  ;;  %v3726_v11 = vld [vmem:[#allocation12_spill] sm:$0xff] }
 0x178   :  { %v2525_v25 = vpop.f32.mrf.mxu1  ;;  %v2462_v5 = vadd.f32 %v2461_v24, %v2460_v22  ;;  %v1367_v1 = vadd.f32 %v2459_v60, %v3726_v11  ;;  %v3733_v22 = vld [vmem:[#allocation15_spill] sm:$0xff]  ;;  %v3739_v60 = vld [vmem:[#allocation18_spill] sm:$0xff] }
 0x179   :  { %v2463_v28 = vpop.f32.mrf.mxu0  ;;  %v2526_v43 = vadd.f32 %v2525_v25, %v2524_v23  ;;  %v3556_v10 = vadd.f32 %v2514_v2, %v1356_v34  ;;  %v3579_v34 = vld [vmem:[#allocation2] ss:$0 sm:$0xff] }
 0x17a   :  { %v2527_v29 = vpop.f32.mrf.mxu1  ;;  %v1372_v7 = vadd.f32 %v2462_v5, %v3727_v6  ;;  %v3582_v5 = vld [vmem:[#allocation7] ss:$0 sm:$0xff] }
 0x17b   :  { %v2464_v30 = vpop.f32.mrf.mxu0 }
 0x17c   :  { %v2528_v31 = vpop.f32.mrf.mxu1  ;;  %v2465_v44 = vadd.f32 %v2464_v30, %v2463_v28  ;;  %v3732_v20 = vld [vmem:[#allocation24_spill] sm:$0xff] }
 0x17d   :  { %v2466_v32 = vpop.f32.mrf.mxu0  ;;  %v2529_v15 = vadd.f32 %v2528_v31, %v2527_v29  ;;  %v3734_v30 = vld [vmem:[#allocation16_spill] sm:$0xff]  ;;  %v3572_v31 = vadd.f32 %v2526_v43, %v1372_v7 }
 0x17e   :  { %v2530_v33 = vpop.f32.mrf.mxu1  ;;  %v1375_v52 = vadd.f32 %v2465_v44, %v3728_v12 }
 0x17f   :  { %v2467_v35 = vpop.f32.mrf.mxu0 }
 0x180   :  { %v2531_v38 = vpop.f32.mrf.mxu1  ;;  %v2468_v59 = vadd.f32 %v2467_v35, %v2466_v32  ;;  %v3564_v32 = vld [vmem:[#allocation6] ss:$0 sm:$0xff] }
 0x181   :  { %v2469_v39 = vpop.f32.mrf.mxu0  ;;  %v2532_v28 = vadd.f32 %v2531_v38, %v2530_v33  ;;  %v3574_v33 = vadd.f32 %v2529_v15, %v1375_v52  ;;  %v3737_v38 = vld [vmem:[#allocation17_spill] sm:$0xff] }
 0x182   :  { %v3536_v40 = vpop.f32.mrf.mxu1  ;;  %v1380_v24 = vadd.f32 %v2468_v59, %v3733_v22 }
 0x183   :  { %3723 = vst [vmem:[#allocation25_spill] sm:$0xff] %v3536_v40  ;;  %v2470_v41 = vpop.f32.mrf.mxu0  ;;  %v2505_v40 = vadd.f32 %v2504_v56, %v2503_v53  ;;  %v1448_v56 = vadd.f32 %v2511_v50, %v1351_v36  ;;  %v3731_v36 = vld [vmem:[#allocation23_spill] sm:$0xff] }
 0x184   :  { %v3538_v42 = vpop.f32.mrf.mxu1  ;;  %v2471_v26 = vadd.f32 %v2470_v41, %v2469_v39 }
 0x185   :  { %3724 = vst [vmem:[#allocation26_spill] sm:$0xff] %v3538_v42  ;;  %v2472_v46 = vpop.f32.mrf.mxu0  ;;  %v2508_v42 = vadd.f32 %v2507_v61, %v2506_v58  ;;  %v3549_v53 = vadd.f32 %v2505_v40, %v1343_v9  ;;  %v1359_v58 = vadd.f32 %v2453_v55, %v3493_v19  ;;  %v1364_v61 = vadd.f32 %v2456_v57, %v3496_v27 }
 0x186   :  { %v3540_v48 = vpop.f32.mrf.mxu1  ;;  %v2523_v19 = vadd.f32 %v3732_v20, %v3731_v36  ;;  %v1383_v23 = vadd.f32 %v2471_v26, %v3734_v30 }
 0x187   :  { %3725 = vst [vmem:[#allocation27_spill] sm:$0xff] %v3540_v48  ;;  %v2473_v37 = vpop.f32.mrf.mxu0  ;;  %v1445_v17 = vadd.f32 %v2508_v42, %v1348_v45  ;;  %v2517_v45 = vadd.f32 %v3730_v16, %v3729_v14  ;;  %v1461_v40 = vadd.f32 %v2520_v0, %v1364_v61  ;;  %v3740_v0 = vld [vmem:[#allocation19_spill] sm:$0xff] }
 0x188   :  { %v2537_v8 = vpop.f32.mrf.mxu1  ;;  %v2474_v21 = vadd.f32 %v2473_v37, %v2472_v46  ;;  %v3566_v41 = vadd.f32 %v2523_v19, %v1367_v1  ;;  %v3590_v1 = vld [vmem:[#allocation4] ss:$0 sm:$0xff] }
 0x189   :  { %v2475_v63 = vpop.f32.mrf.mxu0  ;;  %v3568_v42 = vadd.f32 %v2517_v45, %v1359_v58 }
 0x18a   :  { %v3542_v18 = vpop.f32.mrf.mxu1  ;;  %v3735_v50 = vld [vmem:[#allocation25_spill] sm:$0xff]  ;;  %v1388_v46 = vadd.f32 %v2474_v21, %v3737_v38 }
 0x18b   :  { %v2476_v54 = vpop.f32.mrf.mxu0 }
 0x18c   :  { %v2540_v48 = vpop.f32.mrf.mxu1  ;;  %v2477_v27 = vadd.f32 %v2476_v54, %v2475_v63  ;;  %v3736_v37 = vld [vmem:[#allocation26_spill] sm:$0xff] }
 0x18d   :  { %v2478_v62 = vpop.f32.mrf.mxu0  ;;  %v2535_v54 = vadd.f32 %v3736_v37, %v3735_v50  ;;  %v2541_v61 = vadd.f32 %v2540_v48, %v3542_v18 }
 0x18e   :  { %v2542_v49 = vpop.f32.mrf.mxu1  ;;  %v3738_v55 = vld [vmem:[#allocation27_spill] sm:$0xff] }
 0x18f   :  { %v2479_v51 = vpop.f32.mrf.mxu0  ;;  %v2538_v57 = vadd.f32 %v2537_v8, %v3738_v55  ;;  %v3586_v58 = vadd.f32 %v2535_v54, %v1383_v23 }
 0x190   :  { %v2543_v3 = vpop.f32.mrf.mxu1  ;;  %v2480_v35 = vadd.f32 %v2479_v51, %v2478_v62  ;;  %v1391_v62 = vadd.f32 %v2477_v27, %v3739_v60 }
 0x191   :  { %v2481_v4 = vpop.f32.mrf.mxu0  ;;  %v2544_v11 = vadd.f32 %v2543_v3, %v2542_v49  ;;  %v3596_v18 = vadd.f32 %v2538_v57, %v1388_v46 }
 0x192   :  { %v2545_v9 = vpop.f32.mrf.mxu1  ;;  %v1396_v8 = vadd.f32 %v2480_v35, %v3740_v0  ;;  %v3598_v48 = vadd.f32 %v2541_v61, %v1391_v62  ;;  %v3741_v35 = vld [vmem:[#allocation20_spill] sm:$0xff] }
 0x193   :  { %v2482_v13 = vpop.f32.mrf.mxu0 }
 0x194   :  { %v2546_v25 = vpop.f32.mrf.mxu1  ;;  %v2483_v16 = vadd.f32 %v2482_v13, %v2481_v4  ;;  %v3607_v15 = vadd.f32 %v2544_v11, %v1396_v8 }
 0x195   :  { %v2598_v39 = vpop.f32.mrf.mxu0  ;;  %v3603_v27 = vadd.f32 %v2546_v25, %v2545_v9 }
 0x196   :  { %v1542_v63 = vadd.f32 %v2598_v39, %v1445_v17  ;;  %v2630_v29 = vpop.f32.mrf.mxu1  ;;  %v3584_v17 = vadd.f32 %v2532_v28, %v1380_v24  ;;  %v1399_v39 = vadd.f32 %v2483_v16, %v3741_v35 }
 0x197   :  { %v1892_v2 = vmul.f32 %v2630_v29, %v3564_v32  ;;  %v1533_v44 = vpop.f32.mrf.mxu0 }
 0x198   :  { %v1598_v51 = vmax.f32 %v1542_v63, 0.0  ;;  %v1534_v59 = vadd.f32 %v1533_v44, %v1437_v47  ;;  %v1820_v26 = vpop.f32.mrf.mxu1 }
 0x199   :  { %v1890_v6 = vmul.f32 %v3564_v32, %v1820_v26  ;;  %v2599_v7 = vpop.f32.mrf.mxu0  ;;  %v1915_v12 = vadd.f32 %v3582_v5, %v1892_v2 }
 0x19a   :  { %v1621_v43 = vmul.f32 %v3579_v34, %v1598_v51  ;;  %v1596_v47 = vmax.f32 %v1534_v59, 0.0  ;;  %v1545_v52 = vadd.f32 %v2599_v7, %v1448_v56  ;;  %v2631_v14 = vpop.f32.mrf.mxu1 }
 0x19b   :  { %v1893_v45 = vmul.f32 %v2631_v14, %v3564_v32  ;;  %v1536_v36 = vpop.f32.mrf.mxu0  ;;  %v1913_v56 = vadd.f32 %v3582_v5, %v1890_v6 }
 0x19c   :  { %v1644_v49 = vadd.f32 %v3590_v1, %v1621_v43  ;;  %v1619_v3 = vmul.f32 %v3579_v34, %v1596_v47  ;;  %v1599_v20 = vmax.f32 %v1545_v52, 0.0  ;;  %v1537_v19 = vadd.f32 %v1536_v36, %v3549_v53  ;;  %v1823_v21 = vpop.f32.mrf.mxu1 }
 0x19d   :  { %v1891_v4 = vmul.f32 %v3564_v32, %v1823_v21  ;;  %v2602_v13 = vpop.f32.mrf.mxu0  ;;  %v1916_v53 = vadd.f32 %v3582_v5, %v1893_v45 }
 0x19e   :  { %v1931_v22 = vadd.f32 %v1915_v12, %v1644_v49  ;;  %v1642_v24 = vadd.f32 %v3590_v1, %v1619_v3  ;;  %v1622_v28 = vmul.f32 %v3579_v34, %v1599_v20  ;;  %v1597_v30 = vmax.f32 %v1537_v19, 0.0  ;;  %v2634_v23 = vpop.f32.mrf.mxu1 }
 0x19f   :  { %v1558_v9 = vadd.f32 %v2602_v13, %v1461_v40  ;;  %v1896_v25 = vmul.f32 %v2634_v23, %v3564_v32  ;;  %v1549_v50 = vpop.f32.mrf.mxu0  ;;  %v1914_v29 = vadd.f32 %v3582_v5, %v1891_v4 }
 0x1a0   :  { %v1929_v37 = vadd.f32 %v1913_v56, %v1642_v24  ;;  %v1645_v54 = vadd.f32 %v3590_v1, %v1622_v28  ;;  %v1620_v63 = vmul.f32 %v3579_v34, %v1597_v30  ;;  %v1836_v38 = vpop.f32.mrf.mxu1  ;;  %v1947_v46 = vmax.f32 %v1931_v22, 0.0 }
 0x1a1   :  { %v1602_v55 = vmax.f32 %v1558_v9, 0.0  ;;  %v1550_v57 = vadd.f32 %v1549_v50, %v3556_v10  ;;  %v1894_v60 = vmul.f32 %v3564_v32, %v1836_v38  ;;  %v2603_v62 = vpop.f32.mrf.mxu0  ;;  %v1919_v44 = vadd.f32 %v3582_v5, %v1896_v25 }
 0x1a2   :  { %v1932_v2 = vadd.f32 %v1916_v53, %v1645_v54  ;;  %v1643_v40 = vadd.f32 %v3590_v1, %v1620_v63  ;;  %v1561_v51 = vadd.f32 %v2603_v62, %v3566_v41  ;;  %v2635_v59 = vpop.f32.mrf.mxu1  ;;  %v1945_v26 = vmax.f32 %v1929_v37, 0.0 }
 0x1a3   :  { %v1625_v61 = vmul.f32 %v3579_v34, %v1602_v55  ;;  %v1600_v0 = vmax.f32 %v1550_v57, 0.0  ;;  %v1897_v8 = vmul.f32 %v2635_v59, %v3564_v32  ;;  %v1552_v11 = vpop.f32.mrf.mxu0  ;;  %v1917_v41 = vadd.f32 %v3582_v5, %v1894_v60 }
 0x1a4   :  { %v1948_v6 = vmax.f32 %v1932_v2, 0.0  ;;  %v1930_v10 = vadd.f32 %v1914_v29, %v1643_v40  ;;  %v1603_v7 = vmax.f32 %v1561_v51, 0.0  ;;  %v1553_v43 = vadd.f32 %v1552_v11, %v3568_v42  ;;  %v1839_v12 = vpop.f32.mrf.mxu1 }
 0x1a5   :  { %v1648_v47 = vadd.f32 %v3590_v1, %v1625_v61  ;;  %v1623_v52 = vmul.f32 %v3579_v34, %v1600_v0  ;;  %v1895_v14 = vmul.f32 %v3564_v32, %v1839_v12  ;;  %v2606_v16 = vpop.f32.mrf.mxu0  ;;  %v1920_v42 = vadd.f32 %v3582_v5, %v1897_v8 }
 0x1a6   :  { %v2253_v45 = vpack.c.bf16 %v1948_v6, %v1947_v46  ;;  %v1946_v36 = vmax.f32 %v1930_v10, 0.0  ;;  %v1626_v49 = vmul.f32 %v3579_v34, %v1603_v7  ;;  %v1601_v3 = vmax.f32 %v1553_v43, 0.0  ;;  %v2638_v20 = vpop.f32.mrf.mxu1 }
 0x1a7   :  { %v1935_v19 = vadd.f32 %v1919_v44, %v1648_v47  ;;  %v1646_v21 = vadd.f32 %v3590_v1, %v1623_v52  ;;  %v1574_v56 = vadd.f32 %v2606_v16, %v3584_v17  ;;  %v1565_v4 = vpop.f32.mrf.mxu0  ;;  %v1900_v28 = vmul.f32 %v2638_v20, %v3564_v32 }
 0x1a8   :  { %2285 = vst [vmem:[%s3709_s9 + $0x8] sm:$0xff] %v2253_v45   ;;  %v2248_v13 = vpack.c.bf16 %v1946_v36, %v1945_v26  ;;  %v1649_v22 = vadd.f32 %v3590_v1, %v1626_v49  ;;  %v1624_v24 = vmul.f32 %v3579_v34, %v1601_v3  ;;  %v1852_v30 = vpop.f32.mrf.mxu1  ;;  %v1918_v23 = vadd.f32 %v3582_v5, %v1895_v14 }
 0x1a9   :  { %v1606_v35 = vmax.f32 %v1574_v56, 0.0  ;;  %v1566_v53 = vadd.f32 %v1565_v4, %v3572_v31  ;;  %v2607_v9 = vpop.f32.mrf.mxu0  ;;  %v1496_v17 = vadd.f32 %v3603_v27, %v1399_v39  ;;  %v1951_v25 = vmax.f32 %v1935_v19, 0.0 }
 0x1aa   :  { %2249 = vst [vmem:[%s3709_s9] sm:$0xff] %v2248_v13   ;;  %v1933_v50 = vadd.f32 %v1917_v41, %v1646_v21  ;;  %v1936_v37 = vadd.f32 %v1920_v42, %v1649_v22  ;;  %v1647_v54 = vadd.f32 %v3590_v1, %v1624_v24  ;;  %v2639_v63 = vpop.f32.mrf.mxu1  ;;  %v1923_v38 = vadd.f32 %v3582_v5, %v1900_v28 }
 0x1ab   :  { %v1629_v29 = vmul.f32 %v3579_v34, %v1606_v35  ;;  %v1604_v46 = vmax.f32 %v1566_v53, 0.0  ;;  %v1577_v31 = vadd.f32 %v2607_v9, %v3586_v58  ;;  %v1568_v55 = vpop.f32.mrf.mxu0  ;;  %v1898_v39 = vmul.f32 %v3564_v32, %v1852_v30 }
 0x1ac   :  { %v1952_v57 = vmax.f32 %v1936_v37, 0.0  ;;  %v1934_v27 = vadd.f32 %v1918_v23, %v1647_v54  ;;  %v1901_v60 = vmul.f32 %v2639_v63, %v3564_v32  ;;  %v1855_v62 = vpop.f32.mrf.mxu1  ;;  %v1569_v51 = vadd.f32 %v1568_v55, %v3574_v33 }
 0x1ad   :  { %v1652_v2 = vadd.f32 %v3590_v1, %v1629_v29  ;;  %v1627_v40 = vmul.f32 %v3579_v34, %v1604_v46  ;;  %v1607_v44 = vmax.f32 %v1577_v31, 0.0  ;;  %v2610_v59 = vpop.f32.mrf.mxu0  ;;  %v1949_v26 = vmax.f32 %v1933_v50, 0.0 }
 0x1ae   :  { %v2263_v61 = vpack.c.bf16 %v1952_v57, %v1951_v25  ;;  %v1950_v0 = vmax.f32 %v1934_v27, 0.0  ;;  %v1899_v58 = vmul.f32 %v3564_v32, %v1855_v62  ;;  %v2642_v8 = vpop.f32.mrf.mxu1  ;;  %v1605_v7 = vmax.f32 %v1569_v51, 0.0 }
 0x1af   :  { %v1939_v11 = vadd.f32 %v1923_v38, %v1652_v2  ;;  %v1650_v6 = vadd.f32 %v3590_v1, %v1627_v40  ;;  %v1630_v10 = vmul.f32 %v3579_v34, %v1607_v44  ;;  %v1581_v43 = vpop.f32.mrf.mxu0  ;;  %v1921_v33 = vadd.f32 %v3582_v5, %v1898_v39 }
 0x1b0   :  { %2287 = vst [vmem:[%s3709_s9 + $0x18] sm:$0xff] %v2263_v61   ;;  %v2258_v12 = vpack.c.bf16 %v1950_v0, %v1949_v26  ;;  %v1590_v47 = vadd.f32 %v2610_v59, %v3607_v15  ;;  %v1904_v52 = vmul.f32 %v2642_v8, %v3564_v32  ;;  %v1868_v41 = vpop.f32.mrf.mxu1  ;;  %v1924_v16 = vadd.f32 %v3582_v5, %v1901_v60 }
 0x1b1   :  { %v1653_v14 = vadd.f32 %v3590_v1, %v1630_v10  ;;  %v1628_v45 = vmul.f32 %v3579_v34, %v1605_v7  ;;  %v1922_v36 = vadd.f32 %v3582_v5, %v1899_v58  ;;  %v2611_v49 = vpop.f32.mrf.mxu0  ;;  %v1955_v3 = vmax.f32 %v1939_v11, 0.0 }
 0x1b2   :  { %2286 = vst [vmem:[%s3709_s9 + $0x10] sm:$0xff] %v2258_v12   ;;  %v1937_v20 = vadd.f32 %v1921_v33, %v1650_v6  ;;  %v1610_v19 = vmax.f32 %v1590_v47, 0.0  ;;  %v1582_v15 = vadd.f32 %v1581_v43, %v3596_v18  ;;  %v2643_v21 = vpop.f32.mrf.mxu1  ;;  %v1927_v4 = vadd.f32 %v3582_v5, %v1904_v52 }
 0x1b3   :  { %v1940_v42 = vadd.f32 %v1924_v16, %v1653_v14  ;;  %v1651_v56 = vadd.f32 %v3590_v1, %v1628_v45  ;;  %v1593_v13 = vadd.f32 %v2611_v49, %v1496_v17  ;;  %v1584_v22 = vpop.f32.mrf.mxu0  ;;  %v1902_v30 = vmul.f32 %v3564_v32, %v1868_v41 }
 0x1b4   :  { %v1633_v24 = vmul.f32 %v3579_v34, %v1610_v19  ;;  %v1608_v28 = vmax.f32 %v1582_v15, 0.0  ;;  %v1905_v23 = vmul.f32 %v2643_v21, %v3564_v32  ;;  %v1871_v35 = vpop.f32.mrf.mxu1  ;;  %v1585_v18 = vadd.f32 %v1584_v22, %v3598_v48 }
 0x1b5   :  { %v1956_v53 = vmax.f32 %v1940_v42, 0.0  ;;  %v1938_v9 = vadd.f32 %v1922_v36, %v1651_v56  ;;  %v1611_v25 = vmax.f32 %v1593_v13, 0.0  ;;  %v1953_v50 = vmax.f32 %v1937_v20, 0.0 }
 0x1b6   :  { %v1656_v37 = vadd.f32 %v3590_v1, %v1633_v24  ;;  %v1631_v54 = vmul.f32 %v3579_v34, %v1608_v28  ;;  %v1903_v17 = vmul.f32 %v3564_v32, %v1871_v35  ;;  %v1609_v46 = vmax.f32 %v1585_v18, 0.0 }
 0x1b7   :  { %v2273_v63 = vpack.c.bf16 %v1956_v53, %v1955_v3  ;;  %v1954_v29 = vmax.f32 %v1938_v9, 0.0  ;;  %v1634_v38 = vmul.f32 %v3579_v34, %v1611_v25  ;;  %v1925_v55 = vadd.f32 %v3582_v5, %v1902_v30 }
 0x1b8   :  { %v1654_v31 = vadd.f32 %v3590_v1, %v1631_v54  ;;  %v1928_v57 = vadd.f32 %v3582_v5, %v1905_v23  ;;  %v1943_v27 = vadd.f32 %v1927_v4, %v1656_v37  ;;  %v1632_v32 = vmul.f32 %v3579_v34, %v1609_v46 }
 0x1b9   :  { %2289 = vst [vmem:[%s3709_s9 + $0x28] sm:$0xff] %v2273_v63   ;;  %v2268_v48 = vpack.c.bf16 %v1954_v29, %v1953_v50  ;;  %v1657_v39 = vadd.f32 %v3590_v1, %v1634_v38  ;;  %v1926_v40 = vadd.f32 %v3582_v5, %v1903_v17 }
 0x1ba   :  { %v1941_v60 = vadd.f32 %v1925_v55, %v1654_v31  ;;  %v1655_v2 = vadd.f32 %v3590_v1, %v1632_v32  ;;  %v1959_v44 = vmax.f32 %v1943_v27, 0.0 }
 0x1bb   :  { %2288 = vst [vmem:[%s3709_s9 + $0x20] sm:$0xff] %v2268_v48   ;;  %v1944_v62 = vadd.f32 %v1928_v57, %v1657_v39 }
 0x1bc   :  { %v1942_v59 = vadd.f32 %v1926_v40, %v1655_v2  ;;  %v1957_v26 = vmax.f32 %v1941_v60, 0.0 }
 0x1bd   :  { %v1960_v51 = vmax.f32 %v1944_v62, 0.0 }
 0x1be   :  { %v1958_v0 = vmax.f32 %v1942_v59, 0.0 }
 0x1bf   :  { %v2283_v61 = vpack.c.bf16 %v1960_v51, %v1959_v44 }
 0x1c0   :  { %v2278_v34 = vpack.c.bf16 %v1958_v0, %v1957_v26 }
 0x1c1   :  { %2291 = vst [vmem:[%s3709_s9 + $0x38] sm:$0xff] %v2283_v61  }
 0x1c2   :  { %2290 = vst [vmem:[%s3709_s9 + $0x30] sm:$0xff] %v2278_v34  }
 0x1c3   :  { %2045 = vsyncpa [#allocation3], 1 }
 0x1c4   :  { %2046 = vsyncpa [#allocation5], 1 }
 0x1c5   :  { %2047 = vsyncpa [#allocation8], 1 }

// kernel: bennet_forward.15
= control target key start
LH: loop header
LB: loop body
LE: loop exit
PB: predicated region body
PF: predicated region fallthrough
CT: control target
= control target key end

     0   :  { %10 = vsyncpa [#allocation3], 0  ;;  %s3145_s0 = inlined_call_operand.vmem [shape: bf16[128,1152], index: 0, kind: input, shape index: {}]   ;;  %s3146_s1 = inlined_call_operand.vmem [shape: bf16[1152,128], index: 1, kind: input, shape index: {}]   ;;  %s3147_s2 = inlined_call_operand.hbm [shape: f32[1,128], index: 2, kind: input, shape index: {}]   ;;  %s3148_s3 = inlined_call_operand.hbm [shape: f32[1,128], index: 3, kind: input, shape index: {}]   ;;  %s3149_s4 = inlined_call_operand.hbm [shape: f32[1,128], index: 4, kind: input, shape index: {}]   ;;  %s3150_s5 = inlined_call_operand.vmem [shape: bf16[128,128], index: 5, kind: output, shape index: {}]  }
   0x1   :  { %11 = vsyncpa [#allocation5], 0  ;;  %s2509_s18 = smov [#allocation4]   ;;  %s2510_s20 = smov [#allocation2]  }
   0x2   :  { %s32_s19 = sshll.u32 %s2509_s18, 4  ;;  %s22_s21 = sshll.u32 %s2510_s20, 4  ;;  %s33_s19 = int_to_ptr.vmem [resolvable:$true] %s32_s19  ;;  %s23_s21 = int_to_ptr.vmem [resolvable:$true] %s22_s21 }
   0x3   :  { %s2453_s22 = scalar_lea.vmem %s33_s19, 16  ;;  %s2457_s23 = scalar_lea.vmem %s33_s19, 32 }
   0x4   :  { %p2454_p0 = scmp.ne.s32.totalorder %s33_s19, %s2453_s22  ;;  %p2458_p1 = scmp.lt.s32.totalorder %s33_s19, %s33_s19 }
   0x5   :  { %p2459_p2 = scmp.lt.s32.totalorder %s2457_s23, %s2453_s22 }
   0x7   :  { %p2460_p3 = por %p2459_p2, %p2458_p1 }
   0x9   :  { %p2461_p4 = pnand %p2460_p3, %p2454_p0 }
   0xb   :  { %2464 = shalt.err (!%p2461_p4)
}
   0xc   :  { %35 = dma.hbm_to_vmem [thread:$0]  %s3148_s3, 16, %s33_s19, [#allocation5]  }
   0xd   :  { %s2473_s26 = scalar_lea.vmem %s23_s21, 16  ;;  %s2477_s27 = scalar_lea.vmem %s23_s21, 32 }
   0xe   :  { %p2474_p5 = scmp.ne.s32.totalorder %s23_s21, %s2473_s26  ;;  %p2478_p6 = scmp.lt.s32.totalorder %s23_s21, %s23_s21 }
   0xf   :  { %p2479_p7 = scmp.lt.s32.totalorder %s2477_s27, %s2473_s26 }
  0x11   :  { %p2480_p8 = por %p2479_p7, %p2478_p6 }
  0x13   :  { %p2481_p9 = pnand %p2480_p8, %p2474_p5 }
  0x15   :  { %2484 = shalt.err (!%p2481_p9)
}
  0x16   :  { %25 = dma.hbm_to_vmem [thread:$0]  %s3147_s2, 16, %s23_s21, [#allocation3]  }
  0x17   :  { %s2511_s30 = smov [#allocation6]  }
  0x18   :  { %s42_s6 = sshll.u32 %s2511_s30, 4  ;;  %s43_s6 = int_to_ptr.vmem [resolvable:$true] %s42_s6 }
  0x19   :  { %s2493_s7 = scalar_lea.vmem %s43_s6, 16  ;;  %s2497_s8 = scalar_lea.vmem %s43_s6, 32 }
  0x1a   :  { %p2494_p10 = scmp.ne.s32.totalorder %s43_s6, %s2493_s7  ;;  %p2498_p11 = scmp.lt.s32.totalorder %s43_s6, %s43_s6 }
  0x1b   :  { %p2499_p12 = scmp.lt.s32.totalorder %s2497_s8, %s2493_s7 }
  0x1d   :  { %p2500_p13 = por %p2499_p12, %p2498_p11 }
  0x1f   :  { %p2501_p0 = pnand %p2500_p13, %p2494_p10 }
  0x21   :  { %2504 = shalt.err (!%p2501_p0)
}
  0x22   :  { %45 = dma.hbm_to_vmem [thread:$0]  %s3149_s4, 16, %s43_s6, [#allocation5]  }
  0x23   :  { %2505 = dma.done.wait [#allocation3], 16  }
  0x24   :  { %2506 = vsyncadd [#allocation3], 4294967280 }
  0x25   :  { %2507 = dma.done.wait [#allocation5], 32  }
  0x26   :  { %2508 = vsyncadd [#allocation5], 4294967264  ;;  %v2269_v0 = vld [vmem:[%s3146_s1 + $0x78] sm:$0xff]   ;;  %v2273_v4 = vld [vmem:[%s3146_s1 + $0x70] sm:$0xff]  }
  0x27   :  { %v2270_v1 = vld [vmem:[%s3146_s1 + $0xf8] sm:$0xff]   ;;  %1946 = vmatprep.subr.bf16.mxu0 %v2269_v0  ;;  %v2274_v5 = vld [vmem:[%s3146_s1 + $0xf0] sm:$0xff]   ;;  %v2277_v8 = vld [vmem:[%s3146_s1 + $0x68] sm:$0xff]  }
  0x28   :  { %v2271_v2 = vld [vmem:[%s3146_s1 + $0x38] sm:$0xff]   ;;  %2010 = vmatprep.subr.bf16.mxu1 %v2270_v1  ;;  %v2275_v6 = vld [vmem:[%s3146_s1 + $0x30] sm:$0xff]   ;;  %v2278_v9 = vld [vmem:[%s3146_s1 + $0xe8] sm:$0xff]  }
  0x29   :  { %v2272_v3 = vld [vmem:[%s3146_s1 + $0xb8] sm:$0xff]   ;;  %1947 = vmatpush3.bf16.msra.mxu0 %v2271_v2  ;;  %v2276_v7 = vld [vmem:[%s3146_s1 + $0xb0] sm:$0xff]   ;;  %v2279_v10 = vld [vmem:[%s3146_s1 + $0x28] sm:$0xff]  }
  0x2a   :  { %2011 = vmatpush3.bf16.msra.mxu1 %v2272_v3  ;;  %1948 = vmatprep.subr.bf16.mxu0 %v2273_v4  ;;  %v2280_v11 = vld [vmem:[%s3146_s1 + $0xa8] sm:$0xff]   ;;  %v2281_v12 = vld [vmem:[%s3146_s1 + $0x60] sm:$0xff]   ;;  %v2285_v16 = vld [vmem:[%s3146_s1 + $0x58] sm:$0xff]  }
  0x2b   :  { %2012 = vmatprep.subr.bf16.mxu1 %v2274_v5  ;;  %v2282_v13 = vld [vmem:[%s3146_s1 + $0xe0] sm:$0xff]   ;;  %v2286_v17 = vld [vmem:[%s3146_s1 + $0xd8] sm:$0xff]   ;;  %v2289_v20 = vld [vmem:[%s3146_s1 + $0x50] sm:$0xff]  }
  0x2c   :  { %v2283_v14 = vld [vmem:[%s3146_s1 + $0x20] sm:$0xff]   ;;  %v2287_v18 = vld [vmem:[%s3146_s1 + $0x18] sm:$0xff]   ;;  %v2290_v21 = vld [vmem:[%s3146_s1 + $0xd0] sm:$0xff]  }
  0x2d   :  { %1949 = vmatpush3.bf16.msra.mxu0 %v2275_v6  ;;  %v2284_v15 = vld [vmem:[%s3146_s1 + $0xa0] sm:$0xff]   ;;  %v2288_v19 = vld [vmem:[%s3146_s1 + $0x98] sm:$0xff]   ;;  %v2291_v22 = vld [vmem:[%s3146_s1 + $0x10] sm:$0xff]  }
  0x2e   :  { %2013 = vmatpush3.bf16.msra.mxu1 %v2276_v7  ;;  %1950 = vmatprep.subr.bf16.mxu0 %v2277_v8  ;;  %v2292_v23 = vld [vmem:[%s3146_s1 + $0x90] sm:$0xff]   ;;  %v2293_v24 = vld [vmem:[%s3146_s1 + $0x48] sm:$0xff]   ;;  %v2297_v28 = vld [vmem:[%s3146_s1 + $0x40] sm:$0xff]  }
  0x2f   :  { %2014 = vmatprep.subr.bf16.mxu1 %v2278_v9  ;;  %v2294_v25 = vld [vmem:[%s3146_s1 + $0xc8] sm:$0xff]   ;;  %v2298_v29 = vld [vmem:[%s3146_s1 + $0xc0] sm:$0xff]   ;;  %v2307_v36 = vld [vmem:[%s3146_s1 + $0x178] sm:$0xff]  }
  0x30   :  { %v2295_v26 = vld [vmem:[%s3146_s1 + $0x8] sm:$0xff]   ;;  %v2299_v30 = vld [vmem:[%s3146_s1] sm:$0xff]   ;;  %v2308_v37 = vld [vmem:[%s3146_s1 + $0x1f8] sm:$0xff]  }
  0x31   :  { %1951 = vmatpush3.bf16.msra.mxu0 %v2279_v10  ;;  %v2296_v27 = vld [vmem:[%s3146_s1 + $0x88] sm:$0xff]   ;;  %v2300_v31 = vld [vmem:[%s3146_s1 + $0x80] sm:$0xff]   ;;  %v2309_v38 = vld [vmem:[%s3146_s1 + $0x138] sm:$0xff]  }
  0x32   :  { %2015 = vmatpush3.bf16.msra.mxu1 %v2280_v11  ;;  %1952 = vmatprep.subr.bf16.mxu0 %v2281_v12  ;;  %v2301_v32 = vld [vmem:[%s3145_s0] ss:$36 sps:$4 sm:$0xff]   ;;  %v2304_v34 = vld [vmem:[%s3145_s0 + $0x8] ss:$36 sps:$4 sm:$0xff]   ;;  %v2310_v39 = vld [vmem:[%s3146_s1 + $0x1b8] sm:$0xff]  }
  0x33   :  { %2016 = vmatprep.subr.bf16.mxu1 %v2282_v13  ;;  %v2303_v33 = vld [vmem:[%s3145_s0 + $0x4] ss:$36 sps:$4 sm:$0xff]   ;;  %v2306_v35 = vld [vmem:[%s3145_s0 + $0xc] ss:$36 sps:$4 sm:$0xff]   ;;  %v2313_v41 = vld [vmem:[%s3145_s0 + $0x54] ss:$36 sps:$4 sm:$0xff]  }
  0x34   :  { %1119 = vmatprep.mubr.bf16.mxu0 %v2303_v33  ;;  %1216 = vmatprep.mubr.bf16.mxu1 %v2306_v35  ;;  %v2311_v40 = vld [vmem:[%s3145_s0 + $0x4c] ss:$36 sps:$4 sm:$0xff]   ;;  %v2321_v48 = vld [vmem:[%s3145_s0 + $0x94] ss:$36 sps:$4 sm:$0xff]   ;;  %v2323_v49 = vld [vmem:[%s3145_s0 + $0x9c] ss:$36 sps:$4 sm:$0xff]  }
  0x35   :  { %1953 = vmatpush3.bf16.msra.mxu0 %v2283_v14  ;;  %v2315_v42 = vld [vmem:[%s3145_s0 + $0x48] ss:$36 sps:$4 sm:$0xff]   ;;  %v2316_v43 = vld [vmem:[%s3145_s0 + $0x50] ss:$36 sps:$4 sm:$0xff]   ;;  %v2326_v51 = vld [vmem:[%s3145_s0 + $0x98] ss:$36 sps:$4 sm:$0xff]  }
  0x36   :  { %2017 = vmatpush3.bf16.msra.mxu1 %v2284_v15  ;;  %1954 = vmatprep.subr.bf16.mxu0 %v2285_v16  ;;  %v2317_v44 = vld [vmem:[%s3146_s1 + $0x170] sm:$0xff]   ;;  %v2327_v52 = vld [vmem:[%s3146_s1 + $0x168] sm:$0xff]   ;;  %v2331_v56 = vld [vmem:[%s3145_s0 + $0xdc] ss:$36 sps:$4 sm:$0xff]  }
  0x37   :  { %2018 = vmatprep.subr.bf16.mxu1 %v2286_v17  ;;  %v2318_v45 = vld [vmem:[%s3146_s1 + $0x1f0] sm:$0xff]   ;;  %v2328_v53 = vld [vmem:[%s3146_s1 + $0x1e8] sm:$0xff]   ;;  %v2335_v58 = vld [vmem:[%s3145_s0 + $0xd8] ss:$36 sps:$4 sm:$0xff]  }
  0x38   :  { %v2319_v46 = vld [vmem:[%s3146_s1 + $0x130] sm:$0xff]   ;;  %v2329_v54 = vld [vmem:[%s3146_s1 + $0x128] sm:$0xff]   ;;  %v2336_v59 = vld [vmem:[%s3145_s0 + $0xe0] ss:$36 sps:$4 sm:$0xff]  }
  0x39   :  { %1955 = vmatpush3.bf16.msra.mxu0 %v2287_v18  ;;  %v2320_v47 = vld [vmem:[%s3146_s1 + $0x1b0] sm:$0xff]   ;;  %v2330_v55 = vld [vmem:[%s3146_s1 + $0x1a8] sm:$0xff]   ;;  %v2337_v60 = vld [vmem:[%s3146_s1 + $0x160] sm:$0xff]  }
  0x3a   :  { %2019 = vmatpush3.bf16.msra.mxu1 %v2288_v19  ;;  %1956 = vmatprep.subr.bf16.mxu0 %v2289_v20  ;;  %v2325_v50 = vld [vmem:[%s3145_s0 + $0x90] ss:$36 sps:$4 sm:$0xff]   ;;  %v2333_v57 = vld [vmem:[%s3145_s0 + $0xe4] ss:$36 sps:$4 sm:$0xff]   ;;  %v2347_v3 = vld [vmem:[%s3146_s1 + $0x158] sm:$0xff]  }
  0x3b   :  { %2020 = vmatprep.subr.bf16.mxu1 %v2290_v21  ;;  %v2338_v61 = vld [vmem:[%s3146_s1 + $0x1e0] sm:$0xff]   ;;  %v2343_v1 = vld [vmem:[%s3145_s0 + $0x12c] ss:$36 sps:$4 sm:$0xff]   ;;  %v2348_v5 = vld [vmem:[%s3146_s1 + $0x1d8] sm:$0xff]  }
  0x3c   :  { %v2339_v62 = vld [vmem:[%s3146_s1 + $0x120] sm:$0xff]   ;;  %v2346_v4 = vld [vmem:[%s3145_s0 + $0x128] ss:$36 sps:$4 sm:$0xff]   ;;  %v2349_v6 = vld [vmem:[%s3146_s1 + $0x118] sm:$0xff]  }
  0x3d   :  { %1957 = vmatpush3.bf16.msra.mxu0 %v2291_v22  ;;  %v2340_v63 = vld [vmem:[%s3146_s1 + $0x1a0] sm:$0xff]   ;;  %v2350_v7 = vld [vmem:[%s3146_s1 + $0x198] sm:$0xff]   ;;  %v2351_v8 = vld [vmem:[%s3145_s0 + $0x16c] ss:$36 sps:$4 sm:$0xff]  }
  0x3e   :  { %2021 = vmatpush3.bf16.msra.mxu1 %v2292_v23  ;;  %1958 = vmatprep.subr.bf16.mxu0 %v2293_v24  ;;  %v2341_v0 = vld [vmem:[%s3145_s0 + $0x124] ss:$36 sps:$4 sm:$0xff]   ;;  %v2353_v9 = vld [vmem:[%s3145_s0 + $0x174] ss:$36 sps:$4 sm:$0xff]   ;;  %v2363_v17 = vld [vmem:[%s3145_s0 + $0x1bc] ss:$36 sps:$4 sm:$0xff]  }
  0x3f   :  { %2022 = vmatprep.subr.bf16.mxu1 %v2294_v25  ;;  %v2345_v2 = vld [vmem:[%s3145_s0 + $0x120] ss:$36 sps:$4 sm:$0xff]   ;;  %v2357_v10 = vld [vmem:[%s3146_s1 + $0x150] sm:$0xff]   ;;  %v2355_v12 = vld [vmem:[%s3145_s0 + $0x168] ss:$36 sps:$4 sm:$0xff]  }
  0x40   :  { %v2358_v11 = vld [vmem:[%s3146_s1 + $0x1d0] sm:$0xff]   ;;  %v2367_v18 = vld [vmem:[%s3146_s1 + $0x148] sm:$0xff]   ;;  %v2366_v23 = vld [vmem:[%s3145_s0 + $0x1b8] ss:$36 sps:$4 sm:$0xff]  }
  0x41   :  { %1959 = vmatpush3.bf16.msra.mxu0 %v2295_v26  ;;  %v2359_v13 = vld [vmem:[%s3146_s1 + $0x110] sm:$0xff]   ;;  %v2368_v19 = vld [vmem:[%s3146_s1 + $0x1c8] sm:$0xff]   ;;  %v2371_v24 = vld [vmem:[%s3145_s0 + $0x1fc] ss:$36 sps:$4 sm:$0xff]  }
  0x42   :  { %2023 = vmatpush3.bf16.msra.mxu1 %v2296_v27  ;;  %1960 = vmatprep.subr.bf16.mxu0 %v2297_v28  ;;  %v2360_v14 = vld [vmem:[%s3146_s1 + $0x190] sm:$0xff]   ;;  %v2369_v20 = vld [vmem:[%s3146_s1 + $0x108] sm:$0xff]   ;;  %v2377_v26 = vld [vmem:[%s3146_s1 + $0x140] sm:$0xff]  }
  0x43   :  { %2024 = vmatprep.subr.bf16.mxu1 %v2298_v29  ;;  %v2356_v15 = vld [vmem:[%s3145_s0 + $0x170] ss:$36 sps:$4 sm:$0xff]   ;;  %v2370_v21 = vld [vmem:[%s3146_s1 + $0x188] sm:$0xff]   ;;  %v2378_v27 = vld [vmem:[%s3146_s1 + $0x1c0] sm:$0xff]  }
  0x44   :  { %v2361_v16 = vld [vmem:[%s3145_s0 + $0x1b4] ss:$36 sps:$4 sm:$0xff]   ;;  %v2373_v25 = vld [vmem:[%s3145_s0 + $0x204] ss:$36 sps:$4 sm:$0xff]  }
  0x45   :  { %1961 = vmatpush3.bf16.msra.mxu0 %v2299_v30  ;;  %v2365_v22 = vld [vmem:[%s3145_s0 + $0x1b0] ss:$36 sps:$4 sm:$0xff]   ;;  %v2379_v28 = vld [vmem:[%s3146_s1 + $0x100] sm:$0xff]   ;;  %v2375_v30 = vld [vmem:[%s3145_s0 + $0x1f8] ss:$36 sps:$4 sm:$0xff]  }
  0x46   :  { %2025 = vmatpush3.bf16.msra.mxu1 %v2300_v31  ;;  %2074 = vmatprep.subr.bf16.mxu0 %v2307_v36  ;;  %v2380_v29 = vld [vmem:[%s3146_s1 + $0x180] sm:$0xff]   ;;  %v2383_v33 = vld [vmem:[%s3145_s0 + $0x14] ss:$36 sps:$4 sm:$0xff]  }
  0x47   :  { %2138 = vmatprep.subr.bf16.mxu1 %v2308_v37  ;;  %v2376_v31 = vld [vmem:[%s3145_s0 + $0x200] ss:$36 sps:$4 sm:$0xff]   ;;  %v2381_v35 = vld [vmem:[%s3145_s0 + $0x10] ss:$36 sps:$4 sm:$0xff]   ;;  %v2384_v36 = vld [vmem:[%s3145_s0 + $0x18] ss:$36 sps:$4 sm:$0xff]  }
  0x48   :  { %1120 = vmatmul.mubr.bf16.vlgmr.msra.gmra.mxu0 %v2301_v32  ;;  %v2387_v32 = vld [vmem:[%s3146_s1 + $0x238] sm:$0xff]  }
  0x49   :  { %1217 = vmatmul.mubr.bf16.vlgmr.msra.gmra.mxu1 %v2304_v34  ;;  %2075 = vmatpush3.bf16.msra.mxu0 %v2309_v38  ;;  %v2386_v34 = vld [vmem:[%s3145_s0 + $0x1c] ss:$36 sps:$4 sm:$0xff]   ;;  %v2390_v38 = vld [vmem:[%s3145_s0 + $0x64] ss:$36 sps:$4 sm:$0xff]  }
  0x4a   :  { %2139 = vmatpush3.bf16.msra.mxu1 %v2310_v39  ;;  %1127 = vmatprep.mubr.bf16.mxu0 %v2311_v40  ;;  %v2388_v37 = vld [vmem:[%s3145_s0 + $0x5c] ss:$36 sps:$4 sm:$0xff]   ;;  %v2394_v39 = vld [vmem:[%s3146_s1 + $0x230] sm:$0xff]   ;;  %v2401_v40 = vld [vmem:[%s3146_s1 + $0x228] sm:$0xff]  }
  0x4b   :  { %1224 = vmatprep.mubr.bf16.mxu1 %v2313_v41  ;;  %2076 = vmatprep.subr.bf16.mxu0 %v2317_v44  ;;  %v2392_v41 = vld [vmem:[%s3145_s0 + $0x58] ss:$36 sps:$4 sm:$0xff]   ;;  %v2397_v44 = vld [vmem:[%s3145_s0 + $0xac] ss:$36 sps:$4 sm:$0xff]  }
  0x4c   :  { %2140 = vmatprep.subr.bf16.mxu1 %v2318_v45  ;;  %v2408_v45 = vld [vmem:[%s3146_s1 + $0x220] sm:$0xff]  }
  0x4d   :  { %2077 = vmatpush3.bf16.msra.mxu0 %v2319_v46  ;;  %v2415_v46 = vld [vmem:[%s3146_s1 + $0x218] sm:$0xff]  }
  0x4e   :  { %2141 = vmatpush3.bf16.msra.mxu1 %v2320_v47  ;;  %2078 = vmatprep.subr.bf16.mxu0 %v2327_v52  ;;  %v2399_v47 = vld [vmem:[%s3145_s0 + $0xa0] ss:$36 sps:$4 sm:$0xff]   ;;  %v2406_v52 = vld [vmem:[%s3145_s0 + $0xe8] ss:$36 sps:$4 sm:$0xff]  }
  0x4f   :  { %2142 = vmatprep.subr.bf16.mxu1 %v2328_v53  ;;  %v2429_v53 = vld [vmem:[%s3146_s1 + $0x208] sm:$0xff]  }
  0x50   :  { %1128 = vmatmul.mubr.bf16.gmra.mxu0 %v2315_v42  ;;  %v2393_v42 = vld [vmem:[%s3145_s0 + $0x60] ss:$36 sps:$4 sm:$0xff]  }
  0x51   :  { %1225 = vmatmul.mubr.bf16.gmra.mxu1 %v2316_v43  ;;  %1135 = vmatprep.mubr.bf16.mxu0 %v2321_v48  ;;  %v2395_v43 = vld [vmem:[%s3145_s0 + $0xa4] ss:$36 sps:$4 sm:$0xff]  }
  0x52   :  { %1232 = vmatprep.mubr.bf16.mxu1 %v2323_v49  ;;  %2079 = vmatpush3.bf16.msra.mxu0 %v2329_v54  ;;  %v2400_v48 = vld [vmem:[%s3145_s0 + $0xa8] ss:$36 sps:$4 sm:$0xff]   ;;  %v2407_v54 = vld [vmem:[%s3145_s0 + $0xf0] ss:$36 sps:$4 sm:$0xff]  }
  0x53   :  { %2143 = vmatpush3.bf16.msra.mxu1 %v2330_v55  ;;  %2080 = vmatprep.subr.bf16.mxu0 %v2337_v60  ;;  %v2402_v49 = vld [vmem:[%s3145_s0 + $0xec] ss:$36 sps:$4 sm:$0xff]   ;;  %v2409_v55 = vld [vmem:[%s3145_s0 + $0x134] ss:$36 sps:$4 sm:$0xff]   ;;  %v2416_v60 = vld [vmem:[%s3145_s0 + $0x17c] ss:$36 sps:$4 sm:$0xff]  }
  0x54   :  { %2144 = vmatprep.subr.bf16.mxu1 %v2338_v61  ;;  %v2418_v61 = vld [vmem:[%s3145_s0 + $0x184] ss:$36 sps:$4 sm:$0xff]  }
  0x56   :  { %2081 = vmatpush3.bf16.msra.mxu0 %v2339_v62  ;;  %v2420_v62 = vld [vmem:[%s3145_s0 + $0x178] ss:$36 sps:$4 sm:$0xff]  }
  0x57   :  { %2145 = vmatpush3.bf16.msra.mxu1 %v2340_v63  ;;  %2082 = vmatprep.subr.bf16.mxu0 %v2347_v3  ;;  %v2421_v63 = vld [vmem:[%s3145_s0 + $0x180] ss:$36 sps:$4 sm:$0xff]   ;;  %v2428_v3 = vld [vmem:[%s3145_s0 + $0x1c8] ss:$36 sps:$4 sm:$0xff]  }
  0x58   :  { %1136 = vmatmul.mubr.bf16.gmra.mxu0 %v2325_v50  ;;  %2146 = vmatprep.subr.bf16.mxu1 %v2348_v5  ;;  %v2404_v50 = vld [vmem:[%s3145_s0 + $0xf4] ss:$36 sps:$4 sm:$0xff]  }
  0x59   :  { %1233 = vmatmul.mubr.bf16.gmra.mxu1 %v2326_v51  ;;  %1143 = vmatprep.mubr.bf16.mxu0 %v2331_v56  ;;  %v2422_v51 = vld [vmem:[%s3146_s1 + $0x210] sm:$0xff]   ;;  %v2411_v56 = vld [vmem:[%s3145_s0 + $0x13c] ss:$36 sps:$4 sm:$0xff]  }
  0x5a   :  { %1240 = vmatprep.mubr.bf16.mxu1 %v2333_v57  ;;  %2083 = vmatpush3.bf16.msra.mxu0 %v2349_v6  ;;  %v2436_v57 = vld [vmem:[%s3146_s1 + $0x200] sm:$0xff]   ;;  %v2432_v5 = vld [vmem:[%s3145_s0 + $0x214] ss:$36 sps:$4 sm:$0xff]   ;;  %v2434_v6 = vld [vmem:[%s3145_s0 + $0x208] ss:$36 sps:$4 sm:$0xff]  }
  0x5b   :  { %2147 = vmatpush3.bf16.msra.mxu1 %v2350_v7  ;;  %2084 = vmatprep.subr.bf16.mxu0 %v2357_v10  ;;  %v2435_v7 = vld [vmem:[%s3145_s0 + $0x210] ss:$36 sps:$4 sm:$0xff]   ;;  %v2439_v10 = vld [vmem:[%s3145_s0 + $0x68] ss:$36 sps:$4 sm:$0xff]  }
  0x5c   :  { %2148 = vmatprep.subr.bf16.mxu1 %v2358_v11  ;;  %v2440_v11 = vld [vmem:[%s3145_s0 + $0x188] ss:$36 sps:$4 sm:$0xff]  }
  0x5e   :  { %2085 = vmatpush3.bf16.msra.mxu0 %v2359_v13  ;;  %v2442_v13 = vld [vmem:[%s3145_s0 + $0x1d0] ss:$36 sps:$4 sm:$0xff]  }
  0x5f   :  { %2149 = vmatpush3.bf16.msra.mxu1 %v2360_v14  ;;  %2086 = vmatprep.subr.bf16.mxu0 %v2367_v18  ;;  %v2443_v14 = vld [vmem:[%s3145_s0 + $0xf8] ss:$36 sps:$4 sm:$0xff]   ;;  %v2983_v18 = vld [vmem:[#allocation2] ss:$0 sm:$0xff] }
  0x60   :  { %1144 = vmatmul.mubr.bf16.gmra.mxu0 %v2335_v58  ;;  %2150 = vmatprep.subr.bf16.mxu1 %v2368_v19  ;;  %v2413_v58 = vld [vmem:[%s3145_s0 + $0x130] ss:$36 sps:$4 sm:$0xff]  }
  0x61   :  { %1241 = vmatmul.mubr.bf16.gmra.mxu1 %v2336_v59  ;;  %1151 = vmatprep.mubr.bf16.mxu0 %v2341_v0  ;;  %v2414_v59 = vld [vmem:[%s3145_s0 + $0x138] ss:$36 sps:$4 sm:$0xff]   ;;  %v2423_v0 = vld [vmem:[%s3145_s0 + $0x1c4] ss:$36 sps:$4 sm:$0xff]  }
  0x62   :  { %1248 = vmatprep.mubr.bf16.mxu1 %v2343_v1  ;;  %2087 = vmatpush3.bf16.msra.mxu0 %v2369_v20  ;;  %v2425_v1 = vld [vmem:[%s3145_s0 + $0x1cc] ss:$36 sps:$4 sm:$0xff]  }
  0x63   :  { %2151 = vmatpush3.bf16.msra.mxu1 %v2370_v21  ;;  %2088 = vmatprep.subr.bf16.mxu0 %v2377_v26 }
  0x64   :  { %2152 = vmatprep.subr.bf16.mxu1 %v2378_v27 }
  0x66   :  { %2089 = vmatpush3.bf16.msra.mxu0 %v2379_v28 }
  0x67   :  { %2153 = vmatpush3.bf16.msra.mxu1 %v2380_v29  ;;  %2218 = vmatprep.subr.bf16.mxu0 %v2387_v32 }
  0x68   :  { %1152 = vmatmul.mubr.bf16.gmra.mxu0 %v2345_v2  ;;  %2250 = vmatprep.subr.bf16.mxu1 %v2387_v32  ;;  %v2427_v2 = vld [vmem:[%s3145_s0 + $0x1c0] ss:$36 sps:$4 sm:$0xff]  }
  0x69   :  { %1249 = vmatmul.mubr.bf16.gmra.mxu1 %v2346_v4  ;;  %1159 = vmatprep.mubr.bf16.mxu0 %v2351_v8  ;;  %v2430_v4 = vld [vmem:[%s3145_s0 + $0x20c] ss:$36 sps:$4 sm:$0xff]   ;;  %v2437_v8 = vld [vmem:[%s3145_s0 + $0x20] ss:$36 sps:$4 sm:$0xff]  }
  0x6a   :  { %1256 = vmatprep.mubr.bf16.mxu1 %v2353_v9  ;;  %v2438_v9 = vld [vmem:[%s3145_s0 + $0x140] ss:$36 sps:$4 sm:$0xff]  }
  0x70   :  { %1160 = vmatmul.mubr.bf16.gmra.mxu0 %v2355_v12  ;;  %v2441_v12 = vld [vmem:[%s3145_s0 + $0xb0] ss:$36 sps:$4 sm:$0xff]  }
  0x71   :  { %1257 = vmatmul.mubr.bf16.gmra.mxu1 %v2356_v15  ;;  %1167 = vmatprep.mubr.bf16.mxu0 %v2361_v16  ;;  %v2444_v15 = vld [vmem:[%s3145_s0 + $0x218] ss:$36 sps:$4 sm:$0xff]  }
  0x72   :  { %1264 = vmatprep.mubr.bf16.mxu1 %v2363_v17 }
  0x78   :  { %1168 = vmatmul.mubr.bf16.gmra.mxu0 %v2365_v22 }
  0x79   :  { %1265 = vmatmul.mubr.bf16.gmra.mxu1 %v2366_v23  ;;  %1175 = vmatprep.mubr.bf16.mxu0 %v2371_v24 }
  0x7a   :  { %1272 = vmatprep.mubr.bf16.mxu1 %v2373_v25 }
  0x80   :  { %1176 = vmatmul.mubr.bf16.gmra.mxu0 %v2375_v30 }
  0x81   :  { %1273 = vmatmul.mubr.bf16.gmra.mxu1 %v2376_v31  ;;  %1313 = vmatprep.mubr.bf16.mxu0 %v2383_v33 }
  0x82   :  { %1410 = vmatprep.mubr.bf16.mxu1 %v2386_v34 }
  0x88   :  { %1314 = vmatmul.mubr.bf16.vlgmr.msra.gmra.mxu0 %v2381_v35 }
  0x89   :  { %1411 = vmatmul.mubr.bf16.vlgmr.msra.gmra.mxu1 %v2384_v36  ;;  %2219 = vmatpush3.bf16.msra.mxu0 %v2387_v32 }
  0x8a   :  { %2258 = vmatpush3.bf16.msra.mxu1 %v2387_v32  ;;  %1321 = vmatprep.mubr.bf16.mxu0 %v2388_v37 }
  0x8b   :  { %1418 = vmatprep.mubr.bf16.mxu1 %v2390_v38  ;;  %2220 = vmatprep.subr.bf16.mxu0 %v2394_v39 }
  0x8c   :  { %2251 = vmatprep.subr.bf16.mxu1 %v2394_v39 }
  0x8d   :  { %2221 = vmatpush3.bf16.msra.mxu0 %v2394_v39 }
  0x8e   :  { %2259 = vmatpush3.bf16.msra.mxu1 %v2394_v39  ;;  %2222 = vmatprep.subr.bf16.mxu0 %v2401_v40 }
  0x8f   :  { %2252 = vmatprep.subr.bf16.mxu1 %v2401_v40 }
  0x90   :  { %1322 = vmatmul.mubr.bf16.gmra.mxu0 %v2392_v41 }
  0x91   :  { %1419 = vmatmul.mubr.bf16.gmra.mxu1 %v2393_v42  ;;  %1329 = vmatprep.mubr.bf16.mxu0 %v2395_v43 }
  0x92   :  { %1426 = vmatprep.mubr.bf16.mxu1 %v2397_v44  ;;  %2223 = vmatpush3.bf16.msra.mxu0 %v2401_v40 }
  0x93   :  { %2260 = vmatpush3.bf16.msra.mxu1 %v2401_v40  ;;  %2224 = vmatprep.subr.bf16.mxu0 %v2408_v45 }
  0x94   :  { %2253 = vmatprep.subr.bf16.mxu1 %v2408_v45 }
  0x96   :  { %2225 = vmatpush3.bf16.msra.mxu0 %v2408_v45 }
  0x97   :  { %2261 = vmatpush3.bf16.msra.mxu1 %v2408_v45  ;;  %2226 = vmatprep.subr.bf16.mxu0 %v2415_v46 }
  0x98   :  { %1330 = vmatmul.mubr.bf16.gmra.mxu0 %v2399_v47  ;;  %2254 = vmatprep.subr.bf16.mxu1 %v2415_v46 }
  0x99   :  { %1427 = vmatmul.mubr.bf16.gmra.mxu1 %v2400_v48  ;;  %1337 = vmatprep.mubr.bf16.mxu0 %v2402_v49 }
  0x9a   :  { %1434 = vmatprep.mubr.bf16.mxu1 %v2404_v50  ;;  %2227 = vmatpush3.bf16.msra.mxu0 %v2415_v46 }
  0x9b   :  { %2262 = vmatpush3.bf16.msra.mxu1 %v2415_v46  ;;  %2228 = vmatprep.subr.bf16.mxu0 %v2422_v51 }
  0x9c   :  { %2255 = vmatprep.subr.bf16.mxu1 %v2422_v51 }
  0x9e   :  { %2229 = vmatpush3.bf16.msra.mxu0 %v2422_v51 }
  0x9f   :  { %2263 = vmatpush3.bf16.msra.mxu1 %v2422_v51  ;;  %2230 = vmatprep.subr.bf16.mxu0 %v2429_v53 }
  0xa0   :  { %1338 = vmatmul.mubr.bf16.gmra.mxu0 %v2406_v52  ;;  %2256 = vmatprep.subr.bf16.mxu1 %v2429_v53 }
  0xa1   :  { %1435 = vmatmul.mubr.bf16.gmra.mxu1 %v2407_v54  ;;  %1345 = vmatprep.mubr.bf16.mxu0 %v2409_v55 }
  0xa2   :  { %1442 = vmatprep.mubr.bf16.mxu1 %v2411_v56  ;;  %2231 = vmatpush3.bf16.msra.mxu0 %v2429_v53 }
  0xa3   :  { %2264 = vmatpush3.bf16.msra.mxu1 %v2429_v53  ;;  %2232 = vmatprep.subr.bf16.mxu0 %v2436_v57 }
  0xa4   :  { %2257 = vmatprep.subr.bf16.mxu1 %v2436_v57 }
  0xa6   :  { %2233 = vmatpush3.bf16.msra.mxu0 %v2436_v57 }
  0xa7   :  { %2265 = vmatpush3.bf16.msra.mxu1 %v2436_v57 }
  0xa8   :  { %1346 = vmatmul.mubr.bf16.gmra.mxu0 %v2413_v58 }
  0xa9   :  { %1443 = vmatmul.mubr.bf16.gmra.mxu1 %v2414_v59  ;;  %1353 = vmatprep.mubr.bf16.mxu0 %v2416_v60 }
  0xaa   :  { %1450 = vmatprep.mubr.bf16.mxu1 %v2418_v61 }
  0xb0   :  { %1354 = vmatmul.mubr.bf16.gmra.mxu0 %v2420_v62 }
  0xb1   :  { %1451 = vmatmul.mubr.bf16.gmra.mxu1 %v2421_v63  ;;  %1361 = vmatprep.mubr.bf16.mxu0 %v2423_v0 }
  0xb2   :  { %1458 = vmatprep.mubr.bf16.mxu1 %v2425_v1 }
  0xb8   :  { %1362 = vmatmul.mubr.bf16.gmra.mxu0 %v2427_v2 }
  0xb9   :  { %1459 = vmatmul.mubr.bf16.gmra.mxu1 %v2428_v3  ;;  %1369 = vmatprep.mubr.bf16.mxu0 %v2430_v4 }
  0xba   :  { %1466 = vmatprep.mubr.bf16.mxu1 %v2432_v5 }
  0xc0   :  { %1370 = vmatmul.mubr.bf16.gmra.mxu0 %v2434_v6 }
  0xc1   :  { %1467 = vmatmul.mubr.bf16.gmra.mxu1 %v2435_v7  ;;  %2234 = vmatprep.mubr.bf16.mxu0 %v2437_v8 }
  0xc2   :  { %2242 = vmatprep.mubr.bf16.mxu1 %v2438_v9 }
  0xc8   :  { %2235 = vmatmul.mubr.bf16.vlgmr.msra.gmra.mxu0 %v2439_v10 }
  0xc9   :  { %2243 = vmatmul.mubr.bf16.vlgmr.msra.gmra.mxu1 %v2440_v11  ;;  %2238 = vmatprep.mubr.bf16.mxu0 %v2441_v12 }
  0xca   :  { %2246 = vmatprep.mubr.bf16.mxu1 %v2442_v13 }
  0xd0   :  { %2239 = vmatmul.mubr.bf16.gmra.mxu0 %v2443_v14 }
  0xd1   :  { %2247 = vmatmul.mubr.bf16.gmra.mxu1 %v2444_v15 }
 0x108   :  { %v1962_v16 = vpop.f32.mrf.mxu0 }
 0x109   :  { %v2026_v17 = vpop.f32.mrf.mxu1 }
 0x10a   :  { %v1963_v19 = vpop.f32.mrf.mxu0 }
 0x10b   :  { %v1964_v20 = vadd.f32 %v1963_v19, %v1962_v16  ;;  %v2027_v21 = vpop.f32.mrf.mxu1 }
 0x10c   :  { %v2028_v22 = vadd.f32 %v2027_v21, %v2026_v17  ;;  %v1965_v23 = vpop.f32.mrf.mxu0 }
 0x10d   :  { %v1122_v24 = vadd.f32 %v1964_v20, %v2983_v18  ;;  %v2029_v25 = vpop.f32.mrf.mxu1 }
 0x10e   :  { %v1966_v26 = vpop.f32.mrf.mxu0 }
 0x10f   :  { %v2986_v27 = vadd.f32 %v2028_v22, %v1122_v24  ;;  %v1967_v28 = vadd.f32 %v1966_v26, %v1965_v23  ;;  %v2030_v29 = vpop.f32.mrf.mxu1 }
 0x110   :  { %v2031_v30 = vadd.f32 %v2030_v29, %v2029_v25  ;;  %v1968_v31 = vpop.f32.mrf.mxu0 }
 0x111   :  { %v1125_v32 = vadd.f32 %v1967_v28, %v2983_v18  ;;  %v2032_v33 = vpop.f32.mrf.mxu1 }
 0x112   :  { %v1969_v34 = vpop.f32.mrf.mxu0 }
 0x113   :  { %v2989_v35 = vadd.f32 %v2031_v30, %v1125_v32  ;;  %v1970_v36 = vadd.f32 %v1969_v34, %v1968_v31  ;;  %v2033_v37 = vpop.f32.mrf.mxu1 }
 0x114   :  { %v2034_v38 = vadd.f32 %v2033_v37, %v2032_v33  ;;  %v1971_v39 = vpop.f32.mrf.mxu0 }
 0x115   :  { %v1130_v40 = vadd.f32 %v1970_v36, %v2983_v18  ;;  %v2035_v41 = vpop.f32.mrf.mxu1 }
 0x116   :  { %v1972_v42 = vpop.f32.mrf.mxu0 }
 0x117   :  { %v2992_v43 = vadd.f32 %v2034_v38, %v1130_v40  ;;  %v1973_v44 = vadd.f32 %v1972_v42, %v1971_v39  ;;  %v2036_v45 = vpop.f32.mrf.mxu1 }
 0x118   :  { %v2037_v46 = vadd.f32 %v2036_v45, %v2035_v41  ;;  %v1974_v47 = vpop.f32.mrf.mxu0 }
 0x119   :  { %v1133_v48 = vadd.f32 %v1973_v44, %v2983_v18  ;;  %v2038_v49 = vpop.f32.mrf.mxu1 }
 0x11a   :  { %v1975_v50 = vpop.f32.mrf.mxu0 }
 0x11b   :  { %v2995_v51 = vadd.f32 %v2037_v46, %v1133_v48  ;;  %v1976_v52 = vadd.f32 %v1975_v50, %v1974_v47  ;;  %v2039_v53 = vpop.f32.mrf.mxu1 }
 0x11c   :  { %v2040_v54 = vadd.f32 %v2039_v53, %v2038_v49  ;;  %v1977_v55 = vpop.f32.mrf.mxu0 }
 0x11d   :  { %v1138_v56 = vadd.f32 %v1976_v52, %v2983_v18  ;;  %v2041_v57 = vpop.f32.mrf.mxu1 }
 0x11e   :  { %v1978_v58 = vpop.f32.mrf.mxu0 }
 0x11f   :  { %v2998_v59 = vadd.f32 %v2040_v54, %v1138_v56  ;;  %v1979_v60 = vadd.f32 %v1978_v58, %v1977_v55  ;;  %v2042_v61 = vpop.f32.mrf.mxu1 }
 0x120   :  { %v2043_v62 = vadd.f32 %v2042_v61, %v2041_v57  ;;  %v1980_v63 = vpop.f32.mrf.mxu0 }
 0x121   :  { %v1141_v0 = vadd.f32 %v1979_v60, %v2983_v18  ;;  %v2044_v1 = vpop.f32.mrf.mxu1 }
 0x122   :  { %v1981_v2 = vpop.f32.mrf.mxu0 }
 0x123   :  { %v3001_v3 = vadd.f32 %v2043_v62, %v1141_v0  ;;  %v1982_v4 = vadd.f32 %v1981_v2, %v1980_v63  ;;  %v2045_v5 = vpop.f32.mrf.mxu1 }
 0x124   :  { %v2046_v6 = vadd.f32 %v2045_v5, %v2044_v1  ;;  %v1983_v7 = vpop.f32.mrf.mxu0 }
 0x125   :  { %v1146_v8 = vadd.f32 %v1982_v4, %v2983_v18  ;;  %v2047_v9 = vpop.f32.mrf.mxu1 }
 0x126   :  { %v1984_v10 = vpop.f32.mrf.mxu0 }
 0x127   :  { %v3004_v11 = vadd.f32 %v2046_v6, %v1146_v8  ;;  %v1985_v12 = vadd.f32 %v1984_v10, %v1983_v7  ;;  %v2048_v13 = vpop.f32.mrf.mxu1 }
 0x128   :  { %v2049_v14 = vadd.f32 %v2048_v13, %v2047_v9  ;;  %v1986_v15 = vpop.f32.mrf.mxu0 }
 0x129   :  { %v1149_v16 = vadd.f32 %v1985_v12, %v2983_v18  ;;  %v2050_v17 = vpop.f32.mrf.mxu1 }
 0x12a   :  { %v1987_v19 = vpop.f32.mrf.mxu0 }
 0x12b   :  { %v3007_v20 = vadd.f32 %v2049_v14, %v1149_v16  ;;  %v1988_v21 = vadd.f32 %v1987_v19, %v1986_v15  ;;  %v2051_v22 = vpop.f32.mrf.mxu1 }
 0x12c   :  { %v2052_v23 = vadd.f32 %v2051_v22, %v2050_v17  ;;  %v1989_v24 = vpop.f32.mrf.mxu0 }
 0x12d   :  { %3151 = vst [vmem:[#allocation9_spill] sm:$0xff] %v3007_v20  ;;  %v1154_v25 = vadd.f32 %v1988_v21, %v2983_v18  ;;  %v2053_v26 = vpop.f32.mrf.mxu1 }
 0x12e   :  { %v1990_v28 = vpop.f32.mrf.mxu0 }
 0x12f   :  { %v3010_v29 = vadd.f32 %v2052_v23, %v1154_v25  ;;  %v1991_v30 = vadd.f32 %v1990_v28, %v1989_v24  ;;  %v2054_v31 = vpop.f32.mrf.mxu1 }
 0x130   :  { %v2055_v32 = vadd.f32 %v2054_v31, %v2053_v26  ;;  %v1992_v33 = vpop.f32.mrf.mxu0 }
 0x131   :  { %3152 = vst [vmem:[#allocation10_spill] sm:$0xff] %v3010_v29  ;;  %v1157_v34 = vadd.f32 %v1991_v30, %v2983_v18  ;;  %v2056_v36 = vpop.f32.mrf.mxu1 }
 0x132   :  { %v1993_v37 = vpop.f32.mrf.mxu0 }
 0x133   :  { %v3013_v38 = vadd.f32 %v2055_v32, %v1157_v34  ;;  %v1994_v39 = vadd.f32 %v1993_v37, %v1992_v33  ;;  %v2057_v40 = vpop.f32.mrf.mxu1 }
 0x134   :  { %v2058_v41 = vadd.f32 %v2057_v40, %v2056_v36  ;;  %v1995_v42 = vpop.f32.mrf.mxu0 }
 0x135   :  { %3153 = vst [vmem:[#allocation11_spill] sm:$0xff] %v3013_v38  ;;  %v1162_v44 = vadd.f32 %v1994_v39, %v2983_v18  ;;  %v2059_v45 = vpop.f32.mrf.mxu1 }
 0x136   :  { %v1996_v46 = vpop.f32.mrf.mxu0 }
 0x137   :  { %v3016_v47 = vadd.f32 %v2058_v41, %v1162_v44  ;;  %v1997_v48 = vadd.f32 %v1996_v46, %v1995_v42  ;;  %v2060_v49 = vpop.f32.mrf.mxu1 }
 0x138   :  { %v2061_v50 = vadd.f32 %v2060_v49, %v2059_v45  ;;  %v1998_v52 = vpop.f32.mrf.mxu0 }
 0x139   :  { %v1165_v53 = vadd.f32 %v1997_v48, %v2983_v18  ;;  %v2062_v54 = vpop.f32.mrf.mxu1 }
 0x13a   :  { %v1999_v55 = vpop.f32.mrf.mxu0 }
 0x13b   :  { %v3019_v56 = vadd.f32 %v2061_v50, %v1165_v53  ;;  %v2000_v57 = vadd.f32 %v1999_v55, %v1998_v52  ;;  %v2063_v58 = vpop.f32.mrf.mxu1 }
 0x13c   :  { %v2064_v60 = vadd.f32 %v2063_v58, %v2062_v54  ;;  %v2001_v61 = vpop.f32.mrf.mxu0 }
 0x13d   :  { %3154 = vst [vmem:[#allocation12_spill] sm:$0xff] %v3019_v56  ;;  %v1170_v62 = vadd.f32 %v2000_v57, %v2983_v18  ;;  %v2065_v63 = vpop.f32.mrf.mxu1 }
 0x13e   :  { %v2002_v0 = vpop.f32.mrf.mxu0 }
 0x13f   :  { %v3022_v1 = vadd.f32 %v2064_v60, %v1170_v62  ;;  %v2003_v2 = vadd.f32 %v2002_v0, %v2001_v61  ;;  %v2066_v4 = vpop.f32.mrf.mxu1 }
 0x140   :  { %v2067_v5 = vadd.f32 %v2066_v4, %v2065_v63  ;;  %v2004_v6 = vpop.f32.mrf.mxu0 }
 0x141   :  { %3155 = vst [vmem:[#allocation13_spill] sm:$0xff] %v3022_v1  ;;  %v1173_v7 = vadd.f32 %v2003_v2, %v2983_v18  ;;  %v2068_v8 = vpop.f32.mrf.mxu1 }
 0x142   :  { %v2005_v9 = vpop.f32.mrf.mxu0 }
 0x143   :  { %v3025_v10 = vadd.f32 %v2067_v5, %v1173_v7  ;;  %v2006_v12 = vadd.f32 %v2005_v9, %v2004_v6  ;;  %v2069_v13 = vpop.f32.mrf.mxu1 }
 0x144   :  { %v2070_v14 = vadd.f32 %v2069_v13, %v2068_v8  ;;  %v2007_v15 = vpop.f32.mrf.mxu0 }
 0x145   :  { %3156 = vst [vmem:[#allocation14_spill] sm:$0xff] %v3025_v10  ;;  %v1178_v16 = vadd.f32 %v2006_v12, %v2983_v18  ;;  %v2071_v17 = vpop.f32.mrf.mxu1 }
 0x146   :  { %v2008_v19 = vpop.f32.mrf.mxu0 }
 0x147   :  { %v3028_v21 = vadd.f32 %v2070_v14, %v1178_v16  ;;  %v2009_v22 = vadd.f32 %v2008_v19, %v2007_v15  ;;  %v2072_v23 = vpop.f32.mrf.mxu1 }
 0x148   :  { %v2073_v24 = vadd.f32 %v2072_v23, %v2071_v17  ;;  %v2090_v25 = vpop.f32.mrf.mxu0 }
 0x149   :  { %3157 = vst [vmem:[#allocation15_spill] sm:$0xff] %v3028_v21  ;;  %v1181_v26 = vadd.f32 %v2009_v22, %v2983_v18  ;;  %v2154_v28 = vpop.f32.mrf.mxu1 }
 0x14a   :  { %v2091_v30 = vpop.f32.mrf.mxu0 }
 0x14b   :  { %v3031_v31 = vadd.f32 %v2073_v24, %v1181_v26  ;;  %v2092_v32 = vadd.f32 %v2091_v30, %v2090_v25  ;;  %v2155_v33 = vpop.f32.mrf.mxu1 }
 0x14c   :  { %v2093_v34 = vpop.f32.mrf.mxu0  ;;  %v2156_v37 = vadd.f32 %v2155_v33, %v2154_v28 }
 0x14d   :  { %3158 = vst [vmem:[#allocation16_spill] sm:$0xff] %v3031_v31  ;;  %v1316_v36 = vadd.f32 %v2092_v32, %v2986_v27  ;;  %v2157_v39 = vpop.f32.mrf.mxu1 }
 0x14e   :  { %v2094_v40 = vpop.f32.mrf.mxu0 }
 0x14f   :  { %v2158_v41 = vpop.f32.mrf.mxu1  ;;  %v3034_v42 = vadd.f32 %v2156_v37, %v1316_v36  ;;  %v2095_v37 = vadd.f32 %v2094_v40, %v2093_v34 }
 0x150   :  { %v2096_v44 = vpop.f32.mrf.mxu0 }
 0x151   :  { %3159 = vst [vmem:[#allocation17_spill] sm:$0xff] %v3034_v42  ;;  %v2160_v45 = vpop.f32.mrf.mxu1 }
 0x152   :  { %v2097_v46 = vpop.f32.mrf.mxu0 }
 0x153   :  { %v2161_v48 = vpop.f32.mrf.mxu1  ;;  %v2098_v31 = vadd.f32 %v2097_v46, %v2096_v44 }
 0x154   :  { %v2099_v18 = vpop.f32.mrf.mxu0  ;;  %v2162_v29 = vadd.f32 %v2161_v48, %v2160_v45 }
 0x155   :  { %v2163_v49 = vpop.f32.mrf.mxu1  ;;  %v1324_v38 = vadd.f32 %v2098_v31, %v2992_v43 }
 0x156   :  { %v2100_v50 = vpop.f32.mrf.mxu0 }
 0x157   :  { %v2164_v52 = vpop.f32.mrf.mxu1  ;;  %v2101_v42 = vadd.f32 %v2100_v50, %v2099_v18 }
 0x158   :  { %v2102_v53 = vpop.f32.mrf.mxu0 }
 0x159   :  { %v2166_v54 = vpop.f32.mrf.mxu1  ;;  %v1327_v20 = vadd.f32 %v2101_v42, %v2995_v51 }
 0x15a   :  { %v2103_v55 = vpop.f32.mrf.mxu0 }
 0x15b   :  { %v2167_v57 = vpop.f32.mrf.mxu1 }
 0x15c   :  { %v2105_v58 = vpop.f32.mrf.mxu0 }
 0x15d   :  { %v2169_v27 = vpop.f32.mrf.mxu1 }
 0x15e   :  { %v2106_v60 = vpop.f32.mrf.mxu0 }
 0x15f   :  { %v2170_v61 = vpop.f32.mrf.mxu1  ;;  %v2107_v1 = vadd.f32 %v2106_v60, %v2105_v58  ;;  %v2168_v60 = vadd.f32 %v2167_v57, %v2166_v54  ;;  %v3167_v54 = vld [vmem:[#allocation10_spill] sm:$0xff] }
 0x160   :  { %v2108_v62 = vpop.f32.mrf.mxu0  ;;  %v2171_v43 = vadd.f32 %v2170_v61, %v2169_v27  ;;  %v3168_v27 = vld [vmem:[#allocation11_spill] sm:$0xff] }
 0x161   :  { %v2172_v63 = vpop.f32.mrf.mxu1  ;;  %v1335_v46 = vadd.f32 %v2107_v1, %v3001_v3  ;;  %v3166_v1 = vld [vmem:[#allocation9_spill] sm:$0xff] }
 0x162   :  { %v2109_v0 = vpop.f32.mrf.mxu0 }
 0x163   :  { %v2173_v2 = vpop.f32.mrf.mxu1 }
 0x164   :  { %v2111_v4 = vpop.f32.mrf.mxu0  ;;  %v2174_v31 = vadd.f32 %v2173_v2, %v2172_v63  ;;  %v3169_v2 = vld [vmem:[#allocation12_spill] sm:$0xff] }
 0x165   :  { %v3036_v5 = vpop.f32.mrf.mxu1 }
 0x166   :  { %3160 = vst [vmem:[#allocation18_spill] sm:$0xff] %v3036_v5  ;;  %v2112_v6 = vpop.f32.mrf.mxu0  ;;  %v2159_v5 = vadd.f32 %v2158_v41, %v2157_v39 }
 0x167   :  { %v3038_v7 = vpop.f32.mrf.mxu1  ;;  %v2113_v50 = vadd.f32 %v2112_v6, %v2111_v4 }
 0x168   :  { %3161 = vst [vmem:[#allocation19_spill] sm:$0xff] %v3038_v7  ;;  %v2114_v8 = vpop.f32.mrf.mxu0  ;;  %v1319_v7 = vadd.f32 %v2095_v37, %v2989_v35 }
 0x169   :  { %v3040_v9 = vpop.f32.mrf.mxu1 }
 0x16a   :  { %3162 = vst [vmem:[#allocation20_spill] sm:$0xff] %v3040_v9  ;;  %v2115_v12 = vpop.f32.mrf.mxu0  ;;  %v1416_v3 = vadd.f32 %v2159_v5, %v1319_v7 }
 0x16b   :  { %v3042_v13 = vpop.f32.mrf.mxu1  ;;  %v2116_v58 = vadd.f32 %v2115_v12, %v2114_v8  ;;  %v3174_v12 = vld [vmem:[#allocation13_spill] sm:$0xff] }
 0x16c   :  { %3163 = vst [vmem:[#allocation21_spill] sm:$0xff] %v3042_v13  ;;  %v2117_v14 = vpop.f32.mrf.mxu0  ;;  %v2110_v13 = vadd.f32 %v2109_v0, %v2108_v62 }
 0x16d   :  { %v3044_v15 = vpop.f32.mrf.mxu1  ;;  %v1348_v57 = vadd.f32 %v2116_v58, %v3167_v54 }
 0x16e   :  { %3164 = vst [vmem:[#allocation22_spill] sm:$0xff] %v3044_v15  ;;  %v2118_v16 = vpop.f32.mrf.mxu0  ;;  %v2104_v15 = vadd.f32 %v2103_v55, %v2102_v53  ;;  %v1340_v18 = vadd.f32 %v2110_v13, %v3004_v11  ;;  %v2165_v55 = vadd.f32 %v2164_v52, %v2163_v49  ;;  %v1343_v11 = vadd.f32 %v2113_v50, %v3166_v1 }
 0x16f   :  { %v3046_v17 = vpop.f32.mrf.mxu1  ;;  %v2119_v35 = vadd.f32 %v2118_v16, %v2117_v14  ;;  %v3062_v52 = vadd.f32 %v2171_v43, %v1335_v46 }
 0x170   :  { %3165 = vst [vmem:[#allocation23_spill] sm:$0xff] %v3046_v17  ;;  %v2120_v19 = vpop.f32.mrf.mxu0  ;;  %v1332_v44 = vadd.f32 %v2104_v15, %v2998_v59  ;;  %v1421_v59 = vadd.f32 %v2162_v29, %v1324_v38  ;;  %v1424_v62 = vadd.f32 %v2165_v55, %v1327_v20  ;;  %v3058_v4 = vadd.f32 %v2174_v31, %v1340_v18  ;;  %v3170_v29 = vld [vmem:[#allocation18_spill] sm:$0xff]  ;;  %v3171_v20 = vld [vmem:[#allocation19_spill] sm:$0xff] }
 0x171   :  { %v2184_v22 = vpop.f32.mrf.mxu1  ;;  %v1351_v61 = vadd.f32 %v2119_v35, %v3168_v27  ;;  %v2177_v38 = vadd.f32 %v3171_v20, %v3170_v29  ;;  %v3172_v5 = vld [vmem:[#allocation20_spill] sm:$0xff] }
 0x172   :  { %v2121_v23 = vpop.f32.mrf.mxu0  ;;  %v3060_v49 = vadd.f32 %v2168_v60, %v1332_v44 }
 0x173   :  { %v2185_v24 = vpop.f32.mrf.mxu1  ;;  %v2122_v34 = vadd.f32 %v2121_v23, %v2120_v19  ;;  %v3173_v7 = vld [vmem:[#allocation21_spill] sm:$0xff]  ;;  %v3074_v44 = vadd.f32 %v2177_v38, %v1343_v11 }
 0x174   :  { %v2123_v25 = vpop.f32.mrf.mxu0  ;;  %v2186_v63 = vadd.f32 %v2185_v24, %v2184_v22  ;;  %v2180_v8 = vadd.f32 %v3173_v7, %v3172_v5 }
 0x175   :  { %v2187_v26 = vpop.f32.mrf.mxu1  ;;  %v1356_v42 = vadd.f32 %v2122_v34, %v3016_v47  ;;  %v3175_v16 = vld [vmem:[#allocation22_spill] sm:$0xff] }
 0x176   :  { %v2124_v28 = vpop.f32.mrf.mxu0  ;;  %v1445_v50 = vadd.f32 %v2180_v8, %v1348_v57 }
 0x177   :  { %v2188_v30 = vpop.f32.mrf.mxu1  ;;  %v2125_v39 = vadd.f32 %v2124_v28, %v2123_v25  ;;  %v3176_v19 = vld [vmem:[#allocation23_spill] sm:$0xff]  ;;  %v1453_v22 = vadd.f32 %v2186_v63, %v1356_v42  ;;  %v3180_v42 = vld [vmem:[#allocation14_spill] sm:$0xff] }
 0x178   :  { %v2126_v32 = vpop.f32.mrf.mxu0  ;;  %v2183_v23 = vadd.f32 %v3176_v19, %v3175_v16  ;;  %v2189_v25 = vadd.f32 %v2188_v30, %v2187_v26  ;;  %v3178_v26 = vld [vmem:[#allocation17_spill] sm:$0xff] }
 0x179   :  { %v2190_v33 = vpop.f32.mrf.mxu1  ;;  %v1359_v47 = vadd.f32 %v2125_v39, %v3169_v2 }
 0x17a   :  { %v2127_v36 = vpop.f32.mrf.mxu0  ;;  %v1448_v58 = vadd.f32 %v2183_v23, %v1351_v61 }
 0x17b   :  { %v2191_v10 = vpop.f32.mrf.mxu1  ;;  %v2128_v45 = vadd.f32 %v2127_v36, %v2126_v32  ;;  %v1456_v55 = vadd.f32 %v2189_v25, %v1359_v47  ;;  %v3084_v47 = vld [vmem:[#allocation6] ss:$0 sm:$0xff] }
 0x17c   :  { %v2129_v21 = vpop.f32.mrf.mxu0  ;;  %v2192_v24 = vadd.f32 %v2191_v10, %v2190_v33 }
 0x17d   :  { %v3048_v17 = vpop.f32.mrf.mxu1  ;;  %v1364_v13 = vadd.f32 %v2128_v45, %v3174_v12 }
 0x17e   :  { %v2130_v9 = vpop.f32.mrf.mxu0 }
 0x17f   :  { %v2194_v56 = vpop.f32.mrf.mxu1  ;;  %v2131_v36 = vadd.f32 %v2130_v9, %v2129_v21  ;;  %v1461_v43 = vadd.f32 %v2192_v24, %v1364_v13  ;;  %v3179_v21 = vld [vmem:[#allocation16_spill] sm:$0xff] }
 0x180   :  { %v2132_v40 = vpop.f32.mrf.mxu0  ;;  %v2195_v10 = vadd.f32 %v2194_v56, %v3048_v17 }
 0x181   :  { %v2196_v53 = vpop.f32.mrf.mxu1 }
 0x182   :  { %v2133_v41 = vpop.f32.mrf.mxu0 }
 0x183   :  { %v2197_v51 = vpop.f32.mrf.mxu1  ;;  %v2134_v14 = vadd.f32 %v2133_v41, %v2132_v40  ;;  %v3177_v40 = vld [vmem:[#allocation15_spill] sm:$0xff]  ;;  %v3077_v41 = vld [vmem:[#allocation4] ss:$0 sm:$0xff] }
 0x184   :  { %v2135_v48 = vpop.f32.mrf.mxu0 }
 0x185   :  { %v2199_v0 = vpop.f32.mrf.mxu1  ;;  %v1372_v35 = vadd.f32 %v2134_v14, %v3177_v40 }
 0x186   :  { %v2136_v6 = vpop.f32.mrf.mxu0 }
 0x187   :  { %v2200_v15 = vpop.f32.mrf.mxu1  ;;  %v2137_v28 = vadd.f32 %v2136_v6, %v2135_v48  ;;  %v1367_v48 = vadd.f32 %v2131_v36, %v3180_v42 }
 0x188   :  { %v2236_v32 = vpop.f32.mrf.mxu0  ;;  %v2201_v57 = vadd.f32 %v2200_v15, %v2199_v0 }
 0x189   :  { %v1518_v37 = vadd.f32 %v2236_v32, %v1421_v59  ;;  %v2244_v34 = vpop.f32.mrf.mxu1  ;;  %v1375_v9 = vadd.f32 %v2137_v28, %v3179_v21  ;;  %v2198_v59 = vadd.f32 %v2197_v51, %v2196_v53  ;;  %v1464_v21 = vadd.f32 %v2195_v10, %v1367_v48 }
 0x18a   :  { %v1550_v46 = vadd.f32 %v2244_v34, %v1453_v22  ;;  %v1509_v18 = vpop.f32.mrf.mxu0 }
 0x18b   :  { %v1574_v39 = vmax.f32 %v1518_v37, 0.0  ;;  %v1510_v30 = vadd.f32 %v1509_v18, %v3178_v26  ;;  %v1541_v60 = vpop.f32.mrf.mxu1  ;;  %v1469_v20 = vadd.f32 %v2198_v59, %v1372_v35  ;;  %v1472_v5 = vadd.f32 %v2201_v57, %v1375_v9 }
 0x18c   :  { %v1582_v33 = vmax.f32 %v1550_v46, 0.0  ;;  %v1542_v31 = vadd.f32 %v1541_v60, %v1445_v50  ;;  %v2237_v45 = vpop.f32.mrf.mxu0 }
 0x18d   :  { %v1572_v1 = vmax.f32 %v1510_v30, 0.0  ;;  %v1521_v11 = vadd.f32 %v2237_v45, %v1424_v62  ;;  %v2245_v54 = vpop.f32.mrf.mxu1  ;;  %v1597_v27 = vmul.f32 %v3077_v41, %v1574_v39 }
 0x18e   :  { %v1580_v61 = vmax.f32 %v1542_v31, 0.0  ;;  %v1553_v63 = vadd.f32 %v2245_v54, %v1456_v55  ;;  %v1512_v2 = vpop.f32.mrf.mxu0  ;;  %v1605_v56 = vmul.f32 %v3077_v41, %v1582_v33 }
 0x18f   :  { %v1575_v17 = vmax.f32 %v1521_v11, 0.0  ;;  %v1513_v6 = vadd.f32 %v1512_v2, %v1416_v3  ;;  %v1544_v29 = vpop.f32.mrf.mxu1  ;;  %v1595_v38 = vmul.f32 %v3077_v41, %v1572_v1  ;;  %v1620_v14 = vadd.f32 %v3084_v47, %v1597_v27 }
 0x190   :  { %v1583_v53 = vmax.f32 %v1553_v63, 0.0  ;;  %v1545_v51 = vadd.f32 %v1544_v29, %v1448_v58  ;;  %v2240_v62 = vpop.f32.mrf.mxu0  ;;  %v1603_v0 = vmul.f32 %v3077_v41, %v1580_v61  ;;  %v1628_v23 = vadd.f32 %v3084_v47, %v1605_v56 }
 0x191   :  { %v1598_v7 = vmul.f32 %v3077_v41, %v1575_v17  ;;  %v1573_v8 = vmax.f32 %v1513_v6, 0.0  ;;  %v1534_v12 = vadd.f32 %v2240_v62, %v3058_v4  ;;  %v2248_v13 = vpop.f32.mrf.mxu1  ;;  %v1618_v24 = vadd.f32 %v3084_v47, %v1595_v38 }
 0x192   :  { %v1606_v3 = vmul.f32 %v3077_v41, %v1583_v53  ;;  %v1581_v15 = vmax.f32 %v1545_v51, 0.0  ;;  %v1566_v16 = vadd.f32 %v2248_v13, %v1469_v20  ;;  %v1525_v19 = vpop.f32.mrf.mxu0  ;;  %v1626_v46 = vadd.f32 %v3084_v47, %v1603_v0 }
 0x193   :  { %v1621_v25 = vadd.f32 %v3084_v47, %v1598_v7  ;;  %v1596_v28 = vmul.f32 %v3077_v41, %v1573_v8  ;;  %v1526_v32 = vadd.f32 %v1525_v19, %v3060_v49  ;;  %v1557_v22 = vpop.f32.mrf.mxu1  ;;  %v1578_v55 = vmax.f32 %v1534_v12, 0.0 }
 0x194   :  { %v1629_v4 = vadd.f32 %v3084_v47, %v1606_v3  ;;  %v1604_v36 = vmul.f32 %v3077_v41, %v1581_v15  ;;  %v1558_v37 = vadd.f32 %v1557_v22, %v1461_v43  ;;  %v2241_v34 = vpop.f32.mrf.mxu0  ;;  %v1586_v49 = vmax.f32 %v1566_v16, 0.0 }
 0x195   :  { %v1907_v18 = vpack.c.bf16 %v1621_v25, %v1620_v14  ;;  %v1619_v50 = vadd.f32 %v3084_v47, %v1596_v28  ;;  %v2249_v58 = vpop.f32.mrf.mxu1  ;;  %v1576_v39 = vmax.f32 %v1526_v32, 0.0  ;;  %v1537_v43 = vadd.f32 %v2241_v34, %v3074_v44 }
 0x196   :  { %v1927_v40 = vpack.c.bf16 %v1629_v4, %v1628_v23  ;;  %v1627_v35 = vadd.f32 %v3084_v47, %v1604_v36  ;;  %v1528_v26 = vpop.f32.mrf.mxu0  ;;  %v1584_v60 = vmax.f32 %v1558_v37, 0.0  ;;  %v1569_v31 = vadd.f32 %v2249_v58, %v1472_v5 }
 0x197   :  { %1939 = vst [vmem:[%s3150_s5 + $0x8] sm:$0xff] %v1907_v18   ;;  %v1902_v30 = vpack.c.bf16 %v1619_v50, %v1618_v24  ;;  %v1560_v9 = vpop.f32.mrf.mxu1  ;;  %v1601_v45 = vmul.f32 %v3077_v41, %v1578_v55  ;;  %v1579_v42 = vmax.f32 %v1537_v43, 0.0  ;;  %v1529_v59 = vadd.f32 %v1528_v26, %v3062_v52 }
 0x198   :  { %1943 = vst [vmem:[%s3150_s5 + $0x28] sm:$0xff] %v1927_v40   ;;  %v1922_v33 = vpack.c.bf16 %v1627_v35, %v1626_v46  ;;  %v1561_v1 = vadd.f32 %v1560_v9, %v1464_v21  ;;  %v1609_v44 = vmul.f32 %v3077_v41, %v1586_v49  ;;  %v1599_v10 = vmul.f32 %v3077_v41, %v1576_v39 }
 0x199   :  { %1903 = vst [vmem:[%s3150_s5] sm:$0xff] %v1902_v30   ;;  %v1587_v48 = vmax.f32 %v1569_v31, 0.0  ;;  %v1607_v11 = vmul.f32 %v3077_v41, %v1584_v60  ;;  %v1602_v54 = vmul.f32 %v3077_v41, %v1579_v42  ;;  %v1577_v57 = vmax.f32 %v1529_v59, 0.0 }
 0x19a   :  { %1942 = vst [vmem:[%s3150_s5 + $0x20] sm:$0xff] %v1922_v33   ;;  %v1585_v27 = vmax.f32 %v1561_v1, 0.0  ;;  %v1624_v52 = vadd.f32 %v3084_v47, %v1601_v45  ;;  %v1632_v17 = vadd.f32 %v3084_v47, %v1609_v44  ;;  %v1622_v6 = vadd.f32 %v3084_v47, %v1599_v10 }
 0x19b   :  { %v1610_v61 = vmul.f32 %v3077_v41, %v1587_v48  ;;  %v1625_v63 = vadd.f32 %v3084_v47, %v1602_v54  ;;  %v1600_v2 = vmul.f32 %v3077_v41, %v1577_v57  ;;  %v1630_v20 = vadd.f32 %v3084_v47, %v1607_v11 }
 0x19c   :  { %v1608_v56 = vmul.f32 %v3077_v41, %v1585_v27 }
 0x19d   :  { %v1633_v29 = vadd.f32 %v3084_v47, %v1610_v61  ;;  %v1917_v38 = vpack.c.bf16 %v1625_v63, %v1624_v52  ;;  %v1623_v53 = vadd.f32 %v3084_v47, %v1600_v2 }
 0x19e   :  { %v1631_v51 = vadd.f32 %v3084_v47, %v1608_v56 }
 0x19f   :  { %v1937_v62 = vpack.c.bf16 %v1633_v29, %v1632_v17  ;;  %1941 = vst [vmem:[%s3150_s5 + $0x18] sm:$0xff] %v1917_v38   ;;  %v1912_v5 = vpack.c.bf16 %v1623_v53, %v1622_v6 }
 0x1a0   :  { %v1932_v41 = vpack.c.bf16 %v1631_v51, %v1630_v20 }
 0x1a1   :  { %1945 = vst [vmem:[%s3150_s5 + $0x38] sm:$0xff] %v1937_v62   ;;  %1940 = vst [vmem:[%s3150_s5 + $0x10] sm:$0xff] %v1912_v5  }
 0x1a2   :  { %1944 = vst [vmem:[%s3150_s5 + $0x30] sm:$0xff] %v1932_v41  }
 0x1a3   :  { %1718 = vsyncpa [#allocation3], 1 }
 0x1a4   :  { %1719 = vsyncpa [#allocation5], 1 }

// kernel: bennet_forward.17
= control target key start
LH: loop header
LB: loop body
LE: loop exit
PB: predicated region body
PF: predicated region fallthrough
CT: control target
= control target key end

     0   :  { %10 = vsyncpa [#allocation3], 0  ;;  %s1785_s0 = inlined_call_operand.vmem [shape: bf16[32,1152], index: 0, kind: input, shape index: {}]   ;;  %s1786_s1 = inlined_call_operand.vmem [shape: bf16[1152,128], index: 1, kind: input, shape index: {}]   ;;  %s1787_s2 = inlined_call_operand.hbm [shape: f32[1,128], index: 2, kind: input, shape index: {}]   ;;  %s1788_s3 = inlined_call_operand.hbm [shape: f32[1,128], index: 3, kind: input, shape index: {}]   ;;  %s1789_s4 = inlined_call_operand.hbm [shape: f32[1,128], index: 4, kind: input, shape index: {}]   ;;  %s1790_s5 = inlined_call_operand.vmem [shape: bf16[32,128], index: 5, kind: output, shape index: {}]  }
   0x1   :  { %11 = vsyncpa [#allocation5], 0  ;;  %s1467_s18 = smov [#allocation4]   ;;  %s1468_s20 = smov [#allocation2]  }
   0x2   :  { %s32_s19 = sshll.u32 %s1467_s18, 4  ;;  %s22_s21 = sshll.u32 %s1468_s20, 4  ;;  %s33_s19 = int_to_ptr.vmem [resolvable:$true] %s32_s19  ;;  %s23_s21 = int_to_ptr.vmem [resolvable:$true] %s22_s21 }
   0x3   :  { %s1411_s22 = scalar_lea.vmem %s33_s19, 16  ;;  %s1415_s23 = scalar_lea.vmem %s33_s19, 32 }
   0x4   :  { %p1412_p0 = scmp.ne.s32.totalorder %s33_s19, %s1411_s22  ;;  %p1416_p1 = scmp.lt.s32.totalorder %s33_s19, %s33_s19 }
   0x5   :  { %p1417_p2 = scmp.lt.s32.totalorder %s1415_s23, %s1411_s22 }
   0x7   :  { %p1418_p3 = por %p1417_p2, %p1416_p1 }
   0x9   :  { %p1419_p4 = pnand %p1418_p3, %p1412_p0 }
   0xb   :  { %1422 = shalt.err (!%p1419_p4)
}
   0xc   :  { %35 = dma.hbm_to_vmem [thread:$0]  %s1788_s3, 16, %s33_s19, [#allocation5]  }
   0xd   :  { %s1431_s26 = scalar_lea.vmem %s23_s21, 16  ;;  %s1435_s27 = scalar_lea.vmem %s23_s21, 32 }
   0xe   :  { %p1432_p5 = scmp.ne.s32.totalorder %s23_s21, %s1431_s26  ;;  %p1436_p6 = scmp.lt.s32.totalorder %s23_s21, %s23_s21 }
   0xf   :  { %p1437_p7 = scmp.lt.s32.totalorder %s1435_s27, %s1431_s26 }
  0x11   :  { %p1438_p8 = por %p1437_p7, %p1436_p6 }
  0x13   :  { %p1439_p9 = pnand %p1438_p8, %p1432_p5 }
  0x15   :  { %1442 = shalt.err (!%p1439_p9)
}
  0x16   :  { %25 = dma.hbm_to_vmem [thread:$0]  %s1787_s2, 16, %s23_s21, [#allocation3]  }
  0x17   :  { %s1469_s30 = smov [#allocation6]  }
  0x18   :  { %s42_s6 = sshll.u32 %s1469_s30, 4  ;;  %s43_s6 = int_to_ptr.vmem [resolvable:$true] %s42_s6 }
  0x19   :  { %s1451_s7 = scalar_lea.vmem %s43_s6, 16  ;;  %s1455_s8 = scalar_lea.vmem %s43_s6, 32 }
  0x1a   :  { %p1452_p10 = scmp.ne.s32.totalorder %s43_s6, %s1451_s7  ;;  %p1456_p11 = scmp.lt.s32.totalorder %s43_s6, %s43_s6 }
  0x1b   :  { %p1457_p12 = scmp.lt.s32.totalorder %s1455_s8, %s1451_s7 }
  0x1d   :  { %p1458_p13 = por %p1457_p12, %p1456_p11 }
  0x1f   :  { %p1459_p0 = pnand %p1458_p13, %p1452_p10 }
  0x21   :  { %1462 = shalt.err (!%p1459_p0)
}
  0x22   :  { %45 = dma.hbm_to_vmem [thread:$0]  %s1789_s4, 16, %s43_s6, [#allocation5]  }
  0x23   :  { %1463 = dma.done.wait [#allocation3], 16  }
  0x24   :  { %1464 = vsyncadd [#allocation3], 4294967280 }
  0x25   :  { %1465 = dma.done.wait [#allocation5], 32  }
  0x26   :  { %1466 = vsyncadd [#allocation5], 4294967264  ;;  %v1305_v0 = vld [vmem:[%s1786_s1 + $0x78] sm:$0xff]   ;;  %v1309_v4 = vld [vmem:[%s1786_s1 + $0x70] sm:$0xff]  }
  0x27   :  { %v1306_v1 = vld [vmem:[%s1786_s1 + $0x38] sm:$0xff]   ;;  %1160 = vmatprep.subr.bf16.mxu0 %v1305_v0  ;;  %v1310_v5 = vld [vmem:[%s1786_s1 + $0x30] sm:$0xff]   ;;  %v1313_v8 = vld [vmem:[%s1786_s1 + $0x68] sm:$0xff]  }
  0x28   :  { %v1307_v2 = vld [vmem:[%s1786_s1 + $0xf8] sm:$0xff]   ;;  %1161 = vmatpush3.bf16.msra.mxu0 %v1306_v1  ;;  %v1311_v6 = vld [vmem:[%s1786_s1 + $0xf0] sm:$0xff]   ;;  %v1314_v9 = vld [vmem:[%s1786_s1 + $0x28] sm:$0xff]  }
  0x29   :  { %v1308_v3 = vld [vmem:[%s1786_s1 + $0xb8] sm:$0xff]   ;;  %1188 = vmatprep.subr.bf16.mxu1 %v1307_v2  ;;  %1162 = vmatprep.subr.bf16.mxu0 %v1309_v4  ;;  %v1312_v7 = vld [vmem:[%s1786_s1 + $0xb0] sm:$0xff]   ;;  %v1315_v10 = vld [vmem:[%s1786_s1 + $0xe8] sm:$0xff]  }
  0x2a   :  { %1189 = vmatpush3.bf16.msra.mxu1 %v1308_v3  ;;  %v1316_v11 = vld [vmem:[%s1786_s1 + $0xa8] sm:$0xff]   ;;  %v1317_v12 = vld [vmem:[%s1786_s1 + $0x60] sm:$0xff]   ;;  %v1321_v16 = vld [vmem:[%s1786_s1 + $0x58] sm:$0xff]  }
  0x2b   :  { %1190 = vmatprep.subr.bf16.mxu1 %v1311_v6  ;;  %v1318_v13 = vld [vmem:[%s1786_s1 + $0x20] sm:$0xff]   ;;  %v1322_v17 = vld [vmem:[%s1786_s1 + $0x18] sm:$0xff]   ;;  %v1325_v20 = vld [vmem:[%s1786_s1 + $0x50] sm:$0xff]  }
  0x2c   :  { %1163 = vmatpush3.bf16.msra.mxu0 %v1310_v5  ;;  %v1319_v14 = vld [vmem:[%s1786_s1 + $0xe0] sm:$0xff]   ;;  %v1323_v18 = vld [vmem:[%s1786_s1 + $0xd8] sm:$0xff]   ;;  %v1326_v21 = vld [vmem:[%s1786_s1 + $0x10] sm:$0xff]  }
  0x2d   :  { %1164 = vmatprep.subr.bf16.mxu0 %v1313_v8  ;;  %v1320_v15 = vld [vmem:[%s1786_s1 + $0xa0] sm:$0xff]   ;;  %v1324_v19 = vld [vmem:[%s1786_s1 + $0x98] sm:$0xff]   ;;  %v1327_v22 = vld [vmem:[%s1786_s1 + $0xd0] sm:$0xff]  }
  0x2e   :  { %1191 = vmatpush3.bf16.msra.mxu1 %v1312_v7  ;;  %v1328_v23 = vld [vmem:[%s1786_s1 + $0x90] sm:$0xff]   ;;  %v1329_v24 = vld [vmem:[%s1786_s1 + $0x48] sm:$0xff]   ;;  %v1333_v28 = vld [vmem:[%s1786_s1 + $0x40] sm:$0xff]  }
  0x2f   :  { %1192 = vmatprep.subr.bf16.mxu1 %v1315_v10  ;;  %v1330_v25 = vld [vmem:[%s1786_s1 + $0x8] sm:$0xff]   ;;  %v1334_v29 = vld [vmem:[%s1786_s1] sm:$0xff]   ;;  %v1340_v34 = vld [vmem:[%s1786_s1 + $0x178] sm:$0xff]  }
  0x30   :  { %1165 = vmatpush3.bf16.msra.mxu0 %v1314_v9  ;;  %v1331_v26 = vld [vmem:[%s1786_s1 + $0xc8] sm:$0xff]   ;;  %v1335_v30 = vld [vmem:[%s1786_s1 + $0xc0] sm:$0xff]   ;;  %v1344_v37 = vld [vmem:[%s1786_s1 + $0x138] sm:$0xff]  }
  0x31   :  { %1166 = vmatprep.subr.bf16.mxu0 %v1317_v12  ;;  %v1332_v27 = vld [vmem:[%s1786_s1 + $0x88] sm:$0xff]   ;;  %v1336_v31 = vld [vmem:[%s1785_s0] ss:$36 sps:$4 sm:$0xff]   ;;  %v1345_v38 = vld [vmem:[%s1786_s1 + $0x1f8] sm:$0xff]  }
  0x32   :  { %1193 = vmatpush3.bf16.msra.mxu1 %v1316_v11  ;;  %v1338_v32 = vld [vmem:[%s1785_s0 + $0x4] ss:$36 sps:$4 sm:$0xff]   ;;  %v1343_v36 = vld [vmem:[%s1785_s0 + $0xc] ss:$36 sps:$4 sm:$0xff]   ;;  %v1346_v39 = vld [vmem:[%s1786_s1 + $0x1b8] sm:$0xff]  }
  0x33   :  { %1194 = vmatprep.subr.bf16.mxu1 %v1319_v14  ;;  %v1339_v33 = vld [vmem:[%s1786_s1 + $0x80] sm:$0xff]   ;;  %783 = vmatprep.mubr.bf16.mxu0 %v1338_v32  ;;  %v1341_v35 = vld [vmem:[%s1785_s0 + $0x8] ss:$36 sps:$4 sm:$0xff]   ;;  %v1347_v40 = vld [vmem:[%s1786_s1 + $0x170] sm:$0xff]  }
  0x34   :  { %1167 = vmatpush3.bf16.msra.mxu0 %v1318_v13  ;;  %832 = vmatprep.mubr.bf16.mxu1 %v1343_v36  ;;  %v1348_v41 = vld [vmem:[%s1786_s1 + $0x130] sm:$0xff]   ;;  %v1351_v44 = vld [vmem:[%s1786_s1 + $0x168] sm:$0xff]   ;;  %v1355_v48 = vld [vmem:[%s1786_s1 + $0x160] sm:$0xff]  }
  0x35   :  { %1168 = vmatprep.subr.bf16.mxu0 %v1321_v16  ;;  %v1349_v42 = vld [vmem:[%s1786_s1 + $0x1f0] sm:$0xff]   ;;  %v1352_v45 = vld [vmem:[%s1786_s1 + $0x128] sm:$0xff]   ;;  %v1356_v49 = vld [vmem:[%s1786_s1 + $0x120] sm:$0xff]  }
  0x36   :  { %1195 = vmatpush3.bf16.msra.mxu1 %v1320_v15  ;;  %v1350_v43 = vld [vmem:[%s1786_s1 + $0x1b0] sm:$0xff]   ;;  %v1353_v46 = vld [vmem:[%s1786_s1 + $0x1e8] sm:$0xff]   ;;  %v1357_v50 = vld [vmem:[%s1786_s1 + $0x1e0] sm:$0xff]  }
  0x37   :  { %1196 = vmatprep.subr.bf16.mxu1 %v1323_v18  ;;  %v1354_v47 = vld [vmem:[%s1786_s1 + $0x1a8] sm:$0xff]   ;;  %v1358_v51 = vld [vmem:[%s1786_s1 + $0x1a0] sm:$0xff]   ;;  %v1359_v52 = vld [vmem:[%s1786_s1 + $0x158] sm:$0xff]  }
  0x38   :  { %1169 = vmatpush3.bf16.msra.mxu0 %v1322_v17  ;;  %v1360_v53 = vld [vmem:[%s1786_s1 + $0x118] sm:$0xff]   ;;  %v1361_v54 = vld [vmem:[%s1785_s0 + $0x4c] ss:$36 sps:$4 sm:$0xff]   ;;  %v1377_v4 = vld [vmem:[%s1786_s1 + $0x140] sm:$0xff]  }
  0x39   :  { %1170 = vmatprep.subr.bf16.mxu0 %v1325_v20  ;;  %v1363_v55 = vld [vmem:[%s1786_s1 + $0x1d8] sm:$0xff]   ;;  %v1364_v56 = vld [vmem:[%s1785_s0 + $0x48] ss:$36 sps:$4 sm:$0xff]   ;;  %v1368_v59 = vld [vmem:[%s1786_s1 + $0x150] sm:$0xff]  }
  0x3a   :  { %1197 = vmatpush3.bf16.msra.mxu1 %v1324_v19  ;;  %v1365_v57 = vld [vmem:[%s1786_s1 + $0x198] sm:$0xff]   ;;  %v1369_v60 = vld [vmem:[%s1785_s0 + $0x50] ss:$36 sps:$4 sm:$0xff]   ;;  %v1373_v0 = vld [vmem:[%s1786_s1 + $0x148] sm:$0xff]  }
  0x3b   :  { %1198 = vmatprep.subr.bf16.mxu1 %v1327_v22  ;;  %v1366_v58 = vld [vmem:[%s1785_s0 + $0x54] ss:$36 sps:$4 sm:$0xff]   ;;  %v1374_v1 = vld [vmem:[%s1786_s1 + $0x108] sm:$0xff]   ;;  %v1378_v5 = vld [vmem:[%s1786_s1 + $0x100] sm:$0xff]  }
  0x3c   :  { %1171 = vmatpush3.bf16.msra.mxu0 %v1326_v21  ;;  %v1370_v61 = vld [vmem:[%s1786_s1 + $0x110] sm:$0xff]   ;;  %v1375_v2 = vld [vmem:[%s1786_s1 + $0x1c8] sm:$0xff]   ;;  %v1379_v6 = vld [vmem:[%s1786_s1 + $0x1c0] sm:$0xff]  }
  0x3d   :  { %1172 = vmatprep.subr.bf16.mxu0 %v1329_v24  ;;  %v1371_v62 = vld [vmem:[%s1786_s1 + $0x1d0] sm:$0xff]   ;;  %v1376_v3 = vld [vmem:[%s1786_s1 + $0x188] sm:$0xff]   ;;  %v1383_v9 = vld [vmem:[%s1786_s1 + $0x180] sm:$0xff]  }
  0x3e   :  { %1199 = vmatpush3.bf16.msra.mxu1 %v1328_v23  ;;  %v1372_v63 = vld [vmem:[%s1786_s1 + $0x190] sm:$0xff]   ;;  %v1384_v10 = vld [vmem:[%s1786_s1 + $0x238] sm:$0xff]   ;;  %v1392_v16 = vld [vmem:[%s1786_s1 + $0x228] sm:$0xff]  }
  0x3f   :  { %1200 = vmatprep.subr.bf16.mxu1 %v1331_v26  ;;  %v1380_v7 = vld [vmem:[%s1785_s0 + $0x10] ss:$36 sps:$4 sm:$0xff]   ;;  %v1385_v11 = vld [vmem:[%s1785_s0 + $0x18] ss:$36 sps:$4 sm:$0xff]   ;;  %v1393_v17 = vld [vmem:[%s1785_s0 + $0x64] ss:$36 sps:$4 sm:$0xff]  }
  0x40   :  { %1173 = vmatpush3.bf16.msra.mxu0 %v1330_v25  ;;  %v1382_v8 = vld [vmem:[%s1785_s0 + $0x14] ss:$36 sps:$4 sm:$0xff]   ;;  %v1387_v12 = vld [vmem:[%s1785_s0 + $0x1c] ss:$36 sps:$4 sm:$0xff]   ;;  %v1399_v23 = vld [vmem:[%s1786_s1 + $0x208] sm:$0xff]  }
  0x41   :  { %1174 = vmatprep.subr.bf16.mxu0 %v1333_v28  ;;  %v1388_v13 = vld [vmem:[%s1786_s1 + $0x230] sm:$0xff]   ;;  %v1389_v14 = vld [vmem:[%s1785_s0 + $0x5c] ss:$36 sps:$4 sm:$0xff]   ;;  %v1402_v25 = vld [vmem:[%s1785_s0 + $0x68] ss:$36 sps:$4 sm:$0xff]  }
  0x42   :  { %1201 = vmatpush3.bf16.msra.mxu1 %v1332_v27  ;;  %v1391_v15 = vld [vmem:[%s1785_s0 + $0x58] ss:$36 sps:$4 sm:$0xff]   ;;  %v1395_v18 = vld [vmem:[%s1785_s0 + $0x60] ss:$36 sps:$4 sm:$0xff]   ;;  %v1398_v22 = vld [vmem:[%s1786_s1 + $0x210] sm:$0xff]  }
  0x43   :  { %1202 = vmatprep.subr.bf16.mxu1 %v1335_v30  ;;  %v1396_v19 = vld [vmem:[%s1786_s1 + $0x220] sm:$0xff]   ;;  %v1397_v20 = vld [vmem:[%s1786_s1 + $0x218] sm:$0xff]  }
  0x44   :  { %1175 = vmatpush3.bf16.msra.mxu0 %v1334_v29  ;;  %v1401_v21 = vld [vmem:[%s1785_s0 + $0x20] ss:$36 sps:$4 sm:$0xff]  }
  0x45   :  { %1216 = vmatprep.subr.bf16.mxu0 %v1340_v34  ;;  %v1400_v24 = vld [vmem:[%s1786_s1 + $0x200] sm:$0xff]  }
  0x46   :  { %1203 = vmatpush3.bf16.msra.mxu1 %v1339_v33 }
  0x47   :  { %784 = vmatmul.mubr.bf16.vlgmr.msra.gmra.mxu0 %v1336_v31  ;;  %1244 = vmatprep.subr.bf16.mxu1 %v1345_v38 }
  0x48   :  { %1217 = vmatpush3.bf16.msra.mxu0 %v1344_v37  ;;  %791 = vmatprep.mubr.bf16.mxu0 %v1361_v54 }
  0x49   :  { %833 = vmatmul.mubr.bf16.vlgmr.msra.gmra.mxu1 %v1341_v35  ;;  %1218 = vmatprep.subr.bf16.mxu0 %v1347_v40 }
  0x4a   :  { %1245 = vmatpush3.bf16.msra.mxu1 %v1346_v39  ;;  %840 = vmatprep.mubr.bf16.mxu1 %v1366_v58 }
  0x4b   :  { %1246 = vmatprep.subr.bf16.mxu1 %v1349_v42 }
  0x4c   :  { %1219 = vmatpush3.bf16.msra.mxu0 %v1348_v41 }
  0x4d   :  { %1220 = vmatprep.subr.bf16.mxu0 %v1351_v44 }
  0x4e   :  { %1247 = vmatpush3.bf16.msra.mxu1 %v1350_v43 }
  0x4f   :  { %1248 = vmatprep.subr.bf16.mxu1 %v1353_v46  ;;  %792 = vmatmul.mubr.bf16.gmra.mxu0 %v1364_v56 }
  0x50   :  { %1221 = vmatpush3.bf16.msra.mxu0 %v1352_v45  ;;  %881 = vmatprep.mubr.bf16.mxu0 %v1382_v8 }
  0x51   :  { %1222 = vmatprep.subr.bf16.mxu0 %v1355_v48  ;;  %841 = vmatmul.mubr.bf16.gmra.mxu1 %v1369_v60 }
  0x52   :  { %1249 = vmatpush3.bf16.msra.mxu1 %v1354_v47  ;;  %930 = vmatprep.mubr.bf16.mxu1 %v1387_v12 }
  0x53   :  { %1250 = vmatprep.subr.bf16.mxu1 %v1357_v50 }
  0x54   :  { %1223 = vmatpush3.bf16.msra.mxu0 %v1356_v49 }
  0x55   :  { %1224 = vmatprep.subr.bf16.mxu0 %v1359_v52 }
  0x56   :  { %1251 = vmatpush3.bf16.msra.mxu1 %v1358_v51 }
  0x57   :  { %1252 = vmatprep.subr.bf16.mxu1 %v1363_v55  ;;  %v1048_v55 = vld [vmem:[#allocation2] ss:$0 sm:$0xff] }
  0x58   :  { %1225 = vmatpush3.bf16.msra.mxu0 %v1360_v53 }
  0x59   :  { %1226 = vmatprep.subr.bf16.mxu0 %v1368_v59 }
  0x5a   :  { %1253 = vmatpush3.bf16.msra.mxu1 %v1365_v57 }
  0x5b   :  { %1254 = vmatprep.subr.bf16.mxu1 %v1371_v62 }
  0x5c   :  { %1227 = vmatpush3.bf16.msra.mxu0 %v1370_v61 }
  0x5d   :  { %1228 = vmatprep.subr.bf16.mxu0 %v1373_v0 }
  0x5e   :  { %1255 = vmatpush3.bf16.msra.mxu1 %v1372_v63 }
  0x5f   :  { %1256 = vmatprep.subr.bf16.mxu1 %v1375_v2 }
  0x60   :  { %1229 = vmatpush3.bf16.msra.mxu0 %v1374_v1 }
  0x61   :  { %1230 = vmatprep.subr.bf16.mxu0 %v1377_v4 }
  0x62   :  { %1257 = vmatpush3.bf16.msra.mxu1 %v1376_v3 }
  0x63   :  { %1258 = vmatprep.subr.bf16.mxu1 %v1379_v6 }
  0x64   :  { %1231 = vmatpush3.bf16.msra.mxu0 %v1378_v5 }
  0x65   :  { %1282 = vmatprep.subr.bf16.mxu0 %v1384_v10 }
  0x66   :  { %1259 = vmatpush3.bf16.msra.mxu1 %v1383_v9 }
  0x67   :  { %882 = vmatmul.mubr.bf16.vlgmr.msra.gmra.mxu0 %v1380_v7 }
  0x68   :  { %1283 = vmatpush3.bf16.msra.mxu0 %v1384_v10  ;;  %889 = vmatprep.mubr.bf16.mxu0 %v1389_v14 }
  0x69   :  { %931 = vmatmul.mubr.bf16.vlgmr.msra.gmra.mxu1 %v1385_v11  ;;  %1284 = vmatprep.subr.bf16.mxu0 %v1388_v13 }
  0x6a   :  { %938 = vmatprep.mubr.bf16.mxu1 %v1393_v17 }
  0x6c   :  { %1285 = vmatpush3.bf16.msra.mxu0 %v1388_v13 }
  0x6d   :  { %1286 = vmatprep.subr.bf16.mxu0 %v1392_v16 }
  0x6f   :  { %890 = vmatmul.mubr.bf16.gmra.mxu0 %v1391_v15 }
  0x70   :  { %1287 = vmatpush3.bf16.msra.mxu0 %v1392_v16  ;;  %1298 = vmatprep.mubr.bf16.mxu0 %v1401_v21 }
  0x71   :  { %939 = vmatmul.mubr.bf16.gmra.mxu1 %v1395_v18  ;;  %1288 = vmatprep.subr.bf16.mxu0 %v1396_v19 }
  0x74   :  { %1289 = vmatpush3.bf16.msra.mxu0 %v1396_v19 }
  0x75   :  { %1290 = vmatprep.subr.bf16.mxu0 %v1397_v20 }
  0x78   :  { %1291 = vmatpush3.bf16.msra.mxu0 %v1397_v20 }
  0x79   :  { %1292 = vmatprep.subr.bf16.mxu0 %v1398_v22 }
  0x7c   :  { %1293 = vmatpush3.bf16.msra.mxu0 %v1398_v22 }
  0x7d   :  { %1294 = vmatprep.subr.bf16.mxu0 %v1399_v23 }
  0x80   :  { %1295 = vmatpush3.bf16.msra.mxu0 %v1399_v23 }
  0x81   :  { %1296 = vmatprep.subr.bf16.mxu0 %v1400_v24 }
  0x84   :  { %1297 = vmatpush3.bf16.msra.mxu0 %v1400_v24 }
  0x87   :  { %1299 = vmatmul.mubr.bf16.vlgmr.msra.gmra.mxu0 %v1402_v25 }
 0x107   :  { %v1176_v26 = vpop.f32.mrf.mxu0 }
 0x109   :  { %v1204_v27 = vpop.f32.mrf.mxu1  ;;  %v1177_v28 = vpop.f32.mrf.mxu0 }
 0x10a   :  { %v1178_v54 = vadd.f32 %v1177_v28, %v1176_v26 }
 0x10b   :  { %v1205_v29 = vpop.f32.mrf.mxu1  ;;  %v1179_v30 = vpop.f32.mrf.mxu0 }
 0x10c   :  { %v786_v61 = vadd.f32 %v1178_v54, %v1048_v55  ;;  %v1206_v62 = vadd.f32 %v1205_v29, %v1204_v27 }
 0x10d   :  { %v1207_v31 = vpop.f32.mrf.mxu1  ;;  %v1180_v32 = vpop.f32.mrf.mxu0 }
 0x10e   :  { %v1181_v63 = vadd.f32 %v1180_v32, %v1179_v30  ;;  %v835_v7 = vadd.f32 %v1206_v62, %v786_v61 }
 0x10f   :  { %v1182_v33 = vpop.f32.mrf.mxu0  ;;  %v1208_v34 = vpop.f32.mrf.mxu1 }
 0x110   :  { %v789_v8 = vadd.f32 %v1181_v63, %v1048_v55  ;;  %v1209_v9 = vadd.f32 %v1208_v34, %v1207_v31  ;;  %v1139_v31 = vld [vmem:[#allocation4] ss:$0 sm:$0xff] }
 0x111   :  { %v1210_v35 = vpop.f32.mrf.mxu1  ;;  %v1183_v36 = vpop.f32.mrf.mxu0 }
 0x112   :  { %v1184_v53 = vadd.f32 %v1183_v36, %v1182_v33  ;;  %v838_v18 = vadd.f32 %v1209_v9, %v789_v8 }
 0x113   :  { %v1211_v37 = vpop.f32.mrf.mxu1  ;;  %v1185_v38 = vpop.f32.mrf.mxu0 }
 0x114   :  { %v794_v58 = vadd.f32 %v1184_v53, %v1048_v55  ;;  %v1212_v59 = vadd.f32 %v1211_v37, %v1210_v35 }
 0x115   :  { %v1213_v39 = vpop.f32.mrf.mxu1  ;;  %v1186_v40 = vpop.f32.mrf.mxu0 }
 0x116   :  { %v1187_v60 = vadd.f32 %v1186_v40, %v1185_v38  ;;  %v843_v3 = vadd.f32 %v1212_v59, %v794_v58  ;;  %v1140_v40 = vld [vmem:[#allocation6] ss:$0 sm:$0xff] }
 0x117   :  { %v1214_v42 = vpop.f32.mrf.mxu1 }
 0x118   :  { %v797_v4 = vadd.f32 %v1187_v60, %v1048_v55  ;;  %v1215_v5 = vadd.f32 %v1214_v42, %v1213_v39 }
 0x11a   :  { %v846_v14 = vadd.f32 %v1215_v5, %v797_v4 }
 0x127   :  { %v1232_v41 = vpop.f32.mrf.mxu0 }
 0x129   :  { %v1233_v43 = vpop.f32.mrf.mxu0  ;;  %v1260_v44 = vpop.f32.mrf.mxu1 }
 0x12a   :  { %v1234_v6 = vadd.f32 %v1233_v43, %v1232_v41 }
 0x12b   :  { %v1235_v45 = vpop.f32.mrf.mxu0  ;;  %v1261_v46 = vpop.f32.mrf.mxu1 }
 0x12c   :  { %v884_v15 = vadd.f32 %v1234_v6, %v835_v7  ;;  %v1262_v16 = vadd.f32 %v1261_v46, %v1260_v44 }
 0x12d   :  { %v1236_v47 = vpop.f32.mrf.mxu0  ;;  %v1263_v48 = vpop.f32.mrf.mxu1 }
 0x12e   :  { %v1237_v17 = vadd.f32 %v1236_v47, %v1235_v45  ;;  %v933_v26 = vadd.f32 %v1262_v16, %v884_v15 }
 0x12f   :  { %v1238_v49 = vpop.f32.mrf.mxu0  ;;  %v1264_v50 = vpop.f32.mrf.mxu1 }
 0x130   :  { %v887_v23 = vadd.f32 %v1237_v17, %v838_v18  ;;  %v1265_v24 = vadd.f32 %v1264_v50, %v1263_v48 }
 0x131   :  { %v1239_v51 = vpop.f32.mrf.mxu0  ;;  %v1266_v52 = vpop.f32.mrf.mxu1 }
 0x132   :  { %v1240_v0 = vadd.f32 %v1239_v51, %v1238_v49  ;;  %v936_v35 = vadd.f32 %v1265_v24, %v887_v23 }
 0x133   :  { %v1241_v56 = vpop.f32.mrf.mxu0  ;;  %v1267_v57 = vpop.f32.mrf.mxu1 }
 0x134   :  { %v892_v10 = vadd.f32 %v1240_v0, %v843_v3  ;;  %v1268_v11 = vadd.f32 %v1267_v57, %v1266_v52 }
 0x135   :  { %v1242_v1 = vpop.f32.mrf.mxu0  ;;  %v1269_v2 = vpop.f32.mrf.mxu1 }
 0x136   :  { %v1243_v12 = vadd.f32 %v1242_v1, %v1241_v56  ;;  %v941_v21 = vadd.f32 %v1268_v11, %v892_v10 }
 0x137   :  { %v1270_v13 = vpop.f32.mrf.mxu1 }
 0x138   :  { %v895_v19 = vadd.f32 %v1243_v12, %v846_v14  ;;  %v1271_v20 = vadd.f32 %v1270_v13, %v1269_v2 }
 0x13a   :  { %v944_v30 = vadd.f32 %v1271_v20, %v895_v19 }
 0x147   :  { %v1300_v22 = vpop.f32.mrf.mxu0 }
 0x148   :  { %v990_v25 = vadd.f32 %v1300_v22, %v941_v21 }
 0x149   :  { %v981_v27 = vpop.f32.mrf.mxu0 }
 0x14a   :  { %v998_v28 = vmax.f32 %v990_v25, 0.0  ;;  %v982_v29 = vadd.f32 %v981_v27, %v933_v26 }
 0x14b   :  { %v1301_v32 = vpop.f32.mrf.mxu0 }
 0x14c   :  { %v996_v33 = vmax.f32 %v982_v29, 0.0  ;;  %v993_v34 = vadd.f32 %v1301_v32, %v944_v30  ;;  %v1009_v37 = vmul.f32 %v1139_v31, %v998_v28 }
 0x14d   :  { %v984_v36 = vpop.f32.mrf.mxu0 }
 0x14e   :  { %v999_v38 = vmax.f32 %v993_v34, 0.0  ;;  %v985_v39 = vadd.f32 %v984_v36, %v936_v35  ;;  %v1007_v41 = vmul.f32 %v1139_v31, %v996_v33  ;;  %v1020_v44 = vadd.f32 %v1140_v40, %v1009_v37 }
 0x150   :  { %v1010_v42 = vmul.f32 %v1139_v31, %v999_v38  ;;  %v997_v43 = vmax.f32 %v985_v39, 0.0  ;;  %v1018_v47 = vadd.f32 %v1140_v40, %v1007_v41 }
 0x152   :  { %v1021_v45 = vadd.f32 %v1140_v40, %v1010_v42  ;;  %v1008_v46 = vmul.f32 %v1139_v31, %v997_v43 }
 0x154   :  { %v1157_v48 = vpack.c.bf16 %v1021_v45, %v1020_v44  ;;  %v1019_v49 = vadd.f32 %v1140_v40, %v1008_v46 }
 0x156   :  { %1159 = vst [vmem:[%s1790_s5 + $0x8] sm:$0xff] %v1157_v48   ;;  %v1152_v50 = vpack.c.bf16 %v1019_v49, %v1018_v47 }
 0x158   :  { %1153 = vst [vmem:[%s1790_s5] sm:$0xff] %v1152_v50  }
 0x159   :  { %1046 = vsyncpa [#allocation3], 1 }
 0x15a   :  { %1047 = vsyncpa [#allocation5], 1 }

// kernel: bennet_forward.16
= control target key start
LH: loop header
LB: loop body
LE: loop exit
PB: predicated region body
PF: predicated region fallthrough
CT: control target
= control target key end

     0   :  { %14 = vsyncpa [#allocation3], 0  ;;  %s2134_s0 = inlined_call_operand.vmem [shape: bf16[32,1152], index: 0, kind: input, shape index: {}]   ;;  %s2135_s1 = inlined_call_operand.vmem [shape: bf16[1152,128], index: 1, kind: input, shape index: {}]   ;;  %s2136_s2 = inlined_call_operand.hbm [shape: f32[1,128], index: 2, kind: input, shape index: {}]   ;;  %s2137_s3 = inlined_call_operand.hbm [shape: f32[1,128], index: 3, kind: input, shape index: {}]   ;;  %s2138_s4 = inlined_call_operand.hbm [shape: f32[1,128], index: 4, kind: input, shape index: {}]   ;;  %s2139_s5 = inlined_call_operand.vmem [shape: bf16[32,128], index: 5, kind: input, shape index: {}]   ;;  %s2140_s6 = inlined_call_operand.vmem [shape: bf16[128,128], index: 6, kind: input, shape index: {}]   ;;  %s2141_s7 = inlined_call_operand.hbm [shape: f32[1,128], index: 7, kind: input, shape index: {}]   ;;  %s2142_s8 = inlined_call_operand.hbm [shape: f32[1,128], index: 8, kind: input, shape index: {}]   ;;  %s2143_s9 = inlined_call_operand.vmem [shape: bf16[32,128], index: 9, kind: output, shape index: {}]  }
   0x1   :  { %15 = vsyncpa [#allocation5], 0 }
   0x2   :  { %16 = vsyncpa [#allocation8], 0  ;;  %s1758_s30 = smov [#allocation4]   ;;  %s1759_s11 = smov [#allocation7]  }
   0x3   :  { %s37_s10 = sshll.u32 %s1758_s30, 4  ;;  %s61_s12 = sshll.u32 %s1759_s11, 4  ;;  %s38_s10 = int_to_ptr.vmem [resolvable:$true] %s37_s10  ;;  %s62_s12 = int_to_ptr.vmem [resolvable:$true] %s61_s12 }
   0x4   :  { %s1660_s13 = scalar_lea.vmem %s38_s10, 16  ;;  %s1664_s14 = scalar_lea.vmem %s38_s10, 32 }
   0x5   :  { %p1661_p0 = scmp.ne.s32.totalorder %s38_s10, %s1660_s13  ;;  %p1665_p1 = scmp.lt.s32.totalorder %s38_s10, %s38_s10 }
   0x6   :  { %p1666_p2 = scmp.lt.s32.totalorder %s1664_s14, %s1660_s13 }
   0x8   :  { %p1667_p3 = por %p1666_p2, %p1665_p1 }
   0xa   :  { %p1668_p4 = pnand %p1667_p3, %p1661_p0 }
   0xc   :  { %1671 = shalt.err (!%p1668_p4)
}
   0xd   :  { %40 = dma.hbm_to_vmem [thread:$0]  %s2137_s3, 16, %s38_s10, [#allocation5]  }
   0xe   :  { %s1680_s17 = scalar_lea.vmem %s62_s12, 16  ;;  %s1684_s18 = scalar_lea.vmem %s62_s12, 32 }
   0xf   :  { %p1681_p5 = scmp.ne.s32.totalorder %s62_s12, %s1680_s17  ;;  %p1685_p6 = scmp.lt.s32.totalorder %s62_s12, %s62_s12 }
  0x10   :  { %p1686_p7 = scmp.lt.s32.totalorder %s1684_s18, %s1680_s17 }
  0x12   :  { %p1687_p8 = por %p1686_p7, %p1685_p6 }
  0x14   :  { %p1688_p9 = pnand %p1687_p8, %p1681_p5 }
  0x16   :  { %1691 = shalt.err (!%p1688_p9)
}
  0x17   :  { %64 = dma.hbm_to_vmem [thread:$0]  %s2141_s7, 16, %s62_s12, [#allocation8]  }
  0x18   :  { %s1760_s21 = smov [#allocation2]   ;;  %s1761_s23 = smov [#allocation6]  }
  0x19   :  { %s27_s22 = sshll.u32 %s1760_s21, 4  ;;  %s47_s24 = sshll.u32 %s1761_s23, 4  ;;  %s28_s22 = int_to_ptr.vmem [resolvable:$true] %s27_s22  ;;  %s48_s24 = int_to_ptr.vmem [resolvable:$true] %s47_s24 }
  0x1a   :  { %s1700_s25 = scalar_lea.vmem %s28_s22, 16  ;;  %s1704_s3 = scalar_lea.vmem %s28_s22, 32 }
  0x1b   :  { %p1701_p10 = scmp.ne.s32.totalorder %s28_s22, %s1700_s25  ;;  %p1705_p11 = scmp.lt.s32.totalorder %s28_s22, %s28_s22 }
  0x1c   :  { %p1706_p12 = scmp.lt.s32.totalorder %s1704_s3, %s1700_s25 }
  0x1e   :  { %p1707_p13 = por %p1706_p12, %p1705_p11 }
  0x20   :  { %p1708_p0 = pnand %p1707_p13, %p1701_p10 }
  0x22   :  { %1711 = shalt.err (!%p1708_p0)
}
  0x23   :  { %30 = dma.hbm_to_vmem [thread:$0]  %s2136_s2, 16, %s28_s22, [#allocation3]  }
  0x24   :  { %s1720_s28 = scalar_lea.vmem %s48_s24, 16  ;;  %s1724_s7 = scalar_lea.vmem %s48_s24, 32 }
  0x25   :  { %p1721_p1 = scmp.ne.s32.totalorder %s48_s24, %s1720_s28  ;;  %p1725_p2 = scmp.lt.s32.totalorder %s48_s24, %s48_s24 }
  0x26   :  { %p1726_p3 = scmp.lt.s32.totalorder %s1724_s7, %s1720_s28 }
  0x28   :  { %p1727_p4 = por %p1726_p3, %p1725_p2 }
  0x2a   :  { %p1728_p5 = pnand %p1727_p4, %p1721_p1 }
  0x2c   :  { %1731 = shalt.err (!%p1728_p5)
}
  0x2d   :  { %50 = dma.hbm_to_vmem [thread:$0]  %s2138_s4, 16, %s48_s24, [#allocation5]  }
  0x2e   :  { %s1762_s10 = smov [#allocation9]  }
  0x2f   :  { %s71_s11 = sshll.u32 %s1762_s10, 4  ;;  %s72_s11 = int_to_ptr.vmem [resolvable:$true] %s71_s11 }
  0x30   :  { %s1740_s12 = scalar_lea.vmem %s72_s11, 16  ;;  %s1744_s13 = scalar_lea.vmem %s72_s11, 32 }
  0x31   :  { %p1741_p6 = scmp.ne.s32.totalorder %s72_s11, %s1740_s12  ;;  %p1745_p7 = scmp.lt.s32.totalorder %s72_s11, %s72_s11 }
  0x32   :  { %p1746_p8 = scmp.lt.s32.totalorder %s1744_s13, %s1740_s12 }
  0x34   :  { %p1747_p9 = por %p1746_p8, %p1745_p7 }
  0x36   :  { %p1748_p10 = pnand %p1747_p9, %p1741_p6 }
  0x38   :  { %1751 = shalt.err (!%p1748_p10)
}
  0x39   :  { %74 = dma.hbm_to_vmem [thread:$0]  %s2142_s8, 16, %s72_s11, [#allocation8]  }
  0x3a   :  { %1752 = dma.done.wait [#allocation3], 16  }
  0x3b   :  { %1753 = vsyncadd [#allocation3], 4294967280 }
  0x3c   :  { %1754 = dma.done.wait [#allocation5], 32  }
  0x3d   :  { %1755 = vsyncadd [#allocation5], 4294967264 }
  0x3e   :  { %1756 = dma.done.wait [#allocation8], 32  }
  0x3f   :  { %1757 = vsyncadd [#allocation8], 4294967264  ;;  %v1544_v0 = vld [vmem:[%s2135_s1 + $0x78] sm:$0xff]   ;;  %v1548_v4 = vld [vmem:[%s2135_s1 + $0x70] sm:$0xff]  }
  0x40   :  { %v1545_v1 = vld [vmem:[%s2135_s1 + $0xf8] sm:$0xff]   ;;  %1367 = vmatprep.subr.bf16.mxu0 %v1544_v0  ;;  %v1549_v5 = vld [vmem:[%s2135_s1 + $0xf0] sm:$0xff]   ;;  %v1552_v8 = vld [vmem:[%s2135_s1 + $0x68] sm:$0xff]  }
  0x41   :  { %v1546_v2 = vld [vmem:[%s2135_s1 + $0x38] sm:$0xff]   ;;  %1395 = vmatprep.subr.bf16.mxu1 %v1545_v1  ;;  %v1550_v6 = vld [vmem:[%s2135_s1 + $0x30] sm:$0xff]   ;;  %v1553_v9 = vld [vmem:[%s2135_s1 + $0xe8] sm:$0xff]  }
  0x42   :  { %v1547_v3 = vld [vmem:[%s2135_s1 + $0xb8] sm:$0xff]   ;;  %1368 = vmatpush3.bf16.msra.mxu0 %v1546_v2  ;;  %v1551_v7 = vld [vmem:[%s2135_s1 + $0xb0] sm:$0xff]   ;;  %v1554_v10 = vld [vmem:[%s2135_s1 + $0x28] sm:$0xff]  }
  0x43   :  { %1396 = vmatpush3.bf16.msra.mxu1 %v1547_v3  ;;  %1369 = vmatprep.subr.bf16.mxu0 %v1548_v4  ;;  %v1555_v11 = vld [vmem:[%s2135_s1 + $0xa8] sm:$0xff]   ;;  %v1556_v12 = vld [vmem:[%s2135_s1 + $0x60] sm:$0xff]   ;;  %v1560_v16 = vld [vmem:[%s2135_s1 + $0x58] sm:$0xff]  }
  0x44   :  { %1397 = vmatprep.subr.bf16.mxu1 %v1549_v5  ;;  %v1557_v13 = vld [vmem:[%s2135_s1 + $0xe0] sm:$0xff]   ;;  %v1561_v17 = vld [vmem:[%s2135_s1 + $0xd8] sm:$0xff]   ;;  %v1564_v20 = vld [vmem:[%s2135_s1 + $0x50] sm:$0xff]  }
  0x45   :  { %v1558_v14 = vld [vmem:[%s2135_s1 + $0x20] sm:$0xff]   ;;  %v1562_v18 = vld [vmem:[%s2135_s1 + $0x18] sm:$0xff]   ;;  %v1565_v21 = vld [vmem:[%s2135_s1 + $0xd0] sm:$0xff]  }
  0x46   :  { %1370 = vmatpush3.bf16.msra.mxu0 %v1550_v6  ;;  %v1559_v15 = vld [vmem:[%s2135_s1 + $0xa0] sm:$0xff]   ;;  %v1563_v19 = vld [vmem:[%s2135_s1 + $0x98] sm:$0xff]   ;;  %v1566_v22 = vld [vmem:[%s2135_s1 + $0x10] sm:$0xff]  }
  0x47   :  { %1398 = vmatpush3.bf16.msra.mxu1 %v1551_v7  ;;  %1371 = vmatprep.subr.bf16.mxu0 %v1552_v8  ;;  %v1567_v23 = vld [vmem:[%s2135_s1 + $0x90] sm:$0xff]   ;;  %v1568_v24 = vld [vmem:[%s2135_s1 + $0x48] sm:$0xff]   ;;  %v1572_v28 = vld [vmem:[%s2135_s1 + $0x40] sm:$0xff]  }
  0x48   :  { %1399 = vmatprep.subr.bf16.mxu1 %v1553_v9  ;;  %v1569_v25 = vld [vmem:[%s2135_s1 + $0xc8] sm:$0xff]   ;;  %v1573_v29 = vld [vmem:[%s2135_s1 + $0xc0] sm:$0xff]   ;;  %v1582_v36 = vld [vmem:[%s2135_s1 + $0x178] sm:$0xff]  }
  0x49   :  { %v1570_v26 = vld [vmem:[%s2135_s1 + $0x8] sm:$0xff]   ;;  %v1574_v30 = vld [vmem:[%s2135_s1] sm:$0xff]   ;;  %v1583_v37 = vld [vmem:[%s2135_s1 + $0x1f8] sm:$0xff]  }
  0x4a   :  { %1372 = vmatpush3.bf16.msra.mxu0 %v1554_v10  ;;  %v1571_v27 = vld [vmem:[%s2135_s1 + $0x88] sm:$0xff]   ;;  %v1575_v31 = vld [vmem:[%s2135_s1 + $0x80] sm:$0xff]   ;;  %v1584_v38 = vld [vmem:[%s2135_s1 + $0x138] sm:$0xff]  }
  0x4b   :  { %1400 = vmatpush3.bf16.msra.mxu1 %v1555_v11  ;;  %1373 = vmatprep.subr.bf16.mxu0 %v1556_v12  ;;  %v1576_v32 = vld [vmem:[%s2134_s0] ss:$36 sps:$4 sm:$0xff]   ;;  %v1579_v34 = vld [vmem:[%s2134_s0 + $0x8] ss:$36 sps:$4 sm:$0xff]   ;;  %v1585_v39 = vld [vmem:[%s2135_s1 + $0x1b8] sm:$0xff]  }
  0x4c   :  { %1401 = vmatprep.subr.bf16.mxu1 %v1557_v13  ;;  %v1578_v33 = vld [vmem:[%s2134_s0 + $0x4] ss:$36 sps:$4 sm:$0xff]   ;;  %v1581_v35 = vld [vmem:[%s2134_s0 + $0xc] ss:$36 sps:$4 sm:$0xff]   ;;  %v1598_v52 = vld [vmem:[%s2135_s1 + $0x158] sm:$0xff]  }
  0x4d   :  { %818 = vmatprep.mubr.bf16.mxu0 %v1578_v33  ;;  %867 = vmatprep.mubr.bf16.mxu1 %v1581_v35  ;;  %v1586_v40 = vld [vmem:[%s2135_s1 + $0x170] sm:$0xff]   ;;  %v1590_v44 = vld [vmem:[%s2135_s1 + $0x168] sm:$0xff]   ;;  %v1594_v48 = vld [vmem:[%s2135_s1 + $0x160] sm:$0xff]  }
  0x4e   :  { %1374 = vmatpush3.bf16.msra.mxu0 %v1558_v14  ;;  %v1587_v41 = vld [vmem:[%s2135_s1 + $0x1f0] sm:$0xff]   ;;  %v1591_v45 = vld [vmem:[%s2135_s1 + $0x1e8] sm:$0xff]   ;;  %v1595_v49 = vld [vmem:[%s2135_s1 + $0x1e0] sm:$0xff]  }
  0x4f   :  { %1402 = vmatpush3.bf16.msra.mxu1 %v1559_v15  ;;  %1375 = vmatprep.subr.bf16.mxu0 %v1560_v16  ;;  %v1588_v42 = vld [vmem:[%s2135_s1 + $0x130] sm:$0xff]   ;;  %v1592_v46 = vld [vmem:[%s2135_s1 + $0x128] sm:$0xff]   ;;  %v1596_v50 = vld [vmem:[%s2135_s1 + $0x120] sm:$0xff]  }
  0x50   :  { %1403 = vmatprep.subr.bf16.mxu1 %v1561_v17  ;;  %v1589_v43 = vld [vmem:[%s2135_s1 + $0x1b0] sm:$0xff]   ;;  %v1593_v47 = vld [vmem:[%s2135_s1 + $0x1a8] sm:$0xff]   ;;  %v1597_v51 = vld [vmem:[%s2135_s1 + $0x1a0] sm:$0xff]  }
  0x51   :  { %v1599_v53 = vld [vmem:[%s2135_s1 + $0x1d8] sm:$0xff]   ;;  %v1602_v56 = vld [vmem:[%s2134_s0 + $0x4c] ss:$36 sps:$4 sm:$0xff]   ;;  %v1616_v4 = vld [vmem:[%s2135_s1 + $0x140] sm:$0xff]  }
  0x52   :  { %1376 = vmatpush3.bf16.msra.mxu0 %v1562_v18  ;;  %v1600_v54 = vld [vmem:[%s2135_s1 + $0x118] sm:$0xff]   ;;  %v1604_v57 = vld [vmem:[%s2134_s0 + $0x48] ss:$36 sps:$4 sm:$0xff]   ;;  %v1607_v59 = vld [vmem:[%s2135_s1 + $0x150] sm:$0xff]  }
  0x53   :  { %1404 = vmatpush3.bf16.msra.mxu1 %v1563_v19  ;;  %1377 = vmatprep.subr.bf16.mxu0 %v1564_v20  ;;  %v1601_v55 = vld [vmem:[%s2135_s1 + $0x198] sm:$0xff]   ;;  %v1608_v60 = vld [vmem:[%s2135_s1 + $0x1d0] sm:$0xff]   ;;  %v1612_v0 = vld [vmem:[%s2135_s1 + $0x148] sm:$0xff]  }
  0x54   :  { %1405 = vmatprep.subr.bf16.mxu1 %v1565_v21  ;;  %v1605_v58 = vld [vmem:[%s2134_s0 + $0x54] ss:$36 sps:$4 sm:$0xff]   ;;  %v1613_v1 = vld [vmem:[%s2135_s1 + $0x1c8] sm:$0xff]   ;;  %v1617_v5 = vld [vmem:[%s2135_s1 + $0x1c0] sm:$0xff]  }
  0x55   :  { %v1609_v61 = vld [vmem:[%s2134_s0 + $0x50] ss:$36 sps:$4 sm:$0xff]   ;;  %v1614_v2 = vld [vmem:[%s2135_s1 + $0x108] sm:$0xff]   ;;  %v1618_v6 = vld [vmem:[%s2135_s1 + $0x100] sm:$0xff]  }
  0x56   :  { %1378 = vmatpush3.bf16.msra.mxu0 %v1566_v22  ;;  %v1610_v62 = vld [vmem:[%s2135_s1 + $0x110] sm:$0xff]   ;;  %v1615_v3 = vld [vmem:[%s2135_s1 + $0x188] sm:$0xff]   ;;  %v1619_v7 = vld [vmem:[%s2135_s1 + $0x180] sm:$0xff]  }
  0x57   :  { %1406 = vmatpush3.bf16.msra.mxu1 %v1567_v23  ;;  %1379 = vmatprep.subr.bf16.mxu0 %v1568_v24  ;;  %v1611_v63 = vld [vmem:[%s2135_s1 + $0x190] sm:$0xff]   ;;  %v1623_v10 = vld [vmem:[%s2134_s0 + $0x18] ss:$36 sps:$4 sm:$0xff]   ;;  %v1633_v18 = vld [vmem:[%s2135_s1 + $0x228] sm:$0xff]  }
  0x58   :  { %1407 = vmatprep.subr.bf16.mxu1 %v1569_v25  ;;  %v1620_v8 = vld [vmem:[%s2134_s0 + $0x10] ss:$36 sps:$4 sm:$0xff]   ;;  %v1625_v11 = vld [vmem:[%s2134_s0 + $0x1c] ss:$36 sps:$4 sm:$0xff]   ;;  %v1634_v19 = vld [vmem:[%s2140_s6 + $0x28] sm:$0xff]  }
  0x59   :  { %v1622_v9 = vld [vmem:[%s2134_s0 + $0x14] ss:$36 sps:$4 sm:$0xff]   ;;  %v1630_v16 = vld [vmem:[%s2134_s0 + $0x5c] ss:$36 sps:$4 sm:$0xff]   ;;  %v1635_v20 = vld [vmem:[%s2134_s0 + $0x64] ss:$36 sps:$4 sm:$0xff]  }
  0x5a   :  { %1380 = vmatpush3.bf16.msra.mxu0 %v1570_v26  ;;  %v1626_v12 = vld [vmem:[%s2135_s1 + $0x238] sm:$0xff]   ;;  %v1628_v14 = vld [vmem:[%s2135_s1 + $0x230] sm:$0xff]   ;;  %v1637_v21 = vld [vmem:[%s2134_s0 + $0x60] ss:$36 sps:$4 sm:$0xff]  }
  0x5b   :  { %1408 = vmatpush3.bf16.msra.mxu1 %v1571_v27  ;;  %1381 = vmatprep.subr.bf16.mxu0 %v1572_v28  ;;  %v1627_v13 = vld [vmem:[%s2140_s6 + $0x38] sm:$0xff]   ;;  %v1629_v15 = vld [vmem:[%s2140_s6 + $0x30] sm:$0xff]   ;;  %v1638_v22 = vld [vmem:[%s2135_s1 + $0x220] sm:$0xff]  }
  0x5c   :  { %1409 = vmatprep.subr.bf16.mxu1 %v1573_v29  ;;  %v1632_v17 = vld [vmem:[%s2134_s0 + $0x58] ss:$36 sps:$4 sm:$0xff]   ;;  %v1639_v23 = vld [vmem:[%s2140_s6 + $0x20] sm:$0xff]   ;;  %v1642_v26 = vld [vmem:[%s2135_s1 + $0x210] sm:$0xff]  }
  0x5d   :  { %v1640_v24 = vld [vmem:[%s2135_s1 + $0x218] sm:$0xff]   ;;  %v1643_v27 = vld [vmem:[%s2140_s6 + $0x10] sm:$0xff]   ;;  %v1644_v28 = vld [vmem:[%s2135_s1 + $0x208] sm:$0xff]  }
  0x5e   :  { %1382 = vmatpush3.bf16.msra.mxu0 %v1574_v30  ;;  %v1641_v25 = vld [vmem:[%s2140_s6 + $0x18] sm:$0xff]   ;;  %v1648_v29 = vld [vmem:[%s2134_s0 + $0x20] ss:$36 sps:$4 sm:$0xff]   ;;  %v1651_v35 = vld [vmem:[%s2139_s5 + $0x8] sm:$0xff]  }
  0x5f   :  { %1410 = vmatpush3.bf16.msra.mxu1 %v1575_v31  ;;  %1423 = vmatprep.subr.bf16.mxu0 %v1582_v36  ;;  %v1649_v30 = vld [vmem:[%s2139_s5] sm:$0xff]   ;;  %v1645_v31 = vld [vmem:[%s2140_s6 + $0x8] sm:$0xff]  }
  0x60   :  { %1451 = vmatprep.subr.bf16.mxu1 %v1583_v37  ;;  %v1647_v33 = vld [vmem:[%s2140_s6] sm:$0xff]  }
  0x61   :  { %819 = vmatmul.mubr.bf16.vlgmr.msra.gmra.mxu0 %v1576_v32  ;;  %v1646_v32 = vld [vmem:[%s2135_s1 + $0x200] sm:$0xff]  }
  0x62   :  { %868 = vmatmul.mubr.bf16.vlgmr.msra.gmra.mxu1 %v1579_v34  ;;  %1424 = vmatpush3.bf16.msra.mxu0 %v1584_v38  ;;  %v1650_v34 = vld [vmem:[%s2134_s0 + $0x68] ss:$36 sps:$4 sm:$0xff]  }
  0x63   :  { %1452 = vmatpush3.bf16.msra.mxu1 %v1585_v39  ;;  %1425 = vmatprep.subr.bf16.mxu0 %v1586_v40 }
  0x64   :  { %1453 = vmatprep.subr.bf16.mxu1 %v1587_v41  ;;  %826 = vmatprep.mubr.bf16.mxu0 %v1602_v56 }
  0x65   :  { %875 = vmatprep.mubr.bf16.mxu1 %v1605_v58 }
  0x66   :  { %1426 = vmatpush3.bf16.msra.mxu0 %v1588_v42 }
  0x67   :  { %1454 = vmatpush3.bf16.msra.mxu1 %v1589_v43  ;;  %1427 = vmatprep.subr.bf16.mxu0 %v1590_v44 }
  0x68   :  { %1455 = vmatprep.subr.bf16.mxu1 %v1591_v45 }
  0x69   :  { %827 = vmatmul.mubr.bf16.gmra.mxu0 %v1604_v57 }
  0x6a   :  { %1428 = vmatpush3.bf16.msra.mxu0 %v1592_v46  ;;  %876 = vmatmul.mubr.bf16.gmra.mxu1 %v1609_v61 }
  0x6b   :  { %1456 = vmatpush3.bf16.msra.mxu1 %v1593_v47  ;;  %1429 = vmatprep.subr.bf16.mxu0 %v1594_v48 }
  0x6c   :  { %1457 = vmatprep.subr.bf16.mxu1 %v1595_v49  ;;  %916 = vmatprep.mubr.bf16.mxu0 %v1622_v9 }
  0x6d   :  { %965 = vmatprep.mubr.bf16.mxu1 %v1625_v11 }
  0x6e   :  { %1430 = vmatpush3.bf16.msra.mxu0 %v1596_v50 }
  0x6f   :  { %1458 = vmatpush3.bf16.msra.mxu1 %v1597_v51  ;;  %1431 = vmatprep.subr.bf16.mxu0 %v1598_v52 }
  0x70   :  { %1459 = vmatprep.subr.bf16.mxu1 %v1599_v53 }
  0x72   :  { %1432 = vmatpush3.bf16.msra.mxu0 %v1600_v54 }
  0x73   :  { %1460 = vmatpush3.bf16.msra.mxu1 %v1601_v55  ;;  %1433 = vmatprep.subr.bf16.mxu0 %v1607_v59 }
  0x74   :  { %1461 = vmatprep.subr.bf16.mxu1 %v1608_v60 }
  0x76   :  { %1434 = vmatpush3.bf16.msra.mxu0 %v1610_v62 }
  0x77   :  { %1462 = vmatpush3.bf16.msra.mxu1 %v1611_v63  ;;  %1435 = vmatprep.subr.bf16.mxu0 %v1612_v0 }
  0x78   :  { %1463 = vmatprep.subr.bf16.mxu1 %v1613_v1  ;;  %v1243_v1 = vld [vmem:[#allocation2] ss:$0 sm:$0xff] }
  0x7a   :  { %1436 = vmatpush3.bf16.msra.mxu0 %v1614_v2 }
  0x7b   :  { %1464 = vmatpush3.bf16.msra.mxu1 %v1615_v3  ;;  %1437 = vmatprep.subr.bf16.mxu0 %v1616_v4 }
  0x7c   :  { %1465 = vmatprep.subr.bf16.mxu1 %v1617_v5 }
  0x7e   :  { %1438 = vmatpush3.bf16.msra.mxu0 %v1618_v6 }
  0x7f   :  { %1466 = vmatpush3.bf16.msra.mxu1 %v1619_v7  ;;  %1499 = vmatprep.subr.bf16.mxu0 %v1626_v12 }
  0x80   :  { %1519 = vmatprep.subr.bf16.mxu1 %v1627_v13 }
  0x81   :  { %917 = vmatmul.mubr.bf16.vlgmr.msra.gmra.mxu0 %v1620_v8 }
  0x82   :  { %966 = vmatmul.mubr.bf16.vlgmr.msra.gmra.mxu1 %v1623_v10  ;;  %1500 = vmatpush3.bf16.msra.mxu0 %v1626_v12 }
  0x83   :  { %1520 = vmatpush3.bf16.msra.mxu1 %v1627_v13  ;;  %1501 = vmatprep.subr.bf16.mxu0 %v1628_v14 }
  0x84   :  { %1521 = vmatprep.subr.bf16.mxu1 %v1629_v15  ;;  %924 = vmatprep.mubr.bf16.mxu0 %v1630_v16 }
  0x85   :  { %973 = vmatprep.mubr.bf16.mxu1 %v1635_v20 }
  0x86   :  { %1502 = vmatpush3.bf16.msra.mxu0 %v1628_v14 }
  0x87   :  { %1522 = vmatpush3.bf16.msra.mxu1 %v1629_v15  ;;  %1503 = vmatprep.subr.bf16.mxu0 %v1633_v18 }
  0x88   :  { %1523 = vmatprep.subr.bf16.mxu1 %v1634_v19 }
  0x89   :  { %925 = vmatmul.mubr.bf16.gmra.mxu0 %v1632_v17 }
  0x8a   :  { %1504 = vmatpush3.bf16.msra.mxu0 %v1633_v18  ;;  %974 = vmatmul.mubr.bf16.gmra.mxu1 %v1637_v21 }
  0x8b   :  { %1524 = vmatpush3.bf16.msra.mxu1 %v1634_v19  ;;  %1505 = vmatprep.subr.bf16.mxu0 %v1638_v22 }
  0x8c   :  { %1525 = vmatprep.subr.bf16.mxu1 %v1639_v23  ;;  %1515 = vmatprep.mubr.bf16.mxu0 %v1648_v29 }
  0x8d   :  { %1535 = vmatprep.mubr.bf16.mxu1 %v1649_v30 }
  0x8e   :  { %1506 = vmatpush3.bf16.msra.mxu0 %v1638_v22 }
  0x8f   :  { %1526 = vmatpush3.bf16.msra.mxu1 %v1639_v23  ;;  %1507 = vmatprep.subr.bf16.mxu0 %v1640_v24 }
  0x90   :  { %1527 = vmatprep.subr.bf16.mxu1 %v1641_v25 }
  0x92   :  { %1508 = vmatpush3.bf16.msra.mxu0 %v1640_v24 }
  0x93   :  { %1528 = vmatpush3.bf16.msra.mxu1 %v1641_v25  ;;  %1509 = vmatprep.subr.bf16.mxu0 %v1642_v26 }
  0x94   :  { %1529 = vmatprep.subr.bf16.mxu1 %v1643_v27 }
  0x96   :  { %1510 = vmatpush3.bf16.msra.mxu0 %v1642_v26 }
  0x97   :  { %1530 = vmatpush3.bf16.msra.mxu1 %v1643_v27  ;;  %1511 = vmatprep.subr.bf16.mxu0 %v1644_v28 }
  0x98   :  { %1531 = vmatprep.subr.bf16.mxu1 %v1645_v31 }
  0x9a   :  { %1512 = vmatpush3.bf16.msra.mxu0 %v1644_v28 }
  0x9b   :  { %1532 = vmatpush3.bf16.msra.mxu1 %v1645_v31  ;;  %1513 = vmatprep.subr.bf16.mxu0 %v1646_v32 }
  0x9c   :  { %1533 = vmatprep.subr.bf16.mxu1 %v1647_v33 }
  0x9e   :  { %1514 = vmatpush3.bf16.msra.mxu0 %v1646_v32  ;;  %v1346_v32 = vld [vmem:[#allocation7] ss:$0 sm:$0xff] }
  0x9f   :  { %1534 = vmatpush3.bf16.msra.mxu1 %v1647_v33 }
  0xa1   :  { %1516 = vmatmul.mubr.bf16.vlgmr.msra.gmra.mxu0 %v1650_v34 }
  0xa2   :  { %1536 = vmatmul.mubr.bf16.vlgmr.msra.gmra.mxu1 %v1651_v35 }
 0x121   :  { %v1383_v36 = vpop.f32.mrf.mxu0 }
 0x122   :  { %v1411_v37 = vpop.f32.mrf.mxu1 }
 0x123   :  { %v1384_v38 = vpop.f32.mrf.mxu0 }
 0x124   :  { %v1412_v39 = vpop.f32.mrf.mxu1  ;;  %v1385_v0 = vadd.f32 %v1384_v38, %v1383_v36  ;;  %v1334_v38 = vld [vmem:[#allocation4] ss:$0 sm:$0xff] }
 0x125   :  { %v1386_v40 = vpop.f32.mrf.mxu0  ;;  %v1413_v8 = vadd.f32 %v1412_v39, %v1411_v37 }
 0x126   :  { %v1414_v41 = vpop.f32.mrf.mxu1  ;;  %v821_v7 = vadd.f32 %v1385_v0, %v1243_v1 }
 0x127   :  { %v1387_v42 = vpop.f32.mrf.mxu0 }
 0x128   :  { %v1415_v44 = vpop.f32.mrf.mxu1  ;;  %v1388_v9 = vadd.f32 %v1387_v42, %v1386_v40  ;;  %v870_v17 = vadd.f32 %v1413_v8, %v821_v7 }
 0x129   :  { %v1389_v43 = vpop.f32.mrf.mxu0  ;;  %v1416_v22 = vadd.f32 %v1415_v44, %v1414_v41 }
 0x12a   :  { %v1417_v45 = vpop.f32.mrf.mxu1  ;;  %v824_v18 = vadd.f32 %v1388_v9, %v1243_v1 }
 0x12b   :  { %v1390_v46 = vpop.f32.mrf.mxu0 }
 0x12c   :  { %v1418_v47 = vpop.f32.mrf.mxu1  ;;  %v1391_v63 = vadd.f32 %v1390_v46, %v1389_v43  ;;  %v873_v28 = vadd.f32 %v1416_v22, %v824_v18  ;;  %v1347_v43 = vld [vmem:[#allocation9] ss:$0 sm:$0xff] }
 0x12d   :  { %v1392_v48 = vpop.f32.mrf.mxu0  ;;  %v1419_v5 = vadd.f32 %v1418_v47, %v1417_v45  ;;  %v1335_v47 = vld [vmem:[#allocation6] ss:$0 sm:$0xff] }
 0x12e   :  { %v1420_v49 = vpop.f32.mrf.mxu1  ;;  %v829_v4 = vadd.f32 %v1391_v63, %v1243_v1 }
 0x12f   :  { %v1393_v50 = vpop.f32.mrf.mxu0 }
 0x130   :  { %v1421_v52 = vpop.f32.mrf.mxu1  ;;  %v1394_v6 = vadd.f32 %v1393_v50, %v1392_v48  ;;  %v878_v13 = vadd.f32 %v1419_v5, %v829_v4 }
 0x131   :  { %v1422_v15 = vadd.f32 %v1421_v52, %v1420_v49 }
 0x132   :  { %v832_v14 = vadd.f32 %v1394_v6, %v1243_v1 }
 0x134   :  { %v881_v24 = vadd.f32 %v1422_v15, %v832_v14 }
 0x141   :  { %v1439_v51 = vpop.f32.mrf.mxu0 }
 0x142   :  { %v1467_v54 = vpop.f32.mrf.mxu1 }
 0x143   :  { %v1440_v53 = vpop.f32.mrf.mxu0 }
 0x144   :  { %v1468_v56 = vpop.f32.mrf.mxu1  ;;  %v1441_v16 = vadd.f32 %v1440_v53, %v1439_v51 }
 0x145   :  { %v1442_v55 = vpop.f32.mrf.mxu0  ;;  %v1469_v26 = vadd.f32 %v1468_v56, %v1467_v54 }
 0x146   :  { %v1470_v58 = vpop.f32.mrf.mxu1  ;;  %v919_v25 = vadd.f32 %v1441_v16, %v870_v17 }
 0x147   :  { %v1443_v57 = vpop.f32.mrf.mxu0 }
 0x148   :  { %v1471_v60 = vpop.f32.mrf.mxu1  ;;  %v1444_v27 = vadd.f32 %v1443_v57, %v1442_v55  ;;  %v968_v37 = vadd.f32 %v1469_v26, %v919_v25 }
 0x149   :  { %v1445_v59 = vpop.f32.mrf.mxu0  ;;  %v1472_v42 = vadd.f32 %v1471_v60, %v1470_v58 }
 0x14a   :  { %v1473_v62 = vpop.f32.mrf.mxu1  ;;  %v922_v34 = vadd.f32 %v1444_v27, %v873_v28 }
 0x14b   :  { %v1446_v61 = vpop.f32.mrf.mxu0 }
 0x14c   :  { %v1474_v3 = vpop.f32.mrf.mxu1  ;;  %v1447_v10 = vadd.f32 %v1446_v61, %v1445_v59  ;;  %v971_v53 = vadd.f32 %v1472_v42, %v922_v34 }
 0x14d   :  { %v1448_v2 = vpop.f32.mrf.mxu0  ;;  %v1475_v20 = vadd.f32 %v1474_v3, %v1473_v62 }
 0x14e   :  { %v1476_v12 = vpop.f32.mrf.mxu1  ;;  %v927_v19 = vadd.f32 %v1447_v10, %v878_v13 }
 0x14f   :  { %v1449_v11 = vpop.f32.mrf.mxu0 }
 0x150   :  { %v1450_v21 = vadd.f32 %v1449_v11, %v1448_v2  ;;  %v1477_v23 = vpop.f32.mrf.mxu1  ;;  %v976_v31 = vadd.f32 %v1475_v20, %v927_v19 }
 0x151   :  { %v1478_v30 = vadd.f32 %v1477_v23, %v1476_v12 }
 0x152   :  { %v930_v29 = vadd.f32 %v1450_v21, %v881_v24 }
 0x154   :  { %v979_v46 = vadd.f32 %v1478_v30, %v930_v29 }
 0x161   :  { %v1517_v33 = vpop.f32.mrf.mxu0 }
 0x162   :  { %v1025_v35 = vadd.f32 %v1517_v33, %v976_v31  ;;  %v1537_v36 = vpop.f32.mrf.mxu1 }
 0x163   :  { %v1195_v39 = vmul.f32 %v1537_v36, %v1346_v32  ;;  %v1016_v40 = vpop.f32.mrf.mxu0 }
 0x164   :  { %v1033_v41 = vmax.f32 %v1025_v35, 0.0  ;;  %v1017_v44 = vadd.f32 %v1016_v40, %v968_v37  ;;  %v1171_v45 = vpop.f32.mrf.mxu1 }
 0x165   :  { %v1518_v48 = vpop.f32.mrf.mxu0  ;;  %v1206_v54 = vadd.f32 %v1347_v43, %v1195_v39  ;;  %v1193_v55 = vmul.f32 %v1346_v32, %v1171_v45 }
 0x166   :  { %v1044_v49 = vmul.f32 %v1334_v38, %v1033_v41  ;;  %v1031_v50 = vmax.f32 %v1017_v44, 0.0  ;;  %v1028_v51 = vadd.f32 %v1518_v48, %v979_v46  ;;  %v1538_v52 = vpop.f32.mrf.mxu1 }
 0x167   :  { %v1196_v56 = vmul.f32 %v1538_v52, %v1346_v32  ;;  %v1019_v57 = vpop.f32.mrf.mxu0  ;;  %v1204_v3 = vadd.f32 %v1347_v43, %v1193_v55 }
 0x168   :  { %v1055_v59 = vadd.f32 %v1335_v47, %v1044_v49  ;;  %v1042_v61 = vmul.f32 %v1334_v38, %v1031_v50  ;;  %v1034_v62 = vmax.f32 %v1028_v51, 0.0  ;;  %v1020_v58 = vadd.f32 %v1019_v57, %v971_v53  ;;  %v1174_v60 = vpop.f32.mrf.mxu1 }
 0x169   :  { %v1194_v2 = vmul.f32 %v1346_v32, %v1174_v60  ;;  %v1207_v6 = vadd.f32 %v1347_v43, %v1196_v56 }
 0x16a   :  { %v1053_v63 = vadd.f32 %v1335_v47, %v1042_v61  ;;  %v1045_v0 = vmul.f32 %v1334_v38, %v1034_v62  ;;  %v1032_v1 = vmax.f32 %v1020_v58, 0.0  ;;  %v1210_v4 = vadd.f32 %v1206_v54, %v1055_v59 }
 0x16b   :  { %v1205_v11 = vadd.f32 %v1347_v43, %v1194_v2 }
 0x16c   :  { %v1056_v5 = vadd.f32 %v1335_v47, %v1045_v0  ;;  %v1043_v7 = vmul.f32 %v1334_v38, %v1032_v1  ;;  %v1208_v8 = vadd.f32 %v1204_v3, %v1053_v63  ;;  %v1214_v12 = vmax.f32 %v1210_v4, 0.0 }
 0x16e   :  { %v1211_v9 = vadd.f32 %v1207_v6, %v1056_v5  ;;  %v1054_v10 = vadd.f32 %v1335_v47, %v1043_v7  ;;  %v1212_v15 = vmax.f32 %v1208_v8, 0.0 }
 0x170   :  { %v1215_v13 = vmax.f32 %v1211_v9, 0.0  ;;  %v1209_v14 = vadd.f32 %v1205_v11, %v1054_v10 }
 0x172   :  { %v1364_v16 = vpack.c.bf16 %v1215_v13, %v1214_v12  ;;  %v1213_v17 = vmax.f32 %v1209_v14, 0.0 }
 0x174   :  { %1366 = vst [vmem:[%s2143_s9 + $0x8] sm:$0xff] %v1364_v16   ;;  %v1359_v18 = vpack.c.bf16 %v1213_v17, %v1212_v15 }
 0x176   :  { %1360 = vst [vmem:[%s2143_s9] sm:$0xff] %v1359_v18  }
 0x177   :  { %1240 = vsyncpa [#allocation3], 1 }
 0x178   :  { %1241 = vsyncpa [#allocation5], 1 }
 0x179   :  { %1242 = vsyncpa [#allocation8], 1 }

// kernel: bennet_forward.18
= control target key start
LH: loop header
LB: loop body
LE: loop exit
PB: predicated region body
PF: predicated region fallthrough
CT: control target
= control target key end

     0   :  { %14 = vsyncpa [#allocation3], 0  ;;  %s1909_s0 = inlined_call_operand.vmem [shape: bf16[16,1152], index: 0, kind: input, shape index: {}]   ;;  %s1910_s1 = inlined_call_operand.vmem [shape: bf16[1152,128], index: 1, kind: input, shape index: {}]   ;;  %s1911_s2 = inlined_call_operand.hbm [shape: f32[1,128], index: 2, kind: input, shape index: {}]   ;;  %s1912_s3 = inlined_call_operand.hbm [shape: f32[1,128], index: 3, kind: input, shape index: {}]   ;;  %s1913_s4 = inlined_call_operand.hbm [shape: f32[1,128], index: 4, kind: input, shape index: {}]   ;;  %s1914_s5 = inlined_call_operand.vmem [shape: bf16[16,128], index: 5, kind: input, shape index: {}]   ;;  %s1915_s6 = inlined_call_operand.vmem [shape: bf16[128,128], index: 6, kind: input, shape index: {}]   ;;  %s1916_s7 = inlined_call_operand.hbm [shape: f32[1,128], index: 7, kind: input, shape index: {}]   ;;  %s1917_s8 = inlined_call_operand.hbm [shape: f32[1,128], index: 8, kind: input, shape index: {}]   ;;  %s1918_s9 = inlined_call_operand.vmem [shape: bf16[16,128], index: 9, kind: output, shape index: {}]  }
   0x1   :  { %15 = vsyncpa [#allocation5], 0 }
   0x2   :  { %16 = vsyncpa [#allocation8], 0  ;;  %s1564_s30 = smov [#allocation4]   ;;  %s1565_s11 = smov [#allocation7]  }
   0x3   :  { %s37_s10 = sshll.u32 %s1564_s30, 4  ;;  %s61_s12 = sshll.u32 %s1565_s11, 4  ;;  %s38_s10 = int_to_ptr.vmem [resolvable:$true] %s37_s10  ;;  %s62_s12 = int_to_ptr.vmem [resolvable:$true] %s61_s12 }
   0x4   :  { %s1466_s13 = scalar_lea.vmem %s38_s10, 16  ;;  %s1470_s14 = scalar_lea.vmem %s38_s10, 32 }
   0x5   :  { %p1467_p0 = scmp.ne.s32.totalorder %s38_s10, %s1466_s13  ;;  %p1471_p1 = scmp.lt.s32.totalorder %s38_s10, %s38_s10 }
   0x6   :  { %p1472_p2 = scmp.lt.s32.totalorder %s1470_s14, %s1466_s13 }
   0x8   :  { %p1473_p3 = por %p1472_p2, %p1471_p1 }
   0xa   :  { %p1474_p4 = pnand %p1473_p3, %p1467_p0 }
   0xc   :  { %1477 = shalt.err (!%p1474_p4)
}
   0xd   :  { %40 = dma.hbm_to_vmem [thread:$0]  %s1912_s3, 16, %s38_s10, [#allocation5]  }
   0xe   :  { %s1486_s17 = scalar_lea.vmem %s62_s12, 16  ;;  %s1490_s18 = scalar_lea.vmem %s62_s12, 32 }
   0xf   :  { %p1487_p5 = scmp.ne.s32.totalorder %s62_s12, %s1486_s17  ;;  %p1491_p6 = scmp.lt.s32.totalorder %s62_s12, %s62_s12 }
  0x10   :  { %p1492_p7 = scmp.lt.s32.totalorder %s1490_s18, %s1486_s17 }
  0x12   :  { %p1493_p8 = por %p1492_p7, %p1491_p6 }
  0x14   :  { %p1494_p9 = pnand %p1493_p8, %p1487_p5 }
  0x16   :  { %1497 = shalt.err (!%p1494_p9)
}
  0x17   :  { %64 = dma.hbm_to_vmem [thread:$0]  %s1916_s7, 16, %s62_s12, [#allocation8]  }
  0x18   :  { %s1566_s21 = smov [#allocation2]   ;;  %s1567_s23 = smov [#allocation6]  }
  0x19   :  { %s27_s22 = sshll.u32 %s1566_s21, 4  ;;  %s47_s24 = sshll.u32 %s1567_s23, 4  ;;  %s28_s22 = int_to_ptr.vmem [resolvable:$true] %s27_s22  ;;  %s48_s24 = int_to_ptr.vmem [resolvable:$true] %s47_s24 }
  0x1a   :  { %s1506_s25 = scalar_lea.vmem %s28_s22, 16  ;;  %s1510_s3 = scalar_lea.vmem %s28_s22, 32 }
  0x1b   :  { %p1507_p10 = scmp.ne.s32.totalorder %s28_s22, %s1506_s25  ;;  %p1511_p11 = scmp.lt.s32.totalorder %s28_s22, %s28_s22 }
  0x1c   :  { %p1512_p12 = scmp.lt.s32.totalorder %s1510_s3, %s1506_s25 }
  0x1e   :  { %p1513_p13 = por %p1512_p12, %p1511_p11 }
  0x20   :  { %p1514_p0 = pnand %p1513_p13, %p1507_p10 }
  0x22   :  { %1517 = shalt.err (!%p1514_p0)
}
  0x23   :  { %30 = dma.hbm_to_vmem [thread:$0]  %s1911_s2, 16, %s28_s22, [#allocation3]  }
  0x24   :  { %s1526_s28 = scalar_lea.vmem %s48_s24, 16  ;;  %s1530_s7 = scalar_lea.vmem %s48_s24, 32 }
  0x25   :  { %p1527_p1 = scmp.ne.s32.totalorder %s48_s24, %s1526_s28  ;;  %p1531_p2 = scmp.lt.s32.totalorder %s48_s24, %s48_s24 }
  0x26   :  { %p1532_p3 = scmp.lt.s32.totalorder %s1530_s7, %s1526_s28 }
  0x28   :  { %p1533_p4 = por %p1532_p3, %p1531_p2 }
  0x2a   :  { %p1534_p5 = pnand %p1533_p4, %p1527_p1 }
  0x2c   :  { %1537 = shalt.err (!%p1534_p5)
}
  0x2d   :  { %50 = dma.hbm_to_vmem [thread:$0]  %s1913_s4, 16, %s48_s24, [#allocation5]  }
  0x2e   :  { %s1568_s10 = smov [#allocation9]  }
  0x2f   :  { %s71_s11 = sshll.u32 %s1568_s10, 4  ;;  %s72_s11 = int_to_ptr.vmem [resolvable:$true] %s71_s11 }
  0x30   :  { %s1546_s12 = scalar_lea.vmem %s72_s11, 16  ;;  %s1550_s13 = scalar_lea.vmem %s72_s11, 32 }
  0x31   :  { %p1547_p6 = scmp.ne.s32.totalorder %s72_s11, %s1546_s12  ;;  %p1551_p7 = scmp.lt.s32.totalorder %s72_s11, %s72_s11 }
  0x32   :  { %p1552_p8 = scmp.lt.s32.totalorder %s1550_s13, %s1546_s12 }
  0x34   :  { %p1553_p9 = por %p1552_p8, %p1551_p7 }
  0x36   :  { %p1554_p10 = pnand %p1553_p9, %p1547_p6 }
  0x38   :  { %1557 = shalt.err (!%p1554_p10)
}
  0x39   :  { %74 = dma.hbm_to_vmem [thread:$0]  %s1917_s8, 16, %s72_s11, [#allocation8]  }
  0x3a   :  { %1558 = dma.done.wait [#allocation3], 16  }
  0x3b   :  { %1559 = vsyncadd [#allocation3], 4294967280 }
  0x3c   :  { %1560 = dma.done.wait [#allocation5], 32  }
  0x3d   :  { %1561 = vsyncadd [#allocation5], 4294967264 }
  0x3e   :  { %1562 = dma.done.wait [#allocation8], 32  }
  0x3f   :  { %1563 = vsyncadd [#allocation8], 4294967264  ;;  %v1364_v0 = vld [vmem:[%s1910_s1 + $0x78] sm:$0xff]   ;;  %v1368_v4 = vld [vmem:[%s1910_s1 + $0x70] sm:$0xff]   ;;  %vm1570_vm0 = vmmov 0  }
  0x40   :  { %v1365_v1 = vld [vmem:[%s1910_s1 + $0xf8] sm:$0xff]   ;;  %1211 = vmatprep.subr.bf16.mxu0 %v1364_v0  ;;  %v1369_v5 = vld [vmem:[%s1910_s1 + $0xf0] sm:$0xff]   ;;  %v1372_v8 = vld [vmem:[%s1910_s1 + $0x68] sm:$0xff]  }
  0x41   :  { %v1366_v2 = vld [vmem:[%s1910_s1 + $0x38] sm:$0xff]   ;;  %1233 = vmatprep.subr.bf16.mxu1 %v1365_v1  ;;  %v1370_v6 = vld [vmem:[%s1910_s1 + $0x30] sm:$0xff]   ;;  %v1373_v9 = vld [vmem:[%s1910_s1 + $0xe8] sm:$0xff]  }
  0x42   :  { %v1367_v3 = vld [vmem:[%s1910_s1 + $0xb8] sm:$0xff]   ;;  %1212 = vmatpush3.bf16.msra.mxu0 %v1366_v2  ;;  %v1371_v7 = vld [vmem:[%s1910_s1 + $0xb0] sm:$0xff]   ;;  %v1374_v10 = vld [vmem:[%s1910_s1 + $0x28] sm:$0xff]  }
  0x43   :  { %1234 = vmatpush3.bf16.msra.mxu1 %v1367_v3  ;;  %1213 = vmatprep.subr.bf16.mxu0 %v1368_v4  ;;  %v1375_v11 = vld [vmem:[%s1910_s1 + $0xa8] sm:$0xff]   ;;  %v1376_v12 = vld [vmem:[%s1910_s1 + $0x60] sm:$0xff]   ;;  %v1380_v16 = vld [vmem:[%s1910_s1 + $0x58] sm:$0xff]  }
  0x44   :  { %1235 = vmatprep.subr.bf16.mxu1 %v1369_v5  ;;  %v1377_v13 = vld [vmem:[%s1910_s1 + $0xe0] sm:$0xff]   ;;  %v1381_v17 = vld [vmem:[%s1910_s1 + $0xd8] sm:$0xff]   ;;  %v1384_v20 = vld [vmem:[%s1910_s1 + $0x50] sm:$0xff]  }
  0x45   :  { %v1378_v14 = vld [vmem:[%s1910_s1 + $0x20] sm:$0xff]   ;;  %v1382_v18 = vld [vmem:[%s1910_s1 + $0x18] sm:$0xff]   ;;  %v1385_v21 = vld [vmem:[%s1910_s1 + $0xd0] sm:$0xff]  }
  0x46   :  { %1214 = vmatpush3.bf16.msra.mxu0 %v1370_v6  ;;  %v1379_v15 = vld [vmem:[%s1910_s1 + $0xa0] sm:$0xff]   ;;  %v1383_v19 = vld [vmem:[%s1910_s1 + $0x98] sm:$0xff]   ;;  %v1386_v22 = vld [vmem:[%s1910_s1 + $0x10] sm:$0xff]  }
  0x47   :  { %1236 = vmatpush3.bf16.msra.mxu1 %v1371_v7  ;;  %1215 = vmatprep.subr.bf16.mxu0 %v1372_v8  ;;  %v1387_v23 = vld [vmem:[%s1910_s1 + $0x90] sm:$0xff]   ;;  %v1388_v24 = vld [vmem:[%s1910_s1 + $0x48] sm:$0xff]   ;;  %v1392_v28 = vld [vmem:[%s1910_s1 + $0x40] sm:$0xff]   ;;  %v1569_v7 = vmov 0.0  }
  0x48   :  { %1237 = vmatprep.subr.bf16.mxu1 %v1373_v9  ;;  %v1389_v25 = vld [vmem:[%s1910_s1 + $0xc8] sm:$0xff]   ;;  %v1393_v29 = vld [vmem:[%s1910_s1 + $0xc0] sm:$0xff]   ;;  %v1402_v36 = vld [vmem:[%s1910_s1 + $0x178] sm:$0xff]  }
  0x49   :  { %v1390_v26 = vld [vmem:[%s1910_s1 + $0x8] sm:$0xff]   ;;  %v1394_v30 = vld [vmem:[%s1910_s1] sm:$0xff]   ;;  %v1403_v37 = vld [vmem:[%s1910_s1 + $0x1f8] sm:$0xff]  }
  0x4a   :  { %1216 = vmatpush3.bf16.msra.mxu0 %v1374_v10  ;;  %v1391_v27 = vld [vmem:[%s1910_s1 + $0x88] sm:$0xff]   ;;  %v1395_v31 = vld [vmem:[%s1910_s1 + $0x80] sm:$0xff]   ;;  %v1404_v38 = vld [vmem:[%s1910_s1 + $0x138] sm:$0xff]  }
  0x4b   :  { %1238 = vmatpush3.bf16.msra.mxu1 %v1375_v11  ;;  %1217 = vmatprep.subr.bf16.mxu0 %v1376_v12  ;;  %v1396_v32 = vld [vmem:[%s1909_s0] ss:$36 sps:$4 sm:$0xff]   ;;  %v1399_v34 = vld [vmem:[%s1909_s0 + $0x8] ss:$36 sps:$4 sm:$0xff]   ;;  %v1405_v39 = vld [vmem:[%s1910_s1 + $0x1b8] sm:$0xff]  }
  0x4c   :  { %1239 = vmatprep.subr.bf16.mxu1 %v1377_v13  ;;  %v1398_v33 = vld [vmem:[%s1909_s0 + $0x4] ss:$36 sps:$4 sm:$0xff]   ;;  %v1401_v35 = vld [vmem:[%s1909_s0 + $0xc] ss:$36 sps:$4 sm:$0xff]   ;;  %v1418_v52 = vld [vmem:[%s1910_s1 + $0x158] sm:$0xff]  }
  0x4d   :  { %762 = vmatprep.mubr.bf16.mxu0 %v1398_v33  ;;  %803 = vmatprep.mubr.bf16.mxu1 %v1401_v35  ;;  %v1406_v40 = vld [vmem:[%s1910_s1 + $0x170] sm:$0xff]   ;;  %v1410_v44 = vld [vmem:[%s1910_s1 + $0x168] sm:$0xff]   ;;  %v1414_v48 = vld [vmem:[%s1910_s1 + $0x160] sm:$0xff]  }
  0x4e   :  { %1218 = vmatpush3.bf16.msra.mxu0 %v1378_v14  ;;  %v1407_v41 = vld [vmem:[%s1910_s1 + $0x1f0] sm:$0xff]   ;;  %v1411_v45 = vld [vmem:[%s1910_s1 + $0x1e8] sm:$0xff]   ;;  %v1415_v49 = vld [vmem:[%s1910_s1 + $0x1e0] sm:$0xff]  }
  0x4f   :  { %1240 = vmatpush3.bf16.msra.mxu1 %v1379_v15  ;;  %1219 = vmatprep.subr.bf16.mxu0 %v1380_v16  ;;  %v1408_v42 = vld [vmem:[%s1910_s1 + $0x130] sm:$0xff]   ;;  %v1412_v46 = vld [vmem:[%s1910_s1 + $0x128] sm:$0xff]   ;;  %v1416_v50 = vld [vmem:[%s1910_s1 + $0x120] sm:$0xff]  }
  0x50   :  { %1241 = vmatprep.subr.bf16.mxu1 %v1381_v17  ;;  %v1409_v43 = vld [vmem:[%s1910_s1 + $0x1b0] sm:$0xff]   ;;  %v1413_v47 = vld [vmem:[%s1910_s1 + $0x1a8] sm:$0xff]   ;;  %v1417_v51 = vld [vmem:[%s1910_s1 + $0x1a0] sm:$0xff]  }
  0x51   :  { %v1419_v53 = vld [vmem:[%s1910_s1 + $0x1d8] sm:$0xff]   ;;  %v1422_v56 = vld [vmem:[%s1910_s1 + $0x150] sm:$0xff]   ;;  %v1426_v60 = vld [vmem:[%s1910_s1 + $0x148] sm:$0xff]  }
  0x52   :  { %1220 = vmatpush3.bf16.msra.mxu0 %v1382_v18  ;;  %v1420_v54 = vld [vmem:[%s1910_s1 + $0x118] sm:$0xff]   ;;  %v1423_v57 = vld [vmem:[%s1910_s1 + $0x1d0] sm:$0xff]   ;;  %v1427_v61 = vld [vmem:[%s1910_s1 + $0x1c8] sm:$0xff]  }
  0x53   :  { %1242 = vmatpush3.bf16.msra.mxu1 %v1383_v19  ;;  %1221 = vmatprep.subr.bf16.mxu0 %v1384_v20  ;;  %v1421_v55 = vld [vmem:[%s1910_s1 + $0x198] sm:$0xff]   ;;  %v1424_v58 = vld [vmem:[%s1910_s1 + $0x110] sm:$0xff]   ;;  %v1428_v62 = vld [vmem:[%s1910_s1 + $0x108] sm:$0xff]  }
  0x54   :  { %1243 = vmatprep.subr.bf16.mxu1 %v1385_v21  ;;  %v1425_v59 = vld [vmem:[%s1910_s1 + $0x190] sm:$0xff]   ;;  %v1429_v63 = vld [vmem:[%s1910_s1 + $0x188] sm:$0xff]   ;;  %v1430_v0 = vld [vmem:[%s1910_s1 + $0x140] sm:$0xff]  }
  0x55   :  { %v1431_v1 = vld [vmem:[%s1910_s1 + $0x1c0] sm:$0xff]   ;;  %v1434_v4 = vld [vmem:[%s1909_s0 + $0x10] ss:$36 sps:$4 sm:$0xff]   ;;  %v1437_v6 = vld [vmem:[%s1909_s0 + $0x18] ss:$36 sps:$4 sm:$0xff]  }
  0x56   :  { %1222 = vmatpush3.bf16.msra.mxu0 %v1386_v22  ;;  %v1432_v2 = vld [vmem:[%s1910_s1 + $0x100] sm:$0xff]   ;;  %v1436_v5 = vld [vmem:[%s1909_s0 + $0x14] ss:$36 sps:$4 sm:$0xff]   ;;  %v1444_v13 = vld [vmem:[%s1910_s1 + $0x228] sm:$0xff]  }
  0x57   :  { %1244 = vmatpush3.bf16.msra.mxu1 %v1387_v23  ;;  %1223 = vmatprep.subr.bf16.mxu0 %v1388_v24  ;;  %v1433_v3 = vld [vmem:[%s1910_s1 + $0x180] sm:$0xff]   ;;  %v1440_v9 = vld [vmem:[%s1910_s1 + $0x238] sm:$0xff]   ;;  %v1442_v11 = vld [vmem:[%s1910_s1 + $0x230] sm:$0xff]  }
  0x58   :  { %1245 = vmatprep.subr.bf16.mxu1 %v1389_v25  ;;  %v1439_v8 = vld [vmem:[%s1909_s0 + $0x1c] ss:$36 sps:$4 sm:$0xff]   ;;  %v1443_v12 = vld [vmem:[%s1915_s6 + $0x30] sm:$0xff]   ;;  %v1445_v14 = vld [vmem:[%s1915_s6 + $0x28] sm:$0xff]  }
  0x59   :  { %v1441_v10 = vld [vmem:[%s1915_s6 + $0x38] sm:$0xff]   ;;  %v1446_v15 = vld [vmem:[%s1910_s1 + $0x220] sm:$0xff]   ;;  %v1450_v19 = vld [vmem:[%s1910_s1 + $0x210] sm:$0xff]  }
  0x5a   :  { %1224 = vmatpush3.bf16.msra.mxu0 %v1390_v26  ;;  %v1447_v16 = vld [vmem:[%s1915_s6 + $0x20] sm:$0xff]   ;;  %v1448_v17 = vld [vmem:[%s1910_s1 + $0x218] sm:$0xff]   ;;  %v1451_v20 = vld [vmem:[%s1915_s6 + $0x10] sm:$0xff]  }
  0x5b   :  { %1246 = vmatpush3.bf16.msra.mxu1 %v1391_v27  ;;  %1225 = vmatprep.subr.bf16.mxu0 %v1392_v28  ;;  %v1449_v18 = vld [vmem:[%s1915_s6 + $0x18] sm:$0xff]   ;;  %v1452_v21 = vld [vmem:[%s1910_s1 + $0x208] sm:$0xff]   ;;  %v1454_v23 = vld [vmem:[%s1910_s1 + $0x200] sm:$0xff]  }
  0x5c   :  { %1247 = vmatprep.subr.bf16.mxu1 %v1393_v29  ;;  %v1453_v22 = vld [vmem:[%s1915_s6 + $0x8] sm:$0xff]   ;;  %v1455_v24 = vld [vmem:[%s1915_s6] sm:$0xff]  }
  0x5d   :  { %v1456_v25 = vld [vmem:[%s1909_s0 + $0x20] ss:$36 sps:$4 sm:$0xff]  }
  0x5e   :  { %1226 = vmatpush3.bf16.msra.mxu0 %v1394_v30  ;;  %v1457_v26 = vld [vmem:[%s1914_s5] sm:$0xff]  }
  0x5f   :  { %1248 = vmatpush3.bf16.msra.mxu1 %v1395_v31  ;;  %1255 = vmatprep.subr.bf16.mxu0 %v1402_v36 }
  0x60   :  { %1277 = vmatprep.subr.bf16.mxu1 %v1403_v37 }
  0x61   :  { %763 = vmatmul.mubr.bf16.vlgmr.msra.gmra.mxu0 %v1396_v32 }
  0x62   :  { %804 = vmatmul.mubr.bf16.vlgmr.msra.gmra.mxu1 %v1399_v34  ;;  %1256 = vmatpush3.bf16.msra.mxu0 %v1404_v38  ;;  %v1107_v38 = vld [vmem:[#allocation2] ss:$0 sm:$0xff] }
  0x63   :  { %1278 = vmatpush3.bf16.msra.mxu1 %v1405_v39  ;;  %1257 = vmatprep.subr.bf16.mxu0 %v1406_v40 }
  0x64   :  { %1279 = vmatprep.subr.bf16.mxu1 %v1407_v41  ;;  %844 = vmatprep.mubr.bf16.mxu0 %v1436_v5  ;;  %v1190_v5 = vld [vmem:[#allocation6] ss:$0 sm:$0xff] }
  0x65   :  { %885 = vmatprep.mubr.bf16.mxu1 %v1439_v8 }
  0x66   :  { %1258 = vmatpush3.bf16.msra.mxu0 %v1408_v42 }
  0x67   :  { %1280 = vmatpush3.bf16.msra.mxu1 %v1409_v43  ;;  %1259 = vmatprep.subr.bf16.mxu0 %v1410_v44 }
  0x68   :  { %1281 = vmatprep.subr.bf16.mxu1 %v1411_v45 }
  0x6a   :  { %1260 = vmatpush3.bf16.msra.mxu0 %v1412_v46 }
  0x6b   :  { %1282 = vmatpush3.bf16.msra.mxu1 %v1413_v47  ;;  %1261 = vmatprep.subr.bf16.mxu0 %v1414_v48 }
  0x6c   :  { %1283 = vmatprep.subr.bf16.mxu1 %v1415_v49 }
  0x6e   :  { %1262 = vmatpush3.bf16.msra.mxu0 %v1416_v50 }
  0x6f   :  { %1284 = vmatpush3.bf16.msra.mxu1 %v1417_v51  ;;  %1263 = vmatprep.subr.bf16.mxu0 %v1418_v52 }
  0x70   :  { %1285 = vmatprep.subr.bf16.mxu1 %v1419_v53 }
  0x72   :  { %1264 = vmatpush3.bf16.msra.mxu0 %v1420_v54 }
  0x73   :  { %1286 = vmatpush3.bf16.msra.mxu1 %v1421_v55  ;;  %1265 = vmatprep.subr.bf16.mxu0 %v1422_v56 }
  0x74   :  { %1287 = vmatprep.subr.bf16.mxu1 %v1423_v57 }
  0x76   :  { %1266 = vmatpush3.bf16.msra.mxu0 %v1424_v58 }
  0x77   :  { %1288 = vmatpush3.bf16.msra.mxu1 %v1425_v59  ;;  %1267 = vmatprep.subr.bf16.mxu0 %v1426_v60  ;;  %v1200_v59 = vld [vmem:[#allocation7] ss:$0 sm:$0xff] }
  0x78   :  { %1289 = vmatprep.subr.bf16.mxu1 %v1427_v61 }
  0x7a   :  { %1268 = vmatpush3.bf16.msra.mxu0 %v1428_v62 }
  0x7b   :  { %1290 = vmatpush3.bf16.msra.mxu1 %v1429_v63  ;;  %1269 = vmatprep.subr.bf16.mxu0 %v1430_v0  ;;  %v1189_v63 = vld [vmem:[#allocation4] ss:$0 sm:$0xff] }
  0x7c   :  { %1291 = vmatprep.subr.bf16.mxu1 %v1431_v1 }
  0x7e   :  { %1270 = vmatpush3.bf16.msra.mxu0 %v1432_v2 }
  0x7f   :  { %1292 = vmatpush3.bf16.msra.mxu1 %v1433_v3  ;;  %1317 = vmatprep.subr.bf16.mxu0 %v1569_v7 }
  0x80   :  { %1337 = vmatprep.subr.bf16.mxu1 %v1569_v7 }
  0x81   :  { %845 = vmatmul.mubr.bf16.vlgmr.msra.gmra.mxu0 %v1434_v4 }
  0x82   :  { %1333 = vmatprep.mubr.msk.bf16.mxu0 %vm1570_vm0, %v1569_v7  ;;  %886 = vmatmul.mubr.bf16.vlgmr.msra.gmra.mxu1 %v1437_v6  ;;  %v1201_v6 = vld [vmem:[#allocation9] ss:$0 sm:$0xff] }
  0x83   :  { %1318 = vmatpush3.bf16.msra.mxu0 %v1440_v9  ;;  %1338 = vmatpush3.bf16.msra.mxu1 %v1441_v10 }
  0x84   :  { %1319 = vmatprep.subr.bf16.mxu0 %v1569_v7  ;;  %1339 = vmatprep.subr.bf16.mxu1 %v1569_v7 }
  0x85   :  { %1353 = vmatprep.mubr.msk.bf16.mxu1 %vm1570_vm0, %v1569_v7 }
  0x87   :  { %1320 = vmatpush3.bf16.msra.mxu0 %v1442_v11  ;;  %1340 = vmatpush3.bf16.msra.mxu1 %v1443_v12 }
  0x88   :  { %1321 = vmatprep.subr.bf16.mxu0 %v1569_v7  ;;  %1341 = vmatprep.subr.bf16.mxu1 %v1569_v7 }
  0x8b   :  { %1322 = vmatpush3.bf16.msra.mxu0 %v1444_v13  ;;  %1342 = vmatpush3.bf16.msra.mxu1 %v1445_v14 }
  0x8c   :  { %1323 = vmatprep.subr.bf16.mxu0 %v1569_v7  ;;  %1343 = vmatprep.subr.bf16.mxu1 %v1569_v7 }
  0x8f   :  { %1324 = vmatpush3.bf16.msra.mxu0 %v1446_v15  ;;  %1344 = vmatpush3.bf16.msra.mxu1 %v1447_v16 }
  0x90   :  { %1325 = vmatprep.subr.bf16.mxu0 %v1569_v7  ;;  %1345 = vmatprep.subr.bf16.mxu1 %v1569_v7 }
  0x93   :  { %1326 = vmatpush3.bf16.msra.mxu0 %v1448_v17  ;;  %1346 = vmatpush3.bf16.msra.mxu1 %v1449_v18 }
  0x94   :  { %1327 = vmatprep.subr.bf16.mxu0 %v1569_v7  ;;  %1347 = vmatprep.subr.bf16.mxu1 %v1569_v7 }
  0x97   :  { %1328 = vmatpush3.bf16.msra.mxu0 %v1450_v19  ;;  %1348 = vmatpush3.bf16.msra.mxu1 %v1451_v20 }
  0x98   :  { %1329 = vmatprep.subr.bf16.mxu0 %v1569_v7  ;;  %1349 = vmatprep.subr.bf16.mxu1 %v1569_v7 }
  0x9b   :  { %1330 = vmatpush3.bf16.msra.mxu0 %v1452_v21  ;;  %1350 = vmatpush3.bf16.msra.mxu1 %v1453_v22 }
  0x9c   :  { %1331 = vmatprep.subr.bf16.mxu0 %v1569_v7  ;;  %1351 = vmatprep.subr.bf16.mxu1 %v1569_v7 }
  0x9f   :  { %1332 = vmatpush3.bf16.msra.mxu0 %v1454_v23  ;;  %1352 = vmatpush3.bf16.msra.mxu1 %v1455_v24 }
  0xa2   :  { %1334 = vmatmul.mubr.bf16.vlgmr.msra.gmra.mxu0 %v1456_v25  ;;  %1354 = vmatmul.mubr.bf16.vlgmr.msra.gmra.mxu1 %v1457_v26 }
 0x121   :  { %v1227_v27 = vpop.f32.mrf.mxu0 }
 0x122   :  { %v1249_v29 = vpop.f32.mrf.mxu1 }
 0x123   :  { %v1228_v28 = vpop.f32.mrf.mxu0 }
 0x124   :  { %v1250_v31 = vpop.f32.mrf.mxu1  ;;  %v1229_v37 = vadd.f32 %v1228_v28, %v1227_v27 }
 0x125   :  { %v1230_v30 = vpop.f32.mrf.mxu0  ;;  %v1251_v42 = vadd.f32 %v1250_v31, %v1249_v29 }
 0x126   :  { %v1252_v33 = vpop.f32.mrf.mxu1  ;;  %v765_v41 = vadd.f32 %v1229_v37, %v1107_v38 }
 0x127   :  { %v1231_v32 = vpop.f32.mrf.mxu0 }
 0x128   :  { %v1253_v35 = vpop.f32.mrf.mxu1  ;;  %v1232_v43 = vadd.f32 %v1231_v32, %v1230_v30  ;;  %v806_v47 = vadd.f32 %v1251_v42, %v765_v41 }
 0x129   :  { %v1254_v50 = vadd.f32 %v1253_v35, %v1252_v33 }
 0x12a   :  { %v768_v48 = vadd.f32 %v1232_v43, %v1107_v38 }
 0x12c   :  { %v809_v54 = vadd.f32 %v1254_v50, %v768_v48 }
 0x141   :  { %v1271_v34 = vpop.f32.mrf.mxu0 }
 0x142   :  { %v1293_v39 = vpop.f32.mrf.mxu1 }
 0x143   :  { %v1272_v36 = vpop.f32.mrf.mxu0 }
 0x144   :  { %v1294_v44 = vpop.f32.mrf.mxu1  ;;  %v1273_v45 = vadd.f32 %v1272_v36, %v1271_v34 }
 0x145   :  { %v1274_v40 = vpop.f32.mrf.mxu0  ;;  %v1295_v52 = vadd.f32 %v1294_v44, %v1293_v39 }
 0x146   :  { %v1296_v49 = vpop.f32.mrf.mxu1  ;;  %v847_v51 = vadd.f32 %v1273_v45, %v806_v47 }
 0x147   :  { %v1275_v46 = vpop.f32.mrf.mxu0 }
 0x148   :  { %v1276_v53 = vadd.f32 %v1275_v46, %v1274_v40  ;;  %v1297_v55 = vpop.f32.mrf.mxu1  ;;  %v888_v57 = vadd.f32 %v1295_v52, %v847_v51 }
 0x149   :  { %v1298_v60 = vadd.f32 %v1297_v55, %v1296_v49 }
 0x14a   :  { %v850_v56 = vadd.f32 %v1276_v53, %v809_v54 }
 0x14c   :  { %v891_v4 = vadd.f32 %v1298_v60, %v850_v56 }
 0x162   :  { %v928_v58 = vpop.f32.mrf.mxu0  ;;  %v1061_v62 = vpop.f32.mrf.mxu1 }
 0x163   :  { %v929_v61 = vadd.f32 %v928_v58, %v888_v57  ;;  %v1075_v2 = vmul.f32 %v1200_v59, %v1061_v62 }
 0x164   :  { %v1335_v0 = vpop.f32.mrf.mxu0  ;;  %v1355_v3 = vpop.f32.mrf.mxu1 }
 0x165   :  { %v935_v1 = vmax.f32 %v929_v61, 0.0  ;;  %v1084_v13 = vadd.f32 %v1201_v6, %v1075_v2 }
 0x166   :  { %v931_v7 = vpop.f32.mrf.mxu0  ;;  %v1064_v10 = vpop.f32.mrf.mxu1 }
 0x167   :  { %v944_v8 = vmul.f32 %v1189_v63, %v935_v1  ;;  %v932_v9 = vadd.f32 %v931_v7, %v891_v4  ;;  %v1076_v15 = vmul.f32 %v1200_v59, %v1064_v10 }
 0x168   :  { %v1336_v11 = vpop.f32.mrf.mxu0  ;;  %v1356_v16 = vpop.f32.mrf.mxu1 }
 0x169   :  { %v953_v12 = vadd.f32 %v1190_v5, %v944_v8  ;;  %v936_v14 = vmax.f32 %v932_v9, 0.0  ;;  %v1085_v20 = vadd.f32 %v1201_v6, %v1076_v15 }
 0x16b   :  { %v945_v17 = vmul.f32 %v1189_v63, %v936_v14  ;;  %v1086_v18 = vadd.f32 %v1084_v13, %v953_v12 }
 0x16d   :  { %v954_v19 = vadd.f32 %v1190_v5, %v945_v17  ;;  %v1088_v22 = vmax.f32 %v1086_v18, 0.0 }
 0x16f   :  { %v1087_v21 = vadd.f32 %v1085_v20, %v954_v19 }
 0x171   :  { %v1089_v23 = vmax.f32 %v1087_v21, 0.0 }
 0x173   :  { %v1209_v24 = vpack.c.bf16 %v1089_v23, %v1088_v22 }
 0x175   :  { %1210 = vst [vmem:[%s1918_s9] sm:$0xff] %v1209_v24  }
 0x176   :  { %1104 = vsyncpa [#allocation3], 1 }
 0x177   :  { %1105 = vsyncpa [#allocation5], 1 }
 0x178   :  { %1106 = vsyncpa [#allocation8], 1 }

// kernel: bennet_forward.19
= control target key start
LH: loop header
LB: loop body
LE: loop exit
PB: predicated region body
PF: predicated region fallthrough
CT: control target
= control target key end

     0   :  { %10 = vsyncpa [#allocation3], 0  ;;  %s1590_s0 = inlined_call_operand.vmem [shape: bf16[16,1152], index: 0, kind: input, shape index: {}]   ;;  %s1591_s1 = inlined_call_operand.vmem [shape: bf16[1152,128], index: 1, kind: input, shape index: {}]   ;;  %s1592_s2 = inlined_call_operand.hbm [shape: f32[1,128], index: 2, kind: input, shape index: {}]   ;;  %s1593_s3 = inlined_call_operand.hbm [shape: f32[1,128], index: 3, kind: input, shape index: {}]   ;;  %s1594_s4 = inlined_call_operand.hbm [shape: f32[1,128], index: 4, kind: input, shape index: {}]   ;;  %s1595_s5 = inlined_call_operand.vmem [shape: bf16[16,128], index: 5, kind: output, shape index: {}]  }
   0x1   :  { %11 = vsyncpa [#allocation5], 0  ;;  %s1300_s18 = smov [#allocation4]   ;;  %s1301_s20 = smov [#allocation2]  }
   0x2   :  { %s32_s19 = sshll.u32 %s1300_s18, 4  ;;  %s22_s21 = sshll.u32 %s1301_s20, 4  ;;  %s33_s19 = int_to_ptr.vmem [resolvable:$true] %s32_s19  ;;  %s23_s21 = int_to_ptr.vmem [resolvable:$true] %s22_s21 }
   0x3   :  { %s1244_s22 = scalar_lea.vmem %s33_s19, 16  ;;  %s1248_s23 = scalar_lea.vmem %s33_s19, 32 }
   0x4   :  { %p1245_p0 = scmp.ne.s32.totalorder %s33_s19, %s1244_s22  ;;  %p1249_p1 = scmp.lt.s32.totalorder %s33_s19, %s33_s19 }
   0x5   :  { %p1250_p2 = scmp.lt.s32.totalorder %s1248_s23, %s1244_s22 }
   0x7   :  { %p1251_p3 = por %p1250_p2, %p1249_p1 }
   0x9   :  { %p1252_p4 = pnand %p1251_p3, %p1245_p0 }
   0xb   :  { %1255 = shalt.err (!%p1252_p4)
}
   0xc   :  { %35 = dma.hbm_to_vmem [thread:$0]  %s1593_s3, 16, %s33_s19, [#allocation5]  }
   0xd   :  { %s1264_s26 = scalar_lea.vmem %s23_s21, 16  ;;  %s1268_s27 = scalar_lea.vmem %s23_s21, 32 }
   0xe   :  { %p1265_p5 = scmp.ne.s32.totalorder %s23_s21, %s1264_s26  ;;  %p1269_p6 = scmp.lt.s32.totalorder %s23_s21, %s23_s21 }
   0xf   :  { %p1270_p7 = scmp.lt.s32.totalorder %s1268_s27, %s1264_s26 }
  0x11   :  { %p1271_p8 = por %p1270_p7, %p1269_p6 }
  0x13   :  { %p1272_p9 = pnand %p1271_p8, %p1265_p5 }
  0x15   :  { %1275 = shalt.err (!%p1272_p9)
}
  0x16   :  { %25 = dma.hbm_to_vmem [thread:$0]  %s1592_s2, 16, %s23_s21, [#allocation3]  }
  0x17   :  { %s1302_s30 = smov [#allocation6]  }
  0x18   :  { %s42_s6 = sshll.u32 %s1302_s30, 4  ;;  %s43_s6 = int_to_ptr.vmem [resolvable:$true] %s42_s6 }
  0x19   :  { %s1284_s7 = scalar_lea.vmem %s43_s6, 16  ;;  %s1288_s8 = scalar_lea.vmem %s43_s6, 32 }
  0x1a   :  { %p1285_p10 = scmp.ne.s32.totalorder %s43_s6, %s1284_s7  ;;  %p1289_p11 = scmp.lt.s32.totalorder %s43_s6, %s43_s6 }
  0x1b   :  { %p1290_p12 = scmp.lt.s32.totalorder %s1288_s8, %s1284_s7 }
  0x1d   :  { %p1291_p13 = por %p1290_p12, %p1289_p11 }
  0x1f   :  { %p1292_p0 = pnand %p1291_p13, %p1285_p10 }
  0x21   :  { %1295 = shalt.err (!%p1292_p0)
}
  0x22   :  { %45 = dma.hbm_to_vmem [thread:$0]  %s1594_s4, 16, %s43_s6, [#allocation5]  }
  0x23   :  { %1296 = dma.done.wait [#allocation3], 16  }
  0x24   :  { %1297 = vsyncadd [#allocation3], 4294967280 }
  0x25   :  { %1298 = dma.done.wait [#allocation5], 32  }
  0x26   :  { %1299 = vsyncadd [#allocation5], 4294967264  ;;  %v1151_v0 = vld [vmem:[%s1591_s1 + $0x78] sm:$0xff]   ;;  %v1155_v4 = vld [vmem:[%s1591_s1 + $0x70] sm:$0xff]   ;;  %vm1304_vm0 = vmmov 0  }
  0x27   :  { %v1152_v1 = vld [vmem:[%s1591_s1 + $0x38] sm:$0xff]   ;;  %1029 = vmatprep.subr.bf16.mxu0 %v1151_v0  ;;  %v1156_v5 = vld [vmem:[%s1591_s1 + $0x30] sm:$0xff]   ;;  %v1159_v8 = vld [vmem:[%s1591_s1 + $0x68] sm:$0xff]  }
  0x28   :  { %v1153_v2 = vld [vmem:[%s1591_s1 + $0xf8] sm:$0xff]   ;;  %1030 = vmatpush3.bf16.msra.mxu0 %v1152_v1  ;;  %v1157_v6 = vld [vmem:[%s1591_s1 + $0xf0] sm:$0xff]   ;;  %v1160_v9 = vld [vmem:[%s1591_s1 + $0x28] sm:$0xff]  }
  0x29   :  { %v1154_v3 = vld [vmem:[%s1591_s1 + $0xb8] sm:$0xff]   ;;  %1051 = vmatprep.subr.bf16.mxu1 %v1153_v2  ;;  %1031 = vmatprep.subr.bf16.mxu0 %v1155_v4  ;;  %v1158_v7 = vld [vmem:[%s1591_s1 + $0xb0] sm:$0xff]   ;;  %v1161_v10 = vld [vmem:[%s1591_s1 + $0xe8] sm:$0xff]  }
  0x2a   :  { %1052 = vmatpush3.bf16.msra.mxu1 %v1154_v3  ;;  %v1162_v11 = vld [vmem:[%s1591_s1 + $0xa8] sm:$0xff]   ;;  %v1163_v12 = vld [vmem:[%s1591_s1 + $0x60] sm:$0xff]   ;;  %v1167_v16 = vld [vmem:[%s1591_s1 + $0x58] sm:$0xff]  }
  0x2b   :  { %1053 = vmatprep.subr.bf16.mxu1 %v1157_v6  ;;  %v1164_v13 = vld [vmem:[%s1591_s1 + $0x20] sm:$0xff]   ;;  %v1168_v17 = vld [vmem:[%s1591_s1 + $0x18] sm:$0xff]   ;;  %v1171_v20 = vld [vmem:[%s1591_s1 + $0x50] sm:$0xff]   ;;  %v1303_v6 = vmov 0.0  }
  0x2c   :  { %1032 = vmatpush3.bf16.msra.mxu0 %v1156_v5  ;;  %v1165_v14 = vld [vmem:[%s1591_s1 + $0xe0] sm:$0xff]   ;;  %v1169_v18 = vld [vmem:[%s1591_s1 + $0xd8] sm:$0xff]   ;;  %v1172_v21 = vld [vmem:[%s1591_s1 + $0x10] sm:$0xff]  }
  0x2d   :  { %1033 = vmatprep.subr.bf16.mxu0 %v1159_v8  ;;  %v1166_v15 = vld [vmem:[%s1591_s1 + $0xa0] sm:$0xff]   ;;  %v1170_v19 = vld [vmem:[%s1591_s1 + $0x98] sm:$0xff]   ;;  %v1173_v22 = vld [vmem:[%s1591_s1 + $0xd0] sm:$0xff]  }
  0x2e   :  { %1054 = vmatpush3.bf16.msra.mxu1 %v1158_v7  ;;  %v1174_v23 = vld [vmem:[%s1591_s1 + $0x90] sm:$0xff]   ;;  %v1175_v24 = vld [vmem:[%s1591_s1 + $0x48] sm:$0xff]   ;;  %v1179_v28 = vld [vmem:[%s1591_s1 + $0x40] sm:$0xff]  }
  0x2f   :  { %1055 = vmatprep.subr.bf16.mxu1 %v1161_v10  ;;  %v1176_v25 = vld [vmem:[%s1591_s1 + $0x8] sm:$0xff]   ;;  %v1180_v29 = vld [vmem:[%s1591_s1] sm:$0xff]   ;;  %v1186_v34 = vld [vmem:[%s1591_s1 + $0x178] sm:$0xff]  }
  0x30   :  { %1034 = vmatpush3.bf16.msra.mxu0 %v1160_v9  ;;  %v1177_v26 = vld [vmem:[%s1591_s1 + $0xc8] sm:$0xff]   ;;  %v1181_v30 = vld [vmem:[%s1591_s1 + $0xc0] sm:$0xff]   ;;  %v1190_v37 = vld [vmem:[%s1591_s1 + $0x138] sm:$0xff]  }
  0x31   :  { %1035 = vmatprep.subr.bf16.mxu0 %v1163_v12  ;;  %v1178_v27 = vld [vmem:[%s1591_s1 + $0x88] sm:$0xff]   ;;  %v1182_v31 = vld [vmem:[%s1590_s0] ss:$36 sps:$4 sm:$0xff]   ;;  %v1191_v38 = vld [vmem:[%s1591_s1 + $0x1f8] sm:$0xff]  }
  0x32   :  { %1056 = vmatpush3.bf16.msra.mxu1 %v1162_v11  ;;  %v1184_v32 = vld [vmem:[%s1590_s0 + $0x4] ss:$36 sps:$4 sm:$0xff]   ;;  %v1189_v36 = vld [vmem:[%s1590_s0 + $0xc] ss:$36 sps:$4 sm:$0xff]   ;;  %v1192_v39 = vld [vmem:[%s1591_s1 + $0x1b8] sm:$0xff]  }
  0x33   :  { %1057 = vmatprep.subr.bf16.mxu1 %v1165_v14  ;;  %v1185_v33 = vld [vmem:[%s1591_s1 + $0x80] sm:$0xff]   ;;  %727 = vmatprep.mubr.bf16.mxu0 %v1184_v32  ;;  %v1187_v35 = vld [vmem:[%s1590_s0 + $0x8] ss:$36 sps:$4 sm:$0xff]   ;;  %v1193_v40 = vld [vmem:[%s1591_s1 + $0x170] sm:$0xff]  }
  0x34   :  { %1036 = vmatpush3.bf16.msra.mxu0 %v1164_v13  ;;  %768 = vmatprep.mubr.bf16.mxu1 %v1189_v36  ;;  %v1194_v41 = vld [vmem:[%s1591_s1 + $0x130] sm:$0xff]   ;;  %v1197_v44 = vld [vmem:[%s1591_s1 + $0x168] sm:$0xff]   ;;  %v1201_v48 = vld [vmem:[%s1591_s1 + $0x160] sm:$0xff]  }
  0x35   :  { %1037 = vmatprep.subr.bf16.mxu0 %v1167_v16  ;;  %v1195_v42 = vld [vmem:[%s1591_s1 + $0x1f0] sm:$0xff]   ;;  %v1198_v45 = vld [vmem:[%s1591_s1 + $0x128] sm:$0xff]   ;;  %v1202_v49 = vld [vmem:[%s1591_s1 + $0x120] sm:$0xff]  }
  0x36   :  { %1058 = vmatpush3.bf16.msra.mxu1 %v1166_v15  ;;  %v1196_v43 = vld [vmem:[%s1591_s1 + $0x1b0] sm:$0xff]   ;;  %v1199_v46 = vld [vmem:[%s1591_s1 + $0x1e8] sm:$0xff]   ;;  %v1203_v50 = vld [vmem:[%s1591_s1 + $0x1e0] sm:$0xff]  }
  0x37   :  { %1059 = vmatprep.subr.bf16.mxu1 %v1169_v18  ;;  %v1200_v47 = vld [vmem:[%s1591_s1 + $0x1a8] sm:$0xff]   ;;  %v1204_v51 = vld [vmem:[%s1591_s1 + $0x1a0] sm:$0xff]   ;;  %v1205_v52 = vld [vmem:[%s1591_s1 + $0x158] sm:$0xff]  }
  0x38   :  { %1038 = vmatpush3.bf16.msra.mxu0 %v1168_v17  ;;  %v1206_v53 = vld [vmem:[%s1591_s1 + $0x118] sm:$0xff]   ;;  %v1209_v56 = vld [vmem:[%s1591_s1 + $0x150] sm:$0xff]   ;;  %v1213_v60 = vld [vmem:[%s1591_s1 + $0x148] sm:$0xff]  }
  0x39   :  { %1039 = vmatprep.subr.bf16.mxu0 %v1171_v20  ;;  %v1207_v54 = vld [vmem:[%s1591_s1 + $0x1d8] sm:$0xff]   ;;  %v1210_v57 = vld [vmem:[%s1591_s1 + $0x110] sm:$0xff]   ;;  %v1214_v61 = vld [vmem:[%s1591_s1 + $0x108] sm:$0xff]  }
  0x3a   :  { %1060 = vmatpush3.bf16.msra.mxu1 %v1170_v19  ;;  %v1208_v55 = vld [vmem:[%s1591_s1 + $0x198] sm:$0xff]   ;;  %v1211_v58 = vld [vmem:[%s1591_s1 + $0x1d0] sm:$0xff]   ;;  %v1215_v62 = vld [vmem:[%s1591_s1 + $0x1c8] sm:$0xff]  }
  0x3b   :  { %1061 = vmatprep.subr.bf16.mxu1 %v1173_v22  ;;  %v1212_v59 = vld [vmem:[%s1591_s1 + $0x190] sm:$0xff]   ;;  %v1216_v63 = vld [vmem:[%s1591_s1 + $0x188] sm:$0xff]   ;;  %v1217_v0 = vld [vmem:[%s1591_s1 + $0x140] sm:$0xff]  }
  0x3c   :  { %1040 = vmatpush3.bf16.msra.mxu0 %v1172_v21  ;;  %v1218_v1 = vld [vmem:[%s1591_s1 + $0x100] sm:$0xff]   ;;  %v1220_v3 = vld [vmem:[%s1590_s0 + $0x10] ss:$36 sps:$4 sm:$0xff]   ;;  %v1224_v7 = vld [vmem:[%s1590_s0 + $0x18] ss:$36 sps:$4 sm:$0xff]  }
  0x3d   :  { %1041 = vmatprep.subr.bf16.mxu0 %v1175_v24  ;;  %v1219_v2 = vld [vmem:[%s1591_s1 + $0x1c0] sm:$0xff]   ;;  %v1222_v4 = vld [vmem:[%s1590_s0 + $0x14] ss:$36 sps:$4 sm:$0xff]   ;;  %v1229_v11 = vld [vmem:[%s1591_s1 + $0x228] sm:$0xff]  }
  0x3e   :  { %1062 = vmatpush3.bf16.msra.mxu1 %v1174_v23  ;;  %v1223_v5 = vld [vmem:[%s1591_s1 + $0x180] sm:$0xff]   ;;  %v1227_v9 = vld [vmem:[%s1591_s1 + $0x238] sm:$0xff]   ;;  %v1228_v10 = vld [vmem:[%s1591_s1 + $0x230] sm:$0xff]  }
  0x3f   :  { %1063 = vmatprep.subr.bf16.mxu1 %v1177_v26  ;;  %v1226_v8 = vld [vmem:[%s1590_s0 + $0x1c] ss:$36 sps:$4 sm:$0xff]   ;;  %v1232_v14 = vld [vmem:[%s1591_s1 + $0x210] sm:$0xff]   ;;  %v1233_v15 = vld [vmem:[%s1591_s1 + $0x208] sm:$0xff]  }
  0x40   :  { %1042 = vmatpush3.bf16.msra.mxu0 %v1176_v25  ;;  %v1230_v12 = vld [vmem:[%s1591_s1 + $0x220] sm:$0xff]   ;;  %v1231_v13 = vld [vmem:[%s1591_s1 + $0x218] sm:$0xff]  }
  0x41   :  { %1043 = vmatprep.subr.bf16.mxu0 %v1179_v28  ;;  %v1234_v16 = vld [vmem:[%s1591_s1 + $0x200] sm:$0xff]  }
  0x42   :  { %1064 = vmatpush3.bf16.msra.mxu1 %v1178_v27  ;;  %v1235_v17 = vld [vmem:[%s1590_s0 + $0x20] ss:$36 sps:$4 sm:$0xff]  }
  0x43   :  { %1065 = vmatprep.subr.bf16.mxu1 %v1181_v30  ;;  %v936_v30 = vld [vmem:[#allocation2] ss:$0 sm:$0xff] }
  0x44   :  { %1044 = vmatpush3.bf16.msra.mxu0 %v1180_v29 }
  0x45   :  { %1073 = vmatprep.subr.bf16.mxu0 %v1186_v34 }
  0x46   :  { %1066 = vmatpush3.bf16.msra.mxu1 %v1185_v33 }
  0x47   :  { %728 = vmatmul.mubr.bf16.vlgmr.msra.gmra.mxu0 %v1182_v31  ;;  %1095 = vmatprep.subr.bf16.mxu1 %v1191_v38 }
  0x48   :  { %1074 = vmatpush3.bf16.msra.mxu0 %v1190_v37  ;;  %809 = vmatprep.mubr.bf16.mxu0 %v1222_v4 }
  0x49   :  { %769 = vmatmul.mubr.bf16.vlgmr.msra.gmra.mxu1 %v1187_v35  ;;  %1075 = vmatprep.subr.bf16.mxu0 %v1193_v40 }
  0x4a   :  { %1096 = vmatpush3.bf16.msra.mxu1 %v1192_v39  ;;  %850 = vmatprep.mubr.bf16.mxu1 %v1226_v8 }
  0x4b   :  { %1097 = vmatprep.subr.bf16.mxu1 %v1195_v42 }
  0x4c   :  { %1076 = vmatpush3.bf16.msra.mxu0 %v1194_v41 }
  0x4d   :  { %1077 = vmatprep.subr.bf16.mxu0 %v1197_v44 }
  0x4e   :  { %1098 = vmatpush3.bf16.msra.mxu1 %v1196_v43 }
  0x4f   :  { %1099 = vmatprep.subr.bf16.mxu1 %v1199_v46 }
  0x50   :  { %1078 = vmatpush3.bf16.msra.mxu0 %v1198_v45 }
  0x51   :  { %1079 = vmatprep.subr.bf16.mxu0 %v1201_v48 }
  0x52   :  { %1100 = vmatpush3.bf16.msra.mxu1 %v1200_v47 }
  0x53   :  { %1101 = vmatprep.subr.bf16.mxu1 %v1203_v50 }
  0x54   :  { %1080 = vmatpush3.bf16.msra.mxu0 %v1202_v49 }
  0x55   :  { %1081 = vmatprep.subr.bf16.mxu0 %v1205_v52 }
  0x56   :  { %1102 = vmatpush3.bf16.msra.mxu1 %v1204_v51 }
  0x57   :  { %1103 = vmatprep.subr.bf16.mxu1 %v1207_v54 }
  0x58   :  { %1082 = vmatpush3.bf16.msra.mxu0 %v1206_v53 }
  0x59   :  { %1083 = vmatprep.subr.bf16.mxu0 %v1209_v56 }
  0x5a   :  { %1104 = vmatpush3.bf16.msra.mxu1 %v1208_v55  ;;  %v1018_v55 = vld [vmem:[#allocation4] ss:$0 sm:$0xff] }
  0x5b   :  { %1105 = vmatprep.subr.bf16.mxu1 %v1211_v58 }
  0x5c   :  { %1084 = vmatpush3.bf16.msra.mxu0 %v1210_v57 }
  0x5d   :  { %1085 = vmatprep.subr.bf16.mxu0 %v1213_v60 }
  0x5e   :  { %1106 = vmatpush3.bf16.msra.mxu1 %v1212_v59 }
  0x5f   :  { %1107 = vmatprep.subr.bf16.mxu1 %v1215_v62 }
  0x60   :  { %1086 = vmatpush3.bf16.msra.mxu0 %v1214_v61  ;;  %v1019_v61 = vld [vmem:[#allocation6] ss:$0 sm:$0xff] }
  0x61   :  { %1087 = vmatprep.subr.bf16.mxu0 %v1217_v0 }
  0x62   :  { %1108 = vmatpush3.bf16.msra.mxu1 %v1216_v63 }
  0x63   :  { %1109 = vmatprep.subr.bf16.mxu1 %v1219_v2 }
  0x64   :  { %1088 = vmatpush3.bf16.msra.mxu0 %v1218_v1 }
  0x65   :  { %1126 = vmatprep.subr.bf16.mxu0 %v1303_v6 }
  0x66   :  { %1110 = vmatpush3.bf16.msra.mxu1 %v1223_v5 }
  0x67   :  { %810 = vmatmul.mubr.bf16.vlgmr.msra.gmra.mxu0 %v1220_v3 }
  0x68   :  { %1142 = vmatprep.mubr.msk.bf16.mxu0 %vm1304_vm0, %v1303_v6  ;;  %1127 = vmatpush3.bf16.msra.mxu0 %v1227_v9 }
  0x69   :  { %851 = vmatmul.mubr.bf16.vlgmr.msra.gmra.mxu1 %v1224_v7  ;;  %1128 = vmatprep.subr.bf16.mxu0 %v1303_v6 }
  0x6c   :  { %1129 = vmatpush3.bf16.msra.mxu0 %v1228_v10 }
  0x6d   :  { %1130 = vmatprep.subr.bf16.mxu0 %v1303_v6 }
  0x70   :  { %1131 = vmatpush3.bf16.msra.mxu0 %v1229_v11 }
  0x71   :  { %1132 = vmatprep.subr.bf16.mxu0 %v1303_v6 }
  0x74   :  { %1133 = vmatpush3.bf16.msra.mxu0 %v1230_v12 }
  0x75   :  { %1134 = vmatprep.subr.bf16.mxu0 %v1303_v6 }
  0x78   :  { %1135 = vmatpush3.bf16.msra.mxu0 %v1231_v13 }
  0x79   :  { %1136 = vmatprep.subr.bf16.mxu0 %v1303_v6 }
  0x7c   :  { %1137 = vmatpush3.bf16.msra.mxu0 %v1232_v14 }
  0x7d   :  { %1138 = vmatprep.subr.bf16.mxu0 %v1303_v6 }
  0x80   :  { %1139 = vmatpush3.bf16.msra.mxu0 %v1233_v15 }
  0x81   :  { %1140 = vmatprep.subr.bf16.mxu0 %v1303_v6 }
  0x84   :  { %1141 = vmatpush3.bf16.msra.mxu0 %v1234_v16 }
  0x87   :  { %1143 = vmatmul.mubr.bf16.vlgmr.msra.gmra.mxu0 %v1235_v17 }
 0x107   :  { %v1045_v18 = vpop.f32.mrf.mxu0 }
 0x109   :  { %v1046_v19 = vpop.f32.mrf.mxu0  ;;  %v1067_v20 = vpop.f32.mrf.mxu1 }
 0x10a   :  { %v1047_v29 = vadd.f32 %v1046_v19, %v1045_v18 }
 0x10b   :  { %v1048_v21 = vpop.f32.mrf.mxu0  ;;  %v1068_v22 = vpop.f32.mrf.mxu1 }
 0x10c   :  { %v730_v33 = vadd.f32 %v1047_v29, %v936_v30  ;;  %v1069_v34 = vadd.f32 %v1068_v22, %v1067_v20 }
 0x10d   :  { %v1049_v23 = vpop.f32.mrf.mxu0  ;;  %v1070_v24 = vpop.f32.mrf.mxu1 }
 0x10e   :  { %v1050_v35 = vadd.f32 %v1049_v23, %v1048_v21  ;;  %v771_v39 = vadd.f32 %v1069_v34, %v730_v33 }
 0x10f   :  { %v1071_v26 = vpop.f32.mrf.mxu1 }
 0x110   :  { %v733_v40 = vadd.f32 %v1050_v35, %v936_v30  ;;  %v1072_v41 = vadd.f32 %v1071_v26, %v1070_v24 }
 0x112   :  { %v774_v46 = vadd.f32 %v1072_v41, %v733_v40 }
 0x127   :  { %v1089_v25 = vpop.f32.mrf.mxu0 }
 0x129   :  { %v1090_v27 = vpop.f32.mrf.mxu0  ;;  %v1111_v28 = vpop.f32.mrf.mxu1 }
 0x12a   :  { %v1091_v36 = vadd.f32 %v1090_v27, %v1089_v25 }
 0x12b   :  { %v1092_v31 = vpop.f32.mrf.mxu0  ;;  %v1112_v32 = vpop.f32.mrf.mxu1 }
 0x12c   :  { %v812_v42 = vadd.f32 %v1091_v36, %v771_v39  ;;  %v1113_v43 = vadd.f32 %v1112_v32, %v1111_v28 }
 0x12d   :  { %v1093_v37 = vpop.f32.mrf.mxu0  ;;  %v1114_v38 = vpop.f32.mrf.mxu1 }
 0x12e   :  { %v1094_v44 = vadd.f32 %v1093_v37, %v1092_v31  ;;  %v853_v49 = vadd.f32 %v1113_v43, %v812_v42 }
 0x12f   :  { %v1115_v45 = vpop.f32.mrf.mxu1 }
 0x130   :  { %v815_v47 = vadd.f32 %v1094_v44, %v774_v46  ;;  %v1116_v48 = vadd.f32 %v1115_v45, %v1114_v38 }
 0x132   :  { %v856_v54 = vadd.f32 %v1116_v48, %v815_v47 }
 0x147   :  { %v893_v50 = vpop.f32.mrf.mxu0 }
 0x148   :  { %v894_v51 = vadd.f32 %v893_v50, %v853_v49 }
 0x149   :  { %v1144_v52 = vpop.f32.mrf.mxu0 }
 0x14a   :  { %v900_v53 = vmax.f32 %v894_v51, 0.0 }
 0x14b   :  { %v896_v56 = vpop.f32.mrf.mxu0 }
 0x14c   :  { %v897_v57 = vadd.f32 %v896_v56, %v856_v54  ;;  %v909_v59 = vmul.f32 %v1018_v55, %v900_v53 }
 0x14d   :  { %v1145_v58 = vpop.f32.mrf.mxu0 }
 0x14e   :  { %v901_v60 = vmax.f32 %v897_v57, 0.0  ;;  %v918_v63 = vadd.f32 %v1019_v61, %v909_v59 }
 0x150   :  { %v910_v62 = vmul.f32 %v1018_v55, %v901_v60 }
 0x152   :  { %v919_v0 = vadd.f32 %v1019_v61, %v910_v62 }
 0x154   :  { %v1027_v1 = vpack.c.bf16 %v919_v0, %v918_v63 }
 0x156   :  { %1028 = vst [vmem:[%s1595_s5] sm:$0xff] %v1027_v1  }
 0x157   :  { %934 = vsyncpa [#allocation3], 1 }
 0x158   :  { %935 = vsyncpa [#allocation5], 1 }

// kernel: bennet_forward.22
= control target key start
LH: loop header
LB: loop body
LE: loop exit
PB: predicated region body
PF: predicated region fallthrough
CT: control target
= control target key end

     0   :  { %s2432_s1 = inlined_call_operand.vmem [shape: bf16[1152,256], index: 1, kind: input, shape index: {}]   ;;  %s2433_s0 = inlined_call_operand.vmem [shape: bf16[16,1152], index: 0, kind: input, shape index: {}]   ;;  %s2434_s6 = inlined_call_operand.vmem [shape: bf16[128,256], index: 6, kind: input, shape index: {}]   ;;  %s2435_s5 = inlined_call_operand.vmem [shape: bf16[16,128], index: 5, kind: input, shape index: {}]   ;;  %s2436_s2 = inlined_call_operand.vmem [shape: f32[1,256], index: 2, kind: input, shape index: {}]   ;;  %s2437_s7 = inlined_call_operand.vmem [shape: f32[1,256], index: 7, kind: input, shape index: {}]   ;;  %s2438_s3 = inlined_call_operand.vmem [shape: f32[1,256], index: 3, kind: input, shape index: {}]   ;;  %s2439_s8 = inlined_call_operand.vmem [shape: f32[1,256], index: 8, kind: input, shape index: {}]   ;;  %s2440_s4 = inlined_call_operand.vmem [shape: f32[1,256], index: 4, kind: input, shape index: {}]   ;;  %s2441_s9 = inlined_call_operand.vmem [shape: bf16[16,256], index: 9, kind: output, shape index: {}]  }
   0x1   :  { %v1596_v0 = vld [vmem:[%s2432_s1 + $0x74] ss:$8 sps:$4 sm:$0xff]   ;;  %v1600_v2 = vld [vmem:[%s2432_s1 + $0x70] ss:$8 sps:$4 sm:$0xff]   ;;  %v1602_v4 = vld [vmem:[%s2432_s1 + $0x64] ss:$8 sps:$4 sm:$0xff]  }
   0x2   :  { %v1598_v1 = vld [vmem:[%s2432_s1 + $0x174] ss:$8 sps:$4 sm:$0xff]   ;;  %965 = vmatprep.subr.bf16.mxu0 %v1596_v0  ;;  %v1601_v3 = vld [vmem:[%s2432_s1 + $0x170] ss:$8 sps:$4 sm:$0xff]   ;;  %v1604_v5 = vld [vmem:[%s2432_s1 + $0x164] ss:$8 sps:$4 sm:$0xff]  }
   0x3   :  { %1008 = vmatprep.subr.bf16.mxu1 %v1598_v1  ;;  %966 = vmatpush1.bf16.msra.mxu0 %v1600_v2  ;;  %v1606_v6 = vld [vmem:[%s2432_s1 + $0x60] ss:$8 sps:$4 sm:$0xff]   ;;  %v1608_v8 = vld [vmem:[%s2432_s1 + $0x54] ss:$8 sps:$4 sm:$0xff]   ;;  %v1612_v10 = vld [vmem:[%s2432_s1 + $0x50] ss:$8 sps:$4 sm:$0xff]  }
   0x4   :  { %1009 = vmatpush1.bf16.msra.mxu1 %v1601_v3  ;;  %967 = vmatprep.subr.bf16.mxu0 %v1602_v4  ;;  %v1607_v7 = vld [vmem:[%s2432_s1 + $0x160] ss:$8 sps:$4 sm:$0xff]   ;;  %v1610_v9 = vld [vmem:[%s2432_s1 + $0x154] ss:$8 sps:$4 sm:$0xff]   ;;  %v1613_v11 = vld [vmem:[%s2432_s1 + $0x150] ss:$8 sps:$4 sm:$0xff]  }
   0x5   :  { %1010 = vmatprep.subr.bf16.mxu1 %v1604_v5  ;;  %v1614_v12 = vld [vmem:[%s2432_s1 + $0x44] ss:$8 sps:$4 sm:$0xff]   ;;  %v1618_v14 = vld [vmem:[%s2432_s1 + $0x40] ss:$8 sps:$4 sm:$0xff]   ;;  %v1620_v16 = vld [vmem:[%s2432_s1 + $0x34] ss:$8 sps:$4 sm:$0xff]  }
   0x6   :  { %v1616_v13 = vld [vmem:[%s2432_s1 + $0x144] ss:$8 sps:$4 sm:$0xff]   ;;  %v1619_v15 = vld [vmem:[%s2432_s1 + $0x140] ss:$8 sps:$4 sm:$0xff]   ;;  %v1622_v17 = vld [vmem:[%s2432_s1 + $0x134] ss:$8 sps:$4 sm:$0xff]  }
   0x7   :  { %968 = vmatpush1.bf16.msra.mxu0 %v1606_v6  ;;  %v1624_v18 = vld [vmem:[%s2432_s1 + $0x30] ss:$8 sps:$4 sm:$0xff]   ;;  %v1626_v20 = vld [vmem:[%s2432_s1 + $0x24] ss:$8 sps:$4 sm:$0xff]   ;;  %v1630_v22 = vld [vmem:[%s2432_s1 + $0x20] ss:$8 sps:$4 sm:$0xff]  }
   0x8   :  { %1011 = vmatpush1.bf16.msra.mxu1 %v1607_v7  ;;  %969 = vmatprep.subr.bf16.mxu0 %v1608_v8  ;;  %v1625_v19 = vld [vmem:[%s2432_s1 + $0x130] ss:$8 sps:$4 sm:$0xff]   ;;  %v1628_v21 = vld [vmem:[%s2432_s1 + $0x124] ss:$8 sps:$4 sm:$0xff]   ;;  %v1631_v23 = vld [vmem:[%s2432_s1 + $0x120] ss:$8 sps:$4 sm:$0xff]  }
   0x9   :  { %1012 = vmatprep.subr.bf16.mxu1 %v1610_v9  ;;  %v1632_v24 = vld [vmem:[%s2432_s1 + $0x14] ss:$8 sps:$4 sm:$0xff]   ;;  %v1636_v26 = vld [vmem:[%s2432_s1 + $0x10] ss:$8 sps:$4 sm:$0xff]   ;;  %v1638_v28 = vld [vmem:[%s2432_s1 + $0x4] ss:$8 sps:$4 sm:$0xff]  }
   0xa   :  { %v1634_v25 = vld [vmem:[%s2432_s1 + $0x114] ss:$8 sps:$4 sm:$0xff]   ;;  %v1637_v27 = vld [vmem:[%s2432_s1 + $0x110] ss:$8 sps:$4 sm:$0xff]   ;;  %v1640_v29 = vld [vmem:[%s2432_s1 + $0x104] ss:$8 sps:$4 sm:$0xff]  }
   0xb   :  { %970 = vmatpush1.bf16.msra.mxu0 %v1612_v10  ;;  %v1642_v30 = vld [vmem:[%s2432_s1] ss:$8 sps:$4 sm:$0xff]   ;;  %v1644_v32 = vld [vmem:[%s2432_s1 + $0xf4] ss:$8 sps:$4 sm:$0xff]   ;;  %v1648_v34 = vld [vmem:[%s2432_s1 + $0xf0] ss:$8 sps:$4 sm:$0xff]  }
   0xc   :  { %1013 = vmatpush1.bf16.msra.mxu1 %v1613_v11  ;;  %971 = vmatprep.subr.bf16.mxu0 %v1614_v12  ;;  %v1643_v31 = vld [vmem:[%s2432_s1 + $0x100] ss:$8 sps:$4 sm:$0xff]   ;;  %v1646_v33 = vld [vmem:[%s2432_s1 + $0x1f4] ss:$8 sps:$4 sm:$0xff]   ;;  %v1649_v35 = vld [vmem:[%s2432_s1 + $0x1f0] ss:$8 sps:$4 sm:$0xff]  }
   0xd   :  { %1014 = vmatprep.subr.bf16.mxu1 %v1616_v13  ;;  %v1650_v36 = vld [vmem:[%s2432_s1 + $0xe4] ss:$8 sps:$4 sm:$0xff]   ;;  %v1654_v38 = vld [vmem:[%s2432_s1 + $0xe0] ss:$8 sps:$4 sm:$0xff]   ;;  %v1656_v40 = vld [vmem:[%s2432_s1 + $0xd4] ss:$8 sps:$4 sm:$0xff]  }
   0xe   :  { %v1652_v37 = vld [vmem:[%s2432_s1 + $0x1e4] ss:$8 sps:$4 sm:$0xff]   ;;  %v1655_v39 = vld [vmem:[%s2432_s1 + $0x1e0] ss:$8 sps:$4 sm:$0xff]   ;;  %v1658_v41 = vld [vmem:[%s2432_s1 + $0x1d4] ss:$8 sps:$4 sm:$0xff]  }
   0xf   :  { %972 = vmatpush1.bf16.msra.mxu0 %v1618_v14  ;;  %v1660_v42 = vld [vmem:[%s2432_s1 + $0xd0] ss:$8 sps:$4 sm:$0xff]   ;;  %v1662_v44 = vld [vmem:[%s2432_s1 + $0xc4] ss:$8 sps:$4 sm:$0xff]   ;;  %v1666_v46 = vld [vmem:[%s2432_s1 + $0xc0] ss:$8 sps:$4 sm:$0xff]  }
  0x10   :  { %1015 = vmatpush1.bf16.msra.mxu1 %v1619_v15  ;;  %973 = vmatprep.subr.bf16.mxu0 %v1620_v16  ;;  %v1661_v43 = vld [vmem:[%s2432_s1 + $0x1d0] ss:$8 sps:$4 sm:$0xff]   ;;  %v1664_v45 = vld [vmem:[%s2432_s1 + $0x1c4] ss:$8 sps:$4 sm:$0xff]   ;;  %v1667_v47 = vld [vmem:[%s2432_s1 + $0x1c0] ss:$8 sps:$4 sm:$0xff]  }
  0x11   :  { %1016 = vmatprep.subr.bf16.mxu1 %v1622_v17  ;;  %v1668_v48 = vld [vmem:[%s2432_s1 + $0xb4] ss:$8 sps:$4 sm:$0xff]   ;;  %v1694_v49 = vld [vmem:[%s2433_s0 + $0x4] ss:$36 sps:$4 sm:$0xff]   ;;  %v1697_v51 = vld [vmem:[%s2433_s0 + $0xc] ss:$36 sps:$4 sm:$0xff]  }
  0x12   :  { %v1670_v50 = vld [vmem:[%s2432_s1 + $0x1b4] ss:$8 sps:$4 sm:$0xff]   ;;  %997 = vmatprep.mubr.bf16.mxu0 %v1694_v49  ;;  %v1672_v52 = vld [vmem:[%s2432_s1 + $0xb0] ss:$8 sps:$4 sm:$0xff]   ;;  %1040 = vmatprep.mubr.bf16.mxu1 %v1697_v51  ;;  %v1674_v54 = vld [vmem:[%s2432_s1 + $0xa4] ss:$8 sps:$4 sm:$0xff]  }
  0x13   :  { %974 = vmatpush1.bf16.msra.mxu0 %v1624_v18  ;;  %v1673_v53 = vld [vmem:[%s2432_s1 + $0x1b0] ss:$8 sps:$4 sm:$0xff]   ;;  %v1676_v55 = vld [vmem:[%s2432_s1 + $0x1a4] ss:$8 sps:$4 sm:$0xff]   ;;  %v1678_v56 = vld [vmem:[%s2432_s1 + $0xa0] ss:$8 sps:$4 sm:$0xff]  }
  0x14   :  { %1017 = vmatpush1.bf16.msra.mxu1 %v1625_v19  ;;  %975 = vmatprep.subr.bf16.mxu0 %v1626_v20  ;;  %v1679_v57 = vld [vmem:[%s2432_s1 + $0x1a0] ss:$8 sps:$4 sm:$0xff]   ;;  %v1680_v58 = vld [vmem:[%s2432_s1 + $0x94] ss:$8 sps:$4 sm:$0xff]   ;;  %v1684_v60 = vld [vmem:[%s2432_s1 + $0x90] ss:$8 sps:$4 sm:$0xff]  }
  0x15   :  { %1018 = vmatprep.subr.bf16.mxu1 %v1628_v21  ;;  %v1682_v59 = vld [vmem:[%s2432_s1 + $0x194] ss:$8 sps:$4 sm:$0xff]   ;;  %v1685_v61 = vld [vmem:[%s2432_s1 + $0x190] ss:$8 sps:$4 sm:$0xff]   ;;  %v1686_v62 = vld [vmem:[%s2432_s1 + $0x84] ss:$8 sps:$4 sm:$0xff]  }
  0x16   :  { %v1688_v63 = vld [vmem:[%s2432_s1 + $0x184] ss:$8 sps:$4 sm:$0xff]   ;;  %v1690_v0 = vld [vmem:[%s2432_s1 + $0x80] ss:$8 sps:$4 sm:$0xff]   ;;  %v1700_v2 = vld [vmem:[%s2432_s1 + $0x274] ss:$8 sps:$4 sm:$0xff]  }
  0x17   :  { %976 = vmatpush1.bf16.msra.mxu0 %v1630_v22  ;;  %v1691_v1 = vld [vmem:[%s2432_s1 + $0x180] ss:$8 sps:$4 sm:$0xff]   ;;  %v1703_v3 = vld [vmem:[%s2432_s1 + $0x374] ss:$8 sps:$4 sm:$0xff]   ;;  %v1698_v6 = vld [vmem:[%s2432_s1 + $0x270] ss:$8 sps:$4 sm:$0xff]  }
  0x18   :  { %1019 = vmatpush1.bf16.msra.mxu1 %v1631_v23  ;;  %977 = vmatprep.subr.bf16.mxu0 %v1632_v24  ;;  %v1692_v4 = vld [vmem:[%s2433_s0] ss:$36 sps:$4 sm:$0xff]   ;;  %v1695_v5 = vld [vmem:[%s2433_s0 + $0x8] ss:$36 sps:$4 sm:$0xff]   ;;  %v1701_v7 = vld [vmem:[%s2432_s1 + $0x370] ss:$8 sps:$4 sm:$0xff]  }
  0x19   :  { %1020 = vmatprep.subr.bf16.mxu1 %v1634_v25  ;;  %v1706_v8 = vld [vmem:[%s2432_s1 + $0x264] ss:$8 sps:$4 sm:$0xff]   ;;  %v1704_v10 = vld [vmem:[%s2432_s1 + $0x260] ss:$8 sps:$4 sm:$0xff]   ;;  %v1712_v12 = vld [vmem:[%s2432_s1 + $0x254] ss:$8 sps:$4 sm:$0xff]  }
  0x1a   :  { %v1709_v9 = vld [vmem:[%s2432_s1 + $0x364] ss:$8 sps:$4 sm:$0xff]   ;;  %v1707_v11 = vld [vmem:[%s2432_s1 + $0x360] ss:$8 sps:$4 sm:$0xff]   ;;  %v1715_v13 = vld [vmem:[%s2432_s1 + $0x354] ss:$8 sps:$4 sm:$0xff]  }
  0x1b   :  { %978 = vmatpush1.bf16.msra.mxu0 %v1636_v26  ;;  %v1710_v14 = vld [vmem:[%s2432_s1 + $0x250] ss:$8 sps:$4 sm:$0xff]   ;;  %v1718_v16 = vld [vmem:[%s2432_s1 + $0x244] ss:$8 sps:$4 sm:$0xff]   ;;  %v1716_v18 = vld [vmem:[%s2432_s1 + $0x240] ss:$8 sps:$4 sm:$0xff]  }
  0x1c   :  { %1021 = vmatpush1.bf16.msra.mxu1 %v1637_v27  ;;  %979 = vmatprep.subr.bf16.mxu0 %v1638_v28  ;;  %v1713_v15 = vld [vmem:[%s2432_s1 + $0x350] ss:$8 sps:$4 sm:$0xff]   ;;  %v1721_v17 = vld [vmem:[%s2432_s1 + $0x344] ss:$8 sps:$4 sm:$0xff]   ;;  %v1719_v19 = vld [vmem:[%s2432_s1 + $0x340] ss:$8 sps:$4 sm:$0xff]  }
  0x1d   :  { %1022 = vmatprep.subr.bf16.mxu1 %v1640_v29  ;;  %v1724_v20 = vld [vmem:[%s2432_s1 + $0x234] ss:$8 sps:$4 sm:$0xff]   ;;  %v1722_v22 = vld [vmem:[%s2432_s1 + $0x230] ss:$8 sps:$4 sm:$0xff]   ;;  %v1730_v24 = vld [vmem:[%s2432_s1 + $0x224] ss:$8 sps:$4 sm:$0xff]  }
  0x1e   :  { %v1727_v21 = vld [vmem:[%s2432_s1 + $0x334] ss:$8 sps:$4 sm:$0xff]   ;;  %v1725_v23 = vld [vmem:[%s2432_s1 + $0x330] ss:$8 sps:$4 sm:$0xff]   ;;  %v1733_v25 = vld [vmem:[%s2432_s1 + $0x324] ss:$8 sps:$4 sm:$0xff]  }
  0x1f   :  { %980 = vmatpush1.bf16.msra.mxu0 %v1642_v30  ;;  %v1728_v26 = vld [vmem:[%s2432_s1 + $0x220] ss:$8 sps:$4 sm:$0xff]   ;;  %v1736_v28 = vld [vmem:[%s2432_s1 + $0x214] ss:$8 sps:$4 sm:$0xff]   ;;  %v1734_v30 = vld [vmem:[%s2432_s1 + $0x210] ss:$8 sps:$4 sm:$0xff]  }
  0x20   :  { %1023 = vmatpush1.bf16.msra.mxu1 %v1643_v31  ;;  %981 = vmatprep.subr.bf16.mxu0 %v1644_v32  ;;  %v1731_v27 = vld [vmem:[%s2432_s1 + $0x320] ss:$8 sps:$4 sm:$0xff]   ;;  %v1739_v29 = vld [vmem:[%s2432_s1 + $0x314] ss:$8 sps:$4 sm:$0xff]   ;;  %v1737_v31 = vld [vmem:[%s2432_s1 + $0x310] ss:$8 sps:$4 sm:$0xff]  }
  0x21   :  { %1024 = vmatprep.subr.bf16.mxu1 %v1646_v33  ;;  %v1742_v32 = vld [vmem:[%s2432_s1 + $0x204] ss:$8 sps:$4 sm:$0xff]   ;;  %v1761_v49 = vld [vmem:[%s2432_s1 + $0x3d0] ss:$8 sps:$4 sm:$0xff]  }
  0x22   :  { %v1745_v33 = vld [vmem:[%s2432_s1 + $0x304] ss:$8 sps:$4 sm:$0xff]  }
  0x23   :  { %982 = vmatpush2.bf16.msra.mxu0 %v1648_v34  ;;  %v1796_v34 = vld [vmem:[%s2433_s0 + $0x14] ss:$36 sps:$4 sm:$0xff]   ;;  %v1769_v51 = vld [vmem:[%s2432_s1 + $0x3c4] ss:$8 sps:$4 sm:$0xff]  }
  0x24   :  { %1025 = vmatpush2.bf16.msra.mxu1 %v1649_v35  ;;  %983 = vmatprep.subr.bf16.mxu0 %v1650_v36  ;;  %v1799_v35 = vld [vmem:[%s2433_s0 + $0x1c] ss:$36 sps:$4 sm:$0xff]  }
  0x25   :  { %1026 = vmatprep.subr.bf16.mxu1 %v1652_v37  ;;  %v1740_v36 = vld [vmem:[%s2432_s1 + $0x200] ss:$8 sps:$4 sm:$0xff]  }
  0x26   :  { %v1743_v37 = vld [vmem:[%s2432_s1 + $0x300] ss:$8 sps:$4 sm:$0xff]  }
  0x27   :  { %984 = vmatpush2.bf16.msra.mxu0 %v1654_v38  ;;  %v1748_v38 = vld [vmem:[%s2432_s1 + $0x2f4] ss:$8 sps:$4 sm:$0xff]  }
  0x28   :  { %1027 = vmatpush2.bf16.msra.mxu1 %v1655_v39  ;;  %985 = vmatprep.subr.bf16.mxu0 %v1656_v40  ;;  %v1751_v39 = vld [vmem:[%s2432_s1 + $0x3f4] ss:$8 sps:$4 sm:$0xff]   ;;  %v1746_v40 = vld [vmem:[%s2432_s1 + $0x2f0] ss:$8 sps:$4 sm:$0xff]  }
  0x29   :  { %1028 = vmatprep.subr.bf16.mxu1 %v1658_v41  ;;  %v1749_v41 = vld [vmem:[%s2432_s1 + $0x3f0] ss:$8 sps:$4 sm:$0xff]  }
  0x2b   :  { %986 = vmatpush2.bf16.msra.mxu0 %v1660_v42  ;;  %v1754_v42 = vld [vmem:[%s2432_s1 + $0x2e4] ss:$8 sps:$4 sm:$0xff]  }
  0x2c   :  { %1029 = vmatpush2.bf16.msra.mxu1 %v1661_v43  ;;  %987 = vmatprep.subr.bf16.mxu0 %v1662_v44  ;;  %v1757_v43 = vld [vmem:[%s2432_s1 + $0x3e4] ss:$8 sps:$4 sm:$0xff]   ;;  %v1752_v44 = vld [vmem:[%s2432_s1 + $0x2e0] ss:$8 sps:$4 sm:$0xff]  }
  0x2d   :  { %1030 = vmatprep.subr.bf16.mxu1 %v1664_v45  ;;  %v1755_v45 = vld [vmem:[%s2432_s1 + $0x3e0] ss:$8 sps:$4 sm:$0xff]  }
  0x2f   :  { %988 = vmatpush2.bf16.msra.mxu0 %v1666_v46  ;;  %v1760_v46 = vld [vmem:[%s2432_s1 + $0x2d4] ss:$8 sps:$4 sm:$0xff]  }
  0x30   :  { %1031 = vmatpush2.bf16.msra.mxu1 %v1667_v47  ;;  %989 = vmatprep.subr.bf16.mxu0 %v1668_v48  ;;  %v1763_v47 = vld [vmem:[%s2432_s1 + $0x3d4] ss:$8 sps:$4 sm:$0xff]   ;;  %v1758_v48 = vld [vmem:[%s2432_s1 + $0x2d0] ss:$8 sps:$4 sm:$0xff]  }
  0x31   :  { %1032 = vmatprep.subr.bf16.mxu1 %v1670_v50  ;;  %v1766_v50 = vld [vmem:[%s2432_s1 + $0x2c4] ss:$8 sps:$4 sm:$0xff]  }
  0x33   :  { %990 = vmatpush2.bf16.msra.mxu0 %v1672_v52  ;;  %v1764_v52 = vld [vmem:[%s2432_s1 + $0x2c0] ss:$8 sps:$4 sm:$0xff]  }
  0x34   :  { %1033 = vmatpush2.bf16.msra.mxu1 %v1673_v53  ;;  %991 = vmatprep.subr.bf16.mxu0 %v1674_v54  ;;  %v1767_v53 = vld [vmem:[%s2432_s1 + $0x3c0] ss:$8 sps:$4 sm:$0xff]   ;;  %v1772_v54 = vld [vmem:[%s2432_s1 + $0x2b4] ss:$8 sps:$4 sm:$0xff]  }
  0x35   :  { %1034 = vmatprep.subr.bf16.mxu1 %v1676_v55  ;;  %v1775_v55 = vld [vmem:[%s2432_s1 + $0x3b4] ss:$8 sps:$4 sm:$0xff]  }
  0x37   :  { %992 = vmatpush2.bf16.msra.mxu0 %v1678_v56  ;;  %v1770_v56 = vld [vmem:[%s2432_s1 + $0x2b0] ss:$8 sps:$4 sm:$0xff]  }
  0x38   :  { %1035 = vmatpush2.bf16.msra.mxu1 %v1679_v57  ;;  %993 = vmatprep.subr.bf16.mxu0 %v1680_v58  ;;  %v1773_v57 = vld [vmem:[%s2432_s1 + $0x3b0] ss:$8 sps:$4 sm:$0xff]   ;;  %v1778_v58 = vld [vmem:[%s2432_s1 + $0x2a4] ss:$8 sps:$4 sm:$0xff]  }
  0x39   :  { %1036 = vmatprep.subr.bf16.mxu1 %v1682_v59  ;;  %v1781_v59 = vld [vmem:[%s2432_s1 + $0x3a4] ss:$8 sps:$4 sm:$0xff]  }
  0x3b   :  { %994 = vmatpush2.bf16.msra.mxu0 %v1684_v60  ;;  %v1776_v60 = vld [vmem:[%s2432_s1 + $0x2a0] ss:$8 sps:$4 sm:$0xff]  }
  0x3c   :  { %1037 = vmatpush2.bf16.msra.mxu1 %v1685_v61  ;;  %995 = vmatprep.subr.bf16.mxu0 %v1686_v62  ;;  %v1779_v61 = vld [vmem:[%s2432_s1 + $0x3a0] ss:$8 sps:$4 sm:$0xff]   ;;  %v1784_v62 = vld [vmem:[%s2432_s1 + $0x294] ss:$8 sps:$4 sm:$0xff]  }
  0x3d   :  { %1038 = vmatprep.subr.bf16.mxu1 %v1688_v63  ;;  %v1787_v63 = vld [vmem:[%s2432_s1 + $0x394] ss:$8 sps:$4 sm:$0xff]  }
  0x3f   :  { %996 = vmatpush2.bf16.msra.mxu0 %v1690_v0  ;;  %v1782_v0 = vld [vmem:[%s2432_s1 + $0x290] ss:$8 sps:$4 sm:$0xff]  }
  0x40   :  { %1039 = vmatpush2.bf16.msra.mxu1 %v1691_v1  ;;  %1051 = vmatprep.subr.bf16.mxu0 %v1700_v2  ;;  %v1785_v1 = vld [vmem:[%s2432_s1 + $0x390] ss:$8 sps:$4 sm:$0xff]   ;;  %v1790_v2 = vld [vmem:[%s2432_s1 + $0x284] ss:$8 sps:$4 sm:$0xff]  }
  0x41   :  { %1094 = vmatprep.subr.bf16.mxu1 %v1703_v3  ;;  %v1793_v3 = vld [vmem:[%s2432_s1 + $0x384] ss:$8 sps:$4 sm:$0xff]  }
  0x42   :  { %998 = vmatmul.mubr.bf16.vlgmr.msra.gmra.mxu0 %v1692_v4  ;;  %v1788_v4 = vld [vmem:[%s2432_s1 + $0x280] ss:$8 sps:$4 sm:$0xff]  }
  0x43   :  { %1041 = vmatmul.mubr.bf16.vlgmr.msra.gmra.mxu1 %v1695_v5  ;;  %1052 = vmatpush1.bf16.msra.mxu0 %v1698_v6  ;;  %v1791_v5 = vld [vmem:[%s2432_s1 + $0x380] ss:$8 sps:$4 sm:$0xff]   ;;  %v1802_v6 = vld [vmem:[%s2432_s1 + $0x474] ss:$8 sps:$4 sm:$0xff]  }
  0x44   :  { %1095 = vmatpush1.bf16.msra.mxu1 %v1701_v7  ;;  %1053 = vmatprep.subr.bf16.mxu0 %v1706_v8  ;;  %v1805_v7 = vld [vmem:[%s2434_s6 + $0x74] ss:$8 sps:$4 sm:$0xff]  }
  0x45   :  { %1096 = vmatprep.subr.bf16.mxu1 %v1709_v9  ;;  %1083 = vmatprep.mubr.bf16.mxu0 %v1796_v34  ;;  %v1794_v8 = vld [vmem:[%s2433_s0 + $0x10] ss:$36 sps:$4 sm:$0xff]   ;;  %v1797_v9 = vld [vmem:[%s2433_s0 + $0x18] ss:$36 sps:$4 sm:$0xff]  }
  0x46   :  { %1126 = vmatprep.mubr.bf16.mxu1 %v1799_v35  ;;  %v1841_v34 = vld [vmem:[%s2434_s6 + $0x14] ss:$8 sps:$4 sm:$0xff]   ;;  %v1836_v35 = vld [vmem:[%s2432_s1 + $0x410] ss:$8 sps:$4 sm:$0xff]  }
  0x47   :  { %1054 = vmatpush1.bf16.msra.mxu0 %v1704_v10  ;;  %v1800_v10 = vld [vmem:[%s2432_s1 + $0x470] ss:$8 sps:$4 sm:$0xff]  }
  0x48   :  { %1097 = vmatpush1.bf16.msra.mxu1 %v1707_v11  ;;  %1055 = vmatprep.subr.bf16.mxu0 %v1712_v12  ;;  %v1803_v11 = vld [vmem:[%s2434_s6 + $0x70] ss:$8 sps:$4 sm:$0xff]   ;;  %v1808_v12 = vld [vmem:[%s2432_s1 + $0x464] ss:$8 sps:$4 sm:$0xff]  }
  0x49   :  { %1098 = vmatprep.subr.bf16.mxu1 %v1715_v13  ;;  %v1811_v13 = vld [vmem:[%s2434_s6 + $0x64] ss:$8 sps:$4 sm:$0xff]  }
  0x4b   :  { %1056 = vmatpush1.bf16.msra.mxu0 %v1710_v14  ;;  %v1806_v14 = vld [vmem:[%s2432_s1 + $0x460] ss:$8 sps:$4 sm:$0xff]  }
  0x4c   :  { %1099 = vmatpush1.bf16.msra.mxu1 %v1713_v15  ;;  %1057 = vmatprep.subr.bf16.mxu0 %v1718_v16  ;;  %v1809_v15 = vld [vmem:[%s2434_s6 + $0x60] ss:$8 sps:$4 sm:$0xff]   ;;  %v1814_v16 = vld [vmem:[%s2432_s1 + $0x454] ss:$8 sps:$4 sm:$0xff]  }
  0x4d   :  { %1100 = vmatprep.subr.bf16.mxu1 %v1721_v17  ;;  %v1817_v17 = vld [vmem:[%s2434_s6 + $0x54] ss:$8 sps:$4 sm:$0xff]  }
  0x4f   :  { %1058 = vmatpush1.bf16.msra.mxu0 %v1716_v18  ;;  %v1850_v18 = vmov 0  }
  0x50   :  { %1101 = vmatpush1.bf16.msra.mxu1 %v1719_v19  ;;  %1059 = vmatprep.subr.bf16.mxu0 %v1724_v20  ;;  %v1812_v19 = vld [vmem:[%s2432_s1 + $0x450] ss:$8 sps:$4 sm:$0xff]  }
  0x51   :  { %1102 = vmatprep.subr.bf16.mxu1 %v1727_v21  ;;  %v1815_v20 = vld [vmem:[%s2434_s6 + $0x50] ss:$8 sps:$4 sm:$0xff]   ;;  %v1820_v21 = vld [vmem:[%s2432_s1 + $0x444] ss:$8 sps:$4 sm:$0xff]  }
  0x53   :  { %1060 = vmatpush1.bf16.msra.mxu0 %v1722_v22  ;;  %v1823_v22 = vld [vmem:[%s2434_s6 + $0x44] ss:$8 sps:$4 sm:$0xff]  }
  0x54   :  { %1103 = vmatpush1.bf16.msra.mxu1 %v1725_v23  ;;  %1061 = vmatprep.subr.bf16.mxu0 %v1730_v24  ;;  %v1818_v23 = vld [vmem:[%s2432_s1 + $0x440] ss:$8 sps:$4 sm:$0xff]  }
  0x55   :  { %1104 = vmatprep.subr.bf16.mxu1 %v1733_v25  ;;  %v1821_v24 = vld [vmem:[%s2434_s6 + $0x40] ss:$8 sps:$4 sm:$0xff]   ;;  %v1826_v25 = vld [vmem:[%s2432_s1 + $0x434] ss:$8 sps:$4 sm:$0xff]  }
  0x57   :  { %1062 = vmatpush1.bf16.msra.mxu0 %v1728_v26  ;;  %v1829_v26 = vld [vmem:[%s2434_s6 + $0x34] ss:$8 sps:$4 sm:$0xff]  }
  0x58   :  { %1105 = vmatpush1.bf16.msra.mxu1 %v1731_v27  ;;  %1063 = vmatprep.subr.bf16.mxu0 %v1736_v28  ;;  %v1824_v27 = vld [vmem:[%s2432_s1 + $0x430] ss:$8 sps:$4 sm:$0xff]  }
  0x59   :  { %1106 = vmatprep.subr.bf16.mxu1 %v1739_v29  ;;  %v1827_v28 = vld [vmem:[%s2434_s6 + $0x30] ss:$8 sps:$4 sm:$0xff]   ;;  %v1832_v29 = vld [vmem:[%s2432_s1 + $0x424] ss:$8 sps:$4 sm:$0xff]  }
  0x5b   :  { %1064 = vmatpush1.bf16.msra.mxu0 %v1734_v30  ;;  %v1835_v30 = vld [vmem:[%s2434_s6 + $0x24] ss:$8 sps:$4 sm:$0xff]  }
  0x5c   :  { %1107 = vmatpush1.bf16.msra.mxu1 %v1737_v31  ;;  %1065 = vmatprep.subr.bf16.mxu0 %v1742_v32  ;;  %v1830_v31 = vld [vmem:[%s2432_s1 + $0x420] ss:$8 sps:$4 sm:$0xff]  }
  0x5d   :  { %1108 = vmatprep.subr.bf16.mxu1 %v1745_v33  ;;  %v1833_v32 = vld [vmem:[%s2434_s6 + $0x20] ss:$8 sps:$4 sm:$0xff]   ;;  %v1838_v33 = vld [vmem:[%s2432_s1 + $0x414] ss:$8 sps:$4 sm:$0xff]  }
  0x5f   :  { %1066 = vmatpush1.bf16.msra.mxu0 %v1740_v36  ;;  %v1839_v36 = vld [vmem:[%s2434_s6 + $0x10] ss:$8 sps:$4 sm:$0xff]  }
  0x60   :  { %1109 = vmatpush1.bf16.msra.mxu1 %v1743_v37  ;;  %1067 = vmatprep.subr.bf16.mxu0 %v1748_v38  ;;  %v1844_v37 = vld [vmem:[%s2432_s1 + $0x404] ss:$8 sps:$4 sm:$0xff]  }
  0x61   :  { %1110 = vmatprep.subr.bf16.mxu1 %v1751_v39  ;;  %v1847_v38 = vld [vmem:[%s2434_s6 + $0x4] ss:$8 sps:$4 sm:$0xff]   ;;  %v1842_v39 = vld [vmem:[%s2432_s1 + $0x400] ss:$8 sps:$4 sm:$0xff]  }
  0x63   :  { %1068 = vmatpush2.bf16.msra.mxu0 %v1746_v40  ;;  %v1845_v40 = vld [vmem:[%s2434_s6] ss:$8 sps:$4 sm:$0xff]  }
  0x64   :  { %1111 = vmatpush2.bf16.msra.mxu1 %v1749_v41  ;;  %1069 = vmatprep.subr.bf16.mxu0 %v1754_v42  ;;  %v1848_v41 = vld [vmem:[%s2433_s0 + $0x20] ss:$36 sps:$4 sm:$0xff]  }
  0x65   :  { %1112 = vmatprep.subr.bf16.mxu1 %v1757_v43  ;;  %v1849_v42 = vld [vmem:[%s2435_s5] sm:$0xff]  }
  0x67   :  { %1070 = vmatpush2.bf16.msra.mxu0 %v1752_v44 }
  0x68   :  { %1113 = vmatpush2.bf16.msra.mxu1 %v1755_v45  ;;  %1071 = vmatprep.subr.bf16.mxu0 %v1760_v46  ;;  %v189_v45 = vlaneseq }
  0x69   :  { %1114 = vmatprep.subr.bf16.mxu1 %v1763_v47 }
  0x6b   :  { %1072 = vmatpush2.bf16.msra.mxu0 %v1758_v48  ;;  %v190_v48 = vshrl.u32 %v189_v45, 7 }
  0x6c   :  { %1115 = vmatpush2.bf16.msra.mxu1 %v1761_v49  ;;  %1073 = vmatprep.subr.bf16.mxu0 %v1766_v50 }
  0x6d   :  { %1116 = vmatprep.subr.bf16.mxu1 %v1769_v51  ;;  %v191_v51 = vsub.s32 0, %v190_v48 }
  0x6f   :  { %1074 = vmatpush2.bf16.msra.mxu0 %v1764_v52  ;;  %v187_v52 = vld [vmem:[%s2436_s2] sm:$0x3] }
  0x70   :  { %1117 = vmatpush2.bf16.msra.mxu1 %v1767_v53  ;;  %1075 = vmatprep.subr.bf16.mxu0 %v1772_v54  ;;  %v195_v53 = vsub.s32 1, %v190_v48 }
  0x71   :  { %1118 = vmatprep.subr.bf16.mxu1 %v1775_v55 }
  0x73   :  { %1076 = vmatpush2.bf16.msra.mxu0 %v1770_v56  ;;  %v192_v56 = vrot.slane %v187_v52, %v191_v51 }
  0x74   :  { %1119 = vmatpush2.bf16.msra.mxu1 %v1773_v57  ;;  %1077 = vmatprep.subr.bf16.mxu0 %v1778_v58 }
  0x75   :  { %1120 = vmatprep.subr.bf16.mxu1 %v1781_v59  ;;  %v196_v59 = vrot.slane %v187_v52, %v195_v53 }
  0x77   :  { %1078 = vmatpush2.bf16.msra.mxu0 %v1776_v60 }
  0x78   :  { %1121 = vmatpush2.bf16.msra.mxu1 %v1779_v61  ;;  %1079 = vmatprep.subr.bf16.mxu0 %v1784_v62 }
  0x79   :  { %1122 = vmatprep.subr.bf16.mxu1 %v1787_v63 }
  0x7b   :  { %1080 = vmatpush2.bf16.msra.mxu0 %v1782_v0 }
  0x7c   :  { %1123 = vmatpush2.bf16.msra.mxu1 %v1785_v1  ;;  %1081 = vmatprep.subr.bf16.mxu0 %v1790_v2 }
  0x7d   :  { %1124 = vmatprep.subr.bf16.mxu1 %v1793_v3 }
  0x7f   :  { %1082 = vmatpush2.bf16.msra.mxu0 %v1788_v4 }
  0x80   :  { %1125 = vmatpush2.bf16.msra.mxu1 %v1791_v5  ;;  %1137 = vmatprep.subr.bf16.mxu0 %v1802_v6  ;;  %v1363_v5 = vld [vmem:[%s2437_s7] sm:$0x3] }
  0x81   :  { %1320 = vmatprep.subr.bf16.mxu1 %v1805_v7 }
  0x82   :  { %1084 = vmatmul.mubr.bf16.vlgmr.msra.gmra.mxu0 %v1794_v8 }
  0x83   :  { %1127 = vmatmul.mubr.bf16.vlgmr.msra.gmra.mxu1 %v1797_v9  ;;  %1138 = vmatpush1.bf16.msra.mxu0 %v1800_v10 }
  0x84   :  { %1321 = vmatpush1.bf16.msra.mxu1 %v1803_v11  ;;  %1139 = vmatprep.subr.bf16.mxu0 %v1808_v12  ;;  %v1184_v11 = vld [vmem:[%s2438_s3] sm:$0x3]  ;;  %v1368_v12 = vrot.slane %v1363_v5, %v191_v51 }
  0x85   :  { %1322 = vmatprep.subr.bf16.mxu1 %v1811_v13  ;;  %1169 = vmatprep.mubr.bf16.mxu0 %v1850_v18 }
  0x86   :  { %1352 = vmatprep.mubr.bf16.mxu1 %v1850_v18  ;;  %v1200_v18 = vld [vmem:[%s2440_s4] sm:$0x3] }
  0x87   :  { %1140 = vmatpush1.bf16.msra.mxu0 %v1806_v14 }
  0x88   :  { %1323 = vmatpush1.bf16.msra.mxu1 %v1809_v15  ;;  %1141 = vmatprep.subr.bf16.mxu0 %v1814_v16  ;;  %v1379_v15 = vld [vmem:[%s2439_s8] sm:$0x3] }
  0x89   :  { %1324 = vmatprep.subr.bf16.mxu1 %v1817_v17 }
  0x8b   :  { %1142 = vmatpush1.bf16.msra.mxu0 %v1812_v19 }
  0x8c   :  { %1325 = vmatpush1.bf16.msra.mxu1 %v1815_v20  ;;  %1143 = vmatprep.subr.bf16.mxu0 %v1820_v21  ;;  %v1189_v21 = vrot.slane %v1184_v11, %v191_v51 }
  0x8d   :  { %1326 = vmatprep.subr.bf16.mxu1 %v1823_v22 }
  0x8f   :  { %1144 = vmatpush1.bf16.msra.mxu0 %v1818_v23  ;;  %v1372_v23 = vrot.slane %v1363_v5, %v195_v53 }
  0x90   :  { %1327 = vmatpush1.bf16.msra.mxu1 %v1821_v24  ;;  %1145 = vmatprep.subr.bf16.mxu0 %v1826_v25 }
  0x91   :  { %1328 = vmatprep.subr.bf16.mxu1 %v1829_v26 }
  0x93   :  { %1146 = vmatpush1.bf16.msra.mxu0 %v1824_v27  ;;  %v1384_v27 = vrot.slane %v1379_v15, %v191_v51 }
  0x94   :  { %1329 = vmatpush1.bf16.msra.mxu1 %v1827_v28  ;;  %1147 = vmatprep.subr.bf16.mxu0 %v1832_v29  ;;  %v1205_v28 = vrot.slane %v1200_v18, %v191_v51 }
  0x95   :  { %1330 = vmatprep.subr.bf16.mxu1 %v1835_v30 }
  0x97   :  { %1148 = vmatpush1.bf16.msra.mxu0 %v1830_v31 }
  0x98   :  { %1331 = vmatpush1.bf16.msra.mxu1 %v1833_v32  ;;  %1149 = vmatprep.subr.bf16.mxu0 %v1838_v33 }
  0x99   :  { %1332 = vmatprep.subr.bf16.mxu1 %v1841_v34  ;;  %v1193_v34 = vrot.slane %v1184_v11, %v195_v53 }
  0x9b   :  { %1150 = vmatpush1.bf16.msra.mxu0 %v1836_v35 }
  0x9c   :  { %1333 = vmatpush1.bf16.msra.mxu1 %v1839_v36  ;;  %1151 = vmatprep.subr.bf16.mxu0 %v1844_v37  ;;  %v1209_v36 = vrot.slane %v1200_v18, %v195_v53 }
  0x9d   :  { %1334 = vmatprep.subr.bf16.mxu1 %v1847_v38  ;;  %v1388_v38 = vrot.slane %v1379_v15, %v195_v53 }
  0x9f   :  { %1152 = vmatpush1.bf16.msra.mxu0 %v1842_v39 }
  0xa0   :  { %1335 = vmatpush1.bf16.msra.mxu1 %v1845_v40 }
  0xa2   :  { %1170 = vmatmul.mubr.bf16.vlgmr.msra.gmra.mxu0 %v1848_v41 }
  0xa3   :  { %1353 = vmatmul.mubr.bf16.vlgmr.msra.gmra.mxu1 %v1849_v42 }
 0x102   :  { %v999_v43 = vpop.f32.mrf.mxu0 }
 0x103   :  { %v1042_v44 = vpop.f32.mrf.mxu1  ;;  %v1000_v60 = vadd.f32 %v999_v43, %v192_v56 }
 0x104   :  { %v1001_v46 = vpop.f32.mrf.mxu0 }
 0x105   :  { %v1044_v47 = vpop.f32.mrf.mxu1  ;;  %v1002_v63 = vadd.f32 %v1001_v46, %v196_v59  ;;  %v1043_v0 = vadd.f32 %v1042_v44, %v1000_v60 }
 0x106   :  { %v1003_v49 = vpop.f32.mrf.mxu0 }
 0x107   :  { %v1046_v50 = vpop.f32.mrf.mxu1  ;;  %v1004_v1 = vadd.f32 %v1003_v49, %v192_v56  ;;  %v1045_v6 = vadd.f32 %v1044_v47, %v1002_v63 }
 0x108   :  { %v1005_v54 = vpop.f32.mrf.mxu0 }
 0x109   :  { %v1048_v55 = vpop.f32.mrf.mxu1  ;;  %v1006_v3 = vadd.f32 %v1005_v54, %v196_v59  ;;  %v1047_v8 = vadd.f32 %v1046_v50, %v1004_v1 }
 0x10b   :  { %v1049_v13 = vadd.f32 %v1048_v55, %v1006_v3 }
 0x142   :  { %v1085_v57 = vpop.f32.mrf.mxu0 }
 0x143   :  { %v1128_v58 = vpop.f32.mrf.mxu1  ;;  %v1086_v7 = vadd.f32 %v1085_v57, %v1043_v0 }
 0x144   :  { %v1087_v61 = vpop.f32.mrf.mxu0 }
 0x145   :  { %v1130_v62 = vpop.f32.mrf.mxu1  ;;  %v1088_v9 = vadd.f32 %v1087_v61, %v1045_v6  ;;  %v1129_v16 = vadd.f32 %v1128_v58, %v1086_v7 }
 0x146   :  { %v1089_v2 = vpop.f32.mrf.mxu0 }
 0x147   :  { %v1132_v4 = vpop.f32.mrf.mxu1  ;;  %v1090_v17 = vadd.f32 %v1089_v2, %v1047_v8  ;;  %v1131_v24 = vadd.f32 %v1130_v62, %v1088_v9 }
 0x148   :  { %v1091_v10 = vpop.f32.mrf.mxu0 }
 0x149   :  { %v1134_v14 = vpop.f32.mrf.mxu1  ;;  %v1092_v19 = vadd.f32 %v1091_v10, %v1049_v13  ;;  %v1133_v31 = vadd.f32 %v1132_v4, %v1090_v17 }
 0x14b   :  { %v1135_v35 = vadd.f32 %v1134_v14, %v1092_v19 }
 0x162   :  { %v1171_v20 = vpop.f32.mrf.mxu0 }
 0x163   :  { %v1354_v22 = vpop.f32.mrf.mxu1  ;;  %v1172_v25 = vadd.f32 %v1171_v20, %v1129_v16 }
 0x164   :  { %v1375_v26 = vmul.f32 %v1368_v12, %v1354_v22  ;;  %v1173_v29 = vpop.f32.mrf.mxu0 }
 0x165   :  { %v1356_v30 = vpop.f32.mrf.mxu1  ;;  %v1180_v32 = vmax.f32 %v1172_v25, 0.0  ;;  %v1174_v33 = vadd.f32 %v1173_v29, %v1131_v24 }
 0x166   :  { %v1376_v37 = vmul.f32 %v1372_v23, %v1356_v30  ;;  %v1175_v39 = vpop.f32.mrf.mxu0  ;;  %v1391_v42 = vadd.f32 %v1384_v27, %v1375_v26 }
 0x167   :  { %v1358_v40 = vpop.f32.mrf.mxu1  ;;  %v1196_v41 = vmul.f32 %v1189_v21, %v1180_v32  ;;  %v1181_v43 = vmax.f32 %v1174_v33, 0.0  ;;  %v1176_v44 = vadd.f32 %v1175_v39, %v1133_v31 }
 0x168   :  { %v1377_v45 = vmul.f32 %v1368_v12, %v1358_v40  ;;  %v1177_v46 = vpop.f32.mrf.mxu0  ;;  %v1392_v52 = vadd.f32 %v1388_v38, %v1376_v37 }
 0x169   :  { %v1360_v47 = vpop.f32.mrf.mxu1  ;;  %v1212_v48 = vadd.f32 %v1205_v28, %v1196_v41  ;;  %v1197_v49 = vmul.f32 %v1193_v34, %v1181_v43  ;;  %v1182_v50 = vmax.f32 %v1176_v44, 0.0  ;;  %v1178_v51 = vadd.f32 %v1177_v46, %v1135_v35 }
 0x16a   :  { %v1378_v54 = vmul.f32 %v1372_v23, %v1360_v47  ;;  %v1393_v60 = vadd.f32 %v1384_v27, %v1377_v45 }
 0x16b   :  { %v1395_v55 = vadd.f32 %v1391_v42, %v1212_v48  ;;  %v1213_v56 = vadd.f32 %v1209_v36, %v1197_v49  ;;  %v1198_v57 = vmul.f32 %v1189_v21, %v1182_v50  ;;  %v1183_v58 = vmax.f32 %v1178_v51, 0.0 }
 0x16c   :  { %v1394_v62 = vadd.f32 %v1388_v38, %v1378_v54 }
 0x16d   :  { %v1396_v53 = vadd.f32 %v1392_v52, %v1213_v56  ;;  %v1214_v59 = vadd.f32 %v1205_v28, %v1198_v57  ;;  %v1199_v61 = vmul.f32 %v1193_v34, %v1183_v58  ;;  %v1399_v63 = vmax.f32 %v1395_v55, 0.0 }
 0x16f   :  { %v1400_v0 = vmax.f32 %v1396_v53, 0.0  ;;  %v1397_v1 = vadd.f32 %v1393_v60, %v1214_v59  ;;  %v1215_v2 = vadd.f32 %v1209_v36, %v1199_v61 }
 0x171   :  { %v1593_v3 = vpack.c.bf16 %v1400_v0, %v1399_v63  ;;  %v1398_v4 = vadd.f32 %v1394_v62, %v1215_v2  ;;  %v1401_v5 = vmax.f32 %v1397_v1, 0.0 }
 0x173   :  { %1415 = vst [vmem:[%s2441_s9] sm:$0xff] %v1593_v3  ;;  %v1402_v6 = vmax.f32 %v1398_v4, 0.0 }
 0x175   :  { %v1594_v7 = vpack.c.bf16 %v1402_v6, %v1401_v5 }
 0x177   :  { %1416 = vst [vmem:[%s2441_s9 + $0x8] sm:$0xff] %v1594_v7 }

// kernel: bennet_forward.25
= control target key start
LH: loop header
LB: loop body
LE: loop exit
PB: predicated region body
PF: predicated region fallthrough
CT: control target
= control target key end

     0   :  { %vm1284_vm0 = vmmov 0   ;;  %s1678_s1 = inlined_call_operand.vmem [shape: bf16[256,256], index: 1, kind: input, shape index: {}]   ;;  %s1679_s0 = inlined_call_operand.vmem [shape: bf16[16,256], index: 0, kind: input, shape index: {}]   ;;  %s1680_s3 = inlined_call_operand.vmem [shape: bf16[256,256], index: 3, kind: input, shape index: {}]   ;;  %s1681_s5 = inlined_call_operand.vmem [shape: bf16[256,128], index: 5, kind: input, shape index: {}]   ;;  %s1682_s2 = inlined_call_operand.vmem [shape: f32[1,256], index: 2, kind: input, shape index: {}]   ;;  %s1683_s7 = inlined_call_operand.vmem [shape: bf16[128,128], index: 7, kind: input, shape index: {}]   ;;  %s1684_s4 = inlined_call_operand.vmem [shape: f32[1,256], index: 4, kind: input, shape index: {}]   ;;  %s1685_s9 = inlined_call_operand.vmem [shape: bf16[128,128], index: 9, kind: input, shape index: {}]   ;;  %s1686_s6 = inlined_call_operand.vmem [shape: f32[1,128], index: 6, kind: input, shape index: {}]   ;;  %s1687_s8 = inlined_call_operand.vmem [shape: f32[1,128], index: 8, kind: input, shape index: {}]   ;;  %s1688_s10 = inlined_call_operand.vmem [shape: f32[1,128], index: 10, kind: input, shape index: {}]   ;;  %s1689_s11 = inlined_call_operand.vmem [shape: f32[16,128], index: 11, kind: output, shape index: {}]  }
   0x1   :  { %v1152_v0 = vld [vmem:[%s1678_s1 + $0x74] ss:$8 sps:$4 sm:$0xff]   ;;  %v1154_v1 = vld [vmem:[%s1678_s1 + $0x70] ss:$8 sps:$4 sm:$0xff]   ;;  %v1155_v2 = vld [vmem:[%s1678_s1 + $0x64] ss:$8 sps:$4 sm:$0xff]  }
   0x2   :  { %255 = vmatprep.subr.bf16.mxu0 %v1152_v0  ;;  %v1157_v3 = vld [vmem:[%s1678_s1 + $0x60] ss:$8 sps:$4 sm:$0xff]   ;;  %v1158_v4 = vld [vmem:[%s1678_s1 + $0x54] ss:$8 sps:$4 sm:$0xff]   ;;  %v1160_v5 = vld [vmem:[%s1678_s1 + $0x50] ss:$8 sps:$4 sm:$0xff]  }
   0x3   :  { %256 = vmatpush1.bf16.msra.mxu0 %v1154_v1  ;;  %v1161_v6 = vld [vmem:[%s1678_s1 + $0x44] ss:$8 sps:$4 sm:$0xff]   ;;  %v1163_v7 = vld [vmem:[%s1678_s1 + $0x40] ss:$8 sps:$4 sm:$0xff]   ;;  %v1164_v8 = vld [vmem:[%s1678_s1 + $0x34] ss:$8 sps:$4 sm:$0xff]  }
   0x4   :  { %257 = vmatprep.subr.bf16.mxu0 %v1155_v2  ;;  %v1166_v9 = vld [vmem:[%s1678_s1 + $0x30] ss:$8 sps:$4 sm:$0xff]   ;;  %v1167_v10 = vld [vmem:[%s1678_s1 + $0x24] ss:$8 sps:$4 sm:$0xff]   ;;  %v1169_v11 = vld [vmem:[%s1678_s1 + $0x20] ss:$8 sps:$4 sm:$0xff]  }
   0x5   :  { %v1170_v12 = vld [vmem:[%s1678_s1 + $0x14] ss:$8 sps:$4 sm:$0xff]   ;;  %v1172_v13 = vld [vmem:[%s1678_s1 + $0x10] ss:$8 sps:$4 sm:$0xff]   ;;  %v1173_v14 = vld [vmem:[%s1678_s1 + $0x4] ss:$8 sps:$4 sm:$0xff]  }
   0x6   :  { %v1202_v15 = vld [vmem:[%s1679_s0 + $0x4] ss:$8 sps:$4 sm:$0xff]   ;;  %v1203_v16 = vld [vmem:[%s1680_s3 + $0x74] ss:$8 sps:$4 sm:$0xff]   ;;  %v1205_v17 = vld [vmem:[%s1680_s3 + $0x70] ss:$8 sps:$4 sm:$0xff]  }
   0x7   :  { %258 = vmatpush1.bf16.msra.mxu0 %v1157_v3  ;;  %287 = vmatprep.mubr.bf16.mxu0 %v1202_v15  ;;  %v1206_v18 = vld [vmem:[%s1680_s3 + $0x64] ss:$8 sps:$4 sm:$0xff]   ;;  %v1208_v19 = vld [vmem:[%s1680_s3 + $0x60] ss:$8 sps:$4 sm:$0xff]   ;;  %v1209_v21 = vld [vmem:[%s1680_s3 + $0x54] ss:$8 sps:$4 sm:$0xff]  }
   0x8   :  { %259 = vmatprep.subr.bf16.mxu0 %v1158_v4  ;;  %508 = vmatprep.subr.bf16.mxu1 %v1203_v16  ;;  %v1175_v20 = vld [vmem:[%s1678_s1] ss:$8 sps:$4 sm:$0xff]   ;;  %v1176_v22 = vld [vmem:[%s1678_s1 + $0xf4] ss:$8 sps:$4 sm:$0xff]   ;;  %v1211_v23 = vld [vmem:[%s1680_s3 + $0x50] ss:$8 sps:$4 sm:$0xff]  }
   0x9   :  { %509 = vmatpush1.bf16.msra.mxu1 %v1205_v17  ;;  %v1178_v24 = vld [vmem:[%s1678_s1 + $0xf0] ss:$8 sps:$4 sm:$0xff]   ;;  %v1212_v25 = vld [vmem:[%s1680_s3 + $0x44] ss:$8 sps:$4 sm:$0xff]   ;;  %v1214_v27 = vld [vmem:[%s1680_s3 + $0x40] ss:$8 sps:$4 sm:$0xff]  }
   0xa   :  { %510 = vmatprep.subr.bf16.mxu1 %v1206_v18  ;;  %v1179_v26 = vld [vmem:[%s1678_s1 + $0xe4] ss:$8 sps:$4 sm:$0xff]   ;;  %v1181_v28 = vld [vmem:[%s1678_s1 + $0xe0] ss:$8 sps:$4 sm:$0xff]   ;;  %v1215_v29 = vld [vmem:[%s1680_s3 + $0x34] ss:$8 sps:$4 sm:$0xff]  }
   0xb   :  { %260 = vmatpush1.bf16.msra.mxu0 %v1160_v5  ;;  %v1182_v30 = vld [vmem:[%s1678_s1 + $0xd4] ss:$8 sps:$4 sm:$0xff]   ;;  %v1217_v31 = vld [vmem:[%s1680_s3 + $0x30] ss:$8 sps:$4 sm:$0xff]   ;;  %v1218_v33 = vld [vmem:[%s1680_s3 + $0x24] ss:$8 sps:$4 sm:$0xff]  }
   0xc   :  { %261 = vmatprep.subr.bf16.mxu0 %v1161_v6  ;;  %v1184_v32 = vld [vmem:[%s1678_s1 + $0xd0] ss:$8 sps:$4 sm:$0xff]   ;;  %v1185_v34 = vld [vmem:[%s1678_s1 + $0xc4] ss:$8 sps:$4 sm:$0xff]   ;;  %v1220_v35 = vld [vmem:[%s1680_s3 + $0x20] ss:$8 sps:$4 sm:$0xff]  }
   0xd   :  { %511 = vmatpush1.bf16.msra.mxu1 %v1208_v19  ;;  %v1187_v36 = vld [vmem:[%s1678_s1 + $0xc0] ss:$8 sps:$4 sm:$0xff]   ;;  %v1221_v37 = vld [vmem:[%s1680_s3 + $0x14] ss:$8 sps:$4 sm:$0xff]   ;;  %v1223_v39 = vld [vmem:[%s1680_s3 + $0x10] ss:$8 sps:$4 sm:$0xff]  }
   0xe   :  { %512 = vmatprep.subr.bf16.mxu1 %v1209_v21  ;;  %v1188_v38 = vld [vmem:[%s1678_s1 + $0xb4] ss:$8 sps:$4 sm:$0xff]   ;;  %v1190_v40 = vld [vmem:[%s1678_s1 + $0xb0] ss:$8 sps:$4 sm:$0xff]   ;;  %v1224_v41 = vld [vmem:[%s1680_s3 + $0x4] ss:$8 sps:$4 sm:$0xff]  }
   0xf   :  { %262 = vmatpush1.bf16.msra.mxu0 %v1163_v7  ;;  %v1191_v42 = vld [vmem:[%s1678_s1 + $0xa4] ss:$8 sps:$4 sm:$0xff]   ;;  %v1226_v43 = vld [vmem:[%s1680_s3] ss:$8 sps:$4 sm:$0xff]   ;;  %v1227_v45 = vld [vmem:[%s1680_s3 + $0xf4] ss:$8 sps:$4 sm:$0xff]  }
  0x10   :  { %263 = vmatprep.subr.bf16.mxu0 %v1164_v8  ;;  %v1193_v44 = vld [vmem:[%s1678_s1 + $0xa0] ss:$8 sps:$4 sm:$0xff]   ;;  %v1194_v46 = vld [vmem:[%s1678_s1 + $0x94] ss:$8 sps:$4 sm:$0xff]   ;;  %v1229_v47 = vld [vmem:[%s1680_s3 + $0xf0] ss:$8 sps:$4 sm:$0xff]  }
  0x11   :  { %513 = vmatpush1.bf16.msra.mxu1 %v1211_v23  ;;  %v1196_v48 = vld [vmem:[%s1678_s1 + $0x90] ss:$8 sps:$4 sm:$0xff]   ;;  %v1230_v49 = vld [vmem:[%s1680_s3 + $0xe4] ss:$8 sps:$4 sm:$0xff]   ;;  %v1232_v51 = vld [vmem:[%s1680_s3 + $0xe0] ss:$8 sps:$4 sm:$0xff]  }
  0x12   :  { %514 = vmatprep.subr.bf16.mxu1 %v1212_v25  ;;  %v1197_v50 = vld [vmem:[%s1678_s1 + $0x84] ss:$8 sps:$4 sm:$0xff]   ;;  %v1199_v52 = vld [vmem:[%s1678_s1 + $0x80] ss:$8 sps:$4 sm:$0xff]   ;;  %v1233_v53 = vld [vmem:[%s1680_s3 + $0xd4] ss:$8 sps:$4 sm:$0xff]  }
  0x13   :  { %264 = vmatpush1.bf16.msra.mxu0 %v1166_v9  ;;  %v1200_v54 = vld [vmem:[%s1679_s0] ss:$8 sps:$4 sm:$0xff]   ;;  %v1235_v55 = vld [vmem:[%s1680_s3 + $0xd0] ss:$8 sps:$4 sm:$0xff]   ;;  %v1236_v56 = vld [vmem:[%s1680_s3 + $0xc4] ss:$8 sps:$4 sm:$0xff]  }
  0x14   :  { %265 = vmatprep.subr.bf16.mxu0 %v1167_v10  ;;  %v1238_v57 = vld [vmem:[%s1680_s3 + $0xc0] ss:$8 sps:$4 sm:$0xff]   ;;  %v1239_v58 = vld [vmem:[%s1680_s3 + $0xb4] ss:$8 sps:$4 sm:$0xff]   ;;  %v1241_v59 = vld [vmem:[%s1680_s3 + $0xb0] ss:$8 sps:$4 sm:$0xff]  }
  0x15   :  { %515 = vmatpush1.bf16.msra.mxu1 %v1214_v27  ;;  %v1242_v60 = vld [vmem:[%s1680_s3 + $0xa4] ss:$8 sps:$4 sm:$0xff]   ;;  %v1244_v61 = vld [vmem:[%s1680_s3 + $0xa0] ss:$8 sps:$4 sm:$0xff]   ;;  %v1245_v62 = vld [vmem:[%s1680_s3 + $0x94] ss:$8 sps:$4 sm:$0xff]  }
  0x16   :  { %516 = vmatprep.subr.bf16.mxu1 %v1215_v29  ;;  %v1247_v63 = vld [vmem:[%s1680_s3 + $0x90] ss:$8 sps:$4 sm:$0xff]   ;;  %v1248_v0 = vld [vmem:[%s1680_s3 + $0x84] ss:$8 sps:$4 sm:$0xff]   ;;  %v1250_v1 = vld [vmem:[%s1680_s3 + $0x80] ss:$8 sps:$4 sm:$0xff]  }
  0x17   :  { %266 = vmatpush1.bf16.msra.mxu0 %v1169_v11  ;;  %v1251_v2 = vld [vmem:[%s1681_s5 + $0x78] sm:$0xff]   ;;  %v1253_v4 = vld [vmem:[%s1681_s5 + $0x70] sm:$0xff]   ;;  %v1255_v6 = vld [vmem:[%s1681_s5 + $0x68] sm:$0xff]  }
  0x18   :  { %267 = vmatprep.subr.bf16.mxu0 %v1170_v12  ;;  %v1252_v3 = vld [vmem:[%s1681_s5 + $0x38] sm:$0xff]   ;;  %v1254_v5 = vld [vmem:[%s1681_s5 + $0x30] sm:$0xff]   ;;  %v1256_v7 = vld [vmem:[%s1681_s5 + $0x28] sm:$0xff]   ;;  %v75_v12 = vlaneseq }
  0x19   :  { %517 = vmatpush1.bf16.msra.mxu1 %v1217_v31  ;;  %v1257_v8 = vld [vmem:[%s1681_s5 + $0x60] sm:$0xff]   ;;  %v1259_v10 = vld [vmem:[%s1681_s5 + $0x58] sm:$0xff]  }
  0x1a   :  { %518 = vmatprep.subr.bf16.mxu1 %v1218_v33  ;;  %v1258_v9 = vld [vmem:[%s1681_s5 + $0x20] sm:$0xff]   ;;  %v1260_v11 = vld [vmem:[%s1681_s5 + $0x18] sm:$0xff]   ;;  %v1261_v33 = vld [vmem:[%s1681_s5 + $0x50] sm:$0xff]  }
  0x1b   :  { %268 = vmatpush1.bf16.msra.mxu0 %v1172_v13  ;;  %v76_v13 = vshrl.u32 %v75_v12, 7  ;;  %v73_v16 = vld [vmem:[%s1682_s2] sm:$0x3] }
  0x1c   :  { %269 = vmatprep.subr.bf16.mxu0 %v1173_v14 }
  0x1d   :  { %519 = vmatpush1.bf16.msra.mxu1 %v1220_v35  ;;  %v81_v14 = vsub.s32 1, %v76_v13  ;;  %v77_v15 = vsub.s32 0, %v76_v13  ;;  %v1263_v35 = vld [vmem:[%s1681_s5 + $0x48] sm:$0xff]  }
  0x1e   :  { %520 = vmatprep.subr.bf16.mxu1 %v1221_v37  ;;  %v1265_v37 = vld [vmem:[%s1681_s5 + $0x40] sm:$0xff]  }
  0x1f   :  { %270 = vmatpush1.bf16.msra.mxu0 %v1175_v20  ;;  %v82_v18 = vrot.slane %v73_v16, %v81_v14  ;;  %v78_v19 = vrot.slane %v73_v16, %v77_v15 }
  0x20   :  { %271 = vmatprep.subr.bf16.mxu0 %v1176_v22 }
  0x21   :  { %521 = vmatpush1.bf16.msra.mxu1 %v1223_v39  ;;  %v1283_v39 = vmov 0.0  }
  0x22   :  { %522 = vmatprep.subr.bf16.mxu1 %v1224_v41  ;;  %v1268_v41 = vld [vmem:[%s1683_s7 + $0x30] sm:$0xff]  }
  0x23   :  { %272 = vmatpush2.bf16.msra.mxu0 %v1178_v24 }
  0x24   :  { %273 = vmatprep.subr.bf16.mxu0 %v1179_v26 }
  0x25   :  { %523 = vmatpush1.bf16.msra.mxu1 %v1226_v43  ;;  %v1270_v43 = vld [vmem:[%s1683_s7 + $0x20] sm:$0xff]  }
  0x26   :  { %524 = vmatprep.subr.bf16.mxu1 %v1227_v45 }
  0x27   :  { %274 = vmatpush2.bf16.msra.mxu0 %v1181_v28 }
  0x28   :  { %275 = vmatprep.subr.bf16.mxu0 %v1182_v30 }
  0x29   :  { %525 = vmatpush2.bf16.msra.mxu1 %v1229_v47 }
  0x2a   :  { %526 = vmatprep.subr.bf16.mxu1 %v1230_v49 }
  0x2b   :  { %276 = vmatpush2.bf16.msra.mxu0 %v1184_v32 }
  0x2c   :  { %277 = vmatprep.subr.bf16.mxu0 %v1185_v34  ;;  %v1262_v34 = vld [vmem:[%s1681_s5 + $0x10] sm:$0xff]  }
  0x2d   :  { %527 = vmatpush2.bf16.msra.mxu1 %v1232_v51 }
  0x2e   :  { %528 = vmatprep.subr.bf16.mxu1 %v1233_v53 }
  0x2f   :  { %278 = vmatpush2.bf16.msra.mxu0 %v1187_v36  ;;  %v1264_v36 = vld [vmem:[%s1681_s5 + $0x8] sm:$0xff]  }
  0x30   :  { %279 = vmatprep.subr.bf16.mxu0 %v1188_v38  ;;  %v1266_v38 = vld [vmem:[%s1681_s5] sm:$0xff]  }
  0x31   :  { %529 = vmatpush2.bf16.msra.mxu1 %v1235_v55 }
  0x32   :  { %530 = vmatprep.subr.bf16.mxu1 %v1236_v56 }
  0x33   :  { %280 = vmatpush2.bf16.msra.mxu0 %v1190_v40  ;;  %v1267_v40 = vld [vmem:[%s1683_s7 + $0x38] sm:$0xff]  }
  0x34   :  { %281 = vmatprep.subr.bf16.mxu0 %v1191_v42  ;;  %v1269_v42 = vld [vmem:[%s1683_s7 + $0x28] sm:$0xff]  }
  0x35   :  { %531 = vmatpush2.bf16.msra.mxu1 %v1238_v57 }
  0x36   :  { %532 = vmatprep.subr.bf16.mxu1 %v1239_v58 }
  0x37   :  { %282 = vmatpush2.bf16.msra.mxu0 %v1193_v44  ;;  %v336_v44 = vld [vmem:[%s1684_s4] sm:$0x3] }
  0x38   :  { %283 = vmatprep.subr.bf16.mxu0 %v1194_v46  ;;  %v345_v46 = vrot.slane %v336_v44, %v81_v14  ;;  %v341_v47 = vrot.slane %v336_v44, %v77_v15 }
  0x39   :  { %533 = vmatpush2.bf16.msra.mxu1 %v1241_v59 }
  0x3a   :  { %534 = vmatprep.subr.bf16.mxu1 %v1242_v60 }
  0x3b   :  { %284 = vmatpush2.bf16.msra.mxu0 %v1196_v48 }
  0x3c   :  { %285 = vmatprep.subr.bf16.mxu0 %v1197_v50 }
  0x3d   :  { %535 = vmatpush2.bf16.msra.mxu1 %v1244_v61  ;;  %v1271_v61 = vld [vmem:[%s1683_s7 + $0x18] sm:$0xff]  }
  0x3e   :  { %536 = vmatprep.subr.bf16.mxu1 %v1245_v62  ;;  %v1272_v62 = vld [vmem:[%s1683_s7 + $0x10] sm:$0xff]  }
  0x3f   :  { %286 = vmatpush2.bf16.msra.mxu0 %v1199_v52 }
  0x40   :  { %1070 = vmatprep.subr.bf16.mxu0 %v1251_v2  ;;  %v1276_v2 = vld [vmem:[%s1685_s9 + $0x30] sm:$0xff]  }
  0x41   :  { %537 = vmatpush2.bf16.msra.mxu1 %v1247_v63  ;;  %v1273_v63 = vld [vmem:[%s1683_s7 + $0x8] sm:$0xff]  }
  0x42   :  { %288 = vmatmul.mubr.bf16.vlgmr.msra.gmra.mxu0 %v1200_v54  ;;  %538 = vmatprep.subr.bf16.mxu1 %v1248_v0  ;;  %v1274_v0 = vld [vmem:[%s1683_s7] sm:$0xff]  }
  0x43   :  { %1071 = vmatpush3.bf16.msra.mxu0 %v1252_v3  ;;  %v1277_v3 = vld [vmem:[%s1685_s9 + $0x28] sm:$0xff]  }
  0x44   :  { %1072 = vmatprep.subr.bf16.mxu0 %v1253_v4  ;;  %v1278_v4 = vld [vmem:[%s1685_s9 + $0x20] sm:$0xff]  }
  0x45   :  { %539 = vmatpush2.bf16.msra.mxu1 %v1250_v1  ;;  %v1275_v1 = vld [vmem:[%s1685_s9 + $0x38] sm:$0xff]  }
  0x46   :  { %1110 = vmatprep.subr.bf16.mxu1 %v1283_v39 }
  0x47   :  { %1073 = vmatpush3.bf16.msra.mxu0 %v1254_v5  ;;  %v1279_v5 = vld [vmem:[%s1685_s9 + $0x18] sm:$0xff]  }
  0x48   :  { %1074 = vmatprep.subr.bf16.mxu0 %v1255_v6 }
  0x4b   :  { %1075 = vmatpush3.bf16.msra.mxu0 %v1256_v7 }
  0x4c   :  { %1076 = vmatprep.subr.bf16.mxu0 %v1257_v8 }
  0x4f   :  { %1077 = vmatpush3.bf16.msra.mxu0 %v1258_v9  ;;  %v1035_v9 = vld [vmem:[%s1686_s6] ss:$0 sm:$0xff] }
  0x50   :  { %1078 = vmatprep.subr.bf16.mxu0 %v1259_v10 }
  0x53   :  { %1079 = vmatpush3.bf16.msra.mxu0 %v1260_v11 }
  0x54   :  { %1080 = vmatprep.subr.bf16.mxu0 %v1261_v33 }
  0x57   :  { %1081 = vmatpush3.bf16.msra.mxu0 %v1262_v34 }
  0x58   :  { %1082 = vmatprep.subr.bf16.mxu0 %v1263_v35 }
  0x5b   :  { %1083 = vmatpush3.bf16.msra.mxu0 %v1264_v36 }
  0x5c   :  { %1084 = vmatprep.subr.bf16.mxu0 %v1265_v37 }
  0x5f   :  { %1085 = vmatpush3.bf16.msra.mxu0 %v1266_v38 }
  0x60   :  { %1130 = vmatprep.subr.bf16.mxu0 %v1283_v39 }
 0x102   :  { %v289_v17 = vpop.f32.mrf.mxu0 }
 0x103   :  { %v290_v24 = vadd.f32 %v289_v17, %v78_v19 }
 0x104   :  { %v291_v20 = vpop.f32.mrf.mxu0 }
 0x105   :  { %v292_v22 = vadd.f32 %v291_v20, %v82_v18  ;;  %v298_v30 = vmax.f32 %v290_v24, 0.0  ;;  %v1282_v20 = vld [vmem:[%s1685_s9] sm:$0xff]  }
 0x106   :  { %v293_v21 = vpop.f32.mrf.mxu0 }
 0x107   :  { %v294_v23 = vadd.f32 %v293_v21, %v78_v19  ;;  %v299_v28 = vmax.f32 %v292_v22, 0.0  ;;  %v1281_v19 = vld [vmem:[%s1685_s9 + $0x8] sm:$0xff]   ;;  %v1052_v21 = vld [vmem:[%s1687_s8] ss:$0 sm:$0xff] }
 0x108   :  { %v295_v25 = vpop.f32.mrf.mxu0 }
 0x109   :  { %v296_v26 = vadd.f32 %v295_v25, %v82_v18  ;;  %v300_v27 = vmax.f32 %v294_v23, 0.0  ;;  %v1280_v18 = vld [vmem:[%s1685_s9 + $0x10] sm:$0xff]  }
 0x10b   :  { %v301_v29 = vmax.f32 %v296_v26, 0.0  ;;  %v302_v32 = vpack.c.bf16 %v300_v27, %v298_v30 }
 0x10d   :  { %v303_v31 = vpack.c.bf16 %v301_v29, %v299_v28 }
 0x10f   :  { %540 = vmatprep.mubr.bf16.mxu1 %v303_v31  ;;  %v1061_v31 = vld [vmem:[%s1688_s10] ss:$0 sm:$0xff] }
 0x110   :  { %541 = vmatmul.mubr.bf16.vlgmr.msra.gmra.mxu1 %v302_v32 }
 0x111   :  { %1111 = vmatpush3.bf16.msra.mxu1 %v1267_v40  ;;  %1126 = vmatprep.mubr.msk.bf16.mxu1 %vm1284_vm0, %v1283_v39 }
 0x112   :  { %1112 = vmatprep.subr.bf16.mxu1 %v1283_v39 }
 0x115   :  { %1113 = vmatpush3.bf16.msra.mxu1 %v1268_v41 }
 0x116   :  { %1114 = vmatprep.subr.bf16.mxu1 %v1283_v39 }
 0x119   :  { %1115 = vmatpush3.bf16.msra.mxu1 %v1269_v42 }
 0x11a   :  { %1116 = vmatprep.subr.bf16.mxu1 %v1283_v39 }
 0x11d   :  { %1117 = vmatpush3.bf16.msra.mxu1 %v1270_v43 }
 0x11e   :  { %1118 = vmatprep.subr.bf16.mxu1 %v1283_v39 }
 0x121   :  { %1119 = vmatpush3.bf16.msra.mxu1 %v1271_v61 }
 0x122   :  { %1120 = vmatprep.subr.bf16.mxu1 %v1283_v39 }
 0x125   :  { %1121 = vmatpush3.bf16.msra.mxu1 %v1272_v62 }
 0x126   :  { %1122 = vmatprep.subr.bf16.mxu1 %v1283_v39 }
 0x129   :  { %1123 = vmatpush3.bf16.msra.mxu1 %v1273_v63 }
 0x12a   :  { %1124 = vmatprep.subr.bf16.mxu1 %v1283_v39 }
 0x12d   :  { %1125 = vmatpush3.bf16.msra.mxu1 %v1274_v0 }
 0x1d0   :  { %v542_v45 = vpop.f32.mrf.mxu1 }
 0x1d1   :  { %v543_v52 = vadd.f32 %v542_v45, %v341_v47 }
 0x1d2   :  { %v544_v48 = vpop.f32.mrf.mxu1 }
 0x1d3   :  { %v545_v50 = vadd.f32 %v544_v48, %v345_v46  ;;  %v551_v58 = vmax.f32 %v543_v52, 0.0 }
 0x1d4   :  { %v546_v49 = vpop.f32.mrf.mxu1 }
 0x1d5   :  { %v547_v51 = vadd.f32 %v546_v49, %v341_v47  ;;  %v552_v56 = vmax.f32 %v545_v50, 0.0 }
 0x1d6   :  { %v548_v53 = vpop.f32.mrf.mxu1 }
 0x1d7   :  { %v549_v54 = vadd.f32 %v548_v53, %v345_v46  ;;  %v553_v55 = vmax.f32 %v547_v51, 0.0 }
 0x1d9   :  { %v554_v57 = vmax.f32 %v549_v54, 0.0  ;;  %v555_v60 = vpack.c.bf16 %v553_v55, %v551_v58 }
 0x1db   :  { %v556_v59 = vpack.c.bf16 %v554_v57, %v552_v56 }
 0x1dd   :  { %724 = vmatprep.mubr.bf16.mxu0 %v556_v59 }
 0x1de   :  { %725 = vmatmul.mubr.bf16.vlgmr.msra.gmra.mxu0 %v555_v60 }
 0x1df   :  { %1146 = vmatprep.mubr.msk.bf16.mxu0 %vm1284_vm0, %v1283_v39  ;;  %1131 = vmatpush3.bf16.msra.mxu0 %v1275_v1 }
 0x1e0   :  { %1132 = vmatprep.subr.bf16.mxu0 %v1283_v39 }
 0x1e3   :  { %1133 = vmatpush3.bf16.msra.mxu0 %v1276_v2 }
 0x1e4   :  { %1134 = vmatprep.subr.bf16.mxu0 %v1283_v39 }
 0x1e7   :  { %1135 = vmatpush3.bf16.msra.mxu0 %v1277_v3 }
 0x1e8   :  { %1136 = vmatprep.subr.bf16.mxu0 %v1283_v39 }
 0x1eb   :  { %1137 = vmatpush3.bf16.msra.mxu0 %v1278_v4 }
 0x1ec   :  { %1138 = vmatprep.subr.bf16.mxu0 %v1283_v39 }
 0x1ef   :  { %1139 = vmatpush3.bf16.msra.mxu0 %v1279_v5 }
 0x1f0   :  { %1140 = vmatprep.subr.bf16.mxu0 %v1283_v39 }
 0x1f3   :  { %1141 = vmatpush3.bf16.msra.mxu0 %v1280_v18 }
 0x1f4   :  { %1142 = vmatprep.subr.bf16.mxu0 %v1283_v39 }
 0x1f7   :  { %1143 = vmatpush3.bf16.msra.mxu0 %v1281_v19 }
 0x1f8   :  { %1144 = vmatprep.subr.bf16.mxu0 %v1283_v39 }
 0x1fb   :  { %1145 = vmatpush3.bf16.msra.mxu0 %v1282_v20 }
 0x29e   :  { %v1086_v6 = vpop.f32.mrf.mxu0 }
 0x2a0   :  { %v1087_v7 = vpop.f32.mrf.mxu0 }
 0x2a1   :  { %v1088_v8 = vadd.f32 %v1087_v7, %v1086_v6 }
 0x2a2   :  { %v1089_v10 = vpop.f32.mrf.mxu0 }
 0x2a3   :  { %v727_v12 = vadd.f32 %v1088_v8, %v1035_v9 }
 0x2a4   :  { %v1090_v11 = vpop.f32.mrf.mxu0 }
 0x2a5   :  { %v1091_v13 = vadd.f32 %v1090_v11, %v1089_v10  ;;  %v733_v15 = vmax.f32 %v727_v12, 0.0 }
 0x2a7   :  { %v730_v14 = vadd.f32 %v1091_v13, %v1035_v9 }
 0x2a9   :  { %v734_v16 = vmax.f32 %v730_v14, 0.0 }
 0x2ab   :  { %v735_v17 = vpack.c.bf16 %v734_v16, %v733_v15 }
 0x2ad   :  { %1127 = vmatmul.mubr.bf16.vlgmr.msra.gmra.mxu1 %v735_v17 }
 0x36d   :  { %v841_v22 = vpop.f32.mrf.mxu1 }
 0x36e   :  { %v842_v24 = vadd.f32 %v1052_v21, %v841_v22 }
 0x36f   :  { %v1128_v23 = vpop.f32.mrf.mxu1 }
 0x370   :  { %v848_v28 = vmax.f32 %v842_v24, 0.0 }
 0x371   :  { %v844_v25 = vpop.f32.mrf.mxu1 }
 0x372   :  { %v845_v26 = vadd.f32 %v1052_v21, %v844_v25 }
 0x373   :  { %v1129_v27 = vpop.f32.mrf.mxu1 }
 0x374   :  { %v849_v29 = vmax.f32 %v845_v26, 0.0 }
 0x376   :  { %v850_v30 = vpack.c.bf16 %v849_v29, %v848_v28 }
 0x378   :  { %1147 = vmatmul.mubr.bf16.vlgmr.msra.gmra.mxu0 %v850_v30 }
 0x438   :  { %v956_v32 = vpop.f32.mrf.mxu0 }
 0x439   :  { %v957_v33 = vadd.f32 %v1061_v31, %v956_v32 }
 0x43a   :  { %v1148_v34 = vpop.f32.mrf.mxu0 }
 0x43b   :  { %963 = vst [vmem:[%s1689_s11] sm:$0xff] %v957_v33 }
 0x43c   :  { %v959_v35 = vpop.f32.mrf.mxu0 }
 0x43d   :  { %v960_v36 = vadd.f32 %v1061_v31, %v959_v35 }
 0x43e   :  { %v1149_v37 = vpop.f32.mrf.mxu0 }
 0x43f   :  { %964 = vst [vmem:[%s1689_s11 + $0x8] sm:$0xff] %v960_v36 }

// kernel: bennet_forward.23
= control target key start
LH: loop header
LB: loop body
LE: loop exit
PB: predicated region body
PF: predicated region fallthrough
CT: control target
= control target key end

     0   :  { %s4051_s1 = inlined_call_operand.vmem [shape: bf16[2304,256], index: 1, kind: input, shape index: {}]   ;;  %s4052_s0 = inlined_call_operand.vmem [shape: bf16[16,2304], index: 0, kind: input, shape index: {}]   ;;  %s4053_s2 = inlined_call_operand.vmem [shape: f32[1,256], index: 2, kind: input, shape index: {}]   ;;  %s4054_s3 = inlined_call_operand.vmem [shape: f32[1,256], index: 3, kind: input, shape index: {}]   ;;  %s4055_s4 = inlined_call_operand.vmem [shape: f32[1,256], index: 4, kind: input, shape index: {}]   ;;  %s4056_s5 = inlined_call_operand.vmem [shape: bf16[16,256], index: 5, kind: output, shape index: {}]  }
   0x1   :  { %v2619_v0 = vld [vmem:[%s4051_s1 + $0x74] ss:$8 sps:$4 sm:$0xff]   ;;  %v2621_v1 = vld [vmem:[%s4051_s1 + $0x70] ss:$8 sps:$4 sm:$0xff]   ;;  %v2625_v4 = vld [vmem:[%s4051_s1 + $0x64] ss:$8 sps:$4 sm:$0xff]  }
   0x2   :  { %1868 = vmatprep.subr.bf16.mxu0 %v2619_v0  ;;  %v2622_v2 = vld [vmem:[%s4051_s1 + $0x174] ss:$8 sps:$4 sm:$0xff]   ;;  %v2624_v3 = vld [vmem:[%s4051_s1 + $0x170] ss:$8 sps:$4 sm:$0xff]   ;;  %v2627_v5 = vld [vmem:[%s4051_s1 + $0x60] ss:$8 sps:$4 sm:$0xff]  }
   0x3   :  { %1869 = vmatpush1.bf16.msra.mxu0 %v2621_v1  ;;  %1911 = vmatprep.subr.bf16.mxu1 %v2622_v2  ;;  %v2628_v6 = vld [vmem:[%s4051_s1 + $0x164] ss:$8 sps:$4 sm:$0xff]   ;;  %v2630_v7 = vld [vmem:[%s4051_s1 + $0x160] ss:$8 sps:$4 sm:$0xff]   ;;  %v2631_v8 = vld [vmem:[%s4051_s1 + $0x54] ss:$8 sps:$4 sm:$0xff]  }
   0x4   :  { %1912 = vmatpush1.bf16.msra.mxu1 %v2624_v3  ;;  %1870 = vmatprep.subr.bf16.mxu0 %v2625_v4  ;;  %v2633_v9 = vld [vmem:[%s4051_s1 + $0x50] ss:$8 sps:$4 sm:$0xff]   ;;  %v2634_v10 = vld [vmem:[%s4051_s1 + $0x154] ss:$8 sps:$4 sm:$0xff]   ;;  %v2637_v11 = vld [vmem:[%s4051_s1 + $0x44] ss:$8 sps:$4 sm:$0xff]  }
   0x5   :  { %1913 = vmatprep.subr.bf16.mxu1 %v2628_v6  ;;  %v2636_v12 = vld [vmem:[%s4051_s1 + $0x150] ss:$8 sps:$4 sm:$0xff]   ;;  %v2640_v13 = vld [vmem:[%s4051_s1 + $0x144] ss:$8 sps:$4 sm:$0xff]   ;;  %v2639_v14 = vld [vmem:[%s4051_s1 + $0x40] ss:$8 sps:$4 sm:$0xff]  }
   0x6   :  { %v2643_v15 = vld [vmem:[%s4051_s1 + $0x34] ss:$8 sps:$4 sm:$0xff]   ;;  %v2642_v16 = vld [vmem:[%s4051_s1 + $0x140] ss:$8 sps:$4 sm:$0xff]   ;;  %v2645_v18 = vld [vmem:[%s4051_s1 + $0x30] ss:$8 sps:$4 sm:$0xff]  }
   0x7   :  { %1871 = vmatpush1.bf16.msra.mxu0 %v2627_v5  ;;  %v2646_v17 = vld [vmem:[%s4051_s1 + $0x134] ss:$8 sps:$4 sm:$0xff]   ;;  %v2649_v19 = vld [vmem:[%s4051_s1 + $0x24] ss:$8 sps:$4 sm:$0xff]   ;;  %v2648_v20 = vld [vmem:[%s4051_s1 + $0x130] ss:$8 sps:$4 sm:$0xff]  }
   0x8   :  { %1872 = vmatprep.subr.bf16.mxu0 %v2631_v8  ;;  %1914 = vmatpush1.bf16.msra.mxu1 %v2630_v7  ;;  %v2652_v21 = vld [vmem:[%s4051_s1 + $0x124] ss:$8 sps:$4 sm:$0xff]   ;;  %v2651_v22 = vld [vmem:[%s4051_s1 + $0x20] ss:$8 sps:$4 sm:$0xff]   ;;  %v2655_v23 = vld [vmem:[%s4051_s1 + $0x14] ss:$8 sps:$4 sm:$0xff]  }
   0x9   :  { %1915 = vmatprep.subr.bf16.mxu1 %v2634_v10  ;;  %v2654_v24 = vld [vmem:[%s4051_s1 + $0x120] ss:$8 sps:$4 sm:$0xff]   ;;  %v2658_v25 = vld [vmem:[%s4051_s1 + $0x114] ss:$8 sps:$4 sm:$0xff]   ;;  %v2657_v26 = vld [vmem:[%s4051_s1 + $0x10] ss:$8 sps:$4 sm:$0xff]  }
   0xa   :  { %v2661_v27 = vld [vmem:[%s4051_s1 + $0x4] ss:$8 sps:$4 sm:$0xff]   ;;  %v2660_v28 = vld [vmem:[%s4051_s1 + $0x110] ss:$8 sps:$4 sm:$0xff]   ;;  %v2663_v30 = vld [vmem:[%s4051_s1] ss:$8 sps:$4 sm:$0xff]  }
   0xb   :  { %1873 = vmatpush1.bf16.msra.mxu0 %v2633_v9  ;;  %v2664_v29 = vld [vmem:[%s4051_s1 + $0x104] ss:$8 sps:$4 sm:$0xff]   ;;  %v2667_v31 = vld [vmem:[%s4051_s1 + $0xf4] ss:$8 sps:$4 sm:$0xff]   ;;  %v2666_v32 = vld [vmem:[%s4051_s1 + $0x100] ss:$8 sps:$4 sm:$0xff]  }
   0xc   :  { %1874 = vmatprep.subr.bf16.mxu0 %v2637_v11  ;;  %1916 = vmatpush1.bf16.msra.mxu1 %v2636_v12  ;;  %v2670_v33 = vld [vmem:[%s4051_s1 + $0x1f4] ss:$8 sps:$4 sm:$0xff]   ;;  %v2669_v34 = vld [vmem:[%s4051_s1 + $0xf0] ss:$8 sps:$4 sm:$0xff]   ;;  %v2673_v35 = vld [vmem:[%s4051_s1 + $0xe4] ss:$8 sps:$4 sm:$0xff]  }
   0xd   :  { %1917 = vmatprep.subr.bf16.mxu1 %v2640_v13  ;;  %v2672_v36 = vld [vmem:[%s4051_s1 + $0x1f0] ss:$8 sps:$4 sm:$0xff]   ;;  %v2676_v37 = vld [vmem:[%s4051_s1 + $0x1e4] ss:$8 sps:$4 sm:$0xff]   ;;  %v2675_v38 = vld [vmem:[%s4051_s1 + $0xe0] ss:$8 sps:$4 sm:$0xff]  }
   0xe   :  { %v2679_v39 = vld [vmem:[%s4051_s1 + $0xd4] ss:$8 sps:$4 sm:$0xff]   ;;  %v2678_v40 = vld [vmem:[%s4051_s1 + $0x1e0] ss:$8 sps:$4 sm:$0xff]   ;;  %v2681_v42 = vld [vmem:[%s4051_s1 + $0xd0] ss:$8 sps:$4 sm:$0xff]  }
   0xf   :  { %1875 = vmatpush1.bf16.msra.mxu0 %v2639_v14  ;;  %v2682_v41 = vld [vmem:[%s4051_s1 + $0x1d4] ss:$8 sps:$4 sm:$0xff]   ;;  %v2685_v43 = vld [vmem:[%s4051_s1 + $0xc4] ss:$8 sps:$4 sm:$0xff]   ;;  %v2684_v44 = vld [vmem:[%s4051_s1 + $0x1d0] ss:$8 sps:$4 sm:$0xff]  }
  0x10   :  { %1876 = vmatprep.subr.bf16.mxu0 %v2643_v15  ;;  %1918 = vmatpush1.bf16.msra.mxu1 %v2642_v16  ;;  %v2688_v45 = vld [vmem:[%s4051_s1 + $0x1c4] ss:$8 sps:$4 sm:$0xff]   ;;  %v2687_v46 = vld [vmem:[%s4051_s1 + $0xc0] ss:$8 sps:$4 sm:$0xff]   ;;  %v2691_v48 = vld [vmem:[%s4051_s1 + $0xb4] ss:$8 sps:$4 sm:$0xff]  }
  0x11   :  { %1919 = vmatprep.subr.bf16.mxu1 %v2646_v17  ;;  %v2716_v47 = vld [vmem:[%s4052_s0 + $0x4] ss:$72 sps:$4 sm:$0xff]   ;;  %v2690_v49 = vld [vmem:[%s4051_s1 + $0x1c0] ss:$8 sps:$4 sm:$0xff]   ;;  %v2694_v50 = vld [vmem:[%s4051_s1 + $0x1b4] ss:$8 sps:$4 sm:$0xff]  }
  0x12   :  { %1900 = vmatprep.mubr.bf16.mxu0 %v2716_v47  ;;  %v2723_v51 = vld [vmem:[%s4052_s0 + $0xc] ss:$72 sps:$4 sm:$0xff]   ;;  %v2693_v52 = vld [vmem:[%s4051_s1 + $0xb0] ss:$8 sps:$4 sm:$0xff]   ;;  %v2699_v56 = vld [vmem:[%s4051_s1 + $0xa0] ss:$8 sps:$4 sm:$0xff]  }
  0x13   :  { %1877 = vmatpush1.bf16.msra.mxu0 %v2645_v18  ;;  %v2697_v53 = vld [vmem:[%s4051_s1 + $0xa4] ss:$8 sps:$4 sm:$0xff]   ;;  %1943 = vmatprep.mubr.bf16.mxu1 %v2723_v51  ;;  %v2696_v54 = vld [vmem:[%s4051_s1 + $0x1b0] ss:$8 sps:$4 sm:$0xff]   ;;  %v2703_v57 = vld [vmem:[%s4051_s1 + $0x94] ss:$8 sps:$4 sm:$0xff]  }
  0x14   :  { %1878 = vmatprep.subr.bf16.mxu0 %v2649_v19  ;;  %1920 = vmatpush1.bf16.msra.mxu1 %v2648_v20  ;;  %v2700_v55 = vld [vmem:[%s4051_s1 + $0x1a4] ss:$8 sps:$4 sm:$0xff]   ;;  %v2702_v58 = vld [vmem:[%s4051_s1 + $0x1a0] ss:$8 sps:$4 sm:$0xff]   ;;  %v2706_v59 = vld [vmem:[%s4051_s1 + $0x194] ss:$8 sps:$4 sm:$0xff]  }
  0x15   :  { %1921 = vmatprep.subr.bf16.mxu1 %v2652_v21  ;;  %v2705_v60 = vld [vmem:[%s4051_s1 + $0x90] ss:$8 sps:$4 sm:$0xff]   ;;  %v2709_v61 = vld [vmem:[%s4051_s1 + $0x84] ss:$8 sps:$4 sm:$0xff]   ;;  %v2711_v0 = vld [vmem:[%s4051_s1 + $0x80] ss:$8 sps:$4 sm:$0xff]  }
  0x16   :  { %v2708_v62 = vld [vmem:[%s4051_s1 + $0x190] ss:$8 sps:$4 sm:$0xff]   ;;  %v2712_v63 = vld [vmem:[%s4051_s1 + $0x184] ss:$8 sps:$4 sm:$0xff]   ;;  %v2720_v1 = vld [vmem:[%s4051_s1 + $0x274] ss:$8 sps:$4 sm:$0xff]  }
  0x17   :  { %1879 = vmatpush1.bf16.msra.mxu0 %v2651_v22  ;;  %v2717_v2 = vld [vmem:[%s4051_s1 + $0x180] ss:$8 sps:$4 sm:$0xff]   ;;  %v2726_v4 = vld [vmem:[%s4051_s1 + $0x374] ss:$8 sps:$4 sm:$0xff]   ;;  %v2718_v5 = vld [vmem:[%s4051_s1 + $0x270] ss:$8 sps:$4 sm:$0xff]  }
  0x18   :  { %1880 = vmatprep.subr.bf16.mxu0 %v2655_v23  ;;  %1922 = vmatpush1.bf16.msra.mxu1 %v2654_v24  ;;  %v2714_v3 = vld [vmem:[%s4052_s0] ss:$72 sps:$4 sm:$0xff]   ;;  %v2729_v7 = vld [vmem:[%s4051_s1 + $0x264] ss:$8 sps:$4 sm:$0xff]   ;;  %v2724_v8 = vld [vmem:[%s4051_s1 + $0x370] ss:$8 sps:$4 sm:$0xff]  }
  0x19   :  { %1923 = vmatprep.subr.bf16.mxu1 %v2658_v25  ;;  %v2721_v6 = vld [vmem:[%s4052_s0 + $0x8] ss:$72 sps:$4 sm:$0xff]   ;;  %v2732_v9 = vld [vmem:[%s4051_s1 + $0x364] ss:$8 sps:$4 sm:$0xff]   ;;  %v2735_v11 = vld [vmem:[%s4051_s1 + $0x254] ss:$8 sps:$4 sm:$0xff]  }
  0x1a   :  { %v2727_v10 = vld [vmem:[%s4051_s1 + $0x260] ss:$8 sps:$4 sm:$0xff]   ;;  %v2738_v13 = vld [vmem:[%s4051_s1 + $0x354] ss:$8 sps:$4 sm:$0xff]   ;;  %v2733_v14 = vld [vmem:[%s4051_s1 + $0x250] ss:$8 sps:$4 sm:$0xff]  }
  0x1b   :  { %1881 = vmatpush1.bf16.msra.mxu0 %v2657_v26  ;;  %v2730_v12 = vld [vmem:[%s4051_s1 + $0x360] ss:$8 sps:$4 sm:$0xff]   ;;  %v2741_v15 = vld [vmem:[%s4051_s1 + $0x244] ss:$8 sps:$4 sm:$0xff]   ;;  %v2736_v16 = vld [vmem:[%s4051_s1 + $0x350] ss:$8 sps:$4 sm:$0xff]  }
  0x1c   :  { %1882 = vmatprep.subr.bf16.mxu0 %v2661_v27  ;;  %1924 = vmatpush1.bf16.msra.mxu1 %v2660_v28  ;;  %v2744_v17 = vld [vmem:[%s4051_s1 + $0x344] ss:$8 sps:$4 sm:$0xff]   ;;  %v2739_v18 = vld [vmem:[%s4051_s1 + $0x240] ss:$8 sps:$4 sm:$0xff]   ;;  %v2747_v19 = vld [vmem:[%s4051_s1 + $0x234] ss:$8 sps:$4 sm:$0xff]  }
  0x1d   :  { %1925 = vmatprep.subr.bf16.mxu1 %v2664_v29  ;;  %v2742_v20 = vld [vmem:[%s4051_s1 + $0x340] ss:$8 sps:$4 sm:$0xff]   ;;  %v2750_v21 = vld [vmem:[%s4051_s1 + $0x334] ss:$8 sps:$4 sm:$0xff]   ;;  %v2745_v22 = vld [vmem:[%s4051_s1 + $0x230] ss:$8 sps:$4 sm:$0xff]  }
  0x1e   :  { %v2753_v23 = vld [vmem:[%s4051_s1 + $0x224] ss:$8 sps:$4 sm:$0xff]   ;;  %v2748_v24 = vld [vmem:[%s4051_s1 + $0x330] ss:$8 sps:$4 sm:$0xff]   ;;  %v2751_v26 = vld [vmem:[%s4051_s1 + $0x220] ss:$8 sps:$4 sm:$0xff]  }
  0x1f   :  { %1883 = vmatpush1.bf16.msra.mxu0 %v2663_v30  ;;  %v2756_v25 = vld [vmem:[%s4051_s1 + $0x324] ss:$8 sps:$4 sm:$0xff]   ;;  %v2759_v27 = vld [vmem:[%s4051_s1 + $0x214] ss:$8 sps:$4 sm:$0xff]   ;;  %v2754_v28 = vld [vmem:[%s4051_s1 + $0x320] ss:$8 sps:$4 sm:$0xff]  }
  0x20   :  { %1884 = vmatprep.subr.bf16.mxu0 %v2667_v31  ;;  %1926 = vmatpush1.bf16.msra.mxu1 %v2666_v32  ;;  %v2762_v29 = vld [vmem:[%s4051_s1 + $0x314] ss:$8 sps:$4 sm:$0xff]   ;;  %v2757_v30 = vld [vmem:[%s4051_s1 + $0x210] ss:$8 sps:$4 sm:$0xff]   ;;  %v2765_v32 = vld [vmem:[%s4051_s1 + $0x204] ss:$8 sps:$4 sm:$0xff]  }
  0x21   :  { %1927 = vmatprep.subr.bf16.mxu1 %v2670_v33  ;;  %v2760_v31 = vld [vmem:[%s4051_s1 + $0x310] ss:$8 sps:$4 sm:$0xff]   ;;  %v2819_v33 = vld [vmem:[%s4052_s0 + $0x14] ss:$72 sps:$4 sm:$0xff]   ;;  %v2792_v51 = vld [vmem:[%s4051_s1 + $0x3c4] ss:$8 sps:$4 sm:$0xff]  }
  0x22   :  { %v2786_v47 = vld [vmem:[%s4051_s1 + $0x3d4] ss:$8 sps:$4 sm:$0xff]  }
  0x23   :  { %1885 = vmatpush2.bf16.msra.mxu0 %v2669_v34  ;;  %v2768_v34 = vld [vmem:[%s4051_s1 + $0x304] ss:$8 sps:$4 sm:$0xff]  }
  0x24   :  { %1886 = vmatprep.subr.bf16.mxu0 %v2673_v35  ;;  %1928 = vmatpush2.bf16.msra.mxu1 %v2672_v36  ;;  %v2763_v35 = vld [vmem:[%s4051_s1 + $0x200] ss:$8 sps:$4 sm:$0xff]   ;;  %v2825_v36 = vld [vmem:[%s4052_s0 + $0x1c] ss:$72 sps:$4 sm:$0xff]  }
  0x25   :  { %1929 = vmatprep.subr.bf16.mxu1 %v2676_v37  ;;  %v2771_v37 = vld [vmem:[%s4051_s1 + $0x2f4] ss:$8 sps:$4 sm:$0xff]  }
  0x27   :  { %1887 = vmatpush2.bf16.msra.mxu0 %v2675_v38  ;;  %v2766_v38 = vld [vmem:[%s4051_s1 + $0x300] ss:$8 sps:$4 sm:$0xff]  }
  0x28   :  { %1888 = vmatprep.subr.bf16.mxu0 %v2679_v39  ;;  %1930 = vmatpush2.bf16.msra.mxu1 %v2678_v40  ;;  %v2774_v39 = vld [vmem:[%s4051_s1 + $0x3f4] ss:$8 sps:$4 sm:$0xff]   ;;  %v2769_v40 = vld [vmem:[%s4051_s1 + $0x2f0] ss:$8 sps:$4 sm:$0xff]  }
  0x29   :  { %1931 = vmatprep.subr.bf16.mxu1 %v2682_v41  ;;  %v2777_v41 = vld [vmem:[%s4051_s1 + $0x2e4] ss:$8 sps:$4 sm:$0xff]  }
  0x2b   :  { %1889 = vmatpush2.bf16.msra.mxu0 %v2681_v42  ;;  %v2772_v42 = vld [vmem:[%s4051_s1 + $0x3f0] ss:$8 sps:$4 sm:$0xff]  }
  0x2c   :  { %1890 = vmatprep.subr.bf16.mxu0 %v2685_v43  ;;  %1932 = vmatpush2.bf16.msra.mxu1 %v2684_v44  ;;  %v2780_v43 = vld [vmem:[%s4051_s1 + $0x3e4] ss:$8 sps:$4 sm:$0xff]   ;;  %v2775_v44 = vld [vmem:[%s4051_s1 + $0x2e0] ss:$8 sps:$4 sm:$0xff]  }
  0x2d   :  { %1933 = vmatprep.subr.bf16.mxu1 %v2688_v45  ;;  %v2783_v45 = vld [vmem:[%s4051_s1 + $0x2d4] ss:$8 sps:$4 sm:$0xff]  }
  0x2f   :  { %1891 = vmatpush2.bf16.msra.mxu0 %v2687_v46  ;;  %v2778_v46 = vld [vmem:[%s4051_s1 + $0x3e0] ss:$8 sps:$4 sm:$0xff]  }
  0x30   :  { %1892 = vmatprep.subr.bf16.mxu0 %v2691_v48  ;;  %1934 = vmatpush2.bf16.msra.mxu1 %v2690_v49  ;;  %v2781_v48 = vld [vmem:[%s4051_s1 + $0x2d0] ss:$8 sps:$4 sm:$0xff]   ;;  %v2789_v49 = vld [vmem:[%s4051_s1 + $0x2c4] ss:$8 sps:$4 sm:$0xff]  }
  0x31   :  { %1935 = vmatprep.subr.bf16.mxu1 %v2694_v50  ;;  %v2784_v50 = vld [vmem:[%s4051_s1 + $0x3d0] ss:$8 sps:$4 sm:$0xff]  }
  0x33   :  { %1893 = vmatpush2.bf16.msra.mxu0 %v2693_v52  ;;  %v2787_v52 = vld [vmem:[%s4051_s1 + $0x2c0] ss:$8 sps:$4 sm:$0xff]  }
  0x34   :  { %1894 = vmatprep.subr.bf16.mxu0 %v2697_v53  ;;  %1936 = vmatpush2.bf16.msra.mxu1 %v2696_v54  ;;  %v2795_v53 = vld [vmem:[%s4051_s1 + $0x2b4] ss:$8 sps:$4 sm:$0xff]   ;;  %v2790_v54 = vld [vmem:[%s4051_s1 + $0x3c0] ss:$8 sps:$4 sm:$0xff]  }
  0x35   :  { %1937 = vmatprep.subr.bf16.mxu1 %v2700_v55  ;;  %v2798_v55 = vld [vmem:[%s4051_s1 + $0x3b4] ss:$8 sps:$4 sm:$0xff]  }
  0x37   :  { %1895 = vmatpush2.bf16.msra.mxu0 %v2699_v56  ;;  %v2793_v56 = vld [vmem:[%s4051_s1 + $0x2b0] ss:$8 sps:$4 sm:$0xff]  }
  0x38   :  { %1896 = vmatprep.subr.bf16.mxu0 %v2703_v57  ;;  %1938 = vmatpush2.bf16.msra.mxu1 %v2702_v58  ;;  %v2801_v57 = vld [vmem:[%s4051_s1 + $0x2a4] ss:$8 sps:$4 sm:$0xff]   ;;  %v2796_v58 = vld [vmem:[%s4051_s1 + $0x3b0] ss:$8 sps:$4 sm:$0xff]  }
  0x39   :  { %1939 = vmatprep.subr.bf16.mxu1 %v2706_v59  ;;  %v2804_v59 = vld [vmem:[%s4051_s1 + $0x3a4] ss:$8 sps:$4 sm:$0xff]  }
  0x3b   :  { %1897 = vmatpush2.bf16.msra.mxu0 %v2705_v60  ;;  %v2799_v60 = vld [vmem:[%s4051_s1 + $0x2a0] ss:$8 sps:$4 sm:$0xff]  }
  0x3c   :  { %1898 = vmatprep.subr.bf16.mxu0 %v2709_v61  ;;  %1940 = vmatpush2.bf16.msra.mxu1 %v2708_v62  ;;  %v2807_v61 = vld [vmem:[%s4051_s1 + $0x294] ss:$8 sps:$4 sm:$0xff]   ;;  %v2802_v62 = vld [vmem:[%s4051_s1 + $0x3a0] ss:$8 sps:$4 sm:$0xff]  }
  0x3d   :  { %1941 = vmatprep.subr.bf16.mxu1 %v2712_v63  ;;  %v2810_v63 = vld [vmem:[%s4051_s1 + $0x394] ss:$8 sps:$4 sm:$0xff]  }
  0x3f   :  { %1899 = vmatpush2.bf16.msra.mxu0 %v2711_v0  ;;  %v2805_v0 = vld [vmem:[%s4051_s1 + $0x290] ss:$8 sps:$4 sm:$0xff]  }
  0x40   :  { %1954 = vmatprep.subr.bf16.mxu0 %v2720_v1  ;;  %1942 = vmatpush2.bf16.msra.mxu1 %v2717_v2  ;;  %v2813_v1 = vld [vmem:[%s4051_s1 + $0x284] ss:$8 sps:$4 sm:$0xff]   ;;  %v2808_v2 = vld [vmem:[%s4051_s1 + $0x390] ss:$8 sps:$4 sm:$0xff]  }
  0x41   :  { %1997 = vmatprep.subr.bf16.mxu1 %v2726_v4  ;;  %v2811_v4 = vld [vmem:[%s4051_s1 + $0x280] ss:$8 sps:$4 sm:$0xff]  }
  0x42   :  { %1901 = vmatmul.mubr.bf16.vlgmr.msra.gmra.mxu0 %v2714_v3  ;;  %v2816_v3 = vld [vmem:[%s4051_s1 + $0x384] ss:$8 sps:$4 sm:$0xff]  }
  0x43   :  { %1955 = vmatpush1.bf16.msra.mxu0 %v2718_v5  ;;  %1944 = vmatmul.mubr.bf16.vlgmr.msra.gmra.mxu1 %v2721_v6  ;;  %v2822_v5 = vld [vmem:[%s4051_s1 + $0x474] ss:$8 sps:$4 sm:$0xff]   ;;  %v2814_v6 = vld [vmem:[%s4051_s1 + $0x380] ss:$8 sps:$4 sm:$0xff]  }
  0x44   :  { %1956 = vmatprep.subr.bf16.mxu0 %v2729_v7  ;;  %1998 = vmatpush1.bf16.msra.mxu1 %v2724_v8  ;;  %v2817_v7 = vld [vmem:[%s4052_s0 + $0x10] ss:$72 sps:$4 sm:$0xff]   ;;  %v2828_v8 = vld [vmem:[%s4051_s1 + $0x574] ss:$8 sps:$4 sm:$0xff]  }
  0x45   :  { %1999 = vmatprep.subr.bf16.mxu1 %v2732_v9  ;;  %1986 = vmatprep.mubr.bf16.mxu0 %v2819_v33  ;;  %v2820_v9 = vld [vmem:[%s4051_s1 + $0x470] ss:$8 sps:$4 sm:$0xff]   ;;  %v2861_v33 = vld [vmem:[%s4051_s1 + $0x414] ss:$8 sps:$4 sm:$0xff]  }
  0x46   :  { %2029 = vmatprep.mubr.bf16.mxu1 %v2825_v36  ;;  %v2859_v36 = vld [vmem:[%s4051_s1 + $0x410] ss:$8 sps:$4 sm:$0xff]  }
  0x47   :  { %1957 = vmatpush1.bf16.msra.mxu0 %v2727_v10  ;;  %v2823_v10 = vld [vmem:[%s4052_s0 + $0x18] ss:$72 sps:$4 sm:$0xff]  }
  0x48   :  { %1958 = vmatprep.subr.bf16.mxu0 %v2735_v11  ;;  %2000 = vmatpush1.bf16.msra.mxu1 %v2730_v12  ;;  %v2831_v11 = vld [vmem:[%s4051_s1 + $0x464] ss:$8 sps:$4 sm:$0xff]   ;;  %v2826_v12 = vld [vmem:[%s4051_s1 + $0x570] ss:$8 sps:$4 sm:$0xff]  }
  0x49   :  { %2001 = vmatprep.subr.bf16.mxu1 %v2738_v13  ;;  %v2834_v13 = vld [vmem:[%s4051_s1 + $0x564] ss:$8 sps:$4 sm:$0xff]  }
  0x4b   :  { %1959 = vmatpush1.bf16.msra.mxu0 %v2733_v14  ;;  %v2829_v14 = vld [vmem:[%s4051_s1 + $0x460] ss:$8 sps:$4 sm:$0xff]  }
  0x4c   :  { %1960 = vmatprep.subr.bf16.mxu0 %v2741_v15  ;;  %2002 = vmatpush1.bf16.msra.mxu1 %v2736_v16  ;;  %v2837_v15 = vld [vmem:[%s4051_s1 + $0x454] ss:$8 sps:$4 sm:$0xff]   ;;  %v2832_v16 = vld [vmem:[%s4051_s1 + $0x560] ss:$8 sps:$4 sm:$0xff]  }
  0x4d   :  { %2003 = vmatprep.subr.bf16.mxu1 %v2744_v17  ;;  %v2840_v17 = vld [vmem:[%s4051_s1 + $0x554] ss:$8 sps:$4 sm:$0xff]  }
  0x4f   :  { %1961 = vmatpush1.bf16.msra.mxu0 %v2739_v18  ;;  %v2921_v18 = vld [vmem:[%s4052_s0 + $0x24] ss:$72 sps:$4 sm:$0xff]  }
  0x50   :  { %1962 = vmatprep.subr.bf16.mxu0 %v2747_v19  ;;  %2004 = vmatpush1.bf16.msra.mxu1 %v2742_v20  ;;  %v2835_v19 = vld [vmem:[%s4051_s1 + $0x450] ss:$8 sps:$4 sm:$0xff]  }
  0x51   :  { %2005 = vmatprep.subr.bf16.mxu1 %v2750_v21  ;;  %v2838_v20 = vld [vmem:[%s4051_s1 + $0x550] ss:$8 sps:$4 sm:$0xff]   ;;  %v2843_v21 = vld [vmem:[%s4051_s1 + $0x444] ss:$8 sps:$4 sm:$0xff]  }
  0x53   :  { %1963 = vmatpush1.bf16.msra.mxu0 %v2745_v22  ;;  %v2927_v22 = vld [vmem:[%s4052_s0 + $0x2c] ss:$72 sps:$4 sm:$0xff]  }
  0x54   :  { %1964 = vmatprep.subr.bf16.mxu0 %v2753_v23  ;;  %2006 = vmatpush1.bf16.msra.mxu1 %v2748_v24  ;;  %v2846_v23 = vld [vmem:[%s4051_s1 + $0x544] ss:$8 sps:$4 sm:$0xff]   ;;  %v2841_v24 = vld [vmem:[%s4051_s1 + $0x440] ss:$8 sps:$4 sm:$0xff]  }
  0x55   :  { %2007 = vmatprep.subr.bf16.mxu1 %v2756_v25  ;;  %v2849_v25 = vld [vmem:[%s4051_s1 + $0x434] ss:$8 sps:$4 sm:$0xff]  }
  0x57   :  { %1965 = vmatpush1.bf16.msra.mxu0 %v2751_v26  ;;  %v2844_v26 = vld [vmem:[%s4051_s1 + $0x540] ss:$8 sps:$4 sm:$0xff]  }
  0x58   :  { %1966 = vmatprep.subr.bf16.mxu0 %v2759_v27  ;;  %2008 = vmatpush1.bf16.msra.mxu1 %v2754_v28  ;;  %v2852_v27 = vld [vmem:[%s4051_s1 + $0x534] ss:$8 sps:$4 sm:$0xff]   ;;  %v2847_v28 = vld [vmem:[%s4051_s1 + $0x430] ss:$8 sps:$4 sm:$0xff]  }
  0x59   :  { %2009 = vmatprep.subr.bf16.mxu1 %v2762_v29  ;;  %v2855_v29 = vld [vmem:[%s4051_s1 + $0x424] ss:$8 sps:$4 sm:$0xff]  }
  0x5b   :  { %1967 = vmatpush1.bf16.msra.mxu0 %v2757_v30  ;;  %v2850_v30 = vld [vmem:[%s4051_s1 + $0x530] ss:$8 sps:$4 sm:$0xff]  }
  0x5c   :  { %1968 = vmatprep.subr.bf16.mxu0 %v2765_v32  ;;  %2010 = vmatpush1.bf16.msra.mxu1 %v2760_v31  ;;  %v2858_v31 = vld [vmem:[%s4051_s1 + $0x524] ss:$8 sps:$4 sm:$0xff]   ;;  %v2853_v32 = vld [vmem:[%s4051_s1 + $0x420] ss:$8 sps:$4 sm:$0xff]  }
  0x5d   :  { %2011 = vmatprep.subr.bf16.mxu1 %v2768_v34  ;;  %v2856_v34 = vld [vmem:[%s4051_s1 + $0x520] ss:$8 sps:$4 sm:$0xff]  }
  0x5f   :  { %1969 = vmatpush1.bf16.msra.mxu0 %v2763_v35  ;;  %v2864_v35 = vld [vmem:[%s4051_s1 + $0x514] ss:$8 sps:$4 sm:$0xff]  }
  0x60   :  { %1970 = vmatprep.subr.bf16.mxu0 %v2771_v37  ;;  %2012 = vmatpush1.bf16.msra.mxu1 %v2766_v38  ;;  %v2867_v37 = vld [vmem:[%s4051_s1 + $0x404] ss:$8 sps:$4 sm:$0xff]   ;;  %v2862_v38 = vld [vmem:[%s4051_s1 + $0x510] ss:$8 sps:$4 sm:$0xff]  }
  0x61   :  { %2013 = vmatprep.subr.bf16.mxu1 %v2774_v39  ;;  %v2870_v39 = vld [vmem:[%s4051_s1 + $0x504] ss:$8 sps:$4 sm:$0xff]  }
  0x63   :  { %1971 = vmatpush2.bf16.msra.mxu0 %v2769_v40  ;;  %v2865_v40 = vld [vmem:[%s4051_s1 + $0x400] ss:$8 sps:$4 sm:$0xff]  }
  0x64   :  { %1972 = vmatprep.subr.bf16.mxu0 %v2777_v41  ;;  %2014 = vmatpush2.bf16.msra.mxu1 %v2772_v42  ;;  %v2873_v41 = vld [vmem:[%s4051_s1 + $0x4f4] ss:$8 sps:$4 sm:$0xff]   ;;  %v2868_v42 = vld [vmem:[%s4051_s1 + $0x500] ss:$8 sps:$4 sm:$0xff]  }
  0x65   :  { %2015 = vmatprep.subr.bf16.mxu1 %v2780_v43  ;;  %v2876_v43 = vld [vmem:[%s4051_s1 + $0x5f4] ss:$8 sps:$4 sm:$0xff]  }
  0x67   :  { %1973 = vmatpush2.bf16.msra.mxu0 %v2775_v44  ;;  %v2871_v44 = vld [vmem:[%s4051_s1 + $0x4f0] ss:$8 sps:$4 sm:$0xff]  }
  0x68   :  { %1974 = vmatprep.subr.bf16.mxu0 %v2783_v45  ;;  %2016 = vmatpush2.bf16.msra.mxu1 %v2778_v46  ;;  %v2879_v45 = vld [vmem:[%s4051_s1 + $0x4e4] ss:$8 sps:$4 sm:$0xff]   ;;  %v2874_v46 = vld [vmem:[%s4051_s1 + $0x5f0] ss:$8 sps:$4 sm:$0xff]  }
  0x69   :  { %2017 = vmatprep.subr.bf16.mxu1 %v2786_v47  ;;  %v2882_v47 = vld [vmem:[%s4051_s1 + $0x5e4] ss:$8 sps:$4 sm:$0xff]  }
  0x6b   :  { %1975 = vmatpush2.bf16.msra.mxu0 %v2781_v48  ;;  %v2877_v48 = vld [vmem:[%s4051_s1 + $0x4e0] ss:$8 sps:$4 sm:$0xff]  }
  0x6c   :  { %1976 = vmatprep.subr.bf16.mxu0 %v2789_v49  ;;  %2018 = vmatpush2.bf16.msra.mxu1 %v2784_v50  ;;  %v2885_v49 = vld [vmem:[%s4051_s1 + $0x4d4] ss:$8 sps:$4 sm:$0xff]   ;;  %v2880_v50 = vld [vmem:[%s4051_s1 + $0x5e0] ss:$8 sps:$4 sm:$0xff]  }
  0x6d   :  { %2019 = vmatprep.subr.bf16.mxu1 %v2792_v51  ;;  %v2888_v51 = vld [vmem:[%s4051_s1 + $0x5d4] ss:$8 sps:$4 sm:$0xff]  }
  0x6f   :  { %1977 = vmatpush2.bf16.msra.mxu0 %v2787_v52  ;;  %v2883_v52 = vld [vmem:[%s4051_s1 + $0x4d0] ss:$8 sps:$4 sm:$0xff]  }
  0x70   :  { %1978 = vmatprep.subr.bf16.mxu0 %v2795_v53  ;;  %2020 = vmatpush2.bf16.msra.mxu1 %v2790_v54  ;;  %v2891_v53 = vld [vmem:[%s4051_s1 + $0x4c4] ss:$8 sps:$4 sm:$0xff]   ;;  %v2886_v54 = vld [vmem:[%s4051_s1 + $0x5d0] ss:$8 sps:$4 sm:$0xff]  }
  0x71   :  { %2021 = vmatprep.subr.bf16.mxu1 %v2798_v55  ;;  %v2894_v55 = vld [vmem:[%s4051_s1 + $0x5c4] ss:$8 sps:$4 sm:$0xff]  }
  0x73   :  { %1979 = vmatpush2.bf16.msra.mxu0 %v2793_v56  ;;  %v2889_v56 = vld [vmem:[%s4051_s1 + $0x4c0] ss:$8 sps:$4 sm:$0xff]  }
  0x74   :  { %1980 = vmatprep.subr.bf16.mxu0 %v2801_v57  ;;  %2022 = vmatpush2.bf16.msra.mxu1 %v2796_v58  ;;  %v2897_v57 = vld [vmem:[%s4051_s1 + $0x4b4] ss:$8 sps:$4 sm:$0xff]   ;;  %v2892_v58 = vld [vmem:[%s4051_s1 + $0x5c0] ss:$8 sps:$4 sm:$0xff]  }
  0x75   :  { %2023 = vmatprep.subr.bf16.mxu1 %v2804_v59  ;;  %v2900_v59 = vld [vmem:[%s4051_s1 + $0x5b4] ss:$8 sps:$4 sm:$0xff]  }
  0x77   :  { %1981 = vmatpush2.bf16.msra.mxu0 %v2799_v60  ;;  %v2895_v60 = vld [vmem:[%s4051_s1 + $0x4b0] ss:$8 sps:$4 sm:$0xff]  }
  0x78   :  { %1982 = vmatprep.subr.bf16.mxu0 %v2807_v61  ;;  %2024 = vmatpush2.bf16.msra.mxu1 %v2802_v62  ;;  %v2903_v61 = vld [vmem:[%s4051_s1 + $0x4a4] ss:$8 sps:$4 sm:$0xff]   ;;  %v2898_v62 = vld [vmem:[%s4051_s1 + $0x5b0] ss:$8 sps:$4 sm:$0xff]  }
  0x79   :  { %2025 = vmatprep.subr.bf16.mxu1 %v2810_v63  ;;  %v2906_v63 = vld [vmem:[%s4051_s1 + $0x5a4] ss:$8 sps:$4 sm:$0xff]  }
  0x7b   :  { %1983 = vmatpush2.bf16.msra.mxu0 %v2805_v0  ;;  %v2901_v0 = vld [vmem:[%s4051_s1 + $0x4a0] ss:$8 sps:$4 sm:$0xff]  }
  0x7c   :  { %1984 = vmatprep.subr.bf16.mxu0 %v2813_v1  ;;  %2026 = vmatpush2.bf16.msra.mxu1 %v2808_v2  ;;  %v2909_v1 = vld [vmem:[%s4051_s1 + $0x494] ss:$8 sps:$4 sm:$0xff]   ;;  %v2904_v2 = vld [vmem:[%s4051_s1 + $0x5a0] ss:$8 sps:$4 sm:$0xff]  }
  0x7d   :  { %2027 = vmatprep.subr.bf16.mxu1 %v2816_v3  ;;  %v2912_v3 = vld [vmem:[%s4051_s1 + $0x594] ss:$8 sps:$4 sm:$0xff]  }
  0x7f   :  { %1985 = vmatpush2.bf16.msra.mxu0 %v2811_v4  ;;  %v2907_v4 = vld [vmem:[%s4051_s1 + $0x490] ss:$8 sps:$4 sm:$0xff]  }
  0x80   :  { %2040 = vmatprep.subr.bf16.mxu0 %v2822_v5  ;;  %2028 = vmatpush2.bf16.msra.mxu1 %v2814_v6  ;;  %v2915_v5 = vld [vmem:[%s4051_s1 + $0x484] ss:$8 sps:$4 sm:$0xff]   ;;  %v2910_v6 = vld [vmem:[%s4051_s1 + $0x590] ss:$8 sps:$4 sm:$0xff]  }
  0x81   :  { %2083 = vmatprep.subr.bf16.mxu1 %v2828_v8  ;;  %v2918_v8 = vld [vmem:[%s4051_s1 + $0x584] ss:$8 sps:$4 sm:$0xff]  }
  0x82   :  { %1987 = vmatmul.mubr.bf16.vlgmr.msra.gmra.mxu0 %v2817_v7  ;;  %v2913_v7 = vld [vmem:[%s4051_s1 + $0x480] ss:$8 sps:$4 sm:$0xff]  }
  0x83   :  { %2041 = vmatpush1.bf16.msra.mxu0 %v2820_v9  ;;  %2030 = vmatmul.mubr.bf16.vlgmr.msra.gmra.mxu1 %v2823_v10  ;;  %v2916_v9 = vld [vmem:[%s4051_s1 + $0x580] ss:$8 sps:$4 sm:$0xff]   ;;  %v2924_v10 = vld [vmem:[%s4051_s1 + $0x674] ss:$8 sps:$4 sm:$0xff]  }
  0x84   :  { %2042 = vmatprep.subr.bf16.mxu0 %v2831_v11  ;;  %2084 = vmatpush1.bf16.msra.mxu1 %v2826_v12  ;;  %v2919_v11 = vld [vmem:[%s4052_s0 + $0x20] ss:$72 sps:$4 sm:$0xff]   ;;  %v2922_v12 = vld [vmem:[%s4051_s1 + $0x670] ss:$8 sps:$4 sm:$0xff]  }
  0x85   :  { %2085 = vmatprep.subr.bf16.mxu1 %v2834_v13  ;;  %2072 = vmatprep.mubr.bf16.mxu0 %v2921_v18  ;;  %v2925_v13 = vld [vmem:[%s4052_s0 + $0x28] ss:$72 sps:$4 sm:$0xff]   ;;  %v3029_v18 = vld [vmem:[%s4052_s0 + $0x3c] ss:$72 sps:$4 sm:$0xff]  }
  0x86   :  { %2115 = vmatprep.mubr.bf16.mxu1 %v2927_v22  ;;  %v2934_v22 = vld [vmem:[%s4051_s1 + $0x760] ss:$8 sps:$4 sm:$0xff]  }
  0x87   :  { %2043 = vmatpush1.bf16.msra.mxu0 %v2829_v14  ;;  %v2930_v14 = vld [vmem:[%s4051_s1 + $0x774] ss:$8 sps:$4 sm:$0xff]  }
  0x88   :  { %2044 = vmatprep.subr.bf16.mxu0 %v2837_v15  ;;  %2086 = vmatpush1.bf16.msra.mxu1 %v2832_v16  ;;  %v3023_v15 = vld [vmem:[%s4052_s0 + $0x34] ss:$72 sps:$4 sm:$0xff]   ;;  %v2933_v16 = vld [vmem:[%s4051_s1 + $0x664] ss:$8 sps:$4 sm:$0xff]  }
  0x89   :  { %2087 = vmatprep.subr.bf16.mxu1 %v2840_v17  ;;  %v2928_v17 = vld [vmem:[%s4051_s1 + $0x770] ss:$8 sps:$4 sm:$0xff]  }
  0x8b   :  { %2045 = vmatpush1.bf16.msra.mxu0 %v2835_v19  ;;  %v2936_v19 = vld [vmem:[%s4051_s1 + $0x764] ss:$8 sps:$4 sm:$0xff]  }
  0x8c   :  { %2046 = vmatprep.subr.bf16.mxu0 %v2843_v21  ;;  %2088 = vmatpush1.bf16.msra.mxu1 %v2838_v20  ;;  %v2931_v20 = vld [vmem:[%s4051_s1 + $0x660] ss:$8 sps:$4 sm:$0xff]   ;;  %v2939_v21 = vld [vmem:[%s4051_s1 + $0x654] ss:$8 sps:$4 sm:$0xff]  }
  0x8d   :  { %2089 = vmatprep.subr.bf16.mxu1 %v2846_v23  ;;  %v2942_v23 = vld [vmem:[%s4051_s1 + $0x754] ss:$8 sps:$4 sm:$0xff]  }
  0x8f   :  { %2047 = vmatpush1.bf16.msra.mxu0 %v2841_v24  ;;  %v2937_v24 = vld [vmem:[%s4051_s1 + $0x650] ss:$8 sps:$4 sm:$0xff]  }
  0x90   :  { %2048 = vmatprep.subr.bf16.mxu0 %v2849_v25  ;;  %2090 = vmatpush1.bf16.msra.mxu1 %v2844_v26  ;;  %v2945_v25 = vld [vmem:[%s4051_s1 + $0x644] ss:$8 sps:$4 sm:$0xff]   ;;  %v2940_v26 = vld [vmem:[%s4051_s1 + $0x750] ss:$8 sps:$4 sm:$0xff]  }
  0x91   :  { %2091 = vmatprep.subr.bf16.mxu1 %v2852_v27  ;;  %v2948_v27 = vld [vmem:[%s4051_s1 + $0x744] ss:$8 sps:$4 sm:$0xff]  }
  0x93   :  { %2049 = vmatpush1.bf16.msra.mxu0 %v2847_v28  ;;  %v2943_v28 = vld [vmem:[%s4051_s1 + $0x640] ss:$8 sps:$4 sm:$0xff]  }
  0x94   :  { %2050 = vmatprep.subr.bf16.mxu0 %v2855_v29  ;;  %2092 = vmatpush1.bf16.msra.mxu1 %v2850_v30  ;;  %v2951_v29 = vld [vmem:[%s4051_s1 + $0x634] ss:$8 sps:$4 sm:$0xff]   ;;  %v2946_v30 = vld [vmem:[%s4051_s1 + $0x740] ss:$8 sps:$4 sm:$0xff]  }
  0x95   :  { %2093 = vmatprep.subr.bf16.mxu1 %v2858_v31  ;;  %v2954_v31 = vld [vmem:[%s4051_s1 + $0x734] ss:$8 sps:$4 sm:$0xff]  }
  0x97   :  { %2051 = vmatpush1.bf16.msra.mxu0 %v2853_v32  ;;  %v2949_v32 = vld [vmem:[%s4051_s1 + $0x630] ss:$8 sps:$4 sm:$0xff]  }
  0x98   :  { %2052 = vmatprep.subr.bf16.mxu0 %v2861_v33  ;;  %2094 = vmatpush1.bf16.msra.mxu1 %v2856_v34  ;;  %v2957_v33 = vld [vmem:[%s4051_s1 + $0x624] ss:$8 sps:$4 sm:$0xff]   ;;  %v2952_v34 = vld [vmem:[%s4051_s1 + $0x730] ss:$8 sps:$4 sm:$0xff]  }
  0x99   :  { %2095 = vmatprep.subr.bf16.mxu1 %v2864_v35  ;;  %v2960_v35 = vld [vmem:[%s4051_s1 + $0x724] ss:$8 sps:$4 sm:$0xff]  }
  0x9b   :  { %2053 = vmatpush1.bf16.msra.mxu0 %v2859_v36  ;;  %v2955_v36 = vld [vmem:[%s4051_s1 + $0x620] ss:$8 sps:$4 sm:$0xff]  }
  0x9c   :  { %2054 = vmatprep.subr.bf16.mxu0 %v2867_v37  ;;  %2096 = vmatpush1.bf16.msra.mxu1 %v2862_v38  ;;  %v2963_v37 = vld [vmem:[%s4051_s1 + $0x614] ss:$8 sps:$4 sm:$0xff]   ;;  %v2958_v38 = vld [vmem:[%s4051_s1 + $0x720] ss:$8 sps:$4 sm:$0xff]  }
  0x9d   :  { %2097 = vmatprep.subr.bf16.mxu1 %v2870_v39  ;;  %v2966_v39 = vld [vmem:[%s4051_s1 + $0x714] ss:$8 sps:$4 sm:$0xff]  }
  0x9f   :  { %2055 = vmatpush1.bf16.msra.mxu0 %v2865_v40  ;;  %v2961_v40 = vld [vmem:[%s4051_s1 + $0x610] ss:$8 sps:$4 sm:$0xff]  }
  0xa0   :  { %2056 = vmatprep.subr.bf16.mxu0 %v2873_v41  ;;  %2098 = vmatpush1.bf16.msra.mxu1 %v2868_v42  ;;  %v2969_v41 = vld [vmem:[%s4051_s1 + $0x604] ss:$8 sps:$4 sm:$0xff]   ;;  %v2964_v42 = vld [vmem:[%s4051_s1 + $0x710] ss:$8 sps:$4 sm:$0xff]  }
  0xa1   :  { %2099 = vmatprep.subr.bf16.mxu1 %v2876_v43  ;;  %v2972_v43 = vld [vmem:[%s4051_s1 + $0x704] ss:$8 sps:$4 sm:$0xff]  }
  0xa3   :  { %2057 = vmatpush2.bf16.msra.mxu0 %v2871_v44  ;;  %v2967_v44 = vld [vmem:[%s4051_s1 + $0x600] ss:$8 sps:$4 sm:$0xff]  }
  0xa4   :  { %2058 = vmatprep.subr.bf16.mxu0 %v2879_v45  ;;  %2100 = vmatpush2.bf16.msra.mxu1 %v2874_v46  ;;  %v2975_v45 = vld [vmem:[%s4051_s1 + $0x6f4] ss:$8 sps:$4 sm:$0xff]   ;;  %v2970_v46 = vld [vmem:[%s4051_s1 + $0x700] ss:$8 sps:$4 sm:$0xff]  }
  0xa5   :  { %2101 = vmatprep.subr.bf16.mxu1 %v2882_v47  ;;  %v2978_v47 = vld [vmem:[%s4051_s1 + $0x7f4] ss:$8 sps:$4 sm:$0xff]  }
  0xa7   :  { %2059 = vmatpush2.bf16.msra.mxu0 %v2877_v48  ;;  %v2973_v48 = vld [vmem:[%s4051_s1 + $0x6f0] ss:$8 sps:$4 sm:$0xff]  }
  0xa8   :  { %2060 = vmatprep.subr.bf16.mxu0 %v2885_v49  ;;  %2102 = vmatpush2.bf16.msra.mxu1 %v2880_v50  ;;  %v2981_v49 = vld [vmem:[%s4051_s1 + $0x6e4] ss:$8 sps:$4 sm:$0xff]   ;;  %v2976_v50 = vld [vmem:[%s4051_s1 + $0x7f0] ss:$8 sps:$4 sm:$0xff]  }
  0xa9   :  { %2103 = vmatprep.subr.bf16.mxu1 %v2888_v51  ;;  %v2984_v51 = vld [vmem:[%s4051_s1 + $0x7e4] ss:$8 sps:$4 sm:$0xff]  }
  0xab   :  { %2061 = vmatpush2.bf16.msra.mxu0 %v2883_v52  ;;  %v2979_v52 = vld [vmem:[%s4051_s1 + $0x6e0] ss:$8 sps:$4 sm:$0xff]  }
  0xac   :  { %2062 = vmatprep.subr.bf16.mxu0 %v2891_v53  ;;  %2104 = vmatpush2.bf16.msra.mxu1 %v2886_v54  ;;  %v2987_v53 = vld [vmem:[%s4051_s1 + $0x6d4] ss:$8 sps:$4 sm:$0xff]   ;;  %v2982_v54 = vld [vmem:[%s4051_s1 + $0x7e0] ss:$8 sps:$4 sm:$0xff]  }
  0xad   :  { %2105 = vmatprep.subr.bf16.mxu1 %v2894_v55  ;;  %v2990_v55 = vld [vmem:[%s4051_s1 + $0x7d4] ss:$8 sps:$4 sm:$0xff]  }
  0xaf   :  { %2063 = vmatpush2.bf16.msra.mxu0 %v2889_v56  ;;  %v2985_v56 = vld [vmem:[%s4051_s1 + $0x6d0] ss:$8 sps:$4 sm:$0xff]  }
  0xb0   :  { %2064 = vmatprep.subr.bf16.mxu0 %v2897_v57  ;;  %2106 = vmatpush2.bf16.msra.mxu1 %v2892_v58  ;;  %v2993_v57 = vld [vmem:[%s4051_s1 + $0x6c4] ss:$8 sps:$4 sm:$0xff]   ;;  %v2988_v58 = vld [vmem:[%s4051_s1 + $0x7d0] ss:$8 sps:$4 sm:$0xff]  }
  0xb1   :  { %2107 = vmatprep.subr.bf16.mxu1 %v2900_v59  ;;  %v2996_v59 = vld [vmem:[%s4051_s1 + $0x7c4] ss:$8 sps:$4 sm:$0xff]  }
  0xb3   :  { %2065 = vmatpush2.bf16.msra.mxu0 %v2895_v60  ;;  %v2991_v60 = vld [vmem:[%s4051_s1 + $0x6c0] ss:$8 sps:$4 sm:$0xff]  }
  0xb4   :  { %2066 = vmatprep.subr.bf16.mxu0 %v2903_v61  ;;  %2108 = vmatpush2.bf16.msra.mxu1 %v2898_v62  ;;  %v2999_v61 = vld [vmem:[%s4051_s1 + $0x6b4] ss:$8 sps:$4 sm:$0xff]   ;;  %v2994_v62 = vld [vmem:[%s4051_s1 + $0x7c0] ss:$8 sps:$4 sm:$0xff]  }
  0xb5   :  { %2109 = vmatprep.subr.bf16.mxu1 %v2906_v63  ;;  %v3002_v63 = vld [vmem:[%s4051_s1 + $0x7b4] ss:$8 sps:$4 sm:$0xff]  }
  0xb7   :  { %2067 = vmatpush2.bf16.msra.mxu0 %v2901_v0  ;;  %v2997_v0 = vld [vmem:[%s4051_s1 + $0x6b0] ss:$8 sps:$4 sm:$0xff]  }
  0xb8   :  { %2068 = vmatprep.subr.bf16.mxu0 %v2909_v1  ;;  %2110 = vmatpush2.bf16.msra.mxu1 %v2904_v2  ;;  %v3005_v1 = vld [vmem:[%s4051_s1 + $0x6a4] ss:$8 sps:$4 sm:$0xff]   ;;  %v3000_v2 = vld [vmem:[%s4051_s1 + $0x7b0] ss:$8 sps:$4 sm:$0xff]  }
  0xb9   :  { %2111 = vmatprep.subr.bf16.mxu1 %v2912_v3  ;;  %v3008_v3 = vld [vmem:[%s4051_s1 + $0x7a4] ss:$8 sps:$4 sm:$0xff]  }
  0xbb   :  { %2069 = vmatpush2.bf16.msra.mxu0 %v2907_v4  ;;  %v3003_v4 = vld [vmem:[%s4051_s1 + $0x6a0] ss:$8 sps:$4 sm:$0xff]  }
  0xbc   :  { %2070 = vmatprep.subr.bf16.mxu0 %v2915_v5  ;;  %2112 = vmatpush2.bf16.msra.mxu1 %v2910_v6  ;;  %v3011_v5 = vld [vmem:[%s4051_s1 + $0x694] ss:$8 sps:$4 sm:$0xff]   ;;  %v3006_v6 = vld [vmem:[%s4051_s1 + $0x7a0] ss:$8 sps:$4 sm:$0xff]  }
  0xbd   :  { %2113 = vmatprep.subr.bf16.mxu1 %v2918_v8  ;;  %v3009_v8 = vld [vmem:[%s4051_s1 + $0x690] ss:$8 sps:$4 sm:$0xff]  }
  0xbf   :  { %2071 = vmatpush2.bf16.msra.mxu0 %v2913_v7  ;;  %v3014_v7 = vld [vmem:[%s4051_s1 + $0x794] ss:$8 sps:$4 sm:$0xff]  }
  0xc0   :  { %2126 = vmatprep.subr.bf16.mxu0 %v2924_v10  ;;  %2114 = vmatpush2.bf16.msra.mxu1 %v2916_v9  ;;  %v3017_v9 = vld [vmem:[%s4051_s1 + $0x684] ss:$8 sps:$4 sm:$0xff]   ;;  %v3012_v10 = vld [vmem:[%s4051_s1 + $0x790] ss:$8 sps:$4 sm:$0xff]  }
  0xc1   :  { %2169 = vmatprep.subr.bf16.mxu1 %v2930_v14  ;;  %v3018_v14 = vld [vmem:[%s4051_s1 + $0x780] ss:$8 sps:$4 sm:$0xff]  }
  0xc2   :  { %2073 = vmatmul.mubr.bf16.vlgmr.msra.gmra.mxu0 %v2919_v11  ;;  %v3020_v11 = vld [vmem:[%s4051_s1 + $0x784] ss:$8 sps:$4 sm:$0xff]  }
  0xc3   :  { %2127 = vmatpush1.bf16.msra.mxu0 %v2922_v12  ;;  %2158 = vmatprep.mubr.bf16.mxu0 %v3023_v15  ;;  %v3015_v12 = vld [vmem:[%s4051_s1 + $0x680] ss:$8 sps:$4 sm:$0xff]   ;;  %v3021_v15 = vld [vmem:[%s4052_s0 + $0x30] ss:$72 sps:$4 sm:$0xff]  }
  0xc4   :  { %2116 = vmatmul.mubr.bf16.vlgmr.msra.gmra.mxu1 %v2925_v13  ;;  %2128 = vmatprep.subr.bf16.mxu0 %v2933_v16  ;;  %v3026_v13 = vld [vmem:[%s4051_s1 + $0x874] ss:$8 sps:$4 sm:$0xff]   ;;  %v3024_v16 = vld [vmem:[%s4051_s1 + $0x870] ss:$8 sps:$4 sm:$0xff]  }
  0xc5   :  { %2170 = vmatpush1.bf16.msra.mxu1 %v2928_v17  ;;  %2201 = vmatprep.mubr.bf16.mxu1 %v3029_v18  ;;  %v3077_v17 = vld [vmem:[%s4052_s0 + $0x44] ss:$72 sps:$4 sm:$0xff]   ;;  %v3027_v18 = vld [vmem:[%s4052_s0 + $0x38] ss:$72 sps:$4 sm:$0xff]  }
  0xc6   :  { %2171 = vmatprep.subr.bf16.mxu1 %v2936_v19  ;;  %v3032_v19 = vld [vmem:[%s4051_s1 + $0x864] ss:$8 sps:$4 sm:$0xff]  }
  0xc7   :  { %2129 = vmatpush1.bf16.msra.mxu0 %v2931_v20  ;;  %v3030_v20 = vld [vmem:[%s4051_s1 + $0x860] ss:$8 sps:$4 sm:$0xff]  }
  0xc8   :  { %2130 = vmatprep.subr.bf16.mxu0 %v2939_v21  ;;  %v3035_v21 = vld [vmem:[%s4051_s1 + $0x854] ss:$8 sps:$4 sm:$0xff]  }
  0xc9   :  { %2172 = vmatpush1.bf16.msra.mxu1 %v2934_v22  ;;  %v3033_v22 = vld [vmem:[%s4051_s1 + $0x850] ss:$8 sps:$4 sm:$0xff]  }
  0xca   :  { %2173 = vmatprep.subr.bf16.mxu1 %v2942_v23  ;;  %v3038_v23 = vld [vmem:[%s4051_s1 + $0x844] ss:$8 sps:$4 sm:$0xff]  }
  0xcb   :  { %2131 = vmatpush1.bf16.msra.mxu0 %v2937_v24  ;;  %v3036_v24 = vld [vmem:[%s4051_s1 + $0x840] ss:$8 sps:$4 sm:$0xff]  }
  0xcc   :  { %2132 = vmatprep.subr.bf16.mxu0 %v2945_v25  ;;  %v3041_v25 = vld [vmem:[%s4051_s1 + $0x834] ss:$8 sps:$4 sm:$0xff]  }
  0xcd   :  { %2174 = vmatpush1.bf16.msra.mxu1 %v2940_v26  ;;  %v3039_v26 = vld [vmem:[%s4051_s1 + $0x830] ss:$8 sps:$4 sm:$0xff]  }
  0xce   :  { %2175 = vmatprep.subr.bf16.mxu1 %v2948_v27  ;;  %v3044_v27 = vld [vmem:[%s4051_s1 + $0x824] ss:$8 sps:$4 sm:$0xff]  }
  0xcf   :  { %2133 = vmatpush1.bf16.msra.mxu0 %v2943_v28  ;;  %v3042_v28 = vld [vmem:[%s4051_s1 + $0x820] ss:$8 sps:$4 sm:$0xff]  }
  0xd0   :  { %2134 = vmatprep.subr.bf16.mxu0 %v2951_v29  ;;  %v3047_v29 = vld [vmem:[%s4051_s1 + $0x814] ss:$8 sps:$4 sm:$0xff]  }
  0xd1   :  { %2176 = vmatpush1.bf16.msra.mxu1 %v2946_v30  ;;  %v3045_v30 = vld [vmem:[%s4051_s1 + $0x810] ss:$8 sps:$4 sm:$0xff]  }
  0xd2   :  { %2177 = vmatprep.subr.bf16.mxu1 %v2954_v31  ;;  %v3050_v31 = vld [vmem:[%s4051_s1 + $0x804] ss:$8 sps:$4 sm:$0xff]  }
  0xd3   :  { %2135 = vmatpush1.bf16.msra.mxu0 %v2949_v32  ;;  %v3048_v32 = vld [vmem:[%s4051_s1 + $0x800] ss:$8 sps:$4 sm:$0xff]  }
  0xd4   :  { %2136 = vmatprep.subr.bf16.mxu0 %v2957_v33  ;;  %v3053_v33 = vld [vmem:[%s4051_s1 + $0x8f4] ss:$8 sps:$4 sm:$0xff]  }
  0xd5   :  { %2178 = vmatpush1.bf16.msra.mxu1 %v2952_v34  ;;  %v3051_v34 = vld [vmem:[%s4051_s1 + $0x8f0] ss:$8 sps:$4 sm:$0xff]  }
  0xd6   :  { %2179 = vmatprep.subr.bf16.mxu1 %v2960_v35  ;;  %v3056_v35 = vld [vmem:[%s4051_s1 + $0x8e4] ss:$8 sps:$4 sm:$0xff]  }
  0xd7   :  { %2137 = vmatpush1.bf16.msra.mxu0 %v2955_v36  ;;  %v3054_v36 = vld [vmem:[%s4051_s1 + $0x8e0] ss:$8 sps:$4 sm:$0xff]  }
  0xd8   :  { %2138 = vmatprep.subr.bf16.mxu0 %v2963_v37  ;;  %v3059_v37 = vld [vmem:[%s4051_s1 + $0x8d4] ss:$8 sps:$4 sm:$0xff]  }
  0xd9   :  { %2180 = vmatpush1.bf16.msra.mxu1 %v2958_v38  ;;  %v3057_v38 = vld [vmem:[%s4051_s1 + $0x8d0] ss:$8 sps:$4 sm:$0xff]  }
  0xda   :  { %2181 = vmatprep.subr.bf16.mxu1 %v2966_v39  ;;  %v3062_v39 = vld [vmem:[%s4051_s1 + $0x8c4] ss:$8 sps:$4 sm:$0xff]  }
  0xdb   :  { %2139 = vmatpush1.bf16.msra.mxu0 %v2961_v40  ;;  %v3060_v40 = vld [vmem:[%s4051_s1 + $0x8c0] ss:$8 sps:$4 sm:$0xff]  }
  0xdc   :  { %2140 = vmatprep.subr.bf16.mxu0 %v2969_v41  ;;  %v3065_v41 = vld [vmem:[%s4051_s1 + $0x8b4] ss:$8 sps:$4 sm:$0xff]  }
  0xdd   :  { %2182 = vmatpush1.bf16.msra.mxu1 %v2964_v42  ;;  %v3063_v42 = vld [vmem:[%s4051_s1 + $0x8b0] ss:$8 sps:$4 sm:$0xff]  }
  0xde   :  { %2183 = vmatprep.subr.bf16.mxu1 %v2972_v43  ;;  %v3068_v43 = vld [vmem:[%s4051_s1 + $0x8a4] ss:$8 sps:$4 sm:$0xff]  }
  0xdf   :  { %2141 = vmatpush1.bf16.msra.mxu0 %v2967_v44  ;;  %v3066_v44 = vld [vmem:[%s4051_s1 + $0x8a0] ss:$8 sps:$4 sm:$0xff]  }
  0xe0   :  { %2142 = vmatprep.subr.bf16.mxu0 %v2975_v45  ;;  %v3071_v45 = vld [vmem:[%s4051_s1 + $0x894] ss:$8 sps:$4 sm:$0xff]  }
  0xe1   :  { %2184 = vmatpush1.bf16.msra.mxu1 %v2970_v46  ;;  %v3069_v46 = vld [vmem:[%s4051_s1 + $0x890] ss:$8 sps:$4 sm:$0xff]  }
  0xe2   :  { %2185 = vmatprep.subr.bf16.mxu1 %v2978_v47  ;;  %v3074_v47 = vld [vmem:[%s4051_s1 + $0x884] ss:$8 sps:$4 sm:$0xff]  }
  0xe3   :  { %2143 = vmatpush2.bf16.msra.mxu0 %v2973_v48  ;;  %v3072_v48 = vld [vmem:[%s4051_s1 + $0x880] ss:$8 sps:$4 sm:$0xff]  }
  0xe4   :  { %2144 = vmatprep.subr.bf16.mxu0 %v2981_v49  ;;  %v3075_v49 = vld [vmem:[%s4052_s0 + $0x40] ss:$72 sps:$4 sm:$0xff]  }
  0xe5   :  { %2186 = vmatpush2.bf16.msra.mxu1 %v2976_v50 }
  0xe6   :  { %2187 = vmatprep.subr.bf16.mxu1 %v2984_v51 }
  0xe7   :  { %2145 = vmatpush2.bf16.msra.mxu0 %v2979_v52 }
  0xe8   :  { %2146 = vmatprep.subr.bf16.mxu0 %v2987_v53 }
  0xe9   :  { %2188 = vmatpush2.bf16.msra.mxu1 %v2982_v54 }
  0xea   :  { %2189 = vmatprep.subr.bf16.mxu1 %v2990_v55 }
  0xeb   :  { %2147 = vmatpush2.bf16.msra.mxu0 %v2985_v56 }
  0xec   :  { %2148 = vmatprep.subr.bf16.mxu0 %v2993_v57 }
  0xed   :  { %2190 = vmatpush2.bf16.msra.mxu1 %v2988_v58 }
  0xee   :  { %2191 = vmatprep.subr.bf16.mxu1 %v2996_v59  ;;  %v328_v59 = vlaneseq }
  0xef   :  { %2149 = vmatpush2.bf16.msra.mxu0 %v2991_v60 }
  0xf0   :  { %2150 = vmatprep.subr.bf16.mxu0 %v2999_v61 }
  0xf1   :  { %2192 = vmatpush2.bf16.msra.mxu1 %v2994_v62  ;;  %v329_v62 = vshrl.u32 %v328_v59, 7 }
  0xf2   :  { %2193 = vmatprep.subr.bf16.mxu1 %v3002_v63 }
  0xf3   :  { %2151 = vmatpush2.bf16.msra.mxu0 %v2997_v0 }
  0xf4   :  { %2152 = vmatprep.subr.bf16.mxu0 %v3005_v1  ;;  %v4026_v1 = vsub.s32 0, %v329_v62 }
  0xf5   :  { %2194 = vmatpush2.bf16.msra.mxu1 %v3000_v2  ;;  %v326_v2 = vld [vmem:[%s4053_s2] sm:$0x3] }
  0xf6   :  { %2195 = vmatprep.subr.bf16.mxu1 %v3008_v3 }
  0xf7   :  { %2153 = vmatpush2.bf16.msra.mxu0 %v3003_v4 }
  0xf8   :  { %2154 = vmatprep.subr.bf16.mxu0 %v3011_v5  ;;  %v4031_v5 = vsub.s32 1, %v329_v62 }
  0xf9   :  { %2196 = vmatpush2.bf16.msra.mxu1 %v3006_v6 }
  0xfa   :  { %2197 = vmatprep.subr.bf16.mxu1 %v3014_v7  ;;  %v331_v7 = vrot.slane %v326_v2, %v4026_v1 }
  0xfb   :  { %2155 = vmatpush2.bf16.msra.mxu0 %v3009_v8 }
  0xfc   :  { %2156 = vmatprep.subr.bf16.mxu0 %v3017_v9  ;;  %v335_v9 = vrot.slane %v326_v2, %v4031_v5 }
  0xfd   :  { %2198 = vmatpush2.bf16.msra.mxu1 %v3012_v10 }
  0xfe   :  { %2199 = vmatprep.subr.bf16.mxu1 %v3020_v11 }
  0xff   :  { %2157 = vmatpush2.bf16.msra.mxu0 %v3015_v12 }
 0x100   :  { %2212 = vmatprep.subr.bf16.mxu0 %v3026_v13 }
 0x101   :  { %2200 = vmatpush2.bf16.msra.mxu1 %v3018_v14 }
 0x102   :  { %2159 = vmatmul.mubr.bf16.vlgmr.msra.gmra.mxu0 %v3021_v15  ;;  %v1902_v50 = vpop.f32.mrf.mxu0 }
 0x103   :  { %2213 = vmatpush1.bf16.msra.mxu0 %v3024_v16  ;;  %2244 = vmatprep.mubr.bf16.mxu0 %v3077_v17  ;;  %v1945_v52 = vpop.f32.mrf.mxu1  ;;  %v1903_v12 = vadd.f32 %v1902_v50, %v331_v7 }
 0x104   :  { %2202 = vmatmul.mubr.bf16.vlgmr.msra.gmra.mxu1 %v3027_v18  ;;  %2214 = vmatprep.subr.bf16.mxu0 %v3032_v19  ;;  %v1904_v51 = vpop.f32.mrf.mxu0 }
 0x105   :  { %v1947_v54 = vpop.f32.mrf.mxu1  ;;  %v1905_v13 = vadd.f32 %v1904_v51, %v335_v9  ;;  %v1946_v16 = vadd.f32 %v1945_v52, %v1903_v12 }
 0x106   :  { %v1906_v53 = vpop.f32.mrf.mxu0 }
 0x107   :  { %2215 = vmatpush1.bf16.msra.mxu0 %v3030_v20  ;;  %v1949_v56 = vpop.f32.mrf.mxu1  ;;  %v1907_v17 = vadd.f32 %v1906_v53, %v331_v7  ;;  %v1948_v18 = vadd.f32 %v1947_v54, %v1905_v13 }
 0x108   :  { %2216 = vmatprep.subr.bf16.mxu0 %v3035_v21  ;;  %v1908_v55 = vpop.f32.mrf.mxu0 }
 0x109   :  { %v1951_v58 = vpop.f32.mrf.mxu1  ;;  %v1909_v19 = vadd.f32 %v1908_v55, %v335_v9 }
 0x10b   :  { %2217 = vmatpush1.bf16.msra.mxu0 %v3033_v22 }
 0x10c   :  { %2218 = vmatprep.subr.bf16.mxu0 %v3038_v23  ;;  %v1950_v23 = vadd.f32 %v1949_v56, %v1907_v17 }
 0x10f   :  { %2219 = vmatpush1.bf16.msra.mxu0 %v3036_v24 }
 0x110   :  { %2220 = vmatprep.subr.bf16.mxu0 %v3041_v25 }
 0x113   :  { %2221 = vmatpush1.bf16.msra.mxu0 %v3039_v26  ;;  %v1952_v26 = vadd.f32 %v1951_v58, %v1909_v19  ;;  %v2275_v58 = vld [vmem:[%s4055_s4] sm:$0x3] }
 0x114   :  { %2222 = vmatprep.subr.bf16.mxu0 %v3044_v27  ;;  %v2280_v2 = vrot.slane %v2275_v58, %v4026_v1 }
 0x117   :  { %2223 = vmatpush1.bf16.msra.mxu0 %v3042_v28 }
 0x118   :  { %2224 = vmatprep.subr.bf16.mxu0 %v3047_v29 }
 0x11b   :  { %2225 = vmatpush1.bf16.msra.mxu0 %v3045_v30 }
 0x11c   :  { %2226 = vmatprep.subr.bf16.mxu0 %v3050_v31 }
 0x11f   :  { %2227 = vmatpush1.bf16.msra.mxu0 %v3048_v32 }
 0x120   :  { %2228 = vmatprep.subr.bf16.mxu0 %v3053_v33 }
 0x123   :  { %2229 = vmatpush2.bf16.msra.mxu0 %v3051_v34 }
 0x124   :  { %2230 = vmatprep.subr.bf16.mxu0 %v3056_v35 }
 0x127   :  { %2231 = vmatpush2.bf16.msra.mxu0 %v3054_v36 }
 0x128   :  { %2232 = vmatprep.subr.bf16.mxu0 %v3059_v37 }
 0x12b   :  { %2233 = vmatpush2.bf16.msra.mxu0 %v3057_v38 }
 0x12c   :  { %2234 = vmatprep.subr.bf16.mxu0 %v3062_v39 }
 0x12f   :  { %2235 = vmatpush2.bf16.msra.mxu0 %v3060_v40 }
 0x130   :  { %2236 = vmatprep.subr.bf16.mxu0 %v3065_v41 }
 0x133   :  { %2237 = vmatpush2.bf16.msra.mxu0 %v3063_v42 }
 0x134   :  { %2238 = vmatprep.subr.bf16.mxu0 %v3068_v43 }
 0x137   :  { %2239 = vmatpush2.bf16.msra.mxu0 %v3066_v44 }
 0x138   :  { %2240 = vmatprep.subr.bf16.mxu0 %v3071_v45 }
 0x13b   :  { %2241 = vmatpush2.bf16.msra.mxu0 %v3069_v46 }
 0x13c   :  { %2242 = vmatprep.subr.bf16.mxu0 %v3074_v47 }
 0x13f   :  { %2243 = vmatpush2.bf16.msra.mxu0 %v3072_v48 }
 0x142   :  { %2245 = vmatmul.mubr.bf16.vlgmr.msra.gmra.mxu0 %v3075_v49  ;;  %v1988_v57 = vpop.f32.mrf.mxu0  ;;  %v2259_v49 = vld [vmem:[%s4054_s3] sm:$0x3] }
 0x143   :  { %v2031_v61 = vpop.f32.mrf.mxu1  ;;  %v1989_v20 = vadd.f32 %v1988_v57, %v1946_v16  ;;  %v2264_v57 = vrot.slane %v2259_v49, %v4026_v1 }
 0x144   :  { %v1990_v60 = vpop.f32.mrf.mxu0 }
 0x145   :  { %v2033_v0 = vpop.f32.mrf.mxu1  ;;  %v1991_v24 = vadd.f32 %v1990_v60, %v1948_v18  ;;  %v2032_v27 = vadd.f32 %v2031_v61, %v1989_v20 }
 0x146   :  { %v1992_v63 = vpop.f32.mrf.mxu0 }
 0x147   :  { %v2035_v4 = vpop.f32.mrf.mxu1  ;;  %v1993_v28 = vadd.f32 %v1992_v63, %v1950_v23  ;;  %v2034_v30 = vadd.f32 %v2033_v0, %v1991_v24  ;;  %v2268_v0 = vrot.slane %v2259_v49, %v4031_v5 }
 0x148   :  { %v1994_v3 = vpop.f32.mrf.mxu0 }
 0x149   :  { %v2037_v8 = vpop.f32.mrf.mxu1  ;;  %v1995_v31 = vadd.f32 %v1994_v3, %v1952_v26  ;;  %v2036_v35 = vadd.f32 %v2035_v4, %v1993_v28  ;;  %v2284_v3 = vrot.slane %v2275_v58, %v4031_v5 }
 0x14b   :  { %v2038_v37 = vadd.f32 %v2037_v8, %v1995_v31 }
 0x182   :  { %v2074_v6 = vpop.f32.mrf.mxu0 }
 0x183   :  { %v2075_v32 = vadd.f32 %v2074_v6, %v2032_v27 }
 0x184   :  { %v2076_v10 = vpop.f32.mrf.mxu0  ;;  %v2117_v11 = vpop.f32.mrf.mxu1 }
 0x185   :  { %v2077_v36 = vadd.f32 %v2076_v10, %v2034_v30  ;;  %v2118_v38 = vadd.f32 %v2117_v11, %v2075_v32 }
 0x186   :  { %v2078_v14 = vpop.f32.mrf.mxu0  ;;  %v2119_v15 = vpop.f32.mrf.mxu1 }
 0x187   :  { %v2079_v39 = vadd.f32 %v2078_v14, %v2036_v35  ;;  %v2120_v42 = vadd.f32 %v2119_v15, %v2077_v36 }
 0x188   :  { %v2080_v21 = vpop.f32.mrf.mxu0  ;;  %v2121_v22 = vpop.f32.mrf.mxu1 }
 0x189   :  { %v2081_v43 = vadd.f32 %v2080_v21, %v2038_v37  ;;  %v2122_v45 = vadd.f32 %v2121_v22, %v2079_v39 }
 0x18a   :  { %v2123_v29 = vpop.f32.mrf.mxu1 }
 0x18b   :  { %v2124_v50 = vadd.f32 %v2123_v29, %v2081_v43 }
 0x1c2   :  { %v2160_v25 = vpop.f32.mrf.mxu0 }
 0x1c3   :  { %v2161_v44 = vadd.f32 %v2160_v25, %v2118_v38 }
 0x1c4   :  { %v2162_v33 = vpop.f32.mrf.mxu0  ;;  %v2203_v34 = vpop.f32.mrf.mxu1 }
 0x1c5   :  { %v2163_v46 = vadd.f32 %v2162_v33, %v2120_v42  ;;  %v2204_v51 = vadd.f32 %v2203_v34, %v2161_v44 }
 0x1c6   :  { %v2164_v40 = vpop.f32.mrf.mxu0  ;;  %v2205_v41 = vpop.f32.mrf.mxu1 }
 0x1c7   :  { %v2165_v52 = vadd.f32 %v2164_v40, %v2122_v45  ;;  %v2206_v54 = vadd.f32 %v2205_v41, %v2163_v46 }
 0x1c8   :  { %v2166_v47 = vpop.f32.mrf.mxu0  ;;  %v2207_v48 = vpop.f32.mrf.mxu1 }
 0x1c9   :  { %v2167_v55 = vadd.f32 %v2166_v47, %v2124_v50  ;;  %v2208_v61 = vadd.f32 %v2207_v48, %v2165_v52 }
 0x1ca   :  { %v2209_v59 = vpop.f32.mrf.mxu1 }
 0x1cb   :  { %v2210_v6 = vadd.f32 %v2209_v59, %v2167_v55 }
 0x202   :  { %v2246_v53 = vpop.f32.mrf.mxu0 }
 0x203   :  { %v2247_v56 = vadd.f32 %v2246_v53, %v2204_v51 }
 0x204   :  { %v2248_v60 = vpop.f32.mrf.mxu0 }
 0x205   :  { %v2255_v62 = vmax.f32 %v2247_v56, 0.0  ;;  %v2249_v63 = vadd.f32 %v2248_v60, %v2206_v54 }
 0x206   :  { %v2250_v4 = vpop.f32.mrf.mxu0 }
 0x207   :  { %v2271_v7 = vmul.f32 %v2264_v57, %v2255_v62  ;;  %v2256_v8 = vmax.f32 %v2249_v63, 0.0  ;;  %v2251_v9 = vadd.f32 %v2250_v4, %v2208_v61 }
 0x208   :  { %v2252_v10 = vpop.f32.mrf.mxu0 }
 0x209   :  { %v2272_v11 = vmul.f32 %v2268_v0, %v2256_v8  ;;  %v2257_v12 = vmax.f32 %v2251_v9, 0.0  ;;  %v2253_v13 = vadd.f32 %v2252_v10, %v2210_v6  ;;  %v2287_v14 = vadd.f32 %v2280_v2, %v2271_v7 }
 0x20b   :  { %v2288_v15 = vadd.f32 %v2284_v3, %v2272_v11  ;;  %v2273_v16 = vmul.f32 %v2264_v57, %v2257_v12  ;;  %v2258_v17 = vmax.f32 %v2253_v13, 0.0 }
 0x20d   :  { %v2617_v18 = vpack.c.bf16 %v2288_v15, %v2287_v14  ;;  %v2274_v19 = vmul.f32 %v2268_v0, %v2258_v17  ;;  %v2289_v1 = vadd.f32 %v2280_v2, %v2273_v16 }
 0x20f   :  { %2303 = vst [vmem:[%s4056_s5] sm:$0xff] %v2617_v18  ;;  %v2290_v5 = vadd.f32 %v2284_v3, %v2274_v19 }
 0x211   :  { %v2618_v20 = vpack.c.bf16 %v2290_v5, %v2289_v1 }
 0x213   :  { %2304 = vst [vmem:[%s4056_s5 + $0x8] sm:$0xff] %v2618_v20 }

</bundles_post_ra>
